<compile_context>
chip_gen: v7x
topology: tpu7x:2x2x1
jax: 0.10.0
libtpu: 0.0.40
codegen_flags: <defaults>
</compile_context>

<pallas_src>
import functools

import jax
import jax.numpy as jnp
from jax.experimental import pallas as pl
from jax.experimental.pallas import tpu as pltpu

EPS = 1e-5


# ---------------------------------------------------------------------------
# Pallas kernel: tiled  (P @ W) * scale + shift  [-> PReLU] [-> + residual]
# grid = (M tiles, Cout tiles, K tiles);  K innermost with f32 accumulator.
# ---------------------------------------------------------------------------
def _make_fused_kernel(use_prelu: bool, use_res: bool):
    def kernel(p_ref, w_ref, scale_ref, shift_ref, *rest):
        idx = 0
        alpha_ref = None
        res_ref = None
        if use_prelu:
            alpha_ref = rest[idx]; idx += 1
        if use_res:
            res_ref = rest[idx]; idx += 1
        o_ref = rest[idx]; idx += 1
        acc_ref = rest[idx]

        k = pl.program_id(2)

        @pl.when(k == 0)
        def _():
            acc_ref[...] = jnp.zeros_like(acc_ref)

        # bf16 x bf16 -> f32 accumulation, native MXU rate (no HIGHEST).
        acc_ref[...] += jnp.dot(p_ref[...], w_ref[...],
                                preferred_element_type=jnp.float32)

        @pl.when(k == pl.num_programs(2) - 1)
        def _():
            y = acc_ref[...] * scale_ref[...] + shift_ref[...]
            if use_prelu:
                a = alpha_ref[...]
                y = jnp.where(y >= 0, y, a * y)
            if use_res:
                y = y + res_ref[...]
            o_ref[...] = y.astype(o_ref.dtype)

    return kernel


def _choose_tm(M):
    if M % 256 == 0:
        return 256
    if M % 128 == 0:
        return 128
    return M            # small M: single full-row block (always legal)


def _choose_bc(Cout):
    if Cout % 256 == 0:
        return 256      # fill the 256-wide MXU on v6e/v7x
    if Cout % 128 == 0:
        return 128
    return Cout         # e.g. 64-channel layers: full dim (legal block)


def _choose_tk(K):
    if K <= 1152:
        return K
    for t in (1152, 1024, 768, 512, 384, 256, 128):   # 128-multiples only
        if K % t == 0:
            return t
    return K


def fused_conv(p, w, scale, shift, alpha=None, res=None):
    """p: (M, K) bf16 im2col patches; w: (K, Cout) bf16.
    scale/shift[/alpha]: (Cout,) f32; res: optional (M, Cout) f32.
    Returns (M, Cout) float32."""
    M, K = p.shape
    Cout = w.shape[1]
    tm = _choose_tm(M)
    bc = _choose_bc(Cout)
    tk = _choose_tk(K)
    grid = (M // tm, Cout // bc, K // tk)

    use_prelu = alpha is not None
    use_res = res is not None
    kernel = _make_fused_kernel(use_prelu, use_res)

    in_specs = [
        pl.BlockSpec((tm, tk), lambda i, j, k: (i, k)),
        pl.BlockSpec((tk, bc), lambda i, j, k: (k, j)),
        pl.BlockSpec((1, bc), lambda i, j, k: (0, j)),
        pl.BlockSpec((1, bc), lambda i, j, k: (0, j)),
    ]
    args = [p, w, scale.reshape(1, Cout), shift.reshape(1, Cout)]
    if use_prelu:
        in_specs.append(pl.BlockSpec((1, bc), lambda i, j, k: (0, j)))
        args.append(alpha.reshape(1, Cout))
    if use_res:
        in_specs.append(pl.BlockSpec((tm, bc), lambda i, j, k: (i, j)))
        args.append(res)

    # VMEM budget: double-buffered inputs/outputs + f32 accumulator.
    est = 2 * (tm * tk * 2 + tk * bc * 2 + 3 * bc * 4 + tm * bc * 4)
    if use_res:
        est += 2 * tm * bc * 4
    est += tm * bc * 4
    vmem_limit = int(min(max(32 << 20, 2 * est), 56 << 20))

    return pl.pallas_call(
        kernel,
        out_shape=jax.ShapeDtypeStruct((M, Cout), jnp.float32),
        grid=grid,
        in_specs=in_specs,
        out_specs=pl.BlockSpec((tm, bc), lambda i, j, k: (i, j)),
        scratch_shapes=[pltpu.VMEM((tm, bc), jnp.float32)],
        compiler_params=pltpu.CompilerParams(
            dimension_semantics=("parallel", "parallel", "arbitrary"),
            vmem_limit_bytes=vmem_limit,
        ),
    )(*args)


# ---------------------------------------------------------------------------
# Glue: im2col, BN folding, weight layout
# ---------------------------------------------------------------------------
def im2col(x, k, stride, pad):
    """x: (N, H, W, C) -> ((N*Ho*Wo, k*k*C), Ho, Wo); tap-major, channel-minor."""
    N, H, W, C = x.shape
    xp = jnp.pad(x, ((0, 0), (pad, pad), (pad, pad), (0, 0)))
    Ho = (H + 2 * pad - k) // stride + 1
    Wo = (W + 2 * pad - k) // stride + 1
    cols = []
    for dy in range(k):
        for dx in range(k):
            cols.append(
                xp[:, dy:dy + stride * (Ho - 1) + 1:stride,
                      dx:dx + stride * (Wo - 1) + 1:stride, :])
    p = jnp.concatenate(cols, axis=-1).reshape(N * Ho * Wo, k * k * C)
    return p, Ho, Wo


def _pad_k(p, w):
    """Pad the contraction dim to a multiple of 8 (sublane alignment)."""
    K = p.shape[1]
    Kp = ((K + 7) // 8) * 8
    if Kp != K:
        p = jnp.pad(p, ((0, 0), (0, Kp - K)))
        w = jnp.pad(w, ((0, Kp - K), (0, 0)))
    return p, w


def bn_scale_shift(bn):
    s = bn["gamma"] / jnp.sqrt(bn["var"] + EPS)
    b = bn["beta"] - bn["mean"] * s
    return s, b


def conv_w_to_mat(w):
    """(Cout, Cin, kh, kw) -> (kh*kw*Cin, Cout), matching im2col ordering."""
    cout = w.shape[0]
    return jnp.transpose(w, (2, 3, 1, 0)).reshape(-1, cout)


# ---------------------------------------------------------------------------
# IResNet forward (stem + layer1..layer3, exactly what the torch forward runs)
# ---------------------------------------------------------------------------
def block_forward_pallas(x, bp, stride):
    """stride is a static Python int."""
    N, H, W, Cin = x.shape
    s1, b1 = bn_scale_shift(bp["bn1"])
    s2, b2 = bn_scale_shift(bp["bn2"])
    s3, b3 = bn_scale_shift(bp["bn3"])

    w1 = conv_w_to_mat(bp["conv1"]).astype(jnp.bfloat16)   # (9*Cin, planes)
    w2 = conv_w_to_mat(bp["conv2"]).astype(jnp.bfloat16)   # (9*planes, planes)
    planes = w1.shape[1]

    # bn1 is applied to the input BEFORE zero-padding (torch order), so the
    # padded border correctly contributes 0 even for nonzero bn1 shift.
    x_bn = (x * s1 + b1).astype(jnp.bfloat16)

    # conv1 + bn2 + PReLU  (fused kernel)
    p1, Ho1, Wo1 = im2col(x_bn, 3, 1, 1)
    p1, w1 = _pad_k(p1, w1)
    o1 = fused_conv(p1, w1, s2, b2, alpha=bp["prelu"])
    o1 = o1.reshape(N, Ho1, Wo1, planes)

    # identity path (raw x, per the torch module)
    if bp["downsample"] is not None:
        ds = bp["downsample"]
        sd, bd = bn_scale_shift(ds["bn"])
        wd = jnp.transpose(ds["conv"], (2, 3, 1, 0)).reshape(Cin, planes)
        xs = x[:, ::stride, ::stride, :].reshape(-1, Cin).astype(jnp.bfloat16)
        identity = fused_conv(xs, wd.astype(jnp.bfloat16), sd, bd)
    else:
        identity = x.reshape(-1, Cin)

    # conv2(stride) + bn3 + residual add  (fused kernel)
    p2, Ho2, Wo2 = im2col(o1.astype(jnp.bfloat16), 3, stride, 1)
    p2, w2 = _pad_k(p2, w2)
    o2 = fused_conv(p2, w2, s3, b3, res=identity)
    return o2.reshape(N, Ho2, Wo2, planes)


@functools.partial(jax.jit, static_argnums=(2,))
def iresnet_forward_pallas(x_nchw, params, strides):
    x = jnp.transpose(x_nchw, (0, 2, 3, 1)).astype(jnp.float32)  # NHWC
    N = x.shape[0]
    # stem: conv1 + bn1 + prelu (fused kernel)
    s1, b1 = bn_scale_shift(params["bn1"])
    w = conv_w_to_mat(params["conv1"]).astype(jnp.bfloat16)
    p, Ho, Wo = im2col(x.astype(jnp.bfloat16), 3, 1, 1)
    p, w = _pad_k(p, w)
    y = fused_conv(p, w, s1, b1, alpha=params["prelu"])
    x = y.reshape(N, Ho, Wo, -1)
    for li, lname in enumerate(("layer1", "layer2", "layer3")):
        for bi, bp in enumerate(params[lname]):
            x = block_forward_pallas(x, bp, strides[li][bi])
    return jnp.transpose(x, (0, 3, 1, 2))  # back to NCHW


# ---------------------------------------------------------------------------
# Pure-JAX reference (mirrors the PyTorch module op-by-op) for validation.
# Conv operands are cast to bf16 with f32 accumulation, matching the kernel's
# MXU precision so the comparison is tight.
# ---------------------------------------------------------------------------
def _conv_ref(x, w, stride, pad):
    return jax.lax.conv_general_dilated(
        x.astype(jnp.bfloat16),
        jnp.transpose(w, (2, 3, 1, 0)).astype(jnp.bfloat16),
        (stride, stride), [(pad, pad), (pad, pad)],
        dimension_numbers=("NHWC", "HWIO", "NHWC"),
        preferred_element_type=jnp.float32,
    )


def _bn_ref(x, bn):
    s, b = bn_scale_shift(bn)
    return x * s + b


def _prelu_ref(x, a):
    return jnp.where(x >= 0, x, a * x)


def _block_ref(x, bp, stride):
    out = _bn_ref(x, bp["bn1"])
    out = _conv_ref(out, bp["conv1"], 1, 1)
    out = _bn_ref(out, bp["bn2"])
    out = _prelu_ref(out, bp["prelu"])
    out = _conv_ref(out, bp["conv2"], stride, 1)
    out = _bn_ref(out, bp["bn3"])
    if bp["downsample"] is not None:
        ds = bp["downsample"]
        idn = _conv_ref(x, ds["conv"], stride, 0)
        idn = _bn_ref(idn, ds["bn"])
    else:
        idn = x
    return out + idn


def iresnet_ref(x_nchw, params, strides):
    x = jnp.transpose(x_nchw, (0, 2, 3, 1)).astype(jnp.float32)
    x = _conv_ref(x, params["conv1"], 1, 1)
    x = _bn_ref(x, params["bn1"])
    x = _prelu_ref(x, params["prelu"])
    for li, lname in enumerate(("layer1", "layer2", "layer3")):
        for bi, bp in enumerate(params[lname]):
            x = _block_ref(x, bp, strides[li][bi])
    return jnp.transpose(x, (0, 3, 1, 2))


# ---------------------------------------------------------------------------
# Deterministic parameter construction.
# Conv weights follow the module init (normal, std=0.1).  BatchNorm running
# stats / affine params are slightly perturbed (as in a trained net) so the
# BN and bn1-before-padding paths are actually exercised by the test.
# ---------------------------------------------------------------------------
def make_params(key, layers=(2, 2, 2)):
    it = iter(jax.random.split(key, 512))

    def convw(cout, cin, k):
        return 0.1 * jax.random.normal(next(it), (cout, cin, k, k), jnp.float32)

    def bn(c):
        return {"gamma": 1.0 + 0.1 * jax.random.normal(next(it), (c,), jnp.float32),
                "beta": 0.1 * jax.random.normal(next(it), (c,), jnp.float32),
                "mean": 0.1 * jax.random.normal(next(it), (c,), jnp.float32),
                "var": 1.0 + 0.2 * jnp.abs(jax.random.normal(next(it), (c,), jnp.float32))}

    params = {"conv1": convw(64, 3, 3), "bn1": bn(64),
              "prelu": jnp.full((64,), 0.25, jnp.float32)}
    strides = []
    inplanes = 64
    for li, (planes, nblocks) in enumerate(zip((64, 128, 256), layers)):
        blocks = []
        lstrides = []
        for bi in range(nblocks):
            stride = 2 if bi == 0 else 1
            downsample = None
            if stride != 1 or inplanes != planes:
                downsample = {"conv": convw(planes, inplanes, 1), "bn": bn(planes)}
            blocks.append({
                "bn1": bn(inplanes),
                "conv1": convw(planes, inplanes, 3),
                "bn2": bn(planes),
                "prelu": jnp.full((planes,), 0.25, jnp.float32),
                "conv2": convw(planes, planes, 3),
                "bn3": bn(planes),
                "downsample": downsample,
            })
            lstrides.append(stride)
            inplanes = planes
        params[f"layer{li + 1}"] = blocks
        strides.append(tuple(lstrides))
    return params, tuple(strides)


# ---------------------------------------------------------------------------
if __name__ == "__main__":
    key = jax.random.PRNGKey(0)
    kx, kp = jax.random.split(key)
    x = jax.random.normal(kx, (2, 3, 16, 16), jnp.float32)
    params, strides = make_params(kp, layers=(2, 2, 2))

    out = jax.block_until_ready(iresnet_forward_pallas(x, params, strides))
    ref = jax.block_until_ready(iresnet_ref(x, params, strides))

    assert out.shape == (2, 256, 2, 2), out.shape
    rel_err = float(jnp.linalg.norm(out - ref) / (jnp.linalg.norm(ref) + 1e-12))
    assert rel_err < 1e-2, f"relative error too large: {rel_err}"
    print("KERNEL_OK")
</pallas_src>

<mosaic_0001>
module attributes {stable_mosaic.version = 11 : i64} {
  func.func @kernel(%arg0: i32, %arg1: i32, %arg2: i32, %arg3: memref<256x32xbf16, #tpu.memory_space<vmem>>, %arg4: memref<32x64xbf16, #tpu.memory_space<vmem>>, %arg5: memref<1x64xf32, #tpu.memory_space<vmem>>, %arg6: memref<1x64xf32, #tpu.memory_space<vmem>>, %arg7: memref<1x64xf32, #tpu.memory_space<vmem>>, %arg8: memref<256x64xf32, #tpu.memory_space<vmem>>, %arg9: memref<256x64xf32, #tpu.memory_space<vmem>>) attributes {dimension_semantics = [#tpu.dimension_semantics<parallel>, #tpu.dimension_semantics<parallel>, #tpu.dimension_semantics<arbitrary>], iteration_bounds = array<i64: 2, 1, 1>, scalar_prefetch = 0 : i64, scratch_operands = 1 : i64, tpu.core_type = #tpu.core_type<tc>, window_params = [{transform_indices = @transform_0, window_bounds = array<i64: 256, 32>}, {transform_indices = @transform_1, window_bounds = array<i64: 32, 64>}, {transform_indices = @transform_2, window_bounds = array<i64: 1, 64>}, {transform_indices = @transform_3, window_bounds = array<i64: 1, 64>}, {transform_indices = @transform_4, window_bounds = array<i64: 1, 64>}, {transform_indices = @transform_5, window_bounds = array<i64: 256, 64>}]} {
    %c0_i32 = arith.constant 0 : i32
    %0 = arith.cmpi eq, %arg2, %c0_i32 : i32
    %1 = arith.extui %0 : i1 to i32
    %c0_i32_0 = arith.constant 0 : i32
    %2 = arith.cmpi ne, %1, %c0_i32_0 : i32
    scf.if %2 {
      %cst_10 = arith.constant 0.000000e+00 : f32
      %12 = vector.broadcast %cst_10 : f32 to vector<256x64xf32>
      %c0_11 = arith.constant 0 : index
      %c0_12 = arith.constant 0 : index
      %13 = vector.load %arg9[%c0_11, %c0_12] : memref<256x64xf32, #tpu.memory_space<vmem>>, vector<256x64xf32>
      tpu.vector_store %arg9[%c0_11, %c0_12], %12 {strides = array<i32>} : memref<256x64xf32, #tpu.memory_space<vmem>>, vector<256x64xf32>,
    } else {
    }
    %c0 = arith.constant 0 : index
    %c0_1 = arith.constant 0 : index
    %3 = vector.load %arg9[%c0, %c0_1] : memref<256x64xf32, #tpu.memory_space<vmem>>, vector<256x64xf32>
    %c0_2 = arith.constant 0 : index
    %c0_3 = arith.constant 0 : index
    %4 = vector.load %arg3[%c0_2, %c0_3] : memref<256x32xbf16, #tpu.memory_space<vmem>>, vector<256x32xbf16>
    %c0_4 = arith.constant 0 : index
    %c0_5 = arith.constant 0 : index
    %5 = vector.load %arg4[%c0_4, %c0_5] : memref<32x64xbf16, #tpu.memory_space<vmem>>, vector<32x64xbf16>
    %cst = arith.constant dense<0.000000e+00> : vector<256x64xf32>
    %6 = tpu.matmul %4, %5, %cst {dimension_numbers = #tpu.dot_dimension_numbers<[1], [0], [0], [1], [0, 0, 1, 1], [], []>} : vector<256x32xbf16>, vector<32x64xbf16>, vector<256x64xf32> -> vector<256x64xf32>
    %7 = arith.addf %3, %6 : vector<256x64xf32>
    %c0_6 = arith.constant 0 : index
    %c0_7 = arith.constant 0 : index
    %8 = vector.load %arg9[%c0_6, %c0_7] : memref<256x64xf32, #tpu.memory_space<vmem>>, vector<256x64xf32>
    tpu.vector_store %arg9[%c0_6, %c0_7], %7 {strides = array<i32>} : memref<256x64xf32, #tpu.memory_space<vmem>>, vector<256x64xf32>,
    %c0_i32_8 = arith.constant 0 : i32
    %9 = arith.cmpi eq, %arg2, %c0_i32_8 : i32
    %10 = arith.extui %9 : i1 to i32
    %c0_i32_9 = arith.constant 0 : i32
    %11 = arith.cmpi ne, %10, %c0_i32_9 : i32
    scf.if %11 {
      %c0_10 = arith.constant 0 : index
      %c0_11 = arith.constant 0 : index
      %12 = vector.load %arg9[%c0_10, %c0_11] : memref<256x64xf32, #tpu.memory_space<vmem>>, vector<256x64xf32>
      %c0_12 = arith.constant 0 : index
      %c0_13 = arith.constant 0 : index
      %13 = vector.load %arg5[%c0_12, %c0_13] : memref<1x64xf32, #tpu.memory_space<vmem>>, vector<1x64xf32>
      %14 = vector.broadcast %13 : vector<1x64xf32> to vector<256x64xf32>
      %15 = arith.mulf %12, %14 : vector<256x64xf32>
      %c0_14 = arith.constant 0 : index
      %c0_15 = arith.constant 0 : index
      %16 = vector.load %arg6[%c0_14, %c0_15] : memref<1x64xf32, #tpu.memory_space<vmem>>, vector<1x64xf32>
      %17 = vector.broadcast %16 : vector<1x64xf32> to vector<256x64xf32>
      %18 = arith.addf %15, %17 : vector<256x64xf32>
      %c0_16 = arith.constant 0 : index
      %c0_17 = arith.constant 0 : index
      %19 = vector.load %arg7[%c0_16, %c0_17] : memref<1x64xf32, #tpu.memory_space<vmem>>, vector<1x64xf32>
      %cst_18 = arith.constant 0.000000e+00 : f32
      %20 = vector.broadcast %cst_18 : f32 to vector<256x64xf32>
      %21 = arith.cmpf oge, %18, %20 : vector<256x64xf32>
      %22 = vector.broadcast %19 : vector<1x64xf32> to vector<256x64xf32>
      %23 = arith.mulf %22, %18 : vector<256x64xf32>
      %24 = arith.select %21, %18, %23 : vector<256x64xi1>, vector<256x64xf32>
      %c0_19 = arith.constant 0 : index
      %c0_20 = arith.constant 0 : index
      %25 = vector.load %arg8[%c0_19, %c0_20] : memref<256x64xf32, #tpu.memory_space<vmem>>, vector<256x64xf32>
      tpu.vector_store %arg8[%c0_19, %c0_20], %24 {strides = array<i32>} : memref<256x64xf32, #tpu.memory_space<vmem>>, vector<256x64xf32>,
    } else {
    }
    return
  }
  func.func @transform_0(%arg0: i32, %arg1: i32, %arg2: i32) -> (i32, i32) {
    %c0_i32 = arith.constant 0 : i32
    return %arg0, %arg2 : i32, i32
  }
  func.func @transform_1(%arg0: i32, %arg1: i32, %arg2: i32) -> (i32, i32) {
    %c0_i32 = arith.constant 0 : i32
    return %arg2, %arg1 : i32, i32
  }
  func.func @transform_2(%arg0: i32, %arg1: i32, %arg2: i32) -> (i32, i32) {
    %c0_i32 = arith.constant 0 : i32
    %c0_i32_0 = arith.constant 0 : i32
    return %c0_i32, %arg1 : i32, i32
  }
  func.func @transform_3(%arg0: i32, %arg1: i32, %arg2: i32) -> (i32, i32) {
    %c0_i32 = arith.constant 0 : i32
    %c0_i32_0 = arith.constant 0 : i32
    return %c0_i32, %arg1 : i32, i32
  }
  func.func @transform_4(%arg0: i32, %arg1: i32, %arg2: i32) -> (i32, i32) {
    %c0_i32 = arith.constant 0 : i32
    %c0_i32_0 = arith.constant 0 : i32
    return %c0_i32, %arg1 : i32, i32
  }
  func.func @transform_5(%arg0: i32, %arg1: i32, %arg2: i32) -> (i32, i32) {
    %c0_i32 = arith.constant 0 : i32
    return %arg0, %arg1 : i32, i32
  }
}

module attributes {stable_mosaic.version = 11 : i64} {
  func.func @kernel(%arg0: i32, %arg1: i32, %arg2: i32, %arg3: memref<256x576xbf16, #tpu.memory_space<vmem>>, %arg4: memref<576x64xbf16, #tpu.memory_space<vmem>>, %arg5: memref<1x64xf32, #tpu.memory_space<vmem>>, %arg6: memref<1x64xf32, #tpu.memory_space<vmem>>, %arg7: memref<1x64xf32, #tpu.memory_space<vmem>>, %arg8: memref<256x64xf32, #tpu.memory_space<vmem>>, %arg9: memref<256x64xf32, #tpu.memory_space<vmem>>) attributes {dimension_semantics = [#tpu.dimension_semantics<parallel>, #tpu.dimension_semantics<parallel>, #tpu.dimension_semantics<arbitrary>], iteration_bounds = array<i64: 2, 1, 1>, scalar_prefetch = 0 : i64, scratch_operands = 1 : i64, tpu.core_type = #tpu.core_type<tc>, window_params = [{transform_indices = @transform_0, window_bounds = array<i64: 256, 576>}, {transform_indices = @transform_1, window_bounds = array<i64: 576, 64>}, {transform_indices = @transform_2, window_bounds = array<i64: 1, 64>}, {transform_indices = @transform_3, window_bounds = array<i64: 1, 64>}, {transform_indices = @transform_4, window_bounds = array<i64: 1, 64>}, {transform_indices = @transform_5, window_bounds = array<i64: 256, 64>}]} {
    %c0_i32 = arith.constant 0 : i32
    %0 = arith.cmpi eq, %arg2, %c0_i32 : i32
    %1 = arith.extui %0 : i1 to i32
    %c0_i32_0 = arith.constant 0 : i32
    %2 = arith.cmpi ne, %1, %c0_i32_0 : i32
    scf.if %2 {
      %cst_10 = arith.constant 0.000000e+00 : f32
      %12 = vector.broadcast %cst_10 : f32 to vector<256x64xf32>
      %c0_11 = arith.constant 0 : index
      %c0_12 = arith.constant 0 : index
      %13 = vector.load %arg9[%c0_11, %c0_12] : memref<256x64xf32, #tpu.memory_space<vmem>>, vector<256x64xf32>
      tpu.vector_store %arg9[%c0_11, %c0_12], %12 {strides = array<i32>} : memref<256x64xf32, #tpu.memory_space<vmem>>, vector<256x64xf32>,
    } else {
    }
    %c0 = arith.constant 0 : index
    %c0_1 = arith.constant 0 : index
    %3 = vector.load %arg9[%c0, %c0_1] : memref<256x64xf32, #tpu.memory_space<vmem>>, vector<256x64xf32>
    %c0_2 = arith.constant 0 : index
    %c0_3 = arith.constant 0 : index
    %4 = vector.load %arg3[%c0_2, %c0_3] : memref<256x576xbf16, #tpu.memory_space<vmem>>, vector<256x576xbf16>
    %c0_4 = arith.constant 0 : index
    %c0_5 = arith.constant 0 : index
    %5 = vector.load %arg4[%c0_4, %c0_5] : memref<576x64xbf16, #tpu.memory_space<vmem>>, vector<576x64xbf16>
    %cst = arith.constant dense<0.000000e+00> : vector<256x64xf32>
    %6 = tpu.matmul %4, %5, %cst {dimension_numbers = #tpu.dot_dimension_numbers<[1], [0], [0], [1], [0, 0, 1, 1], [], []>} : vector<256x576xbf16>, vector<576x64xbf16>, vector<256x64xf32> -> vector<256x64xf32>
    %7 = arith.addf %3, %6 : vector<256x64xf32>
    %c0_6 = arith.constant 0 : index
    %c0_7 = arith.constant 0 : index
    %8 = vector.load %arg9[%c0_6, %c0_7] : memref<256x64xf32, #tpu.memory_space<vmem>>, vector<256x64xf32>
    tpu.vector_store %arg9[%c0_6, %c0_7], %7 {strides = array<i32>} : memref<256x64xf32, #tpu.memory_space<vmem>>, vector<256x64xf32>,
    %c0_i32_8 = arith.constant 0 : i32
    %9 = arith.cmpi eq, %arg2, %c0_i32_8 : i32
    %10 = arith.extui %9 : i1 to i32
    %c0_i32_9 = arith.constant 0 : i32
    %11 = arith.cmpi ne, %10, %c0_i32_9 : i32
    scf.if %11 {
      %c0_10 = arith.constant 0 : index
      %c0_11 = arith.constant 0 : index
      %12 = vector.load %arg9[%c0_10, %c0_11] : memref<256x64xf32, #tpu.memory_space<vmem>>, vector<256x64xf32>
      %c0_12 = arith.constant 0 : index
      %c0_13 = arith.constant 0 : index
      %13 = vector.load %arg5[%c0_12, %c0_13] : memref<1x64xf32, #tpu.memory_space<vmem>>, vector<1x64xf32>
      %14 = vector.broadcast %13 : vector<1x64xf32> to vector<256x64xf32>
      %15 = arith.mulf %12, %14 : vector<256x64xf32>
      %c0_14 = arith.constant 0 : index
      %c0_15 = arith.constant 0 : index
      %16 = vector.load %arg6[%c0_14, %c0_15] : memref<1x64xf32, #tpu.memory_space<vmem>>, vector<1x64xf32>
      %17 = vector.broadcast %16 : vector<1x64xf32> to vector<256x64xf32>
      %18 = arith.addf %15, %17 : vector<256x64xf32>
      %c0_16 = arith.constant 0 : index
      %c0_17 = arith.constant 0 : index
      %19 = vector.load %arg7[%c0_16, %c0_17] : memref<1x64xf32, #tpu.memory_space<vmem>>, vector<1x64xf32>
      %cst_18 = arith.constant 0.000000e+00 : f32
      %20 = vector.broadcast %cst_18 : f32 to vector<256x64xf32>
      %21 = arith.cmpf oge, %18, %20 : vector<256x64xf32>
      %22 = vector.broadcast %19 : vector<1x64xf32> to vector<256x64xf32>
      %23 = arith.mulf %22, %18 : vector<256x64xf32>
      %24 = arith.select %21, %18, %23 : vector<256x64xi1>, vector<256x64xf32>
      %c0_19 = arith.constant 0 : index
      %c0_20 = arith.constant 0 : index
      %25 = vector.load %arg8[%c0_19, %c0_20] : memref<256x64xf32, #tpu.memory_space<vmem>>, vector<256x64xf32>
      tpu.vector_store %arg8[%c0_19, %c0_20], %24 {strides = array<i32>} : memref<256x64xf32, #tpu.memory_space<vmem>>, vector<256x64xf32>,
    } else {
    }
    return
  }
  func.func @transform_0(%arg0: i32, %arg1: i32, %arg2: i32) -> (i32, i32) {
    %c0_i32 = arith.constant 0 : i32
    return %arg0, %arg2 : i32, i32
  }
  func.func @transform_1(%arg0: i32, %arg1: i32, %arg2: i32) -> (i32, i32) {
    %c0_i32 = arith.constant 0 : i32
    return %arg2, %arg1 : i32, i32
  }
  func.func @transform_2(%arg0: i32, %arg1: i32, %arg2: i32) -> (i32, i32) {
    %c0_i32 = arith.constant 0 : i32
    %c0_i32_0 = arith.constant 0 : i32
    return %c0_i32, %arg1 : i32, i32
  }
  func.func @transform_3(%arg0: i32, %arg1: i32, %arg2: i32) -> (i32, i32) {
    %c0_i32 = arith.constant 0 : i32
    %c0_i32_0 = arith.constant 0 : i32
    return %c0_i32, %arg1 : i32, i32
  }
  func.func @transform_4(%arg0: i32, %arg1: i32, %arg2: i32) -> (i32, i32) {
    %c0_i32 = arith.constant 0 : i32
    %c0_i32_0 = arith.constant 0 : i32
    return %c0_i32, %arg1 : i32, i32
  }
  func.func @transform_5(%arg0: i32, %arg1: i32, %arg2: i32) -> (i32, i32) {
    %c0_i32 = arith.constant 0 : i32
    return %arg0, %arg1 : i32, i32
  }
}

module attributes {stable_mosaic.version = 11 : i64} {
  func.func @kernel(%arg0: i32, %arg1: i32, %arg2: i32, %arg3: memref<128x576xbf16, #tpu.memory_space<vmem>>, %arg4: memref<576x64xbf16, #tpu.memory_space<vmem>>, %arg5: memref<1x64xf32, #tpu.memory_space<vmem>>, %arg6: memref<1x64xf32, #tpu.memory_space<vmem>>, %arg7: memref<128x64xf32, #tpu.memory_space<vmem>>, %arg8: memref<128x64xf32, #tpu.memory_space<vmem>>, %arg9: memref<128x64xf32, #tpu.memory_space<vmem>>) attributes {dimension_semantics = [#tpu.dimension_semantics<parallel>, #tpu.dimension_semantics<parallel>, #tpu.dimension_semantics<arbitrary>], iteration_bounds = array<i64: 1, 1, 1>, scalar_prefetch = 0 : i64, scratch_operands = 1 : i64, tpu.core_type = #tpu.core_type<tc>, window_params = [{transform_indices = @transform_0, window_bounds = array<i64: 128, 576>}, {transform_indices = @transform_1, window_bounds = array<i64: 576, 64>}, {transform_indices = @transform_2, window_bounds = array<i64: 1, 64>}, {transform_indices = @transform_3, window_bounds = array<i64: 1, 64>}, {transform_indices = @transform_4, window_bounds = array<i64: 128, 64>}, {transform_indices = @transform_5, window_bounds = array<i64: 128, 64>}]} {
    %c0_i32 = arith.constant 0 : i32
    %0 = arith.cmpi eq, %arg2, %c0_i32 : i32
    %1 = arith.extui %0 : i1 to i32
    %c0_i32_0 = arith.constant 0 : i32
    %2 = arith.cmpi ne, %1, %c0_i32_0 : i32
    scf.if %2 {
      %cst_10 = arith.constant 0.000000e+00 : f32
      %12 = vector.broadcast %cst_10 : f32 to vector<128x64xf32>
      %c0_11 = arith.constant 0 : index
      %c0_12 = arith.constant 0 : index
      %13 = vector.load %arg9[%c0_11, %c0_12] : memref<128x64xf32, #tpu.memory_space<vmem>>, vector<128x64xf32>
      tpu.vector_store %arg9[%c0_11, %c0_12], %12 {strides = array<i32>} : memref<128x64xf32, #tpu.memory_space<vmem>>, vector<128x64xf32>,
    } else {
    }
    %c0 = arith.constant 0 : index
    %c0_1 = arith.constant 0 : index
    %3 = vector.load %arg9[%c0, %c0_1] : memref<128x64xf32, #tpu.memory_space<vmem>>, vector<128x64xf32>
    %c0_2 = arith.constant 0 : index
    %c0_3 = arith.constant 0 : index
    %4 = vector.load %arg3[%c0_2, %c0_3] : memref<128x576xbf16, #tpu.memory_space<vmem>>, vector<128x576xbf16>
    %c0_4 = arith.constant 0 : index
    %c0_5 = arith.constant 0 : index
    %5 = vector.load %arg4[%c0_4, %c0_5] : memref<576x64xbf16, #tpu.memory_space<vmem>>, vector<576x64xbf16>
    %cst = arith.constant dense<0.000000e+00> : vector<128x64xf32>
    %6 = tpu.matmul %4, %5, %cst {dimension_numbers = #tpu.dot_dimension_numbers<[1], [0], [0], [1], [0, 0, 1, 1], [], []>} : vector<128x576xbf16>, vector<576x64xbf16>, vector<128x64xf32> -> vector<128x64xf32>
    %7 = arith.addf %3, %6 : vector<128x64xf32>
    %c0_6 = arith.constant 0 : index
    %c0_7 = arith.constant 0 : index
    %8 = vector.load %arg9[%c0_6, %c0_7] : memref<128x64xf32, #tpu.memory_space<vmem>>, vector<128x64xf32>
    tpu.vector_store %arg9[%c0_6, %c0_7], %7 {strides = array<i32>} : memref<128x64xf32, #tpu.memory_space<vmem>>, vector<128x64xf32>,
    %c0_i32_8 = arith.constant 0 : i32
    %9 = arith.cmpi eq, %arg2, %c0_i32_8 : i32
    %10 = arith.extui %9 : i1 to i32
    %c0_i32_9 = arith.constant 0 : i32
    %11 = arith.cmpi ne, %10, %c0_i32_9 : i32
    scf.if %11 {
      %c0_10 = arith.constant 0 : index
      %c0_11 = arith.constant 0 : index
      %12 = vector.load %arg9[%c0_10, %c0_11] : memref<128x64xf32, #tpu.memory_space<vmem>>, vector<128x64xf32>
      %c0_12 = arith.constant 0 : index
      %c0_13 = arith.constant 0 : index
      %13 = vector.load %arg5[%c0_12, %c0_13] : memref<1x64xf32, #tpu.memory_space<vmem>>, vector<1x64xf32>
      %14 = vector.broadcast %13 : vector<1x64xf32> to vector<128x64xf32>
      %15 = arith.mulf %12, %14 : vector<128x64xf32>
      %c0_14 = arith.constant 0 : index
      %c0_15 = arith.constant 0 : index
      %16 = vector.load %arg6[%c0_14, %c0_15] : memref<1x64xf32, #tpu.memory_space<vmem>>, vector<1x64xf32>
      %17 = vector.broadcast %16 : vector<1x64xf32> to vector<128x64xf32>
      %18 = arith.addf %15, %17 : vector<128x64xf32>
      %c0_16 = arith.constant 0 : index
      %c0_17 = arith.constant 0 : index
      %19 = vector.load %arg7[%c0_16, %c0_17] : memref<128x64xf32, #tpu.memory_space<vmem>>, vector<128x64xf32>
      %20 = arith.addf %18, %19 : vector<128x64xf32>
      %c0_18 = arith.constant 0 : index
      %c0_19 = arith.constant 0 : index
      %21 = vector.load %arg8[%c0_18, %c0_19] : memref<128x64xf32, #tpu.memory_space<vmem>>, vector<128x64xf32>
      tpu.vector_store %arg8[%c0_18, %c0_19], %20 {strides = array<i32>} : memref<128x64xf32, #tpu.memory_space<vmem>>, vector<128x64xf32>,
    } else {
    }
    return
  }
  func.func @transform_0(%arg0: i32, %arg1: i32, %arg2: i32) -> (i32, i32) {
    %c0_i32 = arith.constant 0 : i32
    return %arg0, %arg2 : i32, i32
  }
  func.func @transform_1(%arg0: i32, %arg1: i32, %arg2: i32) -> (i32, i32) {
    %c0_i32 = arith.constant 0 : i32
    return %arg2, %arg1 : i32, i32
  }
  func.func @transform_2(%arg0: i32, %arg1: i32, %arg2: i32) -> (i32, i32) {
    %c0_i32 = arith.constant 0 : i32
    %c0_i32_0 = arith.constant 0 : i32
    return %c0_i32, %arg1 : i32, i32
  }
  func.func @transform_3(%arg0: i32, %arg1: i32, %arg2: i32) -> (i32, i32) {
    %c0_i32 = arith.constant 0 : i32
    %c0_i32_0 = arith.constant 0 : i32
    return %c0_i32, %arg1 : i32, i32
  }
  func.func @transform_4(%arg0: i32, %arg1: i32, %arg2: i32) -> (i32, i32) {
    %c0_i32 = arith.constant 0 : i32
    return %arg0, %arg1 : i32, i32
  }
  func.func @transform_5(%arg0: i32, %arg1: i32, %arg2: i32) -> (i32, i32) {
    %c0_i32 = arith.constant 0 : i32
    return %arg0, %arg1 : i32, i32
  }
}

module attributes {stable_mosaic.version = 11 : i64} {
  func.func @kernel(%arg0: i32, %arg1: i32, %arg2: i32, %arg3: memref<128x64xbf16, #tpu.memory_space<vmem>>, %arg4: memref<64x64xbf16, #tpu.memory_space<vmem>>, %arg5: memref<1x64xf32, #tpu.memory_space<vmem>>, %arg6: memref<1x64xf32, #tpu.memory_space<vmem>>, %arg7: memref<128x64xf32, #tpu.memory_space<vmem>>, %arg8: memref<128x64xf32, #tpu.memory_space<vmem>>) attributes {dimension_semantics = [#tpu.dimension_semantics<parallel>, #tpu.dimension_semantics<parallel>, #tpu.dimension_semantics<arbitrary>], iteration_bounds = array<i64: 1, 1, 1>, scalar_prefetch = 0 : i64, scratch_operands = 1 : i64, tpu.core_type = #tpu.core_type<tc>, window_params = [{transform_indices = @transform_0, window_bounds = array<i64: 128, 64>}, {transform_indices = @transform_1, window_bounds = array<i64: 64, 64>}, {transform_indices = @transform_2, window_bounds = array<i64: 1, 64>}, {transform_indices = @transform_3, window_bounds = array<i64: 1, 64>}, {transform_indices = @transform_4, window_bounds = array<i64: 128, 64>}]} {
    %c0_i32 = arith.constant 0 : i32
    %0 = arith.cmpi eq, %arg2, %c0_i32 : i32
    %1 = arith.extui %0 : i1 to i32
    %c0_i32_0 = arith.constant 0 : i32
    %2 = arith.cmpi ne, %1, %c0_i32_0 : i32
    scf.if %2 {
      %cst_10 = arith.constant 0.000000e+00 : f32
      %12 = vector.broadcast %cst_10 : f32 to vector<128x64xf32>
      %c0_11 = arith.constant 0 : index
      %c0_12 = arith.constant 0 : index
      %13 = vector.load %arg8[%c0_11, %c0_12] : memref<128x64xf32, #tpu.memory_space<vmem>>, vector<128x64xf32>
      tpu.vector_store %arg8[%c0_11, %c0_12], %12 {strides = array<i32>} : memref<128x64xf32, #tpu.memory_space<vmem>>, vector<128x64xf32>,
    } else {
    }
    %c0 = arith.constant 0 : index
    %c0_1 = arith.constant 0 : index
    %3 = vector.load %arg8[%c0, %c0_1] : memref<128x64xf32, #tpu.memory_space<vmem>>, vector<128x64xf32>
    %c0_2 = arith.constant 0 : index
    %c0_3 = arith.constant 0 : index
    %4 = vector.load %arg3[%c0_2, %c0_3] : memref<128x64xbf16, #tpu.memory_space<vmem>>, vector<128x64xbf16>
    %c0_4 = arith.constant 0 : index
    %c0_5 = arith.constant 0 : index
    %5 = vector.load %arg4[%c0_4, %c0_5] : memref<64x64xbf16, #tpu.memory_space<vmem>>, vector<64x64xbf16>
    %cst = arith.constant dense<0.000000e+00> : vector<128x64xf32>
    %6 = tpu.matmul %4, %5, %cst {dimension_numbers = #tpu.dot_dimension_numbers<[1], [0], [0], [1], [0, 0, 1, 1], [], []>} : vector<128x64xbf16>, vector<64x64xbf16>, vector<128x64xf32> -> vector<128x64xf32>
    %7 = arith.addf %3, %6 : vector<128x64xf32>
    %c0_6 = arith.constant 0 : index
    %c0_7 = arith.constant 0 : index
    %8 = vector.load %arg8[%c0_6, %c0_7] : memref<128x64xf32, #tpu.memory_space<vmem>>, vector<128x64xf32>
    tpu.vector_store %arg8[%c0_6, %c0_7], %7 {strides = array<i32>} : memref<128x64xf32, #tpu.memory_space<vmem>>, vector<128x64xf32>,
    %c0_i32_8 = arith.constant 0 : i32
    %9 = arith.cmpi eq, %arg2, %c0_i32_8 : i32
    %10 = arith.extui %9 : i1 to i32
    %c0_i32_9 = arith.constant 0 : i32
    %11 = arith.cmpi ne, %10, %c0_i32_9 : i32
    scf.if %11 {
      %c0_10 = arith.constant 0 : index
      %c0_11 = arith.constant 0 : index
      %12 = vector.load %arg8[%c0_10, %c0_11] : memref<128x64xf32, #tpu.memory_space<vmem>>, vector<128x64xf32>
      %c0_12 = arith.constant 0 : index
      %c0_13 = arith.constant 0 : index
      %13 = vector.load %arg5[%c0_12, %c0_13] : memref<1x64xf32, #tpu.memory_space<vmem>>, vector<1x64xf32>
      %14 = vector.broadcast %13 : vector<1x64xf32> to vector<128x64xf32>
      %15 = arith.mulf %12, %14 : vector<128x64xf32>
      %c0_14 = arith.constant 0 : index
      %c0_15 = arith.constant 0 : index
      %16 = vector.load %arg6[%c0_14, %c0_15] : memref<1x64xf32, #tpu.memory_space<vmem>>, vector<1x64xf32>
      %17 = vector.broadcast %16 : vector<1x64xf32> to vector<128x64xf32>
      %18 = arith.addf %15, %17 : vector<128x64xf32>
      %c0_16 = arith.constant 0 : index
      %c0_17 = arith.constant 0 : index
      %19 = vector.load %arg7[%c0_16, %c0_17] : memref<128x64xf32, #tpu.memory_space<vmem>>, vector<128x64xf32>
      tpu.vector_store %arg7[%c0_16, %c0_17], %18 {strides = array<i32>} : memref<128x64xf32, #tpu.memory_space<vmem>>, vector<128x64xf32>,
    } else {
    }
    return
  }
  func.func @transform_0(%arg0: i32, %arg1: i32, %arg2: i32) -> (i32, i32) {
    %c0_i32 = arith.constant 0 : i32
    return %arg0, %arg2 : i32, i32
  }
  func.func @transform_1(%arg0: i32, %arg1: i32, %arg2: i32) -> (i32, i32) {
    %c0_i32 = arith.constant 0 : i32
    return %arg2, %arg1 : i32, i32
  }
  func.func @transform_2(%arg0: i32, %arg1: i32, %arg2: i32) -> (i32, i32) {
    %c0_i32 = arith.constant 0 : i32
    %c0_i32_0 = arith.constant 0 : i32
    return %c0_i32, %arg1 : i32, i32
  }
  func.func @transform_3(%arg0: i32, %arg1: i32, %arg2: i32) -> (i32, i32) {
    %c0_i32 = arith.constant 0 : i32
    %c0_i32_0 = arith.constant 0 : i32
    return %c0_i32, %arg1 : i32, i32
  }
  func.func @transform_4(%arg0: i32, %arg1: i32, %arg2: i32) -> (i32, i32) {
    %c0_i32 = arith.constant 0 : i32
    return %arg0, %arg1 : i32, i32
  }
}

module attributes {stable_mosaic.version = 11 : i64} {
  func.func @kernel(%arg0: i32, %arg1: i32, %arg2: i32, %arg3: memref<128x576xbf16, #tpu.memory_space<vmem>>, %arg4: memref<576x64xbf16, #tpu.memory_space<vmem>>, %arg5: memref<1x64xf32, #tpu.memory_space<vmem>>, %arg6: memref<1x64xf32, #tpu.memory_space<vmem>>, %arg7: memref<1x64xf32, #tpu.memory_space<vmem>>, %arg8: memref<128x64xf32, #tpu.memory_space<vmem>>, %arg9: memref<128x64xf32, #tpu.memory_space<vmem>>) attributes {dimension_semantics = [#tpu.dimension_semantics<parallel>, #tpu.dimension_semantics<parallel>, #tpu.dimension_semantics<arbitrary>], iteration_bounds = array<i64: 1, 1, 1>, scalar_prefetch = 0 : i64, scratch_operands = 1 : i64, tpu.core_type = #tpu.core_type<tc>, window_params = [{transform_indices = @transform_0, window_bounds = array<i64: 128, 576>}, {transform_indices = @transform_1, window_bounds = array<i64: 576, 64>}, {transform_indices = @transform_2, window_bounds = array<i64: 1, 64>}, {transform_indices = @transform_3, window_bounds = array<i64: 1, 64>}, {transform_indices = @transform_4, window_bounds = array<i64: 1, 64>}, {transform_indices = @transform_5, window_bounds = array<i64: 128, 64>}]} {
    %c0_i32 = arith.constant 0 : i32
    %0 = arith.cmpi eq, %arg2, %c0_i32 : i32
    %1 = arith.extui %0 : i1 to i32
    %c0_i32_0 = arith.constant 0 : i32
    %2 = arith.cmpi ne, %1, %c0_i32_0 : i32
    scf.if %2 {
      %cst_10 = arith.constant 0.000000e+00 : f32
      %12 = vector.broadcast %cst_10 : f32 to vector<128x64xf32>
      %c0_11 = arith.constant 0 : index
      %c0_12 = arith.constant 0 : index
      %13 = vector.load %arg9[%c0_11, %c0_12] : memref<128x64xf32, #tpu.memory_space<vmem>>, vector<128x64xf32>
      tpu.vector_store %arg9[%c0_11, %c0_12], %12 {strides = array<i32>} : memref<128x64xf32, #tpu.memory_space<vmem>>, vector<128x64xf32>,
    } else {
    }
    %c0 = arith.constant 0 : index
    %c0_1 = arith.constant 0 : index
    %3 = vector.load %arg9[%c0, %c0_1] : memref<128x64xf32, #tpu.memory_space<vmem>>, vector<128x64xf32>
    %c0_2 = arith.constant 0 : index
    %c0_3 = arith.constant 0 : index
    %4 = vector.load %arg3[%c0_2, %c0_3] : memref<128x576xbf16, #tpu.memory_space<vmem>>, vector<128x576xbf16>
    %c0_4 = arith.constant 0 : index
    %c0_5 = arith.constant 0 : index
    %5 = vector.load %arg4[%c0_4, %c0_5] : memref<576x64xbf16, #tpu.memory_space<vmem>>, vector<576x64xbf16>
    %cst = arith.constant dense<0.000000e+00> : vector<128x64xf32>
    %6 = tpu.matmul %4, %5, %cst {dimension_numbers = #tpu.dot_dimension_numbers<[1], [0], [0], [1], [0, 0, 1, 1], [], []>} : vector<128x576xbf16>, vector<576x64xbf16>, vector<128x64xf32> -> vector<128x64xf32>
    %7 = arith.addf %3, %6 : vector<128x64xf32>
    %c0_6 = arith.constant 0 : index
    %c0_7 = arith.constant 0 : index
    %8 = vector.load %arg9[%c0_6, %c0_7] : memref<128x64xf32, #tpu.memory_space<vmem>>, vector<128x64xf32>
    tpu.vector_store %arg9[%c0_6, %c0_7], %7 {strides = array<i32>} : memref<128x64xf32, #tpu.memory_space<vmem>>, vector<128x64xf32>,
    %c0_i32_8 = arith.constant 0 : i32
    %9 = arith.cmpi eq, %arg2, %c0_i32_8 : i32
    %10 = arith.extui %9 : i1 to i32
    %c0_i32_9 = arith.constant 0 : i32
    %11 = arith.cmpi ne, %10, %c0_i32_9 : i32
    scf.if %11 {
      %c0_10 = arith.constant 0 : index
      %c0_11 = arith.constant 0 : index
      %12 = vector.load %arg9[%c0_10, %c0_11] : memref<128x64xf32, #tpu.memory_space<vmem>>, vector<128x64xf32>
      %c0_12 = arith.constant 0 : index
      %c0_13 = arith.constant 0 : index
      %13 = vector.load %arg5[%c0_12, %c0_13] : memref<1x64xf32, #tpu.memory_space<vmem>>, vector<1x64xf32>
      %14 = vector.broadcast %13 : vector<1x64xf32> to vector<128x64xf32>
      %15 = arith.mulf %12, %14 : vector<128x64xf32>
      %c0_14 = arith.constant 0 : index
      %c0_15 = arith.constant 0 : index
      %16 = vector.load %arg6[%c0_14, %c0_15] : memref<1x64xf32, #tpu.memory_space<vmem>>, vector<1x64xf32>
      %17 = vector.broadcast %16 : vector<1x64xf32> to vector<128x64xf32>
      %18 = arith.addf %15, %17 : vector<128x64xf32>
      %c0_16 = arith.constant 0 : index
      %c0_17 = arith.constant 0 : index
      %19 = vector.load %arg7[%c0_16, %c0_17] : memref<1x64xf32, #tpu.memory_space<vmem>>, vector<1x64xf32>
      %cst_18 = arith.constant 0.000000e+00 : f32
      %20 = vector.broadcast %cst_18 : f32 to vector<128x64xf32>
      %21 = arith.cmpf oge, %18, %20 : vector<128x64xf32>
      %22 = vector.broadcast %19 : vector<1x64xf32> to vector<128x64xf32>
      %23 = arith.mulf %22, %18 : vector<128x64xf32>
      %24 = arith.select %21, %18, %23 : vector<128x64xi1>, vector<128x64xf32>
      %c0_19 = arith.constant 0 : index
      %c0_20 = arith.constant 0 : index
      %25 = vector.load %arg8[%c0_19, %c0_20] : memref<128x64xf32, #tpu.memory_space<vmem>>, vector<128x64xf32>
      tpu.vector_store %arg8[%c0_19, %c0_20], %24 {strides = array<i32>} : memref<128x64xf32, #tpu.memory_space<vmem>>, vector<128x64xf32>,
    } else {
    }
    return
  }
  func.func @transform_0(%arg0: i32, %arg1: i32, %arg2: i32) -> (i32, i32) {
    %c0_i32 = arith.constant 0 : i32
    return %arg0, %arg2 : i32, i32
  }
  func.func @transform_1(%arg0: i32, %arg1: i32, %arg2: i32) -> (i32, i32) {
    %c0_i32 = arith.constant 0 : i32
    return %arg2, %arg1 : i32, i32
  }
  func.func @transform_2(%arg0: i32, %arg1: i32, %arg2: i32) -> (i32, i32) {
    %c0_i32 = arith.constant 0 : i32
    %c0_i32_0 = arith.constant 0 : i32
    return %c0_i32, %arg1 : i32, i32
  }
  func.func @transform_3(%arg0: i32, %arg1: i32, %arg2: i32) -> (i32, i32) {
    %c0_i32 = arith.constant 0 : i32
    %c0_i32_0 = arith.constant 0 : i32
    return %c0_i32, %arg1 : i32, i32
  }
  func.func @transform_4(%arg0: i32, %arg1: i32, %arg2: i32) -> (i32, i32) {
    %c0_i32 = arith.constant 0 : i32
    %c0_i32_0 = arith.constant 0 : i32
    return %c0_i32, %arg1 : i32, i32
  }
  func.func @transform_5(%arg0: i32, %arg1: i32, %arg2: i32) -> (i32, i32) {
    %c0_i32 = arith.constant 0 : i32
    return %arg0, %arg1 : i32, i32
  }
}

module attributes {stable_mosaic.version = 11 : i64} {
  func.func @kernel(%arg0: i32, %arg1: i32, %arg2: i32, %arg3: memref<128x576xbf16, #tpu.memory_space<vmem>>, %arg4: memref<576x128xbf16, #tpu.memory_space<vmem>>, %arg5: memref<1x128xf32, #tpu.memory_space<vmem>>, %arg6: memref<1x128xf32, #tpu.memory_space<vmem>>, %arg7: memref<1x128xf32, #tpu.memory_space<vmem>>, %arg8: memref<128x128xf32, #tpu.memory_space<vmem>>, %arg9: memref<128x128xf32, #tpu.memory_space<vmem>>) attributes {dimension_semantics = [#tpu.dimension_semantics<parallel>, #tpu.dimension_semantics<parallel>, #tpu.dimension_semantics<arbitrary>], iteration_bounds = array<i64: 1, 1, 1>, scalar_prefetch = 0 : i64, scratch_operands = 1 : i64, tpu.core_type = #tpu.core_type<tc>, window_params = [{transform_indices = @transform_0, window_bounds = array<i64: 128, 576>}, {transform_indices = @transform_1, window_bounds = array<i64: 576, 128>}, {transform_indices = @transform_2, window_bounds = array<i64: 1, 128>}, {transform_indices = @transform_3, window_bounds = array<i64: 1, 128>}, {transform_indices = @transform_4, window_bounds = array<i64: 1, 128>}, {transform_indices = @transform_5, window_bounds = array<i64: 128, 128>}]} {
    %c0_i32 = arith.constant 0 : i32
    %0 = arith.cmpi eq, %arg2, %c0_i32 : i32
    %1 = arith.extui %0 : i1 to i32
    %c0_i32_0 = arith.constant 0 : i32
    %2 = arith.cmpi ne, %1, %c0_i32_0 : i32
    scf.if %2 {
      %cst_10 = arith.constant 0.000000e+00 : f32
      %12 = vector.broadcast %cst_10 : f32 to vector<128x128xf32>
      %c0_11 = arith.constant 0 : index
      %c0_12 = arith.constant 0 : index
      %13 = vector.load %arg9[%c0_11, %c0_12] : memref<128x128xf32, #tpu.memory_space<vmem>>, vector<128x128xf32>
      tpu.vector_store %arg9[%c0_11, %c0_12], %12 {strides = array<i32>} : memref<128x128xf32, #tpu.memory_space<vmem>>, vector<128x128xf32>,
    } else {
    }
    %c0 = arith.constant 0 : index
    %c0_1 = arith.constant 0 : index
    %3 = vector.load %arg9[%c0, %c0_1] : memref<128x128xf32, #tpu.memory_space<vmem>>, vector<128x128xf32>
    %c0_2 = arith.constant 0 : index
    %c0_3 = arith.constant 0 : index
    %4 = vector.load %arg3[%c0_2, %c0_3] : memref<128x576xbf16, #tpu.memory_space<vmem>>, vector<128x576xbf16>
    %c0_4 = arith.constant 0 : index
    %c0_5 = arith.constant 0 : index
    %5 = vector.load %arg4[%c0_4, %c0_5] : memref<576x128xbf16, #tpu.memory_space<vmem>>, vector<576x128xbf16>
    %cst = arith.constant dense<0.000000e+00> : vector<128x128xf32>
    %6 = tpu.matmul %4, %5, %cst {dimension_numbers = #tpu.dot_dimension_numbers<[1], [0], [0], [1], [0, 0, 1, 1], [], []>} : vector<128x576xbf16>, vector<576x128xbf16>, vector<128x128xf32> -> vector<128x128xf32>
    %7 = arith.addf %3, %6 : vector<128x128xf32>
    %c0_6 = arith.constant 0 : index
    %c0_7 = arith.constant 0 : index
    %8 = vector.load %arg9[%c0_6, %c0_7] : memref<128x128xf32, #tpu.memory_space<vmem>>, vector<128x128xf32>
    tpu.vector_store %arg9[%c0_6, %c0_7], %7 {strides = array<i32>} : memref<128x128xf32, #tpu.memory_space<vmem>>, vector<128x128xf32>,
    %c0_i32_8 = arith.constant 0 : i32
    %9 = arith.cmpi eq, %arg2, %c0_i32_8 : i32
    %10 = arith.extui %9 : i1 to i32
    %c0_i32_9 = arith.constant 0 : i32
    %11 = arith.cmpi ne, %10, %c0_i32_9 : i32
    scf.if %11 {
      %c0_10 = arith.constant 0 : index
      %c0_11 = arith.constant 0 : index
      %12 = vector.load %arg9[%c0_10, %c0_11] : memref<128x128xf32, #tpu.memory_space<vmem>>, vector<128x128xf32>
      %c0_12 = arith.constant 0 : index
      %c0_13 = arith.constant 0 : index
      %13 = vector.load %arg5[%c0_12, %c0_13] : memref<1x128xf32, #tpu.memory_space<vmem>>, vector<1x128xf32>
      %14 = vector.broadcast %13 : vector<1x128xf32> to vector<128x128xf32>
      %15 = arith.mulf %12, %14 : vector<128x128xf32>
      %c0_14 = arith.constant 0 : index
      %c0_15 = arith.constant 0 : index
      %16 = vector.load %arg6[%c0_14, %c0_15] : memref<1x128xf32, #tpu.memory_space<vmem>>, vector<1x128xf32>
      %17 = vector.broadcast %16 : vector<1x128xf32> to vector<128x128xf32>
      %18 = arith.addf %15, %17 : vector<128x128xf32>
      %c0_16 = arith.constant 0 : index
      %c0_17 = arith.constant 0 : index
      %19 = vector.load %arg7[%c0_16, %c0_17] : memref<1x128xf32, #tpu.memory_space<vmem>>, vector<1x128xf32>
      %cst_18 = arith.constant 0.000000e+00 : f32
      %20 = vector.broadcast %cst_18 : f32 to vector<128x128xf32>
      %21 = arith.cmpf oge, %18, %20 : vector<128x128xf32>
      %22 = vector.broadcast %19 : vector<1x128xf32> to vector<128x128xf32>
      %23 = arith.mulf %22, %18 : vector<128x128xf32>
      %24 = arith.select %21, %18, %23 : vector<128x128xi1>, vector<128x128xf32>
      %c0_19 = arith.constant 0 : index
      %c0_20 = arith.constant 0 : index
      %25 = vector.load %arg8[%c0_19, %c0_20] : memref<128x128xf32, #tpu.memory_space<vmem>>, vector<128x128xf32>
      tpu.vector_store %arg8[%c0_19, %c0_20], %24 {strides = array<i32>} : memref<128x128xf32, #tpu.memory_space<vmem>>, vector<128x128xf32>,
    } else {
    }
    return
  }
  func.func @transform_0(%arg0: i32, %arg1: i32, %arg2: i32) -> (i32, i32) {
    %c0_i32 = arith.constant 0 : i32
    return %arg0, %arg2 : i32, i32
  }
  func.func @transform_1(%arg0: i32, %arg1: i32, %arg2: i32) -> (i32, i32) {
    %c0_i32 = arith.constant 0 : i32
    return %arg2, %arg1 : i32, i32
  }
  func.func @transform_2(%arg0: i32, %arg1: i32, %arg2: i32) -> (i32, i32) {
    %c0_i32 = arith.constant 0 : i32
    %c0_i32_0 = arith.constant 0 : i32
    return %c0_i32, %arg1 : i32, i32
  }
  func.func @transform_3(%arg0: i32, %arg1: i32, %arg2: i32) -> (i32, i32) {
    %c0_i32 = arith.constant 0 : i32
    %c0_i32_0 = arith.constant 0 : i32
    return %c0_i32, %arg1 : i32, i32
  }
  func.func @transform_4(%arg0: i32, %arg1: i32, %arg2: i32) -> (i32, i32) {
    %c0_i32 = arith.constant 0 : i32
    %c0_i32_0 = arith.constant 0 : i32
    return %c0_i32, %arg1 : i32, i32
  }
  func.func @transform_5(%arg0: i32, %arg1: i32, %arg2: i32) -> (i32, i32) {
    %c0_i32 = arith.constant 0 : i32
    return %arg0, %arg1 : i32, i32
  }
}

module attributes {stable_mosaic.version = 11 : i64} {
  func.func @kernel(%arg0: i32, %arg1: i32, %arg2: i32, %arg3: memref<32x64xbf16, #tpu.memory_space<vmem>>, %arg4: memref<64x128xbf16, #tpu.memory_space<vmem>>, %arg5: memref<1x128xf32, #tpu.memory_space<vmem>>, %arg6: memref<1x128xf32, #tpu.memory_space<vmem>>, %arg7: memref<32x128xf32, #tpu.memory_space<vmem>>, %arg8: memref<32x128xf32, #tpu.memory_space<vmem>>) attributes {dimension_semantics = [#tpu.dimension_semantics<parallel>, #tpu.dimension_semantics<parallel>, #tpu.dimension_semantics<arbitrary>], iteration_bounds = array<i64: 1, 1, 1>, scalar_prefetch = 0 : i64, scratch_operands = 1 : i64, tpu.core_type = #tpu.core_type<tc>, window_params = [{transform_indices = @transform_0, window_bounds = array<i64: 32, 64>}, {transform_indices = @transform_1, window_bounds = array<i64: 64, 128>}, {transform_indices = @transform_2, window_bounds = array<i64: 1, 128>}, {transform_indices = @transform_3, window_bounds = array<i64: 1, 128>}, {transform_indices = @transform_4, window_bounds = array<i64: 32, 128>}]} {
    %c0_i32 = arith.constant 0 : i32
    %0 = arith.cmpi eq, %arg2, %c0_i32 : i32
    %1 = arith.extui %0 : i1 to i32
    %c0_i32_0 = arith.constant 0 : i32
    %2 = arith.cmpi ne, %1, %c0_i32_0 : i32
    scf.if %2 {
      %cst_10 = arith.constant 0.000000e+00 : f32
      %12 = vector.broadcast %cst_10 : f32 to vector<32x128xf32>
      %c0_11 = arith.constant 0 : index
      %c0_12 = arith.constant 0 : index
      %13 = vector.load %arg8[%c0_11, %c0_12] : memref<32x128xf32, #tpu.memory_space<vmem>>, vector<32x128xf32>
      tpu.vector_store %arg8[%c0_11, %c0_12], %12 {strides = array<i32>} : memref<32x128xf32, #tpu.memory_space<vmem>>, vector<32x128xf32>,
    } else {
    }
    %c0 = arith.constant 0 : index
    %c0_1 = arith.constant 0 : index
    %3 = vector.load %arg8[%c0, %c0_1] : memref<32x128xf32, #tpu.memory_space<vmem>>, vector<32x128xf32>
    %c0_2 = arith.constant 0 : index
    %c0_3 = arith.constant 0 : index
    %4 = vector.load %arg3[%c0_2, %c0_3] : memref<32x64xbf16, #tpu.memory_space<vmem>>, vector<32x64xbf16>
    %c0_4 = arith.constant 0 : index
    %c0_5 = arith.constant 0 : index
    %5 = vector.load %arg4[%c0_4, %c0_5] : memref<64x128xbf16, #tpu.memory_space<vmem>>, vector<64x128xbf16>
    %cst = arith.constant dense<0.000000e+00> : vector<32x128xf32>
    %6 = tpu.matmul %4, %5, %cst {dimension_numbers = #tpu.dot_dimension_numbers<[1], [0], [0], [1], [0, 0, 1, 1], [], []>} : vector<32x64xbf16>, vector<64x128xbf16>, vector<32x128xf32> -> vector<32x128xf32>
    %7 = arith.addf %3, %6 : vector<32x128xf32>
    %c0_6 = arith.constant 0 : index
    %c0_7 = arith.constant 0 : index
    %8 = vector.load %arg8[%c0_6, %c0_7] : memref<32x128xf32, #tpu.memory_space<vmem>>, vector<32x128xf32>
    tpu.vector_store %arg8[%c0_6, %c0_7], %7 {strides = array<i32>} : memref<32x128xf32, #tpu.memory_space<vmem>>, vector<32x128xf32>,
    %c0_i32_8 = arith.constant 0 : i32
    %9 = arith.cmpi eq, %arg2, %c0_i32_8 : i32
    %10 = arith.extui %9 : i1 to i32
    %c0_i32_9 = arith.constant 0 : i32
    %11 = arith.cmpi ne, %10, %c0_i32_9 : i32
    scf.if %11 {
      %c0_10 = arith.constant 0 : index
      %c0_11 = arith.constant 0 : index
      %12 = vector.load %arg8[%c0_10, %c0_11] : memref<32x128xf32, #tpu.memory_space<vmem>>, vector<32x128xf32>
      %c0_12 = arith.constant 0 : index
      %c0_13 = arith.constant 0 : index
      %13 = vector.load %arg5[%c0_12, %c0_13] : memref<1x128xf32, #tpu.memory_space<vmem>>, vector<1x128xf32>
      %14 = vector.broadcast %13 : vector<1x128xf32> to vector<32x128xf32>
      %15 = arith.mulf %12, %14 : vector<32x128xf32>
      %c0_14 = arith.constant 0 : index
      %c0_15 = arith.constant 0 : index
      %16 = vector.load %arg6[%c0_14, %c0_15] : memref<1x128xf32, #tpu.memory_space<vmem>>, vector<1x128xf32>
      %17 = vector.broadcast %16 : vector<1x128xf32> to vector<32x128xf32>
      %18 = arith.addf %15, %17 : vector<32x128xf32>
      %c0_16 = arith.constant 0 : index
      %c0_17 = arith.constant 0 : index
      %19 = vector.load %arg7[%c0_16, %c0_17] : memref<32x128xf32, #tpu.memory_space<vmem>>, vector<32x128xf32>
      tpu.vector_store %arg7[%c0_16, %c0_17], %18 {strides = array<i32>} : memref<32x128xf32, #tpu.memory_space<vmem>>, vector<32x128xf32>,
    } else {
    }
    return
  }
  func.func @transform_0(%arg0: i32, %arg1: i32, %arg2: i32) -> (i32, i32) {
    %c0_i32 = arith.constant 0 : i32
    return %arg0, %arg2 : i32, i32
  }
  func.func @transform_1(%arg0: i32, %arg1: i32, %arg2: i32) -> (i32, i32) {
    %c0_i32 = arith.constant 0 : i32
    return %arg2, %arg1 : i32, i32
  }
  func.func @transform_2(%arg0: i32, %arg1: i32, %arg2: i32) -> (i32, i32) {
    %c0_i32 = arith.constant 0 : i32
    %c0_i32_0 = arith.constant 0 : i32
    return %c0_i32, %arg1 : i32, i32
  }
  func.func @transform_3(%arg0: i32, %arg1: i32, %arg2: i32) -> (i32, i32) {
    %c0_i32 = arith.constant 0 : i32
    %c0_i32_0 = arith.constant 0 : i32
    return %c0_i32, %arg1 : i32, i32
  }
  func.func @transform_4(%arg0: i32, %arg1: i32, %arg2: i32) -> (i32, i32) {
    %c0_i32 = arith.constant 0 : i32
    return %arg0, %arg1 : i32, i32
  }
}

module attributes {stable_mosaic.version = 11 : i64} {
  func.func @kernel(%arg0: i32, %arg1: i32, %arg2: i32, %arg3: memref<32x1152xbf16, #tpu.memory_space<vmem>>, %arg4: memref<1152x128xbf16, #tpu.memory_space<vmem>>, %arg5: memref<1x128xf32, #tpu.memory_space<vmem>>, %arg6: memref<1x128xf32, #tpu.memory_space<vmem>>, %arg7: memref<32x128xf32, #tpu.memory_space<vmem>>, %arg8: memref<32x128xf32, #tpu.memory_space<vmem>>, %arg9: memref<32x128xf32, #tpu.memory_space<vmem>>) attributes {dimension_semantics = [#tpu.dimension_semantics<parallel>, #tpu.dimension_semantics<parallel>, #tpu.dimension_semantics<arbitrary>], iteration_bounds = array<i64: 1, 1, 1>, scalar_prefetch = 0 : i64, scratch_operands = 1 : i64, tpu.core_type = #tpu.core_type<tc>, window_params = [{transform_indices = @transform_0, window_bounds = array<i64: 32, 1152>}, {transform_indices = @transform_1, window_bounds = array<i64: 1152, 128>}, {transform_indices = @transform_2, window_bounds = array<i64: 1, 128>}, {transform_indices = @transform_3, window_bounds = array<i64: 1, 128>}, {transform_indices = @transform_4, window_bounds = array<i64: 32, 128>}, {transform_indices = @transform_5, window_bounds = array<i64: 32, 128>}]} {
    %c0_i32 = arith.constant 0 : i32
    %0 = arith.cmpi eq, %arg2, %c0_i32 : i32
    %1 = arith.extui %0 : i1 to i32
    %c0_i32_0 = arith.constant 0 : i32
    %2 = arith.cmpi ne, %1, %c0_i32_0 : i32
    scf.if %2 {
      %cst_10 = arith.constant 0.000000e+00 : f32
      %12 = vector.broadcast %cst_10 : f32 to vector<32x128xf32>
      %c0_11 = arith.constant 0 : index
      %c0_12 = arith.constant 0 : index
      %13 = vector.load %arg9[%c0_11, %c0_12] : memref<32x128xf32, #tpu.memory_space<vmem>>, vector<32x128xf32>
      tpu.vector_store %arg9[%c0_11, %c0_12], %12 {strides = array<i32>} : memref<32x128xf32, #tpu.memory_space<vmem>>, vector<32x128xf32>,
    } else {
    }
    %c0 = arith.constant 0 : index
    %c0_1 = arith.constant 0 : index
    %3 = vector.load %arg9[%c0, %c0_1] : memref<32x128xf32, #tpu.memory_space<vmem>>, vector<32x128xf32>
    %c0_2 = arith.constant 0 : index
    %c0_3 = arith.constant 0 : index
    %4 = vector.load %arg3[%c0_2, %c0_3] : memref<32x1152xbf16, #tpu.memory_space<vmem>>, vector<32x1152xbf16>
    %c0_4 = arith.constant 0 : index
    %c0_5 = arith.constant 0 : index
    %5 = vector.load %arg4[%c0_4, %c0_5] : memref<1152x128xbf16, #tpu.memory_space<vmem>>, vector<1152x128xbf16>
    %cst = arith.constant dense<0.000000e+00> : vector<32x128xf32>
    %6 = tpu.matmul %4, %5, %cst {dimension_numbers = #tpu.dot_dimension_numbers<[1], [0], [0], [1], [0, 0, 1, 1], [], []>} : vector<32x1152xbf16>, vector<1152x128xbf16>, vector<32x128xf32> -> vector<32x128xf32>
    %7 = arith.addf %3, %6 : vector<32x128xf32>
    %c0_6 = arith.constant 0 : index
    %c0_7 = arith.constant 0 : index
    %8 = vector.load %arg9[%c0_6, %c0_7] : memref<32x128xf32, #tpu.memory_space<vmem>>, vector<32x128xf32>
    tpu.vector_store %arg9[%c0_6, %c0_7], %7 {strides = array<i32>} : memref<32x128xf32, #tpu.memory_space<vmem>>, vector<32x128xf32>,
    %c0_i32_8 = arith.constant 0 : i32
    %9 = arith.cmpi eq, %arg2, %c0_i32_8 : i32
    %10 = arith.extui %9 : i1 to i32
    %c0_i32_9 = arith.constant 0 : i32
    %11 = arith.cmpi ne, %10, %c0_i32_9 : i32
    scf.if %11 {
      %c0_10 = arith.constant 0 : index
      %c0_11 = arith.constant 0 : index
      %12 = vector.load %arg9[%c0_10, %c0_11] : memref<32x128xf32, #tpu.memory_space<vmem>>, vector<32x128xf32>
      %c0_12 = arith.constant 0 : index
      %c0_13 = arith.constant 0 : index
      %13 = vector.load %arg5[%c0_12, %c0_13] : memref<1x128xf32, #tpu.memory_space<vmem>>, vector<1x128xf32>
      %14 = vector.broadcast %13 : vector<1x128xf32> to vector<32x128xf32>
      %15 = arith.mulf %12, %14 : vector<32x128xf32>
      %c0_14 = arith.constant 0 : index
      %c0_15 = arith.constant 0 : index
      %16 = vector.load %arg6[%c0_14, %c0_15] : memref<1x128xf32, #tpu.memory_space<vmem>>, vector<1x128xf32>
      %17 = vector.broadcast %16 : vector<1x128xf32> to vector<32x128xf32>
      %18 = arith.addf %15, %17 : vector<32x128xf32>
      %c0_16 = arith.constant 0 : index
      %c0_17 = arith.constant 0 : index
      %19 = vector.load %arg7[%c0_16, %c0_17] : memref<32x128xf32, #tpu.memory_space<vmem>>, vector<32x128xf32>
      %20 = arith.addf %18, %19 : vector<32x128xf32>
      %c0_18 = arith.constant 0 : index
      %c0_19 = arith.constant 0 : index
      %21 = vector.load %arg8[%c0_18, %c0_19] : memref<32x128xf32, #tpu.memory_space<vmem>>, vector<32x128xf32>
      tpu.vector_store %arg8[%c0_18, %c0_19], %20 {strides = array<i32>} : memref<32x128xf32, #tpu.memory_space<vmem>>, vector<32x128xf32>,
    } else {
    }
    return
  }
  func.func @transform_0(%arg0: i32, %arg1: i32, %arg2: i32) -> (i32, i32) {
    %c0_i32 = arith.constant 0 : i32
    return %arg0, %arg2 : i32, i32
  }
  func.func @transform_1(%arg0: i32, %arg1: i32, %arg2: i32) -> (i32, i32) {
    %c0_i32 = arith.constant 0 : i32
    return %arg2, %arg1 : i32, i32
  }
  func.func @transform_2(%arg0: i32, %arg1: i32, %arg2: i32) -> (i32, i32) {
    %c0_i32 = arith.constant 0 : i32
    %c0_i32_0 = arith.constant 0 : i32
    return %c0_i32, %arg1 : i32, i32
  }
  func.func @transform_3(%arg0: i32, %arg1: i32, %arg2: i32) -> (i32, i32) {
    %c0_i32 = arith.constant 0 : i32
    %c0_i32_0 = arith.constant 0 : i32
    return %c0_i32, %arg1 : i32, i32
  }
  func.func @transform_4(%arg0: i32, %arg1: i32, %arg2: i32) -> (i32, i32) {
    %c0_i32 = arith.constant 0 : i32
    return %arg0, %arg1 : i32, i32
  }
  func.func @transform_5(%arg0: i32, %arg1: i32, %arg2: i32) -> (i32, i32) {
    %c0_i32 = arith.constant 0 : i32
    return %arg0, %arg1 : i32, i32
  }
}

module attributes {stable_mosaic.version = 11 : i64} {
  func.func @kernel(%arg0: i32, %arg1: i32, %arg2: i32, %arg3: memref<32x1152xbf16, #tpu.memory_space<vmem>>, %arg4: memref<1152x128xbf16, #tpu.memory_space<vmem>>, %arg5: memref<1x128xf32, #tpu.memory_space<vmem>>, %arg6: memref<1x128xf32, #tpu.memory_space<vmem>>, %arg7: memref<1x128xf32, #tpu.memory_space<vmem>>, %arg8: memref<32x128xf32, #tpu.memory_space<vmem>>, %arg9: memref<32x128xf32, #tpu.memory_space<vmem>>) attributes {dimension_semantics = [#tpu.dimension_semantics<parallel>, #tpu.dimension_semantics<parallel>, #tpu.dimension_semantics<arbitrary>], iteration_bounds = array<i64: 1, 1, 1>, scalar_prefetch = 0 : i64, scratch_operands = 1 : i64, tpu.core_type = #tpu.core_type<tc>, window_params = [{transform_indices = @transform_0, window_bounds = array<i64: 32, 1152>}, {transform_indices = @transform_1, window_bounds = array<i64: 1152, 128>}, {transform_indices = @transform_2, window_bounds = array<i64: 1, 128>}, {transform_indices = @transform_3, window_bounds = array<i64: 1, 128>}, {transform_indices = @transform_4, window_bounds = array<i64: 1, 128>}, {transform_indices = @transform_5, window_bounds = array<i64: 32, 128>}]} {
    %c0_i32 = arith.constant 0 : i32
    %0 = arith.cmpi eq, %arg2, %c0_i32 : i32
    %1 = arith.extui %0 : i1 to i32
    %c0_i32_0 = arith.constant 0 : i32
    %2 = arith.cmpi ne, %1, %c0_i32_0 : i32
    scf.if %2 {
      %cst_10 = arith.constant 0.000000e+00 : f32
      %12 = vector.broadcast %cst_10 : f32 to vector<32x128xf32>
      %c0_11 = arith.constant 0 : index
      %c0_12 = arith.constant 0 : index
      %13 = vector.load %arg9[%c0_11, %c0_12] : memref<32x128xf32, #tpu.memory_space<vmem>>, vector<32x128xf32>
      tpu.vector_store %arg9[%c0_11, %c0_12], %12 {strides = array<i32>} : memref<32x128xf32, #tpu.memory_space<vmem>>, vector<32x128xf32>,
    } else {
    }
    %c0 = arith.constant 0 : index
    %c0_1 = arith.constant 0 : index
    %3 = vector.load %arg9[%c0, %c0_1] : memref<32x128xf32, #tpu.memory_space<vmem>>, vector<32x128xf32>
    %c0_2 = arith.constant 0 : index
    %c0_3 = arith.constant 0 : index
    %4 = vector.load %arg3[%c0_2, %c0_3] : memref<32x1152xbf16, #tpu.memory_space<vmem>>, vector<32x1152xbf16>
    %c0_4 = arith.constant 0 : index
    %c0_5 = arith.constant 0 : index
    %5 = vector.load %arg4[%c0_4, %c0_5] : memref<1152x128xbf16, #tpu.memory_space<vmem>>, vector<1152x128xbf16>
    %cst = arith.constant dense<0.000000e+00> : vector<32x128xf32>
    %6 = tpu.matmul %4, %5, %cst {dimension_numbers = #tpu.dot_dimension_numbers<[1], [0], [0], [1], [0, 0, 1, 1], [], []>} : vector<32x1152xbf16>, vector<1152x128xbf16>, vector<32x128xf32> -> vector<32x128xf32>
    %7 = arith.addf %3, %6 : vector<32x128xf32>
    %c0_6 = arith.constant 0 : index
    %c0_7 = arith.constant 0 : index
    %8 = vector.load %arg9[%c0_6, %c0_7] : memref<32x128xf32, #tpu.memory_space<vmem>>, vector<32x128xf32>
    tpu.vector_store %arg9[%c0_6, %c0_7], %7 {strides = array<i32>} : memref<32x128xf32, #tpu.memory_space<vmem>>, vector<32x128xf32>,
    %c0_i32_8 = arith.constant 0 : i32
    %9 = arith.cmpi eq, %arg2, %c0_i32_8 : i32
    %10 = arith.extui %9 : i1 to i32
    %c0_i32_9 = arith.constant 0 : i32
    %11 = arith.cmpi ne, %10, %c0_i32_9 : i32
    scf.if %11 {
      %c0_10 = arith.constant 0 : index
      %c0_11 = arith.constant 0 : index
      %12 = vector.load %arg9[%c0_10, %c0_11] : memref<32x128xf32, #tpu.memory_space<vmem>>, vector<32x128xf32>
      %c0_12 = arith.constant 0 : index
      %c0_13 = arith.constant 0 : index
      %13 = vector.load %arg5[%c0_12, %c0_13] : memref<1x128xf32, #tpu.memory_space<vmem>>, vector<1x128xf32>
      %14 = vector.broadcast %13 : vector<1x128xf32> to vector<32x128xf32>
      %15 = arith.mulf %12, %14 : vector<32x128xf32>
      %c0_14 = arith.constant 0 : index
      %c0_15 = arith.constant 0 : index
      %16 = vector.load %arg6[%c0_14, %c0_15] : memref<1x128xf32, #tpu.memory_space<vmem>>, vector<1x128xf32>
      %17 = vector.broadcast %16 : vector<1x128xf32> to vector<32x128xf32>
      %18 = arith.addf %15, %17 : vector<32x128xf32>
      %c0_16 = arith.constant 0 : index
      %c0_17 = arith.constant 0 : index
      %19 = vector.load %arg7[%c0_16, %c0_17] : memref<1x128xf32, #tpu.memory_space<vmem>>, vector<1x128xf32>
      %cst_18 = arith.constant 0.000000e+00 : f32
      %20 = vector.broadcast %cst_18 : f32 to vector<32x128xf32>
      %21 = arith.cmpf oge, %18, %20 : vector<32x128xf32>
      %22 = vector.broadcast %19 : vector<1x128xf32> to vector<32x128xf32>
      %23 = arith.mulf %22, %18 : vector<32x128xf32>
      %24 = arith.select %21, %18, %23 : vector<32x128xi1>, vector<32x128xf32>
      %c0_19 = arith.constant 0 : index
      %c0_20 = arith.constant 0 : index
      %25 = vector.load %arg8[%c0_19, %c0_20] : memref<32x128xf32, #tpu.memory_space<vmem>>, vector<32x128xf32>
      tpu.vector_store %arg8[%c0_19, %c0_20], %24 {strides = array<i32>} : memref<32x128xf32, #tpu.memory_space<vmem>>, vector<32x128xf32>,
    } else {
    }
    return
  }
  func.func @transform_0(%arg0: i32, %arg1: i32, %arg2: i32) -> (i32, i32) {
    %c0_i32 = arith.constant 0 : i32
    return %arg0, %arg2 : i32, i32
  }
  func.func @transform_1(%arg0: i32, %arg1: i32, %arg2: i32) -> (i32, i32) {
    %c0_i32 = arith.constant 0 : i32
    return %arg2, %arg1 : i32, i32
  }
  func.func @transform_2(%arg0: i32, %arg1: i32, %arg2: i32) -> (i32, i32) {
    %c0_i32 = arith.constant 0 : i32
    %c0_i32_0 = arith.constant 0 : i32
    return %c0_i32, %arg1 : i32, i32
  }
  func.func @transform_3(%arg0: i32, %arg1: i32, %arg2: i32) -> (i32, i32) {
    %c0_i32 = arith.constant 0 : i32
    %c0_i32_0 = arith.constant 0 : i32
    return %c0_i32, %arg1 : i32, i32
  }
  func.func @transform_4(%arg0: i32, %arg1: i32, %arg2: i32) -> (i32, i32) {
    %c0_i32 = arith.constant 0 : i32
    %c0_i32_0 = arith.constant 0 : i32
    return %c0_i32, %arg1 : i32, i32
  }
  func.func @transform_5(%arg0: i32, %arg1: i32, %arg2: i32) -> (i32, i32) {
    %c0_i32 = arith.constant 0 : i32
    return %arg0, %arg1 : i32, i32
  }
}

module attributes {stable_mosaic.version = 11 : i64} {
  func.func @kernel(%arg0: i32, %arg1: i32, %arg2: i32, %arg3: memref<32x1152xbf16, #tpu.memory_space<vmem>>, %arg4: memref<1152x256xbf16, #tpu.memory_space<vmem>>, %arg5: memref<1x256xf32, #tpu.memory_space<vmem>>, %arg6: memref<1x256xf32, #tpu.memory_space<vmem>>, %arg7: memref<1x256xf32, #tpu.memory_space<vmem>>, %arg8: memref<32x256xf32, #tpu.memory_space<vmem>>, %arg9: memref<32x256xf32, #tpu.memory_space<vmem>>) attributes {dimension_semantics = [#tpu.dimension_semantics<parallel>, #tpu.dimension_semantics<parallel>, #tpu.dimension_semantics<arbitrary>], iteration_bounds = array<i64: 1, 1, 1>, scalar_prefetch = 0 : i64, scratch_operands = 1 : i64, tpu.core_type = #tpu.core_type<tc>, window_params = [{transform_indices = @transform_0, window_bounds = array<i64: 32, 1152>}, {transform_indices = @transform_1, window_bounds = array<i64: 1152, 256>}, {transform_indices = @transform_2, window_bounds = array<i64: 1, 256>}, {transform_indices = @transform_3, window_bounds = array<i64: 1, 256>}, {transform_indices = @transform_4, window_bounds = array<i64: 1, 256>}, {transform_indices = @transform_5, window_bounds = array<i64: 32, 256>}]} {
    %c0_i32 = arith.constant 0 : i32
    %0 = arith.cmpi eq, %arg2, %c0_i32 : i32
    %1 = arith.extui %0 : i1 to i32
    %c0_i32_0 = arith.constant 0 : i32
    %2 = arith.cmpi ne, %1, %c0_i32_0 : i32
    scf.if %2 {
      %cst_10 = arith.constant 0.000000e+00 : f32
      %12 = vector.broadcast %cst_10 : f32 to vector<32x256xf32>
      %c0_11 = arith.constant 0 : index
      %c0_12 = arith.constant 0 : index
      %13 = vector.load %arg9[%c0_11, %c0_12] : memref<32x256xf32, #tpu.memory_space<vmem>>, vector<32x256xf32>
      tpu.vector_store %arg9[%c0_11, %c0_12], %12 {strides = array<i32>} : memref<32x256xf32, #tpu.memory_space<vmem>>, vector<32x256xf32>,
    } else {
    }
    %c0 = arith.constant 0 : index
    %c0_1 = arith.constant 0 : index
    %3 = vector.load %arg9[%c0, %c0_1] : memref<32x256xf32, #tpu.memory_space<vmem>>, vector<32x256xf32>
    %c0_2 = arith.constant 0 : index
    %c0_3 = arith.constant 0 : index
    %4 = vector.load %arg3[%c0_2, %c0_3] : memref<32x1152xbf16, #tpu.memory_space<vmem>>, vector<32x1152xbf16>
    %c0_4 = arith.constant 0 : index
    %c0_5 = arith.constant 0 : index
    %5 = vector.load %arg4[%c0_4, %c0_5] : memref<1152x256xbf16, #tpu.memory_space<vmem>>, vector<1152x256xbf16>
    %cst = arith.constant dense<0.000000e+00> : vector<32x256xf32>
    %6 = tpu.matmul %4, %5, %cst {dimension_numbers = #tpu.dot_dimension_numbers<[1], [0], [0], [1], [0, 0, 1, 1], [], []>} : vector<32x1152xbf16>, vector<1152x256xbf16>, vector<32x256xf32> -> vector<32x256xf32>
    %7 = arith.addf %3, %6 : vector<32x256xf32>
    %c0_6 = arith.constant 0 : index
    %c0_7 = arith.constant 0 : index
    %8 = vector.load %arg9[%c0_6, %c0_7] : memref<32x256xf32, #tpu.memory_space<vmem>>, vector<32x256xf32>
    tpu.vector_store %arg9[%c0_6, %c0_7], %7 {strides = array<i32>} : memref<32x256xf32, #tpu.memory_space<vmem>>, vector<32x256xf32>,
    %c0_i32_8 = arith.constant 0 : i32
    %9 = arith.cmpi eq, %arg2, %c0_i32_8 : i32
    %10 = arith.extui %9 : i1 to i32
    %c0_i32_9 = arith.constant 0 : i32
    %11 = arith.cmpi ne, %10, %c0_i32_9 : i32
    scf.if %11 {
      %c0_10 = arith.constant 0 : index
      %c0_11 = arith.constant 0 : index
      %12 = vector.load %arg9[%c0_10, %c0_11] : memref<32x256xf32, #tpu.memory_space<vmem>>, vector<32x256xf32>
      %c0_12 = arith.constant 0 : index
      %c0_13 = arith.constant 0 : index
      %13 = vector.load %arg5[%c0_12, %c0_13] : memref<1x256xf32, #tpu.memory_space<vmem>>, vector<1x256xf32>
      %14 = vector.broadcast %13 : vector<1x256xf32> to vector<32x256xf32>
      %15 = arith.mulf %12, %14 : vector<32x256xf32>
      %c0_14 = arith.constant 0 : index
      %c0_15 = arith.constant 0 : index
      %16 = vector.load %arg6[%c0_14, %c0_15] : memref<1x256xf32, #tpu.memory_space<vmem>>, vector<1x256xf32>
      %17 = vector.broadcast %16 : vector<1x256xf32> to vector<32x256xf32>
      %18 = arith.addf %15, %17 : vector<32x256xf32>
      %c0_16 = arith.constant 0 : index
      %c0_17 = arith.constant 0 : index
      %19 = vector.load %arg7[%c0_16, %c0_17] : memref<1x256xf32, #tpu.memory_space<vmem>>, vector<1x256xf32>
      %cst_18 = arith.constant 0.000000e+00 : f32
      %20 = vector.broadcast %cst_18 : f32 to vector<32x256xf32>
      %21 = arith.cmpf oge, %18, %20 : vector<32x256xf32>
      %22 = vector.broadcast %19 : vector<1x256xf32> to vector<32x256xf32>
      %23 = arith.mulf %22, %18 : vector<32x256xf32>
      %24 = arith.select %21, %18, %23 : vector<32x256xi1>, vector<32x256xf32>
      %c0_19 = arith.constant 0 : index
      %c0_20 = arith.constant 0 : index
      %25 = vector.load %arg8[%c0_19, %c0_20] : memref<32x256xf32, #tpu.memory_space<vmem>>, vector<32x256xf32>
      tpu.vector_store %arg8[%c0_19, %c0_20], %24 {strides = array<i32>} : memref<32x256xf32, #tpu.memory_space<vmem>>, vector<32x256xf32>,
    } else {
    }
    return
  }
  func.func @transform_0(%arg0: i32, %arg1: i32, %arg2: i32) -> (i32, i32) {
    %c0_i32 = arith.constant 0 : i32
    return %arg0, %arg2 : i32, i32
  }
  func.func @transform_1(%arg0: i32, %arg1: i32, %arg2: i32) -> (i32, i32) {
    %c0_i32 = arith.constant 0 : i32
    return %arg2, %arg1 : i32, i32
  }
  func.func @transform_2(%arg0: i32, %arg1: i32, %arg2: i32) -> (i32, i32) {
    %c0_i32 = arith.constant 0 : i32
    %c0_i32_0 = arith.constant 0 : i32
    return %c0_i32, %arg1 : i32, i32
  }
  func.func @transform_3(%arg0: i32, %arg1: i32, %arg2: i32) -> (i32, i32) {
    %c0_i32 = arith.constant 0 : i32
    %c0_i32_0 = arith.constant 0 : i32
    return %c0_i32, %arg1 : i32, i32
  }
  func.func @transform_4(%arg0: i32, %arg1: i32, %arg2: i32) -> (i32, i32) {
    %c0_i32 = arith.constant 0 : i32
    %c0_i32_0 = arith.constant 0 : i32
    return %c0_i32, %arg1 : i32, i32
  }
  func.func @transform_5(%arg0: i32, %arg1: i32, %arg2: i32) -> (i32, i32) {
    %c0_i32 = arith.constant 0 : i32
    return %arg0, %arg1 : i32, i32
  }
}

module attributes {stable_mosaic.version = 11 : i64} {
  func.func @kernel(%arg0: i32, %arg1: i32, %arg2: i32, %arg3: memref<8x128xbf16, #tpu.memory_space<vmem>>, %arg4: memref<128x256xbf16, #tpu.memory_space<vmem>>, %arg5: memref<1x256xf32, #tpu.memory_space<vmem>>, %arg6: memref<1x256xf32, #tpu.memory_space<vmem>>, %arg7: memref<8x256xf32, #tpu.memory_space<vmem>>, %arg8: memref<8x256xf32, #tpu.memory_space<vmem>>) attributes {dimension_semantics = [#tpu.dimension_semantics<parallel>, #tpu.dimension_semantics<parallel>, #tpu.dimension_semantics<arbitrary>], iteration_bounds = array<i64: 1, 1, 1>, scalar_prefetch = 0 : i64, scratch_operands = 1 : i64, tpu.core_type = #tpu.core_type<tc>, window_params = [{transform_indices = @transform_0, window_bounds = array<i64: 8, 128>}, {transform_indices = @transform_1, window_bounds = array<i64: 128, 256>}, {transform_indices = @transform_2, window_bounds = array<i64: 1, 256>}, {transform_indices = @transform_3, window_bounds = array<i64: 1, 256>}, {transform_indices = @transform_4, window_bounds = array<i64: 8, 256>}]} {
    %c0_i32 = arith.constant 0 : i32
    %0 = arith.cmpi eq, %arg2, %c0_i32 : i32
    %1 = arith.extui %0 : i1 to i32
    %c0_i32_0 = arith.constant 0 : i32
    %2 = arith.cmpi ne, %1, %c0_i32_0 : i32
    scf.if %2 {
      %cst_10 = arith.constant 0.000000e+00 : f32
      %12 = vector.broadcast %cst_10 : f32 to vector<8x256xf32>
      %c0_11 = arith.constant 0 : index
      %c0_12 = arith.constant 0 : index
      %13 = vector.load %arg8[%c0_11, %c0_12] : memref<8x256xf32, #tpu.memory_space<vmem>>, vector<8x256xf32>
      tpu.vector_store %arg8[%c0_11, %c0_12], %12 {strides = array<i32>} : memref<8x256xf32, #tpu.memory_space<vmem>>, vector<8x256xf32>,
    } else {
    }
    %c0 = arith.constant 0 : index
    %c0_1 = arith.constant 0 : index
    %3 = vector.load %arg8[%c0, %c0_1] : memref<8x256xf32, #tpu.memory_space<vmem>>, vector<8x256xf32>
    %c0_2 = arith.constant 0 : index
    %c0_3 = arith.constant 0 : index
    %4 = vector.load %arg3[%c0_2, %c0_3] : memref<8x128xbf16, #tpu.memory_space<vmem>>, vector<8x128xbf16>
    %c0_4 = arith.constant 0 : index
    %c0_5 = arith.constant 0 : index
    %5 = vector.load %arg4[%c0_4, %c0_5] : memref<128x256xbf16, #tpu.memory_space<vmem>>, vector<128x256xbf16>
    %cst = arith.constant dense<0.000000e+00> : vector<8x256xf32>
    %6 = tpu.matmul %4, %5, %cst {dimension_numbers = #tpu.dot_dimension_numbers<[1], [0], [0], [1], [0, 0, 1, 1], [], []>} : vector<8x128xbf16>, vector<128x256xbf16>, vector<8x256xf32> -> vector<8x256xf32>
    %7 = arith.addf %3, %6 : vector<8x256xf32>
    %c0_6 = arith.constant 0 : index
    %c0_7 = arith.constant 0 : index
    %8 = vector.load %arg8[%c0_6, %c0_7] : memref<8x256xf32, #tpu.memory_space<vmem>>, vector<8x256xf32>
    tpu.vector_store %arg8[%c0_6, %c0_7], %7 {strides = array<i32>} : memref<8x256xf32, #tpu.memory_space<vmem>>, vector<8x256xf32>,
    %c0_i32_8 = arith.constant 0 : i32
    %9 = arith.cmpi eq, %arg2, %c0_i32_8 : i32
    %10 = arith.extui %9 : i1 to i32
    %c0_i32_9 = arith.constant 0 : i32
    %11 = arith.cmpi ne, %10, %c0_i32_9 : i32
    scf.if %11 {
      %c0_10 = arith.constant 0 : index
      %c0_11 = arith.constant 0 : index
      %12 = vector.load %arg8[%c0_10, %c0_11] : memref<8x256xf32, #tpu.memory_space<vmem>>, vector<8x256xf32>
      %c0_12 = arith.constant 0 : index
      %c0_13 = arith.constant 0 : index
      %13 = vector.load %arg5[%c0_12, %c0_13] : memref<1x256xf32, #tpu.memory_space<vmem>>, vector<1x256xf32>
      %14 = vector.broadcast %13 : vector<1x256xf32> to vector<8x256xf32>
      %15 = arith.mulf %12, %14 : vector<8x256xf32>
      %c0_14 = arith.constant 0 : index
      %c0_15 = arith.constant 0 : index
      %16 = vector.load %arg6[%c0_14, %c0_15] : memref<1x256xf32, #tpu.memory_space<vmem>>, vector<1x256xf32>
      %17 = vector.broadcast %16 : vector<1x256xf32> to vector<8x256xf32>
      %18 = arith.addf %15, %17 : vector<8x256xf32>
      %c0_16 = arith.constant 0 : index
      %c0_17 = arith.constant 0 : index
      %19 = vector.load %arg7[%c0_16, %c0_17] : memref<8x256xf32, #tpu.memory_space<vmem>>, vector<8x256xf32>
      tpu.vector_store %arg7[%c0_16, %c0_17], %18 {strides = array<i32>} : memref<8x256xf32, #tpu.memory_space<vmem>>, vector<8x256xf32>,
    } else {
    }
    return
  }
  func.func @transform_0(%arg0: i32, %arg1: i32, %arg2: i32) -> (i32, i32) {
    %c0_i32 = arith.constant 0 : i32
    return %arg0, %arg2 : i32, i32
  }
  func.func @transform_1(%arg0: i32, %arg1: i32, %arg2: i32) -> (i32, i32) {
    %c0_i32 = arith.constant 0 : i32
    return %arg2, %arg1 : i32, i32
  }
  func.func @transform_2(%arg0: i32, %arg1: i32, %arg2: i32) -> (i32, i32) {
    %c0_i32 = arith.constant 0 : i32
    %c0_i32_0 = arith.constant 0 : i32
    return %c0_i32, %arg1 : i32, i32
  }
  func.func @transform_3(%arg0: i32, %arg1: i32, %arg2: i32) -> (i32, i32) {
    %c0_i32 = arith.constant 0 : i32
    %c0_i32_0 = arith.constant 0 : i32
    return %c0_i32, %arg1 : i32, i32
  }
  func.func @transform_4(%arg0: i32, %arg1: i32, %arg2: i32) -> (i32, i32) {
    %c0_i32 = arith.constant 0 : i32
    return %arg0, %arg1 : i32, i32
  }
}

module attributes {stable_mosaic.version = 11 : i64} {
  func.func @kernel(%arg0: i32, %arg1: i32, %arg2: i32, %arg3: memref<8x1152xbf16, #tpu.memory_space<vmem>>, %arg4: memref<1152x256xbf16, #tpu.memory_space<vmem>>, %arg5: memref<1x256xf32, #tpu.memory_space<vmem>>, %arg6: memref<1x256xf32, #tpu.memory_space<vmem>>, %arg7: memref<8x256xf32, #tpu.memory_space<vmem>>, %arg8: memref<8x256xf32, #tpu.memory_space<vmem>>, %arg9: memref<8x256xf32, #tpu.memory_space<vmem>>) attributes {dimension_semantics = [#tpu.dimension_semantics<parallel>, #tpu.dimension_semantics<parallel>, #tpu.dimension_semantics<arbitrary>], iteration_bounds = array<i64: 1, 1, 2>, scalar_prefetch = 0 : i64, scratch_operands = 1 : i64, tpu.core_type = #tpu.core_type<tc>, window_params = [{transform_indices = @transform_0, window_bounds = array<i64: 8, 1152>}, {transform_indices = @transform_1, window_bounds = array<i64: 1152, 256>}, {transform_indices = @transform_2, window_bounds = array<i64: 1, 256>}, {transform_indices = @transform_3, window_bounds = array<i64: 1, 256>}, {transform_indices = @transform_4, window_bounds = array<i64: 8, 256>}, {transform_indices = @transform_5, window_bounds = array<i64: 8, 256>}]} {
    %c0_i32 = arith.constant 0 : i32
    %0 = arith.cmpi eq, %arg2, %c0_i32 : i32
    %1 = arith.extui %0 : i1 to i32
    %c0_i32_0 = arith.constant 0 : i32
    %2 = arith.cmpi ne, %1, %c0_i32_0 : i32
    scf.if %2 {
      %cst_9 = arith.constant 0.000000e+00 : f32
      %12 = vector.broadcast %cst_9 : f32 to vector<8x256xf32>
      %c0_10 = arith.constant 0 : index
      %c0_11 = arith.constant 0 : index
      %13 = vector.load %arg9[%c0_10, %c0_11] : memref<8x256xf32, #tpu.memory_space<vmem>>, vector<8x256xf32>
      tpu.vector_store %arg9[%c0_10, %c0_11], %12 {strides = array<i32>} : memref<8x256xf32, #tpu.memory_space<vmem>>, vector<8x256xf32>,
    } else {
    }
    %c0 = arith.constant 0 : index
    %c0_1 = arith.constant 0 : index
    %3 = vector.load %arg9[%c0, %c0_1] : memref<8x256xf32, #tpu.memory_space<vmem>>, vector<8x256xf32>
    %c0_2 = arith.constant 0 : index
    %c0_3 = arith.constant 0 : index
    %4 = vector.load %arg3[%c0_2, %c0_3] : memref<8x1152xbf16, #tpu.memory_space<vmem>>, vector<8x1152xbf16>
    %c0_4 = arith.constant 0 : index
    %c0_5 = arith.constant 0 : index
    %5 = vector.load %arg4[%c0_4, %c0_5] : memref<1152x256xbf16, #tpu.memory_space<vmem>>, vector<1152x256xbf16>
    %cst = arith.constant dense<0.000000e+00> : vector<8x256xf32>
    %6 = tpu.matmul %4, %5, %cst {dimension_numbers = #tpu.dot_dimension_numbers<[1], [0], [0], [1], [0, 0, 1, 1], [], []>} : vector<8x1152xbf16>, vector<1152x256xbf16>, vector<8x256xf32> -> vector<8x256xf32>
    %7 = arith.addf %3, %6 : vector<8x256xf32>
    %c0_6 = arith.constant 0 : index
    %c0_7 = arith.constant 0 : index
    %8 = vector.load %arg9[%c0_6, %c0_7] : memref<8x256xf32, #tpu.memory_space<vmem>>, vector<8x256xf32>
    tpu.vector_store %arg9[%c0_6, %c0_7], %7 {strides = array<i32>} : memref<8x256xf32, #tpu.memory_space<vmem>>, vector<8x256xf32>,
    %c1_i32 = arith.constant 1 : i32
    %9 = arith.cmpi eq, %arg2, %c1_i32 : i32
    %10 = arith.extui %9 : i1 to i32
    %c0_i32_8 = arith.constant 0 : i32
    %11 = arith.cmpi ne, %10, %c0_i32_8 : i32
    scf.if %11 {
      %c0_9 = arith.constant 0 : index
      %c0_10 = arith.constant 0 : index
      %12 = vector.load %arg9[%c0_9, %c0_10] : memref<8x256xf32, #tpu.memory_space<vmem>>, vector<8x256xf32>
      %c0_11 = arith.constant 0 : index
      %c0_12 = arith.constant 0 : index
      %13 = vector.load %arg5[%c0_11, %c0_12] : memref<1x256xf32, #tpu.memory_space<vmem>>, vector<1x256xf32>
      %14 = vector.broadcast %13 : vector<1x256xf32> to vector<8x256xf32>
      %15 = arith.mulf %12, %14 : vector<8x256xf32>
      %c0_13 = arith.constant 0 : index
      %c0_14 = arith.constant 0 : index
      %16 = vector.load %arg6[%c0_13, %c0_14] : memref<1x256xf32, #tpu.memory_space<vmem>>, vector<1x256xf32>
      %17 = vector.broadcast %16 : vector<1x256xf32> to vector<8x256xf32>
      %18 = arith.addf %15, %17 : vector<8x256xf32>
      %c0_15 = arith.constant 0 : index
      %c0_16 = arith.constant 0 : index
      %19 = vector.load %arg7[%c0_15, %c0_16] : memref<8x256xf32, #tpu.memory_space<vmem>>, vector<8x256xf32>
      %20 = arith.addf %18, %19 : vector<8x256xf32>
      %c0_17 = arith.constant 0 : index
      %c0_18 = arith.constant 0 : index
      %21 = vector.load %arg8[%c0_17, %c0_18] : memref<8x256xf32, #tpu.memory_space<vmem>>, vector<8x256xf32>
      tpu.vector_store %arg8[%c0_17, %c0_18], %20 {strides = array<i32>} : memref<8x256xf32, #tpu.memory_space<vmem>>, vector<8x256xf32>,
    } else {
    }
    return
  }
  func.func @transform_0(%arg0: i32, %arg1: i32, %arg2: i32) -> (i32, i32) {
    %c0_i32 = arith.constant 0 : i32
    return %arg0, %arg2 : i32, i32
  }
  func.func @transform_1(%arg0: i32, %arg1: i32, %arg2: i32) -> (i32, i32) {
    %c0_i32 = arith.constant 0 : i32
    return %arg2, %arg1 : i32, i32
  }
  func.func @transform_2(%arg0: i32, %arg1: i32, %arg2: i32) -> (i32, i32) {
    %c0_i32 = arith.constant 0 : i32
    %c0_i32_0 = arith.constant 0 : i32
    return %c0_i32, %arg1 : i32, i32
  }
  func.func @transform_3(%arg0: i32, %arg1: i32, %arg2: i32) -> (i32, i32) {
    %c0_i32 = arith.constant 0 : i32
    %c0_i32_0 = arith.constant 0 : i32
    return %c0_i32, %arg1 : i32, i32
  }
  func.func @transform_4(%arg0: i32, %arg1: i32, %arg2: i32) -> (i32, i32) {
    %c0_i32 = arith.constant 0 : i32
    return %arg0, %arg1 : i32, i32
  }
  func.func @transform_5(%arg0: i32, %arg1: i32, %arg2: i32) -> (i32, i32) {
    %c0_i32 = arith.constant 0 : i32
    return %arg0, %arg1 : i32, i32
  }
}

module attributes {stable_mosaic.version = 11 : i64} {
  func.func @kernel(%arg0: i32, %arg1: i32, %arg2: i32, %arg3: memref<8x1152xbf16, #tpu.memory_space<vmem>>, %arg4: memref<1152x256xbf16, #tpu.memory_space<vmem>>, %arg5: memref<1x256xf32, #tpu.memory_space<vmem>>, %arg6: memref<1x256xf32, #tpu.memory_space<vmem>>, %arg7: memref<1x256xf32, #tpu.memory_space<vmem>>, %arg8: memref<8x256xf32, #tpu.memory_space<vmem>>, %arg9: memref<8x256xf32, #tpu.memory_space<vmem>>) attributes {dimension_semantics = [#tpu.dimension_semantics<parallel>, #tpu.dimension_semantics<parallel>, #tpu.dimension_semantics<arbitrary>], iteration_bounds = array<i64: 1, 1, 2>, scalar_prefetch = 0 : i64, scratch_operands = 1 : i64, tpu.core_type = #tpu.core_type<tc>, window_params = [{transform_indices = @transform_0, window_bounds = array<i64: 8, 1152>}, {transform_indices = @transform_1, window_bounds = array<i64: 1152, 256>}, {transform_indices = @transform_2, window_bounds = array<i64: 1, 256>}, {transform_indices = @transform_3, window_bounds = array<i64: 1, 256>}, {transform_indices = @transform_4, window_bounds = array<i64: 1, 256>}, {transform_indices = @transform_5, window_bounds = array<i64: 8, 256>}]} {
    %c0_i32 = arith.constant 0 : i32
    %0 = arith.cmpi eq, %arg2, %c0_i32 : i32
    %1 = arith.extui %0 : i1 to i32
    %c0_i32_0 = arith.constant 0 : i32
    %2 = arith.cmpi ne, %1, %c0_i32_0 : i32
    scf.if %2 {
      %cst_9 = arith.constant 0.000000e+00 : f32
      %12 = vector.broadcast %cst_9 : f32 to vector<8x256xf32>
      %c0_10 = arith.constant 0 : index
      %c0_11 = arith.constant 0 : index
      %13 = vector.load %arg9[%c0_10, %c0_11] : memref<8x256xf32, #tpu.memory_space<vmem>>, vector<8x256xf32>
      tpu.vector_store %arg9[%c0_10, %c0_11], %12 {strides = array<i32>} : memref<8x256xf32, #tpu.memory_space<vmem>>, vector<8x256xf32>,
    } else {
    }
    %c0 = arith.constant 0 : index
    %c0_1 = arith.constant 0 : index
    %3 = vector.load %arg9[%c0, %c0_1] : memref<8x256xf32, #tpu.memory_space<vmem>>, vector<8x256xf32>
    %c0_2 = arith.constant 0 : index
    %c0_3 = arith.constant 0 : index
    %4 = vector.load %arg3[%c0_2, %c0_3] : memref<8x1152xbf16, #tpu.memory_space<vmem>>, vector<8x1152xbf16>
    %c0_4 = arith.constant 0 : index
    %c0_5 = arith.constant 0 : index
    %5 = vector.load %arg4[%c0_4, %c0_5] : memref<1152x256xbf16, #tpu.memory_space<vmem>>, vector<1152x256xbf16>
    %cst = arith.constant dense<0.000000e+00> : vector<8x256xf32>
    %6 = tpu.matmul %4, %5, %cst {dimension_numbers = #tpu.dot_dimension_numbers<[1], [0], [0], [1], [0, 0, 1, 1], [], []>} : vector<8x1152xbf16>, vector<1152x256xbf16>, vector<8x256xf32> -> vector<8x256xf32>
    %7 = arith.addf %3, %6 : vector<8x256xf32>
    %c0_6 = arith.constant 0 : index
    %c0_7 = arith.constant 0 : index
    %8 = vector.load %arg9[%c0_6, %c0_7] : memref<8x256xf32, #tpu.memory_space<vmem>>, vector<8x256xf32>
    tpu.vector_store %arg9[%c0_6, %c0_7], %7 {strides = array<i32>} : memref<8x256xf32, #tpu.memory_space<vmem>>, vector<8x256xf32>,
    %c1_i32 = arith.constant 1 : i32
    %9 = arith.cmpi eq, %arg2, %c1_i32 : i32
    %10 = arith.extui %9 : i1 to i32
    %c0_i32_8 = arith.constant 0 : i32
    %11 = arith.cmpi ne, %10, %c0_i32_8 : i32
    scf.if %11 {
      %c0_9 = arith.constant 0 : index
      %c0_10 = arith.constant 0 : index
      %12 = vector.load %arg9[%c0_9, %c0_10] : memref<8x256xf32, #tpu.memory_space<vmem>>, vector<8x256xf32>
      %c0_11 = arith.constant 0 : index
      %c0_12 = arith.constant 0 : index
      %13 = vector.load %arg5[%c0_11, %c0_12] : memref<1x256xf32, #tpu.memory_space<vmem>>, vector<1x256xf32>
      %14 = vector.broadcast %13 : vector<1x256xf32> to vector<8x256xf32>
      %15 = arith.mulf %12, %14 : vector<8x256xf32>
      %c0_13 = arith.constant 0 : index
      %c0_14 = arith.constant 0 : index
      %16 = vector.load %arg6[%c0_13, %c0_14] : memref<1x256xf32, #tpu.memory_space<vmem>>, vector<1x256xf32>
      %17 = vector.broadcast %16 : vector<1x256xf32> to vector<8x256xf32>
      %18 = arith.addf %15, %17 : vector<8x256xf32>
      %c0_15 = arith.constant 0 : index
      %c0_16 = arith.constant 0 : index
      %19 = vector.load %arg7[%c0_15, %c0_16] : memref<1x256xf32, #tpu.memory_space<vmem>>, vector<1x256xf32>
      %cst_17 = arith.constant 0.000000e+00 : f32
      %20 = vector.broadcast %cst_17 : f32 to vector<8x256xf32>
      %21 = arith.cmpf oge, %18, %20 : vector<8x256xf32>
      %22 = vector.broadcast %19 : vector<1x256xf32> to vector<8x256xf32>
      %23 = arith.mulf %22, %18 : vector<8x256xf32>
      %24 = arith.select %21, %18, %23 : vector<8x256xi1>, vector<8x256xf32>
      %c0_18 = arith.constant 0 : index
      %c0_19 = arith.constant 0 : index
      %25 = vector.load %arg8[%c0_18, %c0_19] : memref<8x256xf32, #tpu.memory_space<vmem>>, vector<8x256xf32>
      tpu.vector_store %arg8[%c0_18, %c0_19], %24 {strides = array<i32>} : memref<8x256xf32, #tpu.memory_space<vmem>>, vector<8x256xf32>,
    } else {
    }
    return
  }
  func.func @transform_0(%arg0: i32, %arg1: i32, %arg2: i32) -> (i32, i32) {
    %c0_i32 = arith.constant 0 : i32
    return %arg0, %arg2 : i32, i32
  }
  func.func @transform_1(%arg0: i32, %arg1: i32, %arg2: i32) -> (i32, i32) {
    %c0_i32 = arith.constant 0 : i32
    return %arg2, %arg1 : i32, i32
  }
  func.func @transform_2(%arg0: i32, %arg1: i32, %arg2: i32) -> (i32, i32) {
    %c0_i32 = arith.constant 0 : i32
    %c0_i32_0 = arith.constant 0 : i32
    return %c0_i32, %arg1 : i32, i32
  }
  func.func @transform_3(%arg0: i32, %arg1: i32, %arg2: i32) -> (i32, i32) {
    %c0_i32 = arith.constant 0 : i32
    %c0_i32_0 = arith.constant 0 : i32
    return %c0_i32, %arg1 : i32, i32
  }
  func.func @transform_4(%arg0: i32, %arg1: i32, %arg2: i32) -> (i32, i32) {
    %c0_i32 = arith.constant 0 : i32
    %c0_i32_0 = arith.constant 0 : i32
    return %c0_i32, %arg1 : i32, i32
  }
  func.func @transform_5(%arg0: i32, %arg1: i32, %arg2: i32) -> (i32, i32) {
    %c0_i32 = arith.constant 0 : i32
    return %arg0, %arg1 : i32, i32
  }
}

</mosaic_0001>

<bundles_post_ra>
// kernel: iresnet_forward_pallas.16
= control target key start
LH: loop header
LB: loop body
LE: loop exit
PB: predicated region body
PF: predicated region fallthrough
CT: control target
= control target key end

     0   :  { %s1405_s18 = smov 0   ;;  %s1407_s19 = smov 0   ;;  %s1771_s0 = inlined_call_operand.vmem [shape: bf16[512,32], index: 0, kind: input, shape index: {}]   ;;  %s1772_s1 = inlined_call_operand.vmem [shape: bf16[32,64], index: 1, kind: input, shape index: {}]   ;;  %s1773_s2 = inlined_call_operand.vmem [shape: f32[1,64], index: 2, kind: input, shape index: {}]   ;;  %s1774_s3 = inlined_call_operand.vmem [shape: f32[1,64], index: 3, kind: input, shape index: {}]   ;;  %s1775_s4 = inlined_call_operand.vmem [shape: f32[1,64], index: 4, kind: input, shape index: {}]   ;;  %s1776_s5 = inlined_call_operand.vmem [shape: f32[512,64], index: 5, kind: output, shape index: {}]  }
   0x1   :  { %s1409_s20 = smov 0  }
   0x2 LB: > { %s34_s21 = sadd.s32 1, %s1368_s19  ;;  %p1205_p0 = scmp.ge.s32.totalorder %s1372_s20, 1  ;;  %s1372_s20 = sphi %s1409_s20, %s15_s20   ;;  %s1368_s19 = sphi %s1407_s19, %s1778_s19   ;;  %s1364_s18 = sphi %s1405_s18, %s1777_s18  }
   0x3   : > { %p36_p1 = scmp.ge.s32.totalorder %s34_s21, 2  ;;  %p254_p2 = scmp.lt.s32.totalorder %s1372_s20, 3 }
   0x5   : > { %s1780_s21 = smov (%p36_p1, %s34_s21), 0  ;;  %p255_p3 = pnand %p1205_p0, %p254_p2 }
   0x6   : > { %v1332_v0 = vld [vmem:[%s1772_s1] sm:$0xff] (!%p255_p3)   ;;  %s1206_s24 = sshll.u32 (!%p255_p3), %s1364_s18, 5  ;;  %v1333_v1 = vld [vmem:[%s1772_s1 + $0x8] sm:$0xff] (!%p255_p3)   ;;  %vm346_vm0 = vcmask (!%p255_p3), 523264   ;;  %v1374_v2 = vmov (!%p255_p3), 0.0   ;;  %vm539_vm1 = vcmask (!%p255_p3), 261120  }
   0x7   : > { %258 = sbr.rel (%p255_p3) target bundleno = 295 (0x127), region = 40  ;;  %p306_p4 = scmp.lt.s32.totalorder (!%p255_p3), %s1206_s24, 63  ;;  %1267 = vmatprep.subr.bf16.mxu0 (!%p255_p3), %v1332_v0  ;;  %1303 = vmatprep.subr.bf16.mxu1 (!%p255_p3), %v1332_v0  ;;  %349 = vst.msk [vmem:[#allocation2 + $0x10] sm:$0xff] (!%p255_p3), %vm346_vm0, %v1374_v2  ;;  %347 = vst.msk [vmem:[#allocation2] sm:$0xff] (!%p255_p3), %vm346_vm0, %v1374_v2  ;;  %v1512_v46 = vld [vmem:[%s1773_s2] ss:$0 sm:$0xff] (!%p255_p3) }
   0x8   : > { %1268 = vmatpush3.bf16.msra.mxu0 (!%p255_p3), %v1332_v0  ;;  %1305 = vmatpush3.bf16.msra.mxu1 (!%p255_p3), %v1332_v0  ;;  %348 = vst.msk [vmem:[#allocation2 + $0x8] sm:$0xff] (!%p255_p3), %vm346_vm0, %v1374_v2  ;;  %350 = vst.msk [vmem:[#allocation2 + $0x18] sm:$0xff] (!%p255_p3), %vm346_vm0, %v1374_v2  ;;  %v1517_v56 = vld [vmem:[%s1774_s3] ss:$0 sm:$0xff] (!%p255_p3) }
   0x9   : > { %351 = vst.msk [vmem:[#allocation2 + $0x20] sm:$0xff] (!%p255_p3), %vm346_vm0, %v1374_v2  ;;  %352 = vst.msk [vmem:[#allocation2 + $0x28] sm:$0xff] (!%p255_p3), %vm346_vm0, %v1374_v2  ;;  %1269 = vmatprep.subr.bf16.mxu0 (!%p255_p3), %v1333_v1  ;;  %1304 = vmatprep.subr.bf16.mxu1 (!%p255_p3), %v1333_v1 }
   0xa   : > { %353 = vst.msk [vmem:[#allocation2 + $0x30] sm:$0xff] (!%p255_p3), %vm346_vm0, %v1374_v2  ;;  %354 = vst.msk [vmem:[#allocation2 + $0x38] sm:$0xff] (!%p255_p3), %vm346_vm0, %v1374_v2 }
   0xb   : > { %355 = vst.msk [vmem:[#allocation2 + $0x40] sm:$0xff] (!%p255_p3), %vm346_vm0, %v1374_v2  ;;  %356 = vst.msk [vmem:[#allocation2 + $0x48] sm:$0xff] (!%p255_p3), %vm346_vm0, %v1374_v2 }
   0xc   : > { %357 = vst.msk [vmem:[#allocation2 + $0x50] sm:$0xff] (!%p255_p3), %vm346_vm0, %v1374_v2  ;;  %358 = vst.msk [vmem:[#allocation2 + $0x58] sm:$0xff] (!%p255_p3), %vm346_vm0, %v1374_v2  ;;  %1270 = vmatpush3.bf16.msra.mxu0 (!%p255_p3), %v1333_v1  ;;  %1306 = vmatpush3.bf16.msra.mxu1 (!%p255_p3), %v1333_v1 }
   0xd   : > { %359 = vst.msk [vmem:[#allocation2 + $0x60] sm:$0xff] (!%p255_p3), %vm346_vm0, %v1374_v2  ;;  %360 = vst.msk [vmem:[#allocation2 + $0x68] sm:$0xff] (!%p255_p3), %vm346_vm0, %v1374_v2 }
   0xe   : > { %s1782_s24 = smov (!%p306_p4, %s1206_s24), 63  ;;  %361 = vst.msk [vmem:[#allocation2 + $0x70] sm:$0xff] %vm346_vm0, %v1374_v2  ;;  %362 = vst.msk [vmem:[#allocation2 + $0x78] sm:$0xff] %vm346_vm0, %v1374_v2  ;;  %v381_v19 = vld [vmem:[#allocation2 + $0x10] sm:$0xff]  ;;  %v379_v21 = vld [vmem:[#allocation2] sm:$0xff] }
   0xf   : > { %363 = vst.msk [vmem:[#allocation2 + $0x80] sm:$0xff] %vm346_vm0, %v1374_v2  ;;  %364 = vst.msk [vmem:[#allocation2 + $0x88] sm:$0xff] %vm346_vm0, %v1374_v2  ;;  %s1207_s27 = sshll.u32 %s1782_s24, 2  ;;  %v382_v24 = vld [vmem:[#allocation2 + $0x18] sm:$0xff]  ;;  %v380_v29 = vld [vmem:[#allocation2 + $0x8] sm:$0xff]  ;;  %s1209_s10 = sshll.u32 %s1782_s24, 3 }
  0x10   : > { %365 = vst.msk [vmem:[#allocation2 + $0x90] sm:$0xff] %vm346_vm0, %v1374_v2  ;;  %366 = vst.msk [vmem:[#allocation2 + $0x98] sm:$0xff] %vm346_vm0, %v1374_v2  ;;  %s1467_s30 = scalar_lea.vmem %s1771_s0, %s1207_s27  ;;  %v383_v45 = vld [vmem:[#allocation2 + $0x20] sm:$0xff]  ;;  %v384_v54 = vld [vmem:[#allocation2 + $0x28] sm:$0xff]  ;;  %s1545_s15 = scalar_lea.vmem %s1776_s5, %s1209_s10 }
  0x11   : > { %367 = vst.msk [vmem:[#allocation2 + $0xa0] sm:$0xff] %vm346_vm0, %v1374_v2  ;;  %368 = vst.msk [vmem:[#allocation2 + $0xa8] sm:$0xff] %vm346_vm0, %v1374_v2  ;;  %v1334_v3 = vld [vmem:[%s1467_s30] sm:$0xff]   ;;  %v1336_v5 = vld [vmem:[%s1467_s30 + $0x8] sm:$0xff]  }
  0x12   : > { %369 = vst.msk [vmem:[#allocation2 + $0xb0] sm:$0xff] %vm346_vm0, %v1374_v2  ;;  %370 = vst.msk [vmem:[#allocation2 + $0xb8] sm:$0xff] %vm346_vm0, %v1374_v2  ;;  %v1335_v4 = vld [vmem:[%s1467_s30 + $0x40] sm:$0xff]   ;;  %1271 = vmatprep.mubr.msk.bf16.mxu0 %vm539_vm1, %v1334_v3  ;;  %v1337_v6 = vld [vmem:[%s1467_s30 + $0x48] sm:$0xff]  }
  0x13   : > { %371 = vst.msk [vmem:[#allocation2 + $0xc0] sm:$0xff] %vm346_vm0, %v1374_v2  ;;  %372 = vst.msk [vmem:[#allocation2 + $0xc8] sm:$0xff] %vm346_vm0, %v1374_v2  ;;  %1287 = vmatprep.mubr.msk.bf16.mxu1 %vm539_vm1, %v1335_v4  ;;  %1272 = vmatmul.mubr.msk.bf16.vlgmr.msra.gmra.mrb[0].mxu0 %vm539_vm1, %v1336_v5  ;;  %v1338_v7 = vld [vmem:[%s1467_s30 + $0x10] sm:$0xff]   ;;  %v1340_v9 = vld [vmem:[%s1467_s30 + $0x18] sm:$0xff]  }
  0x14   : > { %373 = vst.msk [vmem:[#allocation2 + $0xd0] sm:$0xff] %vm346_vm0, %v1374_v2  ;;  %374 = vst.msk [vmem:[#allocation2 + $0xd8] sm:$0xff] %vm346_vm0, %v1374_v2  ;;  %1288 = vmatmul.mubr.msk.bf16.vlgmr.msra.gmra.mrb[0].mxu1 %vm539_vm1, %v1337_v6  ;;  %v1339_v8 = vld [vmem:[%s1467_s30 + $0x50] sm:$0xff]   ;;  %1275 = vmatprep.mubr.msk.bf16.mxu0 %vm539_vm1, %v1338_v7  ;;  %v1341_v10 = vld [vmem:[%s1467_s30 + $0x58] sm:$0xff]  }
  0x15   : > { %375 = vst.msk [vmem:[#allocation2 + $0xe0] sm:$0xff] %vm346_vm0, %v1374_v2  ;;  %376 = vst.msk [vmem:[#allocation2 + $0xe8] sm:$0xff] %vm346_vm0, %v1374_v2  ;;  %1291 = vmatprep.mubr.msk.bf16.mxu1 %vm539_vm1, %v1339_v8  ;;  %v1342_v11 = vld [vmem:[%s1467_s30 + $0x20] sm:$0xff]   ;;  %v1344_v13 = vld [vmem:[%s1467_s30 + $0x28] sm:$0xff]  }
  0x16   : > { %377 = vst.msk [vmem:[#allocation2 + $0xf0] sm:$0xff] %vm346_vm0, %v1374_v2  ;;  %378 = vst.msk [vmem:[#allocation2 + $0xf8] sm:$0xff] %vm346_vm0, %v1374_v2  ;;  %v1343_v12 = vld [vmem:[%s1467_s30 + $0x60] sm:$0xff]   ;;  %v1345_v14 = vld [vmem:[%s1467_s30 + $0x68] sm:$0xff]  }
  0x17   : > { %v1346_v15 = vld [vmem:[%s1467_s30 + $0x30] sm:$0xff]   ;;  %v1348_v17 = vld [vmem:[%s1467_s30 + $0x38] sm:$0xff]   ;;  %v395_v23 = vld [vmem:[#allocation2 + $0x80] sm:$0xff] }
  0x18   : > { %v1347_v16 = vld [vmem:[%s1467_s30 + $0x70] sm:$0xff]   ;;  %v1349_v18 = vld [vmem:[%s1467_s30 + $0x78] sm:$0xff]   ;;  %v396_v34 = vld [vmem:[#allocation2 + $0x88] sm:$0xff] }
  0x19   : > { %v397_v20 = vld [vmem:[#allocation2 + $0x90] sm:$0xff]  ;;  %v398_v28 = vld [vmem:[#allocation2 + $0x98] sm:$0xff]  ;;  %v399_v48 = vld [vmem:[#allocation2 + $0xa0] sm:$0xff] }
  0x1a   : > { %v385_v43 = vld [vmem:[#allocation2 + $0x30] sm:$0xff]  ;;  %v386_v49 = vld [vmem:[#allocation2 + $0x38] sm:$0xff]  ;;  %v400_v61 = vld [vmem:[#allocation2 + $0xa8] sm:$0xff] }
  0x1b   : > { %1276 = vmatmul.mubr.msk.bf16.gmra.mrb[4].mxu0 %vm539_vm1, %v1340_v9  ;;  %v401_v44 = vld [vmem:[#allocation2 + $0xb0] sm:$0xff]  ;;  %v402_v53 = vld [vmem:[#allocation2 + $0xb8] sm:$0xff]  ;;  %v1525_v5 = vld [vmem:[%s1775_s4] ss:$0 sm:$0xff] }
  0x1c   : > { %1292 = vmatmul.mubr.msk.bf16.gmra.mrb[4].mxu1 %vm539_vm1, %v1341_v10  ;;  %1279 = vmatprep.mubr.msk.bf16.mxu0 %vm539_vm1, %v1342_v11 }
  0x1d   : > { %1295 = vmatprep.mubr.msk.bf16.mxu1 %vm539_vm1, %v1343_v12 }
  0x23   : > { %1280 = vmatmul.mubr.msk.bf16.gmra.mrb[8].mxu0 %vm539_vm1, %v1344_v13 }
  0x24   : > { %1296 = vmatmul.mubr.msk.bf16.gmra.mrb[8].mxu1 %vm539_vm1, %v1345_v14  ;;  %1283 = vmatprep.mubr.msk.bf16.mxu0 %vm539_vm1, %v1346_v15 }
  0x25   : > { %1299 = vmatprep.mubr.msk.bf16.mxu1 %vm539_vm1, %v1347_v16 }
  0x2b   : > { %1284 = vmatmul.mubr.msk.bf16.gmra.mrb[12].mxu0 %vm539_vm1, %v1348_v17 }
  0x2c   : > { %1300 = vmatmul.mubr.msk.bf16.gmra.mrb[12].mxu1 %vm539_vm1, %v1349_v18 }
  0xe6   : > { %v1273_v22 = vpop.f32.mrb[0].mxu0 }
  0xe7   : > { %v751_v25 = vadd.f32 %v1273_v22, %v381_v19  ;;  %v1289_v26 = vpop.f32.mrb[0].mxu1  ;;  %v622_v27 = vpop.f32.mrb[1].mxu0 }
  0xe8   : > { %v767_v30 = vadd.f32 %v1289_v26, %v397_v20  ;;  %v749_v31 = vadd.f32 %v622_v27, %v379_v21  ;;  %v686_v32 = vpop.f32.mrb[1].mxu1  ;;  %v1274_v33 = vpop.f32.mrb[2].mxu0 }
  0xe9   : > { %784 = vst.msk [vmem:[#allocation2 + $0x10] sm:$0xff] %vm346_vm0, %v751_v25  ;;  %v765_v35 = vadd.f32 %v686_v32, %v395_v23  ;;  %v752_v36 = vadd.f32 %v1274_v33, %v382_v24  ;;  %v1290_v37 = vpop.f32.mrb[2].mxu1  ;;  %v625_v38 = vpop.f32.mrb[3].mxu0 }
  0xea   : > { %800 = vst.msk [vmem:[#allocation2 + $0x90] sm:$0xff] %vm346_vm0, %v767_v30  ;;  %782 = vst.msk [vmem:[#allocation2] sm:$0xff] %vm346_vm0, %v749_v31  ;;  %v768_v39 = vadd.f32 %v1290_v37, %v398_v28  ;;  %v750_v40 = vadd.f32 %v625_v38, %v380_v29  ;;  %v689_v41 = vpop.f32.mrb[3].mxu1 }
  0xeb   : > { %798 = vst.msk [vmem:[#allocation2 + $0x80] sm:$0xff] %vm346_vm0, %v765_v35  ;;  %785 = vst.msk [vmem:[#allocation2 + $0x18] sm:$0xff] %vm346_vm0, %v752_v36  ;;  %v766_v42 = vadd.f32 %v689_v41, %v396_v34 }
  0xec   : > { %801 = vst.msk [vmem:[#allocation2 + $0x98] sm:$0xff] %vm346_vm0, %v768_v39  ;;  %783 = vst.msk [vmem:[#allocation2 + $0x8] sm:$0xff] %vm346_vm0, %v750_v40 }
  0xed   : > { %799 = vst.msk [vmem:[#allocation2 + $0x88] sm:$0xff] %vm346_vm0, %v766_v42 }
  0xee   : > { %v1277_v47 = vpop.f32.mrb[4].mxu0 }
  0xef   : > { %v755_v50 = vadd.f32 %v1277_v47, %v385_v43  ;;  %v1293_v51 = vpop.f32.mrb[4].mxu1  ;;  %v638_v52 = vpop.f32.mrb[5].mxu0 }
  0xf0   : > { %v819_v55 = vld [vmem:[#allocation2 + $0x10] sm:$0xff]  ;;  %v771_v57 = vadd.f32 %v1293_v51, %v401_v44  ;;  %v753_v58 = vadd.f32 %v638_v52, %v383_v45  ;;  %v702_v59 = vpop.f32.mrb[5].mxu1  ;;  %v1278_v60 = vpop.f32.mrb[6].mxu0 }
  0xf1   : > { %v858_v62 = vmul.f32 %v1512_v46, %v819_v55  ;;  %v835_v63 = vld [vmem:[#allocation2 + $0x90] sm:$0xff]  ;;  %v817_v0 = vld [vmem:[#allocation2] sm:$0xff]  ;;  %788 = vst.msk [vmem:[#allocation2 + $0x30] sm:$0xff] %vm346_vm0, %v755_v50  ;;  %v769_v1 = vadd.f32 %v702_v59, %v399_v48  ;;  %v756_v2 = vadd.f32 %v1278_v60, %v386_v49  ;;  %v1294_v3 = vpop.f32.mrb[6].mxu1  ;;  %v641_v4 = vpop.f32.mrb[7].mxu0 }
  0xf2   : > { %v874_v6 = vmul.f32 %v1512_v46, %v835_v63  ;;  %v856_v7 = vmul.f32 %v1512_v46, %v817_v0  ;;  %v833_v8 = vld [vmem:[#allocation2 + $0x80] sm:$0xff]  ;;  %v820_v9 = vld [vmem:[#allocation2 + $0x18] sm:$0xff]  ;;  %804 = vst.msk [vmem:[#allocation2 + $0xb0] sm:$0xff] %vm346_vm0, %v771_v57  ;;  %786 = vst.msk [vmem:[#allocation2 + $0x20] sm:$0xff] %vm346_vm0, %v753_v58  ;;  %v772_v10 = vadd.f32 %v1294_v3, %v402_v53  ;;  %v705_v12 = vpop.f32.mrb[7].mxu1 }
  0xf3   : > { %v754_v11 = vadd.f32 %v641_v4, %v384_v54  ;;  %v897_v13 = vadd.f32 %v1517_v56, %v858_v62  ;;  %v872_v14 = vmul.f32 %v1512_v46, %v833_v8  ;;  %v859_v15 = vmul.f32 %v1512_v46, %v820_v9  ;;  %v836_v16 = vld [vmem:[#allocation2 + $0x98] sm:$0xff]  ;;  %v818_v17 = vld [vmem:[#allocation2 + $0x8] sm:$0xff]  ;;  %802 = vst.msk [vmem:[#allocation2 + $0xa0] sm:$0xff] %vm346_vm0, %v769_v1 }
  0xf4   : > { %789 = vst.msk [vmem:[#allocation2 + $0x38] sm:$0xff] %vm346_vm0, %v756_v2  ;;  %v770_v18 = vadd.f32 %v705_v12, %v400_v61  ;;  %v913_v19 = vadd.f32 %v1517_v56, %v874_v6  ;;  %v895_v20 = vadd.f32 %v1517_v56, %v856_v7  ;;  %v875_v21 = vmul.f32 %v1512_v46, %v836_v16  ;;  %v834_v28 = vld [vmem:[#allocation2 + $0x88] sm:$0xff] }
  0xf5   : > { %v857_v22 = vmul.f32 %v1512_v46, %v818_v17  ;;  %805 = vst.msk [vmem:[#allocation2 + $0xb8] sm:$0xff] %vm346_vm0, %v772_v10  ;;  %787 = vst.msk [vmem:[#allocation2 + $0x28] sm:$0xff] %vm346_vm0, %v754_v11  ;;  %vm930_vm2 = vcmp.ge.f32.partialorder %v897_v13, 0.0  ;;  %v968_v23 = vmul.f32 %v1525_v5, %v897_v13  ;;  %v911_v24 = vadd.f32 %v1517_v56, %v872_v14  ;;  %v389_v14 = vld [vmem:[#allocation2 + $0x50] sm:$0xff] }
  0xf6   : > { %v898_v25 = vadd.f32 %v1517_v56, %v859_v15  ;;  %803 = vst.msk [vmem:[#allocation2 + $0xa8] sm:$0xff] %vm346_vm0, %v770_v18  ;;  %vm946_vm3 = vcmp.ge.f32.partialorder %v913_v19, 0.0  ;;  %v984_v26 = vmul.f32 %v1525_v5, %v913_v19  ;;  %vm928_vm4 = vcmp.ge.f32.partialorder %v895_v20, 0.0  ;;  %v1553_v29 = vpop.f32.mrb[8].mxu0 }
  0xf7   : > { %v966_v27 = vmul.f32 %v1525_v5, %v895_v20  ;;  %v1000_v30 = vsel %vm930_vm2, %v897_v13, %v968_v23  ;;  %vm944_vm5 = vcmp.ge.f32.partialorder %v911_v24, 0.0  ;;  %v982_v31 = vmul.f32 %v1525_v5, %v911_v24  ;;  %v1556_v32 = vpop.f32.mrb[8].mxu1  ;;  %v1558_v33 = vpop.f32.mrb[9].mxu0 }
  0xf8   : > { %vm931_vm6 = vcmp.ge.f32.partialorder %v898_v25, 0.0  ;;  %1032 = vst.msk [vmem:[%s1545_s15 + $0x10] sm:$0xff] %vm346_vm0, %v1000_v30  ;;  %v1016_v34 = vsel %vm946_vm3, %v913_v19, %v984_v26  ;;  %v969_v36 = vmul.f32 %v1525_v5, %v898_v25  ;;  %v914_v37 = vadd.f32 %v1517_v56, %v875_v21  ;;  %v823_v38 = vld [vmem:[#allocation2 + $0x30] sm:$0xff]  ;;  %v1564_v39 = vpop.f32.mrb[9].mxu1  ;;  %v1566_v40 = vpop.f32.mrb[10].mxu0 }
  0xf9   : > { %v998_v35 = vsel %vm928_vm4, %v895_v20, %v966_v27  ;;  %1048 = vst.msk [vmem:[%s1545_s15 + $0x90] sm:$0xff] %vm346_vm0, %v1016_v34  ;;  %v1014_v41 = vsel %vm944_vm5, %v911_v24, %v982_v31  ;;  %v896_v42 = vadd.f32 %v1517_v56, %v857_v22  ;;  %v873_v43 = vmul.f32 %v1512_v46, %v834_v28  ;;  %v839_v45 = vld [vmem:[#allocation2 + $0xb0] sm:$0xff]  ;;  %v821_v47 = vld [vmem:[#allocation2 + $0x20] sm:$0xff]  ;;  %v1575_v48 = vpop.f32.mrb[10].mxu1  ;;  %v1577_v49 = vpop.f32.mrb[11].mxu0 }
  0xfa   : > { %1030 = vst.msk [vmem:[%s1545_s15] sm:$0xff] %vm346_vm0, %v998_v35  ;;  %v862_v44 = vmul.f32 %v1512_v46, %v823_v38  ;;  %1046 = vst.msk [vmem:[%s1545_s15 + $0x80] sm:$0xff] %vm346_vm0, %v1014_v41  ;;  %v1001_v50 = vsel %vm931_vm6, %v898_v25, %v969_v36  ;;  %vm947_vm7 = vcmp.ge.f32.partialorder %v914_v37, 0.0  ;;  %v985_v51 = vmul.f32 %v1525_v5, %v914_v37  ;;  %v837_v53 = vld [vmem:[#allocation2 + $0xa0] sm:$0xff]  ;;  %v1584_v54 = vpop.f32.mrb[11].mxu1  ;;  %v405_v25 = vld [vmem:[#allocation2 + $0xd0] sm:$0xff] }
  0xfb   : > { %v878_v52 = vmul.f32 %v1512_v46, %v839_v45  ;;  %1033 = vst.msk [vmem:[%s1545_s15 + $0x18] sm:$0xff] %vm346_vm0, %v1001_v50  ;;  %vm929_vm8 = vcmp.ge.f32.partialorder %v896_v42, 0.0  ;;  %v967_v55 = vmul.f32 %v1525_v5, %v896_v42  ;;  %v912_v57 = vadd.f32 %v1517_v56, %v873_v43  ;;  %v824_v63 = vld [vmem:[#allocation2 + $0x38] sm:$0xff]  ;;  %v387_v35 = vld [vmem:[#allocation2 + $0x40] sm:$0xff]  ;;  %v388_v50 = vld [vmem:[#allocation2 + $0x48] sm:$0xff] }
  0xfc   : > { %v901_v58 = vadd.f32 %v1517_v56, %v862_v44  ;;  %v1017_v59 = vsel %vm947_vm7, %v914_v37, %v985_v51  ;;  %v860_v61 = vmul.f32 %v1512_v46, %v821_v47  ;;  %v876_v62 = vmul.f32 %v1512_v46, %v837_v53  ;;  %v840_v0 = vld [vmem:[#allocation2 + $0xb8] sm:$0xff]  ;;  %v822_v12 = vld [vmem:[#allocation2 + $0x28] sm:$0xff]  ;;  %v403_v36 = vld [vmem:[#allocation2 + $0xc0] sm:$0xff] }
  0xfd   : > { %v917_v60 = vadd.f32 %v1517_v56, %v878_v52  ;;  %1049 = vst.msk [vmem:[%s1545_s15 + $0x98] sm:$0xff] %vm346_vm0, %v1017_v59  ;;  %v999_v1 = vsel %vm929_vm8, %v896_v42, %v967_v55  ;;  %vm945_vm9 = vcmp.ge.f32.partialorder %v912_v57, 0.0  ;;  %v983_v2 = vmul.f32 %v1525_v5, %v912_v57  ;;  %v838_v13 = vld [vmem:[#allocation2 + $0xa8] sm:$0xff]  ;;  %v390_v37 = vld [vmem:[#allocation2 + $0x58] sm:$0xff]  ;;  %v409_v59 = vld [vmem:[#allocation2 + $0xf0] sm:$0xff] }
  0xfe   : > { %vm934_vm10 = vcmp.ge.f32.partialorder %v901_v58, 0.0  ;;  %1031 = vst.msk [vmem:[%s1545_s15 + $0x8] sm:$0xff] %vm346_vm0, %v999_v1  ;;  %v972_v3 = vmul.f32 %v1525_v5, %v901_v58  ;;  %v899_v6 = vadd.f32 %v1517_v56, %v860_v61  ;;  %v1602_v7 = vpop.f32.mrb[12].mxu0  ;;  %v915_v9 = vadd.f32 %v1517_v56, %v876_v62  ;;  %v406_v47 = vld [vmem:[#allocation2 + $0xd8] sm:$0xff]  ;;  %v404_v51 = vld [vmem:[#allocation2 + $0xc8] sm:$0xff]  ;;  %v407_v62 = vld [vmem:[#allocation2 + $0xe0] sm:$0xff] }
  0xff   : > { %vm950_vm11 = vcmp.ge.f32.partialorder %v917_v60, 0.0  ;;  %v988_v4 = vmul.f32 %v1525_v5, %v917_v60  ;;  %v1015_v8 = vsel %vm945_vm9, %v912_v57, %v983_v2  ;;  %v863_v10 = vmul.f32 %v1512_v46, %v824_v63  ;;  %v1607_v15 = vpop.f32.mrb[12].mxu1  ;;  %v1609_v16 = vpop.f32.mrb[13].mxu0  ;;  %v394_v63 = vld [vmem:[#allocation2 + $0x78] sm:$0xff]  ;;  %v392_v2 = vld [vmem:[#allocation2 + $0x68] sm:$0xff] }
 0x100   : > { %v879_v11 = vmul.f32 %v1512_v46, %v840_v0  ;;  %1047 = vst.msk [vmem:[%s1545_s15 + $0x88] sm:$0xff] %vm346_vm0, %v1015_v8  ;;  %v1004_v17 = vsel %vm934_vm10, %v901_v58, %v972_v3  ;;  %vm932_vm12 = vcmp.ge.f32.partialorder %v899_v6, 0.0  ;;  %v970_v19 = vmul.f32 %v1525_v5, %v899_v6  ;;  %v1615_v20 = vpop.f32.mrb[13].mxu1  ;;  %v1617_v21 = vpop.f32.mrb[14].mxu0  ;;  %v393_v58 = vld [vmem:[#allocation2 + $0x70] sm:$0xff]  ;;  %v408_v3 = vld [vmem:[#allocation2 + $0xe8] sm:$0xff] }
 0x101   : > { %v1020_v18 = vsel %vm950_vm11, %v917_v60, %v988_v4  ;;  %1036 = vst.msk [vmem:[%s1545_s15 + $0x30] sm:$0xff] %vm346_vm0, %v1004_v17  ;;  %vm948_vm13 = vcmp.ge.f32.partialorder %v915_v9, 0.0  ;;  %v986_v22 = vmul.f32 %v1525_v5, %v915_v9  ;;  %v902_v23 = vadd.f32 %v1517_v56, %v863_v10  ;;  %v1302_v26 = vpop.f32.mrb[14].mxu1  ;;  %v1626_v27 = vpop.f32.mrb[15].mxu0  ;;  %v391_v60 = vld [vmem:[#allocation2 + $0x60] sm:$0xff] }
 0x102   : > { %1052 = vst.msk [vmem:[%s1545_s15 + $0xb0] sm:$0xff] %vm346_vm0, %v1020_v18  ;;  %v918_v24 = vadd.f32 %v1517_v56, %v879_v11  ;;  %v1002_v28 = vsel %vm932_vm12, %v899_v6, %v970_v19  ;;  %v861_v30 = vmul.f32 %v1512_v46, %v822_v12  ;;  %v877_v31 = vmul.f32 %v1512_v46, %v838_v13  ;;  %v737_v38 = vpop.f32.mrb[15].mxu1 }
 0x103   : > { %v759_v34 = vadd.f32 %v1553_v29, %v389_v14  ;;  %1034 = vst.msk [vmem:[%s1545_s15 + $0x20] sm:$0xff] %vm346_vm0, %v1002_v28  ;;  %v1018_v41 = vsel %vm948_vm13, %v915_v9, %v986_v22  ;;  %vm935_vm14 = vcmp.ge.f32.partialorder %v902_v23, 0.0  ;;  %v973_v42 = vmul.f32 %v1525_v5, %v902_v23 }
 0x104   : > { %vm951_vm15 = vcmp.ge.f32.partialorder %v918_v24, 0.0  ;;  %1050 = vst.msk [vmem:[%s1545_s15 + $0xa0] sm:$0xff] %vm346_vm0, %v1018_v41  ;;  %v989_v43 = vmul.f32 %v1525_v5, %v918_v24  ;;  %v900_v44 = vadd.f32 %v1517_v56, %v861_v30  ;;  %v916_v29 = vadd.f32 %v1517_v56, %v877_v31 }
 0x105   : > { %792 = vst.msk [vmem:[#allocation2 + $0x50] sm:$0xff] %vm346_vm0, %v759_v34  ;;  %v775_v45 = vadd.f32 %v1556_v32, %v405_v25  ;;  %v1005_v52 = vsel %vm935_vm14, %v902_v23, %v973_v42  ;;  %v757_v53 = vadd.f32 %v1558_v33, %v387_v35  ;;  %v773_v55 = vadd.f32 %v1564_v39, %v403_v36  ;;  %v410_v33 = vld [vmem:[#allocation2 + $0xf8] sm:$0xff] }
 0x106   : > { %v760_v57 = vadd.f32 %v1566_v40, %v390_v37  ;;  %1037 = vst.msk [vmem:[%s1545_s15 + $0x38] sm:$0xff] %vm346_vm0, %v1005_v52  ;;  %v1021_v61 = vsel %vm951_vm15, %v918_v24, %v989_v43  ;;  %vm933_vm1 = vcmp.ge.f32.partialorder %v900_v44, 0.0  ;;  %v971_v32 = vmul.f32 %v1525_v5, %v900_v44 }
 0x107   : > { %vm949_vm2 = vcmp.ge.f32.partialorder %v916_v29, 0.0  ;;  %808 = vst.msk [vmem:[#allocation2 + $0xd0] sm:$0xff] %vm346_vm0, %v775_v45  ;;  %1053 = vst.msk [vmem:[%s1545_s15 + $0xb8] sm:$0xff] %vm346_vm0, %v1021_v61  ;;  %v987_v39 = vmul.f32 %v1525_v5, %v916_v29  ;;  %v776_v40 = vadd.f32 %v1575_v48, %v406_v47  ;;  %v758_v0 = vadd.f32 %v1577_v49, %v388_v50 }
 0x108   : > { %790 = vst.msk [vmem:[#allocation2 + $0x40] sm:$0xff] %vm346_vm0, %v757_v53  ;;  %806 = vst.msk [vmem:[#allocation2 + $0xc0] sm:$0xff] %vm346_vm0, %v773_v55  ;;  %v774_v1 = vadd.f32 %v1584_v54, %v404_v51  ;;  %v1003_v4 = vsel %vm933_vm1, %v900_v44, %v971_v32  ;;  %v763_v6 = vadd.f32 %v1602_v7, %v393_v58 }
 0x109   : > { %793 = vst.msk [vmem:[#allocation2 + $0x58] sm:$0xff] %vm346_vm0, %v760_v57  ;;  %v779_v8 = vadd.f32 %v1607_v15, %v409_v59  ;;  %v761_v9 = vadd.f32 %v1609_v16, %v391_v60  ;;  %1035 = vst.msk [vmem:[%s1545_s15 + $0x28] sm:$0xff] %vm346_vm0, %v1003_v4  ;;  %v1019_v10 = vsel %vm949_vm2, %v916_v29, %v987_v39 }
 0x10a   : > { %809 = vst.msk [vmem:[#allocation2 + $0xd8] sm:$0xff] %vm346_vm0, %v776_v40  ;;  %791 = vst.msk [vmem:[#allocation2 + $0x48] sm:$0xff] %vm346_vm0, %v758_v0  ;;  %v777_v48 = vadd.f32 %v1615_v20, %v407_v62  ;;  %v764_v49 = vadd.f32 %v1617_v21, %v394_v63  ;;  %v780_v54 = vadd.f32 %v1302_v26, %v410_v33 }
 0x10b   : > { %807 = vst.msk [vmem:[#allocation2 + $0xc8] sm:$0xff] %vm346_vm0, %v774_v1  ;;  %1051 = vst.msk [vmem:[%s1545_s15 + $0xa8] sm:$0xff] %vm346_vm0, %v1019_v10  ;;  %v762_v7 = vadd.f32 %v1626_v27, %v392_v2  ;;  %v778_v11 = vadd.f32 %v737_v38, %v408_v3 }
 0x10c   : > { %796 = vst.msk [vmem:[#allocation2 + $0x70] sm:$0xff] %vm346_vm0, %v763_v6  ;;  %812 = vst.msk [vmem:[#allocation2 + $0xf0] sm:$0xff] %vm346_vm0, %v779_v8  ;;  %v827_v12 = vld [vmem:[#allocation2 + $0x50] sm:$0xff] }
 0x10d   : > { %794 = vst.msk [vmem:[#allocation2 + $0x60] sm:$0xff] %vm346_vm0, %v761_v9  ;;  %810 = vst.msk [vmem:[#allocation2 + $0xe0] sm:$0xff] %vm346_vm0, %v777_v48  ;;  %v866_v13 = vmul.f32 %v1512_v46, %v827_v12 }
 0x10e   : > { %797 = vst.msk [vmem:[#allocation2 + $0x78] sm:$0xff] %vm346_vm0, %v764_v49  ;;  %813 = vst.msk [vmem:[#allocation2 + $0xf8] sm:$0xff] %vm346_vm0, %v780_v54  ;;  %v843_v14 = vld [vmem:[#allocation2 + $0xd0] sm:$0xff] }
 0x10f   : > { %795 = vst.msk [vmem:[#allocation2 + $0x68] sm:$0xff] %vm346_vm0, %v762_v7  ;;  %811 = vst.msk [vmem:[#allocation2 + $0xe8] sm:$0xff] %vm346_vm0, %v778_v11  ;;  %v905_v15 = vadd.f32 %v1517_v56, %v866_v13  ;;  %v882_v16 = vmul.f32 %v1512_v46, %v843_v14  ;;  %v825_v17 = vld [vmem:[#allocation2 + $0x40] sm:$0xff] }
 0x110   : > { %v841_v18 = vld [vmem:[#allocation2 + $0xc0] sm:$0xff]  ;;  %v828_v19 = vld [vmem:[#allocation2 + $0x58] sm:$0xff]  ;;  %v864_v20 = vmul.f32 %v1512_v46, %v825_v17 }
 0x111   : > { %v880_v21 = vmul.f32 %v1512_v46, %v841_v18  ;;  %v867_v22 = vmul.f32 %v1512_v46, %v828_v19  ;;  %vm938_vm3 = vcmp.ge.f32.partialorder %v905_v15, 0.0  ;;  %v976_v23 = vmul.f32 %v1525_v5, %v905_v15  ;;  %v844_v25 = vld [vmem:[#allocation2 + $0xd8] sm:$0xff]  ;;  %v826_v26 = vld [vmem:[#allocation2 + $0x48] sm:$0xff] }
 0x112   : > { %v921_v24 = vadd.f32 %v1517_v56, %v882_v16  ;;  %v903_v27 = vadd.f32 %v1517_v56, %v864_v20  ;;  %v883_v31 = vmul.f32 %v1512_v46, %v844_v25  ;;  %v865_v36 = vmul.f32 %v1512_v46, %v826_v26  ;;  %v842_v37 = vld [vmem:[#allocation2 + $0xc8] sm:$0xff] }
 0x113   : > { %v919_v28 = vadd.f32 %v1517_v56, %v880_v21  ;;  %v906_v30 = vadd.f32 %v1517_v56, %v867_v22  ;;  %v1008_v34 = vsel %vm938_vm3, %v905_v15, %v976_v23  ;;  %v831_v42 = vld [vmem:[#allocation2 + $0x70] sm:$0xff]  ;;  %v881_v52 = vmul.f32 %v1512_v46, %v842_v37 }
 0x114   : > { %vm954_vm4 = vcmp.ge.f32.partialorder %v921_v24, 0.0  ;;  %v992_v35 = vmul.f32 %v1525_v5, %v921_v24  ;;  %1040 = vst.msk [vmem:[%s1545_s15 + $0x50] sm:$0xff] %vm346_vm0, %v1008_v34  ;;  %vm936_vm5 = vcmp.ge.f32.partialorder %v903_v27, 0.0  ;;  %v974_v38 = vmul.f32 %v1525_v5, %v903_v27  ;;  %v847_v45 = vld [vmem:[#allocation2 + $0xf0] sm:$0xff]  ;;  %v829_v53 = vld [vmem:[#allocation2 + $0x60] sm:$0xff] }
 0x115   : > { %vm952_vm6 = vcmp.ge.f32.partialorder %v919_v28, 0.0  ;;  %v990_v41 = vmul.f32 %v1525_v5, %v919_v28  ;;  %vm939_vm7 = vcmp.ge.f32.partialorder %v906_v30, 0.0  ;;  %v977_v44 = vmul.f32 %v1525_v5, %v906_v30  ;;  %v845_v55 = vld [vmem:[#allocation2 + $0xe0] sm:$0xff]  ;;  %v832_v40 = vld [vmem:[#allocation2 + $0x78] sm:$0xff] }
 0x116   : > { %v1024_v43 = vsel %vm954_vm4, %v921_v24, %v992_v35  ;;  %v922_v29 = vadd.f32 %v1517_v56, %v883_v31  ;;  %v1006_v47 = vsel %vm936_vm5, %v903_v27, %v974_v38  ;;  %v904_v51 = vadd.f32 %v1517_v56, %v865_v36  ;;  %v848_v8 = vld [vmem:[#allocation2 + $0xf8] sm:$0xff]  ;;  %v830_v49 = vld [vmem:[#allocation2 + $0x68] sm:$0xff] }
 0x117   : > { %1056 = vst.msk [vmem:[%s1545_s15 + $0xd0] sm:$0xff] %vm346_vm0, %v1024_v43  ;;  %v1022_v50 = vsel %vm952_vm6, %v919_v28, %v990_v41  ;;  %1038 = vst.msk [vmem:[%s1545_s15 + $0x40] sm:$0xff] %vm346_vm0, %v1006_v47  ;;  %v1009_v57 = vsel %vm939_vm7, %v906_v30, %v977_v44  ;;  %v870_v59 = vmul.f32 %v1512_v46, %v831_v42  ;;  %v846_v54 = vld [vmem:[#allocation2 + $0xe8] sm:$0xff] }
 0x118   : > { %1054 = vst.msk [vmem:[%s1545_s15 + $0xc0] sm:$0xff] %vm346_vm0, %v1022_v50  ;;  %vm955_vm8 = vcmp.ge.f32.partialorder %v922_v29, 0.0  ;;  %v993_v58 = vmul.f32 %v1525_v5, %v922_v29  ;;  %1041 = vst.msk [vmem:[%s1545_s15 + $0x58] sm:$0xff] %vm346_vm0, %v1009_v57  ;;  %vm937_vm9 = vcmp.ge.f32.partialorder %v904_v51, 0.0  ;;  %v975_v60 = vmul.f32 %v1525_v5, %v904_v51 }
 0x119   : > { %v920_v61 = vadd.f32 %v1517_v56, %v881_v52  ;;  %v886_v32 = vmul.f32 %v1512_v46, %v847_v45  ;;  %v909_v63 = vadd.f32 %v1517_v56, %v870_v59  ;;  %v868_v33 = vmul.f32 %v1512_v46, %v829_v53 }
 0x11a   : > { %v1025_v62 = vsel %vm955_vm8, %v922_v29, %v993_v58  ;;  %v884_v39 = vmul.f32 %v1512_v46, %v845_v55  ;;  %v1007_v0 = vsel %vm937_vm9, %v904_v51, %v975_v60  ;;  %v871_v48 = vmul.f32 %v1512_v46, %v832_v40 }
 0x11b   : > { %1057 = vst.msk [vmem:[%s1545_s15 + $0xd8] sm:$0xff] %vm346_vm0, %v1025_v62  ;;  %vm953_vm10 = vcmp.ge.f32.partialorder %v920_v61, 0.0  ;;  %v991_v1 = vmul.f32 %v1525_v5, %v920_v61  ;;  %v925_v2 = vadd.f32 %v1517_v56, %v886_v32  ;;  %1039 = vst.msk [vmem:[%s1545_s15 + $0x48] sm:$0xff] %vm346_vm0, %v1007_v0  ;;  %vm942_vm11 = vcmp.ge.f32.partialorder %v909_v63, 0.0 }
 0x11c   : > { %v980_v3 = vmul.f32 %v1525_v5, %v909_v63  ;;  %v907_v4 = vadd.f32 %v1517_v56, %v868_v33  ;;  %v923_v6 = vadd.f32 %v1517_v56, %v884_v39  ;;  %v910_v14 = vadd.f32 %v1517_v56, %v871_v48 }
 0x11d   : > { %v1023_v9 = vsel %vm953_vm10, %v920_v61, %v991_v1  ;;  %vm958_vm12 = vcmp.ge.f32.partialorder %v925_v2, 0.0  ;;  %v996_v10 = vmul.f32 %v1525_v5, %v925_v2  ;;  %v887_v15 = vmul.f32 %v1512_v46, %v848_v8 }
 0x11e   : > { %1055 = vst.msk [vmem:[%s1545_s15 + $0xc8] sm:$0xff] %vm346_vm0, %v1023_v9  ;;  %v1012_v7 = vsel %vm942_vm11, %v909_v63, %v980_v3  ;;  %vm940_vm13 = vcmp.ge.f32.partialorder %v907_v4, 0.0  ;;  %v978_v11 = vmul.f32 %v1525_v5, %v907_v4  ;;  %vm956_vm14 = vcmp.ge.f32.partialorder %v923_v6, 0.0 }
 0x11f   : > { %1044 = vst.msk [vmem:[%s1545_s15 + $0x70] sm:$0xff] %vm346_vm0, %v1012_v7  ;;  %v1028_v12 = vsel %vm958_vm12, %v925_v2, %v996_v10  ;;  %v994_v13 = vmul.f32 %v1525_v5, %v923_v6  ;;  %v869_v17 = vmul.f32 %v1512_v46, %v830_v49  ;;  %v885_v18 = vmul.f32 %v1512_v46, %v846_v54 }
 0x120   : > { %1060 = vst.msk [vmem:[%s1545_s15 + $0xf0] sm:$0xff] %vm346_vm0, %v1028_v12  ;;  %v1010_v16 = vsel %vm940_vm13, %v907_v4, %v978_v11  ;;  %vm943_vm15 = vcmp.ge.f32.partialorder %v910_v14, 0.0  ;;  %v981_v20 = vmul.f32 %v1525_v5, %v910_v14  ;;  %v926_v21 = vadd.f32 %v1517_v56, %v887_v15 }
 0x121   : > { %1042 = vst.msk [vmem:[%s1545_s15 + $0x60] sm:$0xff] %vm346_vm0, %v1010_v16  ;;  %v1026_v19 = vsel %vm956_vm14, %v923_v6, %v994_v13  ;;  %v908_v22 = vadd.f32 %v1517_v56, %v869_v17  ;;  %v924_v23 = vadd.f32 %v1517_v56, %v885_v18 }
 0x122   : > { %1058 = vst.msk [vmem:[%s1545_s15 + $0xe0] sm:$0xff] %vm346_vm0, %v1026_v19  ;;  %v1013_v24 = vsel %vm943_vm15, %v910_v14, %v981_v20  ;;  %vm959_vm1 = vcmp.ge.f32.partialorder %v926_v21, 0.0  ;;  %v997_v46 = vmul.f32 %v1525_v5, %v926_v21 }
 0x123   : > { %1045 = vst.msk [vmem:[%s1545_s15 + $0x78] sm:$0xff] %vm346_vm0, %v1013_v24  ;;  %vm941_vm2 = vcmp.ge.f32.partialorder %v908_v22, 0.0  ;;  %v979_v25 = vmul.f32 %v1525_v5, %v908_v22  ;;  %vm957_vm3 = vcmp.ge.f32.partialorder %v924_v23, 0.0  ;;  %v995_v26 = vmul.f32 %v1525_v5, %v924_v23 }
 0x124   : > { %v1029_v27 = vsel %vm959_vm1, %v926_v21, %v997_v46 }
 0x125   : > { %1061 = vst.msk [vmem:[%s1545_s15 + $0xf8] sm:$0xff] %vm346_vm0, %v1029_v27  ;;  %v1011_v28 = vsel %vm941_vm2, %v908_v22, %v979_v25  ;;  %v1027_v30 = vsel %vm957_vm3, %v924_v23, %v995_v26 }
 0x126   : > { %1043 = vst.msk [vmem:[%s1545_s15 + $0x68] sm:$0xff] %vm346_vm0, %v1011_v28  ;;  %1059 = vst.msk [vmem:[%s1545_s15 + $0xe8] sm:$0xff] %vm346_vm0, %v1027_v30 }
 0x127 PF: > { %s15_s20 = sadd.s32 1, %s1372_s20   ;;  %s1777_s18 = smov %s1368_s19 }
 0x128   : > { %p12_p5 = scmp.ge.s32.totalorder %s15_s20, 4   ;;  %s1778_s19 = smov %s1780_s21 }
 0x12a   :  { %14 = sbr.rel (!%p12_p5) target bundleno = 2 (0x2), region = 90 }

// kernel: iresnet_forward_pallas.17
= control target key start
LH: loop header
LB: loop body
LE: loop exit
PB: predicated region body
PF: predicated region fallthrough
CT: control target
= control target key end

     0   :  { %s2864_s18 = smov 0   ;;  %s2866_s19 = smov 0   ;;  %s3476_s0 = inlined_call_operand.vmem [shape: bf16[512,576], index: 0, kind: input, shape index: {}]   ;;  %s3477_s1 = inlined_call_operand.vmem [shape: bf16[576,64], index: 1, kind: input, shape index: {}]   ;;  %s3478_s2 = inlined_call_operand.vmem [shape: f32[1,64], index: 2, kind: input, shape index: {}]   ;;  %s3479_s3 = inlined_call_operand.vmem [shape: f32[1,64], index: 3, kind: input, shape index: {}]   ;;  %s3480_s4 = inlined_call_operand.vmem [shape: f32[1,64], index: 4, kind: input, shape index: {}]   ;;  %s3481_s5 = inlined_call_operand.vmem [shape: f32[512,64], index: 5, kind: output, shape index: {}]  }
   0x1   :  { %s2868_s20 = smov 0  }
   0x2 LB: > { %s34_s21 = sadd.s32 1, %s2827_s19  ;;  %p2193_p0 = scmp.ge.s32.totalorder %s2831_s20, 1  ;;  %s2831_s20 = sphi %s2868_s20, %s15_s20   ;;  %s2827_s19 = sphi %s2866_s19, %s3483_s19   ;;  %s2823_s18 = sphi %s2864_s18, %s3482_s18  }
   0x3   : > { %p36_p1 = scmp.ge.s32.totalorder %s34_s21, 2  ;;  %p257_p2 = scmp.lt.s32.totalorder %s2831_s20, 3 }
   0x5   : > { %s3485_s21 = smov (%p36_p1, %s34_s21), 0  ;;  %p258_p3 = pnand %p2193_p0, %p257_p2 }
   0x6   : > { %v2661_v0 = vld [vmem:[%s3477_s1 + $0x40] sm:$0xff] (!%p258_p3)   ;;  %s2194_s24 = sshll.u32 (!%p258_p3), %s2823_s18, 5  ;;  %v2663_v2 = vld [vmem:[%s3477_s1 + $0x48] sm:$0xff] (!%p258_p3)   ;;  %v2665_v4 = vld [vmem:[%s3477_s1 + $0x50] sm:$0xff] (!%p258_p3)   ;;  %vm354_vm0 = vcmask (!%p258_p3), 523264  }
   0x7   : > { %261 = sbr.rel (%p258_p3) target bundleno = 432 (0x1b0), region = 40  ;;  %v2662_v1 = vld [vmem:[%s3477_s1] sm:$0xff] (!%p258_p3)   ;;  %2335 = vmatprep.subr.bf16.mxu0 (!%p258_p3), %v2661_v0  ;;  %2619 = vmatprep.subr.bf16.mxu1 (!%p258_p3), %v2661_v0  ;;  %p312_p4 = scmp.lt.s32.totalorder (!%p258_p3), %s2194_s24, 63  ;;  %v2664_v3 = vld [vmem:[%s3477_s1 + $0x8] sm:$0xff] (!%p258_p3)   ;;  %v2666_v5 = vld [vmem:[%s3477_s1 + $0x10] sm:$0xff] (!%p258_p3)  }
   0x8   : > { %2336 = vmatpush3.bf16.msra.mxu0 (!%p258_p3), %v2662_v1  ;;  %2627 = vmatpush3.bf16.msra.mxu1 (!%p258_p3), %v2662_v1  ;;  %v2667_v6 = vld [vmem:[%s3477_s1 + $0x58] sm:$0xff] (!%p258_p3)   ;;  %v2669_v8 = vld [vmem:[%s3477_s1 + $0x60] sm:$0xff] (!%p258_p3)   ;;  %v2671_v10 = vld [vmem:[%s3477_s1 + $0x68] sm:$0xff] (!%p258_p3)  }
   0x9   : > { %2337 = vmatprep.subr.bf16.mxu0 (!%p258_p3), %v2663_v2  ;;  %2620 = vmatprep.subr.bf16.mxu1 (!%p258_p3), %v2663_v2  ;;  %v2668_v7 = vld [vmem:[%s3477_s1 + $0x18] sm:$0xff] (!%p258_p3)   ;;  %v2670_v9 = vld [vmem:[%s3477_s1 + $0x20] sm:$0xff] (!%p258_p3)   ;;  %v2672_v13 = vld [vmem:[%s3477_s1 + $0x28] sm:$0xff] (!%p258_p3)  }
   0xa   : > { %v2673_v14 = vld [vmem:[%s3477_s1 + $0x70] sm:$0xff] (!%p258_p3)   ;;  %v2675_v16 = vld [vmem:[%s3477_s1 + $0x78] sm:$0xff] (!%p258_p3)   ;;  %v2683_v18 = vld [vmem:[%s3477_s1 + $0xc0] sm:$0xff] (!%p258_p3)  }
   0xb   : > { %v2674_v15 = vld [vmem:[%s3477_s1 + $0x30] sm:$0xff] (!%p258_p3)   ;;  %v2676_v17 = vld [vmem:[%s3477_s1 + $0x38] sm:$0xff] (!%p258_p3)   ;;  %v2686_v19 = vld [vmem:[%s3477_s1 + $0x100] sm:$0xff] (!%p258_p3)  }
   0xc   : > { %2338 = vmatpush3.bf16.msra.mxu0 (!%p258_p3), %v2664_v3  ;;  %2628 = vmatpush3.bf16.msra.mxu1 (!%p258_p3), %v2664_v3  ;;  %v2684_v22 = vld [vmem:[%s3477_s1 + $0x80] sm:$0xff] (!%p258_p3)   ;;  %v2685_v23 = vld [vmem:[%s3477_s1 + $0xc8] sm:$0xff] (!%p258_p3)   ;;  %v2694_v28 = vld [vmem:[%s3477_s1 + $0xd0] sm:$0xff] (!%p258_p3)  }
   0xd   : > { %2339 = vmatprep.subr.bf16.mxu0 (!%p258_p3), %v2665_v4  ;;  %2621 = vmatprep.subr.bf16.mxu1 (!%p258_p3), %v2665_v4  ;;  %v2687_v26 = vld [vmem:[%s3477_s1 + $0x88] sm:$0xff] (!%p258_p3)   ;;  %v2695_v30 = vld [vmem:[%s3477_s1 + $0x90] sm:$0xff] (!%p258_p3)   ;;  %v2696_v31 = vld [vmem:[%s3477_s1 + $0xd8] sm:$0xff] (!%p258_p3)  }
   0xe   : > { %s3487_s24 = smov (!%p312_p4, %s2194_s24), 63  ;;  %v2697_v34 = vld [vmem:[%s3477_s1 + $0x98] sm:$0xff]   ;;  %v2717_v35 = vld [vmem:[%s3477_s1 + $0x108] sm:$0xff]   ;;  %v2704_v37 = vld [vmem:[%s3477_s1 + $0xe0] sm:$0xff]  }
   0xf   : > { %s2635_s12 = smul.u32 20, %s3487_s24  ;;  %v2705_v39 = vld [vmem:[%s3477_s1 + $0xa0] sm:$0xff]   ;;  %v2706_v40 = vld [vmem:[%s3477_s1 + $0xe8] sm:$0xff]   ;;  %v2714_v46 = vld [vmem:[%s3477_s1 + $0xf0] sm:$0xff]   ;;  %s2197_s16 = sshll.u32 %s3487_s24, 3 }
  0x10   : > { %2340 = vmatpush3.bf16.msra.mxu0 %v2666_v5  ;;  %2629 = vmatpush3.bf16.msra.mxu1 %v2666_v5  ;;  %v2707_v43 = vld [vmem:[%s3477_s1 + $0xa8] sm:$0xff]   ;;  %v2737_v47 = vld [vmem:[%s3477_s1 + $0x110] sm:$0xff]   ;;  %v2716_v49 = vld [vmem:[%s3477_s1 + $0xf8] sm:$0xff]   ;;  %s3243_s25 = scalar_lea.vmem %s3481_s5, %s2197_s16 }
  0x11   : > { %2341 = vmatprep.subr.bf16.mxu0 %v2667_v6  ;;  %2622 = vmatprep.subr.bf16.mxu1 %v2667_v6  ;;  %s2915_s22 = scalar_lea.vmem %s3476_s0, %s2635_s12  ;;  %v2715_v48 = vld [vmem:[%s3477_s1 + $0xb0] sm:$0xff]   ;;  %v2718_v52 = vld [vmem:[%s3477_s1 + $0xb8] sm:$0xff]  }
  0x12   : > { %v2679_v11 = vld [vmem:[%s2915_s22 + $0x4] ss:$20 sps:$4 sm:$0xff]   ;;  %v2677_v20 = vld [vmem:[%s2915_s22] ss:$20 sps:$4 sm:$0xff]   ;;  %v2692_v27 = vld [vmem:[%s2915_s22 + $0x28] ss:$20 sps:$4 sm:$0xff]  }
  0x13   : > { %v2682_v12 = vld [vmem:[%s2915_s22 + $0x1e4] ss:$20 sps:$4 sm:$0xff]   ;;  %1284 = vmatprep.mubr.bf16.mxu0 %v2679_v11  ;;  %v2680_v21 = vld [vmem:[%s2915_s22 + $0x1e0] ss:$20 sps:$4 sm:$0xff]   ;;  %v2693_v29 = vld [vmem:[%s2915_s22 + $0x208] ss:$20 sps:$4 sm:$0xff]  }
  0x14   : > { %2342 = vmatpush3.bf16.msra.mxu0 %v2668_v7  ;;  %2630 = vmatpush3.bf16.msra.mxu1 %v2668_v7  ;;  %v2688_v24 = vld [vmem:[%s2915_s22 + $0x2c] ss:$20 sps:$4 sm:$0xff]   ;;  %v2698_v32 = vld [vmem:[%s2915_s22 + $0x54] ss:$20 sps:$4 sm:$0xff]   ;;  %v2702_v36 = vld [vmem:[%s2915_s22 + $0x50] ss:$20 sps:$4 sm:$0xff]  }
  0x15   : > { %2343 = vmatprep.subr.bf16.mxu0 %v2669_v8  ;;  %2623 = vmatprep.subr.bf16.mxu1 %v2669_v8  ;;  %v2690_v25 = vld [vmem:[%s2915_s22 + $0x20c] ss:$20 sps:$4 sm:$0xff]   ;;  %v2700_v33 = vld [vmem:[%s2915_s22 + $0x234] ss:$20 sps:$4 sm:$0xff]   ;;  %v2703_v38 = vld [vmem:[%s2915_s22 + $0x230] ss:$20 sps:$4 sm:$0xff]  }
  0x16   : > { %1380 = vmatprep.mubr.bf16.mxu1 %v2682_v12  ;;  %v2708_v41 = vld [vmem:[%s2915_s22 + $0x7c] ss:$20 sps:$4 sm:$0xff]   ;;  %v2712_v44 = vld [vmem:[%s2915_s22 + $0x78] ss:$20 sps:$4 sm:$0xff]   ;;  %v2724_v54 = vld [vmem:[%s2915_s22 + $0xa0] ss:$20 sps:$4 sm:$0xff]  }
  0x17   : > { %v2710_v42 = vld [vmem:[%s2915_s22 + $0x25c] ss:$20 sps:$4 sm:$0xff]   ;;  %v2713_v45 = vld [vmem:[%s2915_s22 + $0x258] ss:$20 sps:$4 sm:$0xff]   ;;  %v2727_v57 = vld [vmem:[%s2915_s22 + $0x34] ss:$20 sps:$4 sm:$0xff]  }
  0x18   : > { %2344 = vmatpush3.bf16.msra.mxu0 %v2670_v9  ;;  %2631 = vmatpush3.bf16.msra.mxu1 %v2670_v9  ;;  %v2719_v50 = vld [vmem:[%s2915_s22 + $0xa4] ss:$20 sps:$4 sm:$0xff]   ;;  %v2723_v51 = vld [vmem:[%s2915_s22 + $0xc] ss:$20 sps:$4 sm:$0xff]   ;;  %v2721_v53 = vld [vmem:[%s2915_s22 + $0x8] ss:$20 sps:$4 sm:$0xff]  }
  0x19   : > { %2345 = vmatprep.subr.bf16.mxu0 %v2671_v10  ;;  %2624 = vmatprep.subr.bf16.mxu1 %v2671_v10  ;;  %v2725_v55 = vld [vmem:[%s2915_s22 + $0xcc] ss:$20 sps:$4 sm:$0xff]   ;;  %v2756_v56 = vld [vmem:[%s3477_s1 + $0x118] sm:$0xff]   ;;  %v2730_v59 = vld [vmem:[%s2915_s22 + $0x30] ss:$20 sps:$4 sm:$0xff]  }
  0x1a   : > { %v2729_v58 = vld [vmem:[%s2915_s22 + $0xc8] ss:$20 sps:$4 sm:$0xff]   ;;  %v2735_v62 = vld [vmem:[%s2915_s22 + $0xf0] ss:$20 sps:$4 sm:$0xff]   ;;  %v2736_v63 = vld [vmem:[%s2915_s22 + $0x58] ss:$20 sps:$4 sm:$0xff]  }
  0x1b   : > { %v2731_v60 = vld [vmem:[%s2915_s22 + $0xf4] ss:$20 sps:$4 sm:$0xff]   ;;  %v2733_v61 = vld [vmem:[%s2915_s22 + $0x5c] ss:$20 sps:$4 sm:$0xff]   ;;  %v2740_v1 = vld [vmem:[%s2915_s22 + $0x84] ss:$20 sps:$4 sm:$0xff]  }
  0x1c   : > { %2346 = vmatpush3.bf16.msra.mxu0 %v2672_v13  ;;  %2632 = vmatpush3.bf16.msra.mxu1 %v2672_v13  ;;  %v2738_v0 = vld [vmem:[%s2915_s22 + $0x11c] ss:$20 sps:$4 sm:$0xff]   ;;  %v2742_v2 = vld [vmem:[%s2915_s22 + $0x118] ss:$20 sps:$4 sm:$0xff]   ;;  %v2743_v3 = vld [vmem:[%s2915_s22 + $0x80] ss:$20 sps:$4 sm:$0xff]  }
  0x1d   : > { %2347 = vmatprep.subr.bf16.mxu0 %v2673_v14  ;;  %2625 = vmatprep.subr.bf16.mxu1 %v2673_v14  ;;  %v2744_v4 = vld [vmem:[%s2915_s22 + $0x144] ss:$20 sps:$4 sm:$0xff]   ;;  %v2746_v5 = vld [vmem:[%s2915_s22 + $0xac] ss:$20 sps:$4 sm:$0xff]   ;;  %v2749_v7 = vld [vmem:[%s2915_s22 + $0xa8] ss:$20 sps:$4 sm:$0xff]  }
  0x1e   : > { %v2748_v6 = vld [vmem:[%s2915_s22 + $0x140] ss:$20 sps:$4 sm:$0xff]   ;;  %v2754_v10 = vld [vmem:[%s2915_s22 + $0x168] ss:$20 sps:$4 sm:$0xff]   ;;  %v2755_v11 = vld [vmem:[%s2915_s22 + $0xd0] ss:$20 sps:$4 sm:$0xff]  }
  0x1f   : > { %v2750_v8 = vld [vmem:[%s2915_s22 + $0x16c] ss:$20 sps:$4 sm:$0xff]   ;;  %v2752_v9 = vld [vmem:[%s2915_s22 + $0xd4] ss:$20 sps:$4 sm:$0xff]   ;;  %v2759_v13 = vld [vmem:[%s2915_s22 + $0xfc] ss:$20 sps:$4 sm:$0xff]  }
  0x20   : > { %2348 = vmatpush3.bf16.msra.mxu0 %v2674_v15  ;;  %2633 = vmatpush3.bf16.msra.mxu1 %v2674_v15  ;;  %v2757_v12 = vld [vmem:[%s2915_s22 + $0x194] ss:$20 sps:$4 sm:$0xff]   ;;  %v2761_v14 = vld [vmem:[%s2915_s22 + $0x190] ss:$20 sps:$4 sm:$0xff]   ;;  %v2762_v15 = vld [vmem:[%s2915_s22 + $0xf8] ss:$20 sps:$4 sm:$0xff]  }
  0x21   : > { %2349 = vmatprep.subr.bf16.mxu0 %v2675_v16  ;;  %2626 = vmatprep.subr.bf16.mxu1 %v2675_v16  ;;  %v2763_v16 = vld [vmem:[%s2915_s22 + $0x1bc] ss:$20 sps:$4 sm:$0xff]  }
  0x24   : > { %2350 = vmatpush3.bf16.msra.mxu0 %v2676_v17  ;;  %2634 = vmatpush3.bf16.msra.mxu1 %v2676_v17  ;;  %v2765_v17 = vld [vmem:[%s2915_s22 + $0x124] ss:$20 sps:$4 sm:$0xff]  }
  0x25   : > { %2447 = vmatprep.subr.bf16.mxu1 %v2683_v18  ;;  %2579 = vmatprep.subr.bf16.mxu0 %v2686_v19  ;;  %v2767_v18 = vld [vmem:[%s2915_s22 + $0x1b8] ss:$20 sps:$4 sm:$0xff]  }
  0x27   : > { %1285 = vmatmul.mubr.bf16.vlgmr.msra.gmra.mrb[0].mxu0 %v2677_v20  ;;  %1381 = vmatmul.mubr.bf16.vlgmr.msra.gmra.mrb[0].mxu1 %v2680_v21  ;;  %v2769_v20 = vld [vmem:[%s2915_s22 + $0x14c] ss:$20 sps:$4 sm:$0xff]   ;;  %v2771_v21 = vld [vmem:[%s2915_s22 + $0x10] ss:$20 sps:$4 sm:$0xff]  }
  0x28   : > { %2448 = vmatpush3.bf16.msra.mxu1 %v2684_v22  ;;  %2580 = vmatpush3.bf16.msra.mxu0 %v2686_v19  ;;  %v2768_v19 = vld [vmem:[%s2915_s22 + $0x120] ss:$20 sps:$4 sm:$0xff]   ;;  %v2772_v22 = vld [vmem:[%s2915_s22 + $0x148] ss:$20 sps:$4 sm:$0xff]  }
  0x29   : > { %2449 = vmatprep.subr.bf16.mxu1 %v2685_v23  ;;  %1292 = vmatprep.mubr.bf16.mxu0 %v2688_v24  ;;  %v2773_v23 = vld [vmem:[%s2915_s22 + $0x38] ss:$20 sps:$4 sm:$0xff]   ;;  %v2774_v24 = vld [vmem:[%s2915_s22 + $0x174] ss:$20 sps:$4 sm:$0xff]  }
  0x2a   : > { %1388 = vmatprep.mubr.bf16.mxu1 %v2690_v25  ;;  %2581 = vmatprep.subr.bf16.mxu0 %v2717_v35  ;;  %v2776_v25 = vld [vmem:[%s2915_s22 + $0x60] ss:$20 sps:$4 sm:$0xff]  }
  0x2c   : > { %2450 = vmatpush3.bf16.msra.mxu1 %v2687_v26  ;;  %2582 = vmatpush3.bf16.msra.mxu0 %v2717_v35  ;;  %v2777_v26 = vld [vmem:[%s2915_s22 + $0x170] ss:$20 sps:$4 sm:$0xff]   ;;  %v2788_v35 = vld [vmem:[%s2915_s22 + $0x128] ss:$20 sps:$4 sm:$0xff]  }
  0x2d   : > { %2451 = vmatprep.subr.bf16.mxu1 %v2694_v28  ;;  %2583 = vmatprep.subr.bf16.mxu0 %v2737_v47  ;;  %v2779_v28 = vld [vmem:[%s2915_s22 + $0x19c] ss:$20 sps:$4 sm:$0xff]  }
  0x2f   : > { %1293 = vmatmul.mubr.bf16.gmra.mrb[4].mxu0 %v2692_v27  ;;  %1389 = vmatmul.mubr.bf16.gmra.mrb[4].mxu1 %v2693_v29  ;;  %v2778_v27 = vld [vmem:[%s2915_s22 + $0x88] ss:$20 sps:$4 sm:$0xff]   ;;  %v2781_v29 = vld [vmem:[%s2915_s22 + $0xb0] ss:$20 sps:$4 sm:$0xff]  }
  0x30   : > { %2452 = vmatpush3.bf16.msra.mxu1 %v2695_v30  ;;  %1300 = vmatprep.mubr.bf16.mxu0 %v2698_v32  ;;  %v2782_v30 = vld [vmem:[%s2915_s22 + $0x198] ss:$20 sps:$4 sm:$0xff]  }
  0x31   : > { %2453 = vmatprep.subr.bf16.mxu1 %v2696_v31  ;;  %1396 = vmatprep.mubr.bf16.mxu1 %v2700_v33  ;;  %v2783_v31 = vld [vmem:[%s2915_s22 + $0xd8] ss:$20 sps:$4 sm:$0xff]   ;;  %v2786_v33 = vld [vmem:[%s2915_s22 + $0x100] ss:$20 sps:$4 sm:$0xff]  }
  0x32   : > { %2584 = vmatpush3.bf16.msra.mxu0 %v2737_v47  ;;  %v2784_v32 = vld [vmem:[%s2915_s22 + $0x1c4] ss:$20 sps:$4 sm:$0xff]  }
  0x33   : > { %2585 = vmatprep.subr.bf16.mxu0 %v2756_v56  ;;  %v2803_v47 = vld [vmem:[%s2915_s22 + $0x218] ss:$20 sps:$4 sm:$0xff]  }
  0x34   : > { %2454 = vmatpush3.bf16.msra.mxu1 %v2697_v34  ;;  %v2787_v34 = vld [vmem:[%s2915_s22 + $0x1c0] ss:$20 sps:$4 sm:$0xff]  }
  0x35   : > { %2455 = vmatprep.subr.bf16.mxu1 %v2704_v37  ;;  %v2791_v37 = vld [vmem:[%s2915_s22 + $0x150] ss:$20 sps:$4 sm:$0xff]  }
  0x36   : > { %2586 = vmatpush3.bf16.msra.mxu0 %v2756_v56 }
  0x37   : > { %1301 = vmatmul.mubr.bf16.gmra.mrb[8].mxu0 %v2702_v36  ;;  %1397 = vmatmul.mubr.bf16.gmra.mrb[8].mxu1 %v2703_v38  ;;  %v2789_v36 = vld [vmem:[%s2915_s22 + $0x1ec] ss:$20 sps:$4 sm:$0xff]   ;;  %v2792_v38 = vld [vmem:[%s2915_s22 + $0x1e8] ss:$20 sps:$4 sm:$0xff]  }
  0x38   : > { %2456 = vmatpush3.bf16.msra.mxu1 %v2705_v39  ;;  %1308 = vmatprep.mubr.bf16.mxu0 %v2708_v41  ;;  %v2793_v39 = vld [vmem:[%s2915_s22 + $0x178] ss:$20 sps:$4 sm:$0xff]   ;;  %v2796_v41 = vld [vmem:[%s2915_s22 + $0x1a0] ss:$20 sps:$4 sm:$0xff]  }
  0x39   : > { %2457 = vmatprep.subr.bf16.mxu1 %v2706_v40  ;;  %1404 = vmatprep.mubr.bf16.mxu1 %v2710_v42  ;;  %v2794_v40 = vld [vmem:[%s2915_s22 + $0x214] ss:$20 sps:$4 sm:$0xff]   ;;  %v2797_v42 = vld [vmem:[%s2915_s22 + $0x210] ss:$20 sps:$4 sm:$0xff]  }
  0x3c   : > { %2458 = vmatpush3.bf16.msra.mxu1 %v2707_v43  ;;  %v2798_v43 = vld [vmem:[%s2915_s22 + $0x1c8] ss:$20 sps:$4 sm:$0xff]  }
  0x3d   : > { %2459 = vmatprep.subr.bf16.mxu1 %v2714_v46  ;;  %v2802_v46 = vld [vmem:[%s2915_s22 + $0x238] ss:$20 sps:$4 sm:$0xff]  }
  0x3f   : > { %1309 = vmatmul.mubr.bf16.gmra.mrb[12].mxu0 %v2712_v44  ;;  %1405 = vmatmul.mubr.bf16.gmra.mrb[12].mxu1 %v2713_v45  ;;  %v2799_v44 = vld [vmem:[%s2915_s22 + $0x23c] ss:$20 sps:$4 sm:$0xff]  }
  0x40   : > { %2460 = vmatpush3.bf16.msra.mxu1 %v2715_v48  ;;  %1316 = vmatprep.mubr.bf16.mxu0 %v2719_v50  ;;  %v2801_v45 = vld [vmem:[%s2915_s22 + $0x1f0] ss:$20 sps:$4 sm:$0xff]   ;;  %v2807_v50 = vld [vmem:[%s2915_s22 + $0x260] ss:$20 sps:$4 sm:$0xff]  }
  0x41   : > { %2461 = vmatprep.subr.bf16.mxu1 %v2716_v49  ;;  %1445 = vmatprep.mubr.bf16.mxu1 %v2723_v51  ;;  %v2804_v48 = vld [vmem:[%s2915_s22 + $0x264] ss:$20 sps:$4 sm:$0xff]   ;;  %v2806_v49 = vld [vmem:[%s2915_s22 + $0x240] ss:$20 sps:$4 sm:$0xff]   ;;  %v2808_v51 = vld [vmem:[%s2915_s22 + $0x268] ss:$20 sps:$4 sm:$0xff]  }
  0x44   : > { %2462 = vmatpush3.bf16.msra.mxu1 %v2718_v52  ;;  %v2833_v52 = vmov 0.0  }
  0x45   : > { %357 = vst.msk [vmem:[#allocation2 + $0x10] sm:$0xff] %vm354_vm0, %v2833_v52  ;;  %355 = vst.msk [vmem:[#allocation2] sm:$0xff] %vm354_vm0, %v2833_v52 }
  0x46   : > { %356 = vst.msk [vmem:[#allocation2 + $0x8] sm:$0xff] %vm354_vm0, %v2833_v52  ;;  %358 = vst.msk [vmem:[#allocation2 + $0x18] sm:$0xff] %vm354_vm0, %v2833_v52 }
  0x47   : > { %1317 = vmatmul.mubr.bf16.gmra.mrb[16].mxu0 %v2724_v54  ;;  %1446 = vmatmul.mubr.bf16.vlgmr.msra.gmra.mrb[16].mxu1 %v2721_v53  ;;  %359 = vst.msk [vmem:[#allocation2 + $0x20] sm:$0xff] %vm354_vm0, %v2833_v52  ;;  %360 = vst.msk [vmem:[#allocation2 + $0x28] sm:$0xff] %vm354_vm0, %v2833_v52 }
  0x48   : > { %1324 = vmatprep.mubr.bf16.mxu0 %v2725_v55  ;;  %1453 = vmatprep.mubr.bf16.mxu1 %v2727_v57  ;;  %361 = vst.msk [vmem:[#allocation2 + $0x30] sm:$0xff] %vm354_vm0, %v2833_v52  ;;  %362 = vst.msk [vmem:[#allocation2 + $0x38] sm:$0xff] %vm354_vm0, %v2833_v52 }
  0x49   : > { %363 = vst.msk [vmem:[#allocation2 + $0x40] sm:$0xff] %vm354_vm0, %v2833_v52  ;;  %364 = vst.msk [vmem:[#allocation2 + $0x48] sm:$0xff] %vm354_vm0, %v2833_v52 }
  0x4a   : > { %365 = vst.msk [vmem:[#allocation2 + $0x50] sm:$0xff] %vm354_vm0, %v2833_v52  ;;  %366 = vst.msk [vmem:[#allocation2 + $0x58] sm:$0xff] %vm354_vm0, %v2833_v52 }
  0x4b   : > { %367 = vst.msk [vmem:[#allocation2 + $0x60] sm:$0xff] %vm354_vm0, %v2833_v52  ;;  %368 = vst.msk [vmem:[#allocation2 + $0x68] sm:$0xff] %vm354_vm0, %v2833_v52 }
  0x4c   : > { %369 = vst.msk [vmem:[#allocation2 + $0x70] sm:$0xff] %vm354_vm0, %v2833_v52  ;;  %370 = vst.msk [vmem:[#allocation2 + $0x78] sm:$0xff] %vm354_vm0, %v2833_v52 }
  0x4d   : > { %371 = vst.msk [vmem:[#allocation2 + $0x80] sm:$0xff] %vm354_vm0, %v2833_v52  ;;  %372 = vst.msk [vmem:[#allocation2 + $0x88] sm:$0xff] %vm354_vm0, %v2833_v52 }
  0x4e   : > { %373 = vst.msk [vmem:[#allocation2 + $0x90] sm:$0xff] %vm354_vm0, %v2833_v52  ;;  %374 = vst.msk [vmem:[#allocation2 + $0x98] sm:$0xff] %vm354_vm0, %v2833_v52 }
  0x4f   : > { %1325 = vmatmul.mubr.bf16.gmra.mrb[20].mxu0 %v2729_v58  ;;  %1454 = vmatmul.mubr.bf16.gmra.mrb[20].mxu1 %v2730_v59  ;;  %375 = vst.msk [vmem:[#allocation2 + $0xa0] sm:$0xff] %vm354_vm0, %v2833_v52  ;;  %376 = vst.msk [vmem:[#allocation2 + $0xa8] sm:$0xff] %vm354_vm0, %v2833_v52 }
  0x50   : > { %1332 = vmatprep.mubr.bf16.mxu0 %v2731_v60  ;;  %1461 = vmatprep.mubr.bf16.mxu1 %v2733_v61  ;;  %377 = vst.msk [vmem:[#allocation2 + $0xb0] sm:$0xff] %vm354_vm0, %v2833_v52  ;;  %378 = vst.msk [vmem:[#allocation2 + $0xb8] sm:$0xff] %vm354_vm0, %v2833_v52 }
  0x51   : > { %379 = vst.msk [vmem:[#allocation2 + $0xc0] sm:$0xff] %vm354_vm0, %v2833_v52  ;;  %380 = vst.msk [vmem:[#allocation2 + $0xc8] sm:$0xff] %vm354_vm0, %v2833_v52 }
  0x52   : > { %381 = vst.msk [vmem:[#allocation2 + $0xd0] sm:$0xff] %vm354_vm0, %v2833_v52  ;;  %382 = vst.msk [vmem:[#allocation2 + $0xd8] sm:$0xff] %vm354_vm0, %v2833_v52 }
  0x53   : > { %383 = vst.msk [vmem:[#allocation2 + $0xe0] sm:$0xff] %vm354_vm0, %v2833_v52  ;;  %384 = vst.msk [vmem:[#allocation2 + $0xe8] sm:$0xff] %vm354_vm0, %v2833_v52 }
  0x54   : > { %385 = vst.msk [vmem:[#allocation2 + $0xf0] sm:$0xff] %vm354_vm0, %v2833_v52  ;;  %386 = vst.msk [vmem:[#allocation2 + $0xf8] sm:$0xff] %vm354_vm0, %v2833_v52 }
  0x57   : > { %1333 = vmatmul.mubr.bf16.gmra.mrb[24].mxu0 %v2735_v62  ;;  %1462 = vmatmul.mubr.bf16.gmra.mrb[24].mxu1 %v2736_v63 }
  0x58   : > { %1340 = vmatprep.mubr.bf16.mxu0 %v2738_v0  ;;  %1469 = vmatprep.mubr.bf16.mxu1 %v2740_v1 }
  0x5f   : > { %1341 = vmatmul.mubr.bf16.gmra.mrb[28].mxu0 %v2742_v2  ;;  %1470 = vmatmul.mubr.bf16.gmra.mrb[28].mxu1 %v2743_v3 }
  0x60   : > { %1348 = vmatprep.mubr.bf16.mxu0 %v2744_v4  ;;  %1477 = vmatprep.mubr.bf16.mxu1 %v2746_v5 }
  0x67   : > { %1349 = vmatmul.mubr.bf16.gmra.mrb[32].mxu0 %v2748_v6  ;;  %1478 = vmatmul.mubr.bf16.gmra.mrb[32].mxu1 %v2749_v7 }
  0x68   : > { %1356 = vmatprep.mubr.bf16.mxu0 %v2750_v8  ;;  %1485 = vmatprep.mubr.bf16.mxu1 %v2752_v9 }
  0x6f   : > { %1357 = vmatmul.mubr.bf16.gmra.mrb[36].mxu0 %v2754_v10  ;;  %1486 = vmatmul.mubr.bf16.gmra.mrb[36].mxu1 %v2755_v11 }
  0x70   : > { %1364 = vmatprep.mubr.bf16.mxu0 %v2757_v12  ;;  %1493 = vmatprep.mubr.bf16.mxu1 %v2759_v13 }
  0x77   : > { %1365 = vmatmul.mubr.bf16.gmra.mrb[40].mxu0 %v2761_v14  ;;  %1494 = vmatmul.mubr.bf16.gmra.mrb[40].mxu1 %v2762_v15 }
  0x78   : > { %1372 = vmatprep.mubr.bf16.mxu0 %v2763_v16  ;;  %1501 = vmatprep.mubr.bf16.mxu1 %v2765_v17 }
  0x7f   : > { %1373 = vmatmul.mubr.bf16.gmra.mrb[44].mxu0 %v2767_v18  ;;  %1502 = vmatmul.mubr.bf16.gmra.mrb[44].mxu1 %v2768_v19 }
  0x80   : > { %1509 = vmatprep.mubr.bf16.mxu1 %v2769_v20  ;;  %2587 = vmatprep.mubr.msk.bf16.mxu0 %vm354_vm0, %v2771_v21 }
  0x87   : > { %1510 = vmatmul.mubr.bf16.gmra.mrb[48].mxu1 %v2772_v22  ;;  %2588 = vmatmul.mubr.msk.bf16.vlgmr.msra.gmra.mrb[48].mxu0 %vm354_vm0, %v2773_v23 }
  0x88   : > { %1517 = vmatprep.mubr.bf16.mxu1 %v2774_v24  ;;  %2591 = vmatprep.mubr.msk.bf16.mxu0 %vm354_vm0, %v2776_v25 }
  0x8f   : > { %1518 = vmatmul.mubr.bf16.gmra.mrb[52].mxu1 %v2777_v26  ;;  %2592 = vmatmul.mubr.msk.bf16.gmra.mrb[52].mxu0 %vm354_vm0, %v2778_v27 }
  0x90   : > { %1525 = vmatprep.mubr.bf16.mxu1 %v2779_v28  ;;  %2595 = vmatprep.mubr.msk.bf16.mxu0 %vm354_vm0, %v2781_v29 }
  0x97   : > { %1526 = vmatmul.mubr.bf16.gmra.mrb[56].mxu1 %v2782_v30  ;;  %2596 = vmatmul.mubr.msk.bf16.gmra.mrb[56].mxu0 %vm354_vm0, %v2783_v31 }
  0x98   : > { %1533 = vmatprep.mubr.bf16.mxu1 %v2784_v32  ;;  %2599 = vmatprep.mubr.msk.bf16.mxu0 %vm354_vm0, %v2786_v33 }
  0x9f   : > { %1534 = vmatmul.mubr.bf16.gmra.mrb[60].mxu1 %v2787_v34  ;;  %2600 = vmatmul.mubr.msk.bf16.gmra.mrb[60].mxu0 %vm354_vm0, %v2788_v35 }
  0xa0   : > { %1541 = vmatprep.mubr.bf16.mxu1 %v2789_v36  ;;  %2603 = vmatprep.mubr.msk.bf16.mxu0 %vm354_vm0, %v2791_v37 }
  0xa7   : > { %1542 = vmatmul.mubr.bf16.gmra.mrb[64].mxu1 %v2792_v38  ;;  %2604 = vmatmul.mubr.msk.bf16.gmra.mrb[64].mxu0 %vm354_vm0, %v2793_v39 }
  0xa8   : > { %1549 = vmatprep.mubr.bf16.mxu1 %v2794_v40  ;;  %2607 = vmatprep.mubr.msk.bf16.mxu0 %vm354_vm0, %v2796_v41 }
  0xaf   : > { %1550 = vmatmul.mubr.bf16.gmra.mrb[68].mxu1 %v2797_v42  ;;  %2608 = vmatmul.mubr.msk.bf16.gmra.mrb[68].mxu0 %vm354_vm0, %v2798_v43 }
  0xb0   : > { %1557 = vmatprep.mubr.bf16.mxu1 %v2799_v44  ;;  %2611 = vmatprep.mubr.msk.bf16.mxu0 %vm354_vm0, %v2801_v45 }
  0xb7   : > { %1558 = vmatmul.mubr.bf16.gmra.mrb[72].mxu1 %v2802_v46  ;;  %2612 = vmatmul.mubr.msk.bf16.gmra.mrb[72].mxu0 %vm354_vm0, %v2803_v47 }
  0xb8   : > { %1565 = vmatprep.mubr.bf16.mxu1 %v2804_v48  ;;  %2615 = vmatprep.mubr.msk.bf16.mxu0 %vm354_vm0, %v2806_v49 }
  0xbf   : > { %1566 = vmatmul.mubr.bf16.gmra.mrb[76].mxu1 %v2807_v50  ;;  %2616 = vmatmul.mubr.msk.bf16.gmra.mrb[76].mxu0 %vm354_vm0, %v2808_v51 }
  0xfa   : > { %v2423_v53 = vpop.f32.mrb[0].mxu1  ;;  %v2351_v54 = vpop.f32.mrb[0].mxu0 }
  0xfb   : > { %v2424_v55 = vpop.f32.mrb[1].mxu1  ;;  %v2352_v56 = vpop.f32.mrb[1].mxu0 }
  0xfc   : > { %v3126_v57 = vadd.f32 %v2424_v55, %v2423_v53  ;;  %v2426_v58 = vpop.f32.mrb[2].mxu1  ;;  %v2353_v59 = vadd.f32 %v2352_v56, %v2351_v54  ;;  %v2354_v60 = vpop.f32.mrb[2].mxu0 }
  0xfd   : > { %v2427_v61 = vpop.f32.mrb[3].mxu1  ;;  %v2355_v62 = vpop.f32.mrb[3].mxu0 }
  0xfe   : > { %v3128_v63 = vadd.f32 %v2427_v61, %v2426_v58  ;;  %v2356_v0 = vadd.f32 %v2355_v62, %v2354_v60 }
 0x102   : > { %v2429_v1 = vpop.f32.mrb[4].mxu1  ;;  %v2357_v2 = vpop.f32.mrb[4].mxu0 }
 0x103   : > { %v2430_v3 = vpop.f32.mrb[5].mxu1  ;;  %v2358_v4 = vpop.f32.mrb[5].mxu0 }
 0x104   : > { %v3130_v5 = vadd.f32 %v2430_v3, %v2429_v1  ;;  %v2432_v6 = vpop.f32.mrb[6].mxu1  ;;  %v2359_v7 = vadd.f32 %v2358_v4, %v2357_v2  ;;  %v2360_v8 = vpop.f32.mrb[6].mxu0 }
 0x105   : > { %v2433_v9 = vpop.f32.mrb[7].mxu1  ;;  %v2361_v10 = vpop.f32.mrb[7].mxu0 }
 0x106   : > { %v3132_v11 = vadd.f32 %v2433_v9, %v2432_v6  ;;  %v2362_v12 = vadd.f32 %v2361_v10, %v2360_v8 }
 0x10a   : > { %v2435_v13 = vpop.f32.mrb[8].mxu1  ;;  %v2363_v14 = vpop.f32.mrb[8].mxu0 }
 0x10b   : > { %v2436_v15 = vpop.f32.mrb[9].mxu1  ;;  %v2364_v16 = vpop.f32.mrb[9].mxu0 }
 0x10c   : > { %v3134_v17 = vadd.f32 %v2436_v15, %v2435_v13  ;;  %v2438_v18 = vpop.f32.mrb[10].mxu1  ;;  %v2365_v19 = vadd.f32 %v2364_v16, %v2363_v14  ;;  %v2366_v20 = vpop.f32.mrb[10].mxu0 }
 0x10d   : > { %v2439_v21 = vpop.f32.mrb[11].mxu1  ;;  %v2367_v22 = vpop.f32.mrb[11].mxu0 }
 0x10e   : > { %v3136_v23 = vadd.f32 %v2439_v21, %v2438_v18  ;;  %v2368_v24 = vadd.f32 %v2367_v22, %v2366_v20 }
 0x112   : > { %v2441_v25 = vpop.f32.mrb[12].mxu1  ;;  %v2369_v26 = vpop.f32.mrb[12].mxu0 }
 0x113   : > { %v2442_v27 = vpop.f32.mrb[13].mxu1  ;;  %v2370_v28 = vpop.f32.mrb[13].mxu0 }
 0x114   : > { %v3138_v29 = vadd.f32 %v2442_v27, %v2441_v25  ;;  %v2444_v30 = vpop.f32.mrb[14].mxu1  ;;  %v2371_v31 = vadd.f32 %v2370_v28, %v2369_v26  ;;  %v2372_v32 = vpop.f32.mrb[14].mxu0 }
 0x115   : > { %v2445_v33 = vpop.f32.mrb[15].mxu1  ;;  %v2373_v34 = vpop.f32.mrb[15].mxu0 }
 0x116   : > { %v3140_v35 = vadd.f32 %v2445_v33, %v2444_v30  ;;  %v2374_v36 = vadd.f32 %v2373_v34, %v2372_v32 }
 0x11a   : > { %v2463_v37 = vpop.f32.mrb[16].mxu1  ;;  %v2375_v38 = vpop.f32.mrb[16].mxu0 }
 0x11b   : > { %v2464_v39 = vpop.f32.mrb[17].mxu1  ;;  %v2376_v40 = vpop.f32.mrb[17].mxu0 }
 0x11c   : > { %v2465_v41 = vadd.f32 %v2464_v39, %v2463_v37  ;;  %v2466_v42 = vpop.f32.mrb[18].mxu1  ;;  %v2377_v43 = vadd.f32 %v2376_v40, %v2375_v38  ;;  %v2378_v44 = vpop.f32.mrb[18].mxu0 }
 0x11d   : > { %v2467_v45 = vpop.f32.mrb[19].mxu1  ;;  %v2379_v46 = vpop.f32.mrb[19].mxu0 }
 0x11e   : > { %v2468_v47 = vadd.f32 %v2467_v45, %v2466_v42  ;;  %v2380_v48 = vadd.f32 %v2379_v46, %v2378_v44  ;;  %v3142_v49 = vadd.f32 %v2465_v41, %v2353_v59 }
 0x120   : > { %v3144_v50 = vadd.f32 %v2468_v47, %v2356_v0 }
 0x122   : > { %v2469_v51 = vpop.f32.mrb[20].mxu1  ;;  %v2381_v52 = vpop.f32.mrb[20].mxu0 }
 0x123   : > { %v2470_v53 = vpop.f32.mrb[21].mxu1  ;;  %v2382_v54 = vpop.f32.mrb[21].mxu0 }
 0x124   : > { %v2471_v55 = vadd.f32 %v2470_v53, %v2469_v51  ;;  %v2472_v56 = vpop.f32.mrb[22].mxu1  ;;  %v2383_v58 = vadd.f32 %v2382_v54, %v2381_v52  ;;  %v2384_v60 = vpop.f32.mrb[22].mxu0 }
 0x125   : > { %v2473_v61 = vpop.f32.mrb[23].mxu1  ;;  %v2385_v62 = vpop.f32.mrb[23].mxu0 }
 0x126   : > { %v2474_v1 = vadd.f32 %v2473_v61, %v2472_v56  ;;  %v2386_v2 = vadd.f32 %v2385_v62, %v2384_v60  ;;  %v3146_v3 = vadd.f32 %v2471_v55, %v2359_v7 }
 0x128   : > { %v3148_v4 = vadd.f32 %v2474_v1, %v2362_v12 }
 0x12a   : > { %v2475_v59 = vpop.f32.mrb[24].mxu1  ;;  %v2387_v6 = vpop.f32.mrb[24].mxu0 }
 0x12b   : > { %v2476_v0 = vpop.f32.mrb[25].mxu1  ;;  %v2388_v8 = vpop.f32.mrb[25].mxu0 }
 0x12c   : > { %v2477_v9 = vadd.f32 %v2476_v0, %v2475_v59  ;;  %v2478_v10 = vpop.f32.mrb[26].mxu1  ;;  %v2389_v13 = vadd.f32 %v2388_v8, %v2387_v6  ;;  %v2390_v14 = vpop.f32.mrb[26].mxu0 }
 0x12d   : > { %v2479_v15 = vpop.f32.mrb[27].mxu1  ;;  %v2391_v16 = vpop.f32.mrb[27].mxu0 }
 0x12e   : > { %v2480_v18 = vadd.f32 %v2479_v15, %v2478_v10  ;;  %v2392_v20 = vadd.f32 %v2391_v16, %v2390_v14  ;;  %v3150_v21 = vadd.f32 %v2477_v9, %v2365_v19 }
 0x130   : > { %v3152_v22 = vadd.f32 %v2480_v18, %v2368_v24 }
 0x132   : > { %v2481_v7 = vpop.f32.mrb[28].mxu1  ;;  %v2393_v25 = vpop.f32.mrb[28].mxu0 }
 0x133   : > { %v2482_v12 = vpop.f32.mrb[29].mxu1  ;;  %v2394_v26 = vpop.f32.mrb[29].mxu0 }
 0x134   : > { %v2483_v27 = vadd.f32 %v2482_v12, %v2481_v7  ;;  %v2484_v28 = vpop.f32.mrb[30].mxu1  ;;  %v2395_v30 = vadd.f32 %v2394_v26, %v2393_v25  ;;  %v2396_v32 = vpop.f32.mrb[30].mxu0 }
 0x135   : > { %v2485_v33 = vpop.f32.mrb[31].mxu1  ;;  %v2397_v34 = vpop.f32.mrb[31].mxu0 }
 0x136   : > { %v2486_v37 = vadd.f32 %v2485_v33, %v2484_v28  ;;  %v2398_v38 = vadd.f32 %v2397_v34, %v2396_v32  ;;  %v3154_v39 = vadd.f32 %v2483_v27, %v2371_v31 }
 0x138   : > { %v3156_v40 = vadd.f32 %v2486_v37, %v2374_v36 }
 0x13a   : > { %v2487_v19 = vpop.f32.mrb[32].mxu1  ;;  %v2399_v41 = vpop.f32.mrb[32].mxu0 }
 0x13b   : > { %v2488_v24 = vpop.f32.mrb[33].mxu1  ;;  %v2400_v42 = vpop.f32.mrb[33].mxu0 }
 0x13c   : > { %v2489_v44 = vadd.f32 %v2488_v24, %v2487_v19  ;;  %v2490_v45 = vpop.f32.mrb[34].mxu1  ;;  %v3158_v46 = vadd.f32 %v2400_v42, %v2399_v41  ;;  %v2402_v47 = vpop.f32.mrb[34].mxu0 }
 0x13d   : > { %v2491_v51 = vpop.f32.mrb[35].mxu1  ;;  %v2403_v52 = vpop.f32.mrb[35].mxu0 }
 0x13e   : > { %v2492_v53 = vadd.f32 %v2491_v51, %v2490_v45  ;;  %v3160_v54 = vadd.f32 %v2403_v52, %v2402_v47  ;;  %v3162_v55 = vadd.f32 %v2489_v44, %v2377_v43 }
 0x140   : > { %v3164_v31 = vadd.f32 %v2492_v53, %v2380_v48 }
 0x142   : > { %v2493_v36 = vpop.f32.mrb[36].mxu1  ;;  %v2405_v56 = vpop.f32.mrb[36].mxu0 }
 0x143   : > { %v2494_v60 = vpop.f32.mrb[37].mxu1  ;;  %v2406_v61 = vpop.f32.mrb[37].mxu0 }
 0x144   : > { %v2495_v62 = vadd.f32 %v2494_v60, %v2493_v36  ;;  %v2496_v1 = vpop.f32.mrb[38].mxu1  ;;  %v3166_v59 = vadd.f32 %v2406_v61, %v2405_v56  ;;  %v2408_v6 = vpop.f32.mrb[38].mxu0  ;;  %v389_v56 = vld [vmem:[#allocation2 + $0x10] sm:$0xff] }
 0x145   : > { %v2497_v0 = vpop.f32.mrb[39].mxu1  ;;  %v2409_v8 = vpop.f32.mrb[39].mxu0 }
 0x146   : > { %v2498_v9 = vadd.f32 %v2497_v0, %v2496_v1  ;;  %v3168_v10 = vadd.f32 %v2409_v8, %v2408_v6  ;;  %v3170_v14 = vadd.f32 %v2495_v62, %v2383_v58  ;;  %v387_v1 = vld [vmem:[#allocation2] sm:$0xff] }
 0x148   : > { %v3172_v43 = vadd.f32 %v2498_v9, %v2386_v2 }
 0x14a   : > { %v2499_v48 = vpop.f32.mrb[40].mxu1  ;;  %v2411_v15 = vpop.f32.mrb[40].mxu0 }
 0x14b   : > { %v2500_v16 = vpop.f32.mrb[41].mxu1  ;;  %v2412_v18 = vpop.f32.mrb[41].mxu0 }
 0x14c   : > { %v2501_v7 = vadd.f32 %v2500_v16, %v2499_v48  ;;  %v2502_v25 = vpop.f32.mrb[42].mxu1  ;;  %v3174_v12 = vadd.f32 %v2412_v18, %v2411_v15  ;;  %v2414_v26 = vpop.f32.mrb[42].mxu0  ;;  %v390_v48 = vld [vmem:[#allocation2 + $0x18] sm:$0xff] }
 0x14d   : > { %v2503_v27 = vpop.f32.mrb[43].mxu1  ;;  %v2415_v28 = vpop.f32.mrb[43].mxu0 }
 0x14e   : > { %v2504_v32 = vadd.f32 %v2503_v27, %v2502_v25  ;;  %v3176_v33 = vadd.f32 %v2415_v28, %v2414_v26  ;;  %v3178_v34 = vadd.f32 %v2501_v7, %v2389_v13 }
 0x150   : > { %v3180_v58 = vadd.f32 %v2504_v32, %v2392_v20 }
 0x152   : > { %v2505_v2 = vpop.f32.mrb[44].mxu1  ;;  %v2417_v37 = vpop.f32.mrb[44].mxu0 }
 0x153   : > { %v2506_v19 = vpop.f32.mrb[45].mxu1  ;;  %v2418_v41 = vpop.f32.mrb[45].mxu0 }
 0x154   : > { %v2507_v24 = vadd.f32 %v2506_v19, %v2505_v2  ;;  %v2508_v42 = vpop.f32.mrb[46].mxu1  ;;  %v3182_v44 = vadd.f32 %v2418_v41, %v2417_v37  ;;  %v2420_v45 = vpop.f32.mrb[46].mxu0  ;;  %v393_v2 = vld [vmem:[#allocation2 + $0x30] sm:$0xff]  ;;  %v391_v19 = vld [vmem:[#allocation2 + $0x20] sm:$0xff] }
 0x155   : > { %v2509_v47 = vpop.f32.mrb[47].mxu1  ;;  %v2421_v51 = vpop.f32.mrb[47].mxu0 }
 0x156   : > { %v2510_v52 = vadd.f32 %v2509_v47, %v2508_v42  ;;  %v3184_v53 = vadd.f32 %v2421_v51, %v2420_v45  ;;  %v3186_v36 = vadd.f32 %v2507_v24, %v2395_v30  ;;  %v3208_v24 = vld [vmem:[%s3478_s2] ss:$0 sm:$0xff]  ;;  %v394_v47 = vld [vmem:[#allocation2 + $0x38] sm:$0xff] }
 0x158   : > { %v3188_v13 = vadd.f32 %v2510_v52, %v2398_v38  ;;  %v388_v38 = vld [vmem:[#allocation2 + $0x8] sm:$0xff] }
 0x15a   : > { %v2511_v20 = vpop.f32.mrb[48].mxu1  ;;  %v2589_v60 = vpop.f32.mrb[48].mxu0 }
 0x15b   : > { %v1617_v61 = vadd.f32 %v2589_v60, %v3146_v3  ;;  %v2512_v62 = vpop.f32.mrb[49].mxu1  ;;  %v1608_v6 = vpop.f32.mrb[49].mxu0 }
 0x15c   : > { %v2513_v0 = vadd.f32 %v2512_v62, %v2511_v20  ;;  %v1609_v8 = vadd.f32 %v1608_v6, %v3142_v49  ;;  %v2514_v9 = vpop.f32.mrb[50].mxu1  ;;  %v2590_v15 = vpop.f32.mrb[50].mxu0  ;;  %v3215_v62 = vld [vmem:[%s3479_s3] ss:$0 sm:$0xff] }
 0x15d   : > { %v1737_v16 = vadd.f32 %v1617_v61, %v389_v56  ;;  %v1620_v30 = vadd.f32 %v2590_v15, %v3148_v4  ;;  %v2515_v18 = vpop.f32.mrb[51].mxu1  ;;  %v1611_v7 = vpop.f32.mrb[51].mxu0 }
 0x15e   : > { %v1735_v25 = vadd.f32 %v1609_v8, %v387_v1  ;;  %v2516_v26 = vadd.f32 %v2515_v18, %v2514_v9  ;;  %v1612_v27 = vadd.f32 %v1611_v7, %v3144_v50  ;;  %v3195_v3 = vadd.f32 %v2513_v0, %v3158_v46 }
 0x15f   : > { %1769 = vst.msk [vmem:[#allocation2 + $0x10] sm:$0xff] %vm354_vm0, %v1737_v16  ;;  %v1738_v28 = vadd.f32 %v1620_v30, %v390_v48  ;;  %v3227_v48 = vld [vmem:[%s3480_s4] ss:$0 sm:$0xff] }
 0x160   : > { %1767 = vst.msk [vmem:[#allocation2] sm:$0xff] %vm354_vm0, %v1735_v25  ;;  %v1736_v49 = vadd.f32 %v1612_v27, %v388_v38  ;;  %v3200_v32 = vadd.f32 %v2516_v26, %v3160_v54  ;;  %v397_v27 = vld [vmem:[#allocation2 + $0x50] sm:$0xff] }
 0x161   : > { %1770 = vst.msk [vmem:[#allocation2 + $0x18] sm:$0xff] %vm354_vm0, %v1738_v28 }
 0x162   : > { %1768 = vst.msk [vmem:[#allocation2 + $0x8] sm:$0xff] %vm354_vm0, %v1736_v49  ;;  %v2517_v4 = vpop.f32.mrb[52].mxu1  ;;  %v2593_v37 = vpop.f32.mrb[52].mxu0 }
 0x163   : > { %v1633_v50 = vadd.f32 %v2593_v37, %v3154_v39  ;;  %v2518_v46 = vpop.f32.mrb[53].mxu1  ;;  %v1624_v41 = vpop.f32.mrb[53].mxu0  ;;  %v392_v39 = vld [vmem:[#allocation2 + $0x28] sm:$0xff] }
 0x164   : > { %v2519_v42 = vadd.f32 %v2518_v46, %v2517_v4  ;;  %v1625_v54 = vadd.f32 %v1624_v41, %v3150_v21  ;;  %v2520_v45 = vpop.f32.mrb[54].mxu1  ;;  %v2594_v51 = vpop.f32.mrb[54].mxu0 }
 0x165   : > { %v1741_v52 = vadd.f32 %v1633_v50, %v393_v2  ;;  %v1636_v20 = vadd.f32 %v2594_v51, %v3156_v40  ;;  %v2521_v56 = vpop.f32.mrb[55].mxu1  ;;  %v1627_v60 = vpop.f32.mrb[55].mxu0  ;;  %v395_v51 = vld [vmem:[#allocation2 + $0x40] sm:$0xff] }
 0x166   : > { %v1804_v61 = vld [vmem:[#allocation2 + $0x10] sm:$0xff]  ;;  %v1739_v1 = vadd.f32 %v1625_v54, %v391_v19  ;;  %v2522_v6 = vadd.f32 %v2521_v56, %v2520_v45  ;;  %v1628_v21 = vadd.f32 %v1627_v60, %v3152_v22  ;;  %v3219_v0 = vadd.f32 %v2519_v42, %v3166_v59 }
 0x167   : > { %v1843_v8 = vmul.f32 %v3208_v24, %v1804_v61  ;;  %v1802_v9 = vld [vmem:[#allocation2] sm:$0xff]  ;;  %1773 = vst.msk [vmem:[#allocation2 + $0x30] sm:$0xff] %vm354_vm0, %v1741_v52  ;;  %v1742_v40 = vadd.f32 %v1636_v20, %v394_v47  ;;  %v398_v61 = vld [vmem:[#allocation2 + $0x58] sm:$0xff] }
 0x168   : > { %v1841_v15 = vmul.f32 %v3208_v24, %v1802_v9  ;;  %v1805_v16 = vld [vmem:[#allocation2 + $0x18] sm:$0xff]  ;;  %1771 = vst.msk [vmem:[#allocation2 + $0x20] sm:$0xff] %vm354_vm0, %v1739_v1  ;;  %v1740_v22 = vadd.f32 %v1628_v21, %v392_v39  ;;  %v3232_v59 = vadd.f32 %v2522_v6, %v3168_v10 }
 0x169   : > { %v1882_v30 = vadd.f32 %v3215_v62, %v1843_v8  ;;  %v1844_v18 = vmul.f32 %v3208_v24, %v1805_v16  ;;  %v1803_v38 = vld [vmem:[#allocation2 + $0x8] sm:$0xff]  ;;  %1774 = vst.msk [vmem:[#allocation2 + $0x38] sm:$0xff] %vm354_vm0, %v1742_v40 }
 0x16a   : > { %v1880_v7 = vadd.f32 %v3215_v62, %v1841_v15  ;;  %v1842_v25 = vmul.f32 %v3208_v24, %v1803_v38  ;;  %1772 = vst.msk [vmem:[#allocation2 + $0x28] sm:$0xff] %vm354_vm0, %v1740_v22  ;;  %v2523_v26 = vpop.f32.mrb[56].mxu1  ;;  %v2597_v28 = vpop.f32.mrb[56].mxu0  ;;  %v396_v40 = vld [vmem:[#allocation2 + $0x48] sm:$0xff] }
 0x16b   : > { %vm1915_vm1 = vcmp.ge.f32.partialorder %v1882_v30, 0.0  ;;  %v1953_v10 = vmul.f32 %v3227_v48, %v1882_v30  ;;  %v1883_v49 = vadd.f32 %v3215_v62, %v1844_v18  ;;  %v1649_v4 = vadd.f32 %v2597_v28, %v3170_v14  ;;  %v2524_v2 = vpop.f32.mrb[57].mxu1  ;;  %v1640_v37 = vpop.f32.mrb[57].mxu0 }
 0x16c   : > { %vm1913_vm2 = vcmp.ge.f32.partialorder %v1880_v7, 0.0  ;;  %v1951_v50 = vmul.f32 %v3227_v48, %v1880_v7  ;;  %v1881_v46 = vadd.f32 %v3215_v62, %v1842_v25  ;;  %v2525_v19 = vadd.f32 %v2524_v2, %v2523_v26  ;;  %v2526_v41 = vpop.f32.mrb[58].mxu1  ;;  %v2598_v42 = vpop.f32.mrb[58].mxu0 }
 0x16d   : > { %v1985_v54 = vsel %vm1915_vm1, %v1882_v30, %v1953_v10  ;;  %vm1916_vm3 = vcmp.ge.f32.partialorder %v1883_v49, 0.0  ;;  %v1954_v45 = vmul.f32 %v3227_v48, %v1883_v49  ;;  %v1745_v47 = vadd.f32 %v1649_v4, %v397_v27  ;;  %v2527_v52 = vpop.f32.mrb[59].mxu1  ;;  %v1643_v14 = vpop.f32.mrb[59].mxu0 }
 0x16e   : > { %2017 = vst.msk [vmem:[%s3243_s25 + $0x10] sm:$0xff] %vm354_vm0, %v1985_v54  ;;  %v1983_v20 = vsel %vm1913_vm2, %v1880_v7, %v1951_v50  ;;  %vm1914_vm4 = vcmp.ge.f32.partialorder %v1881_v46, 0.0  ;;  %v1952_v56 = vmul.f32 %v3227_v48, %v1881_v46  ;;  %v1808_v39 = vld [vmem:[#allocation2 + $0x30] sm:$0xff]  ;;  %v1641_v60 = vadd.f32 %v1640_v37, %v3162_v55 }
 0x16f   : > { %2015 = vst.msk [vmem:[%s3243_s25] sm:$0xff] %vm354_vm0, %v1983_v20  ;;  %v1986_v1 = vsel %vm1916_vm3, %v1883_v49, %v1954_v45  ;;  %v1847_v6 = vmul.f32 %v3208_v24, %v1808_v39  ;;  %v1806_v21 = vld [vmem:[#allocation2 + $0x20] sm:$0xff]  ;;  %1777 = vst.msk [vmem:[#allocation2 + $0x50] sm:$0xff] %vm354_vm0, %v1745_v47  ;;  %v1652_v8 = vadd.f32 %v2598_v42, %v3172_v43 }
 0x170   : > { %v2528_v9 = vadd.f32 %v2527_v52, %v2526_v41  ;;  %2018 = vst.msk [vmem:[%s3243_s25 + $0x18] sm:$0xff] %vm354_vm0, %v1986_v1  ;;  %v1984_v15 = vsel %vm1914_vm4, %v1881_v46, %v1952_v56  ;;  %v1845_v16 = vmul.f32 %v3208_v24, %v1806_v21  ;;  %v1809_v55 = vld [vmem:[#allocation2 + $0x38] sm:$0xff]  ;;  %v1743_v22 = vadd.f32 %v1641_v60, %v395_v51 }
 0x171   : > { %v1644_v30 = vadd.f32 %v1643_v14, %v3164_v31  ;;  %2016 = vst.msk [vmem:[%s3243_s25 + $0x8] sm:$0xff] %vm354_vm0, %v1984_v15  ;;  %v1886_v18 = vadd.f32 %v3215_v62, %v1847_v6  ;;  %v1848_v38 = vmul.f32 %v3208_v24, %v1809_v55  ;;  %v1807_v7 = vld [vmem:[#allocation2 + $0x28] sm:$0xff]  ;;  %v1746_v25 = vadd.f32 %v1652_v8, %v398_v61  ;;  %v401_v31 = vld [vmem:[#allocation2 + $0x70] sm:$0xff]  ;;  %v402_v61 = vld [vmem:[#allocation2 + $0x78] sm:$0xff] }
 0x172   : > { %v3269_v43 = vadd.f32 %v2525_v19, %v3174_v12  ;;  %v1884_v26 = vadd.f32 %v3215_v62, %v1845_v16  ;;  %v1846_v27 = vmul.f32 %v3208_v24, %v1807_v7  ;;  %1775 = vst.msk [vmem:[#allocation2 + $0x40] sm:$0xff] %vm354_vm0, %v1743_v22  ;;  %v2529_v10 = vpop.f32.mrb[60].mxu1  ;;  %v2601_v49 = vpop.f32.mrb[60].mxu0  ;;  %v3275_v4 = vadd.f32 %v2528_v9, %v3176_v33  ;;  %v400_v9 = vld [vmem:[#allocation2 + $0x68] sm:$0xff] }
 0x173   : > { %v1744_v28 = vadd.f32 %v1644_v30, %v396_v40  ;;  %vm1919_vm5 = vcmp.ge.f32.partialorder %v1886_v18, 0.0  ;;  %v1957_v2 = vmul.f32 %v3227_v48, %v1886_v18  ;;  %v1887_v37 = vadd.f32 %v3215_v62, %v1848_v38  ;;  %1778 = vst.msk [vmem:[#allocation2 + $0x58] sm:$0xff] %vm354_vm0, %v1746_v25  ;;  %v2530_v50 = vpop.f32.mrb[61].mxu1  ;;  %v1656_v46 = vpop.f32.mrb[61].mxu0 }
 0x174   : > { %v1665_v12 = vadd.f32 %v2601_v49, %v3186_v36  ;;  %vm1917_vm6 = vcmp.ge.f32.partialorder %v1884_v26, 0.0  ;;  %v1955_v19 = vmul.f32 %v3227_v48, %v1884_v26  ;;  %v1885_v41 = vadd.f32 %v3215_v62, %v1846_v27  ;;  %v2532_v42 = vpop.f32.mrb[62].mxu1  ;;  %v2602_v54 = vpop.f32.mrb[62].mxu0  ;;  %v399_v36 = vld [vmem:[#allocation2 + $0x60] sm:$0xff] }
 0x175   : > { %1776 = vst.msk [vmem:[#allocation2 + $0x48] sm:$0xff] %vm354_vm0, %v1744_v28  ;;  %v2531_v33 = vadd.f32 %v2530_v50, %v2529_v10  ;;  %v1989_v45 = vsel %vm1919_vm5, %v1886_v18, %v1957_v2  ;;  %vm1920_vm7 = vcmp.ge.f32.partialorder %v1887_v37, 0.0  ;;  %v1958_v47 = vmul.f32 %v3227_v48, %v1887_v37  ;;  %v2533_v52 = vpop.f32.mrb[63].mxu1  ;;  %v1659_v14 = vpop.f32.mrb[63].mxu0 }
 0x176   : > { %v1749_v51 = vadd.f32 %v1665_v12, %v401_v31  ;;  %2021 = vst.msk [vmem:[%s3243_s25 + $0x30] sm:$0xff] %vm354_vm0, %v1989_v45  ;;  %v1987_v20 = vsel %vm1917_vm6, %v1884_v26, %v1955_v19  ;;  %vm1918_vm8 = vcmp.ge.f32.partialorder %v1885_v41, 0.0  ;;  %v1956_v56 = vmul.f32 %v3227_v48, %v1885_v41  ;;  %v1812_v39 = vld [vmem:[#allocation2 + $0x50] sm:$0xff]  ;;  %v403_v31 = vld [vmem:[#allocation2 + $0x80] sm:$0xff]  ;;  %v406_v19 = vld [vmem:[#allocation2 + $0x98] sm:$0xff] }
 0x177   : > { %v1657_v60 = vadd.f32 %v1656_v46, %v3178_v34  ;;  %2019 = vst.msk [vmem:[%s3243_s25 + $0x20] sm:$0xff] %vm354_vm0, %v1987_v20  ;;  %v1990_v1 = vsel %vm1920_vm7, %v1887_v37, %v1958_v47  ;;  %v1851_v6 = vmul.f32 %v3208_v24, %v1812_v39  ;;  %v1668_v21 = vadd.f32 %v2602_v54, %v3188_v13 }
 0x178   : > { %1781 = vst.msk [vmem:[#allocation2 + $0x70] sm:$0xff] %vm354_vm0, %v1749_v51  ;;  %v2534_v8 = vadd.f32 %v2533_v52, %v2532_v42  ;;  %2022 = vst.msk [vmem:[%s3243_s25 + $0x38] sm:$0xff] %vm354_vm0, %v1990_v1  ;;  %v1988_v40 = vsel %vm1918_vm8, %v1885_v41, %v1956_v56  ;;  %v1660_v16 = vadd.f32 %v1659_v14, %v3180_v58  ;;  %v405_v58 = vld [vmem:[#allocation2 + $0x90] sm:$0xff] }
 0x179   : > { %v1747_v15 = vadd.f32 %v1657_v60, %v399_v36  ;;  %v3298_v34 = vadd.f32 %v2531_v33, %v3182_v44  ;;  %2020 = vst.msk [vmem:[%s3243_s25 + $0x28] sm:$0xff] %vm354_vm0, %v1988_v40  ;;  %v1890_v55 = vadd.f32 %v3215_v62, %v1851_v6  ;;  %v1810_v22 = vld [vmem:[#allocation2 + $0x40] sm:$0xff]  ;;  %v1750_v30 = vadd.f32 %v1668_v21, %v402_v61  ;;  %v404_v61 = vld [vmem:[#allocation2 + $0x88] sm:$0xff] }
 0x17a   : > { %v3304_v18 = vadd.f32 %v2534_v8, %v3184_v53  ;;  %v1849_v13 = vmul.f32 %v3208_v24, %v1810_v22  ;;  %v1813_v38 = vld [vmem:[#allocation2 + $0x58] sm:$0xff]  ;;  %v1748_v7 = vadd.f32 %v1660_v16, %v400_v9  ;;  %v2535_v25 = vpop.f32.mrb[64].mxu1  ;;  %v2605_v26 = vpop.f32.mrb[64].mxu0 }
 0x17b   : > { %1779 = vst.msk [vmem:[#allocation2 + $0x60] sm:$0xff] %vm354_vm0, %v1747_v15  ;;  %vm1923_vm9 = vcmp.ge.f32.partialorder %v1890_v55, 0.0  ;;  %v1961_v44 = vmul.f32 %v3227_v48, %v1890_v55  ;;  %v1852_v27 = vmul.f32 %v3208_v24, %v1813_v38  ;;  %1782 = vst.msk [vmem:[#allocation2 + $0x78] sm:$0xff] %vm354_vm0, %v1750_v30  ;;  %v1681_v53 = vadd.f32 %v2605_v26, %v3219_v0  ;;  %v2536_v10 = vpop.f32.mrb[65].mxu1  ;;  %v1672_v49 = vpop.f32.mrb[65].mxu0 }
 0x17c   : > { %v1811_v28 = vld [vmem:[#allocation2 + $0x48] sm:$0xff]  ;;  %v1888_v2 = vadd.f32 %v3215_v62, %v1849_v13  ;;  %1780 = vst.msk [vmem:[#allocation2 + $0x68] sm:$0xff] %vm354_vm0, %v1748_v7  ;;  %v2537_v12 = vadd.f32 %v2536_v10, %v2535_v25  ;;  %v1673_v50 = vadd.f32 %v1672_v49, %v3195_v3  ;;  %v2538_v46 = vpop.f32.mrb[66].mxu1  ;;  %v2606_v41 = vpop.f32.mrb[66].mxu0  ;;  %v409_v7 = vld [vmem:[#allocation2 + $0xb0] sm:$0xff] }
 0x17d   : > { %v1850_v37 = vmul.f32 %v3208_v24, %v1811_v28  ;;  %v1993_v33 = vsel %vm1923_vm9, %v1890_v55, %v1961_v44  ;;  %v1891_v0 = vadd.f32 %v3215_v62, %v1852_v27  ;;  %v1753_v42 = vadd.f32 %v1681_v53, %v405_v58  ;;  %v2539_v45 = vpop.f32.mrb[67].mxu1  ;;  %v1675_v47 = vpop.f32.mrb[67].mxu0  ;;  %v407_v28 = vld [vmem:[#allocation2 + $0xa0] sm:$0xff] }
 0x17e   : > { %v1684_v54 = vadd.f32 %v2606_v41, %v3232_v59  ;;  %2025 = vst.msk [vmem:[%s3243_s25 + $0x50] sm:$0xff] %vm354_vm0, %v1993_v33  ;;  %vm1921_vm10 = vcmp.ge.f32.partialorder %v1888_v2, 0.0  ;;  %v1959_v51 = vmul.f32 %v3227_v48, %v1888_v2  ;;  %v1751_v52 = vadd.f32 %v1673_v50, %v403_v31  ;;  %v410_v33 = vld [vmem:[#allocation2 + $0xb8] sm:$0xff] }
 0x17f   : > { %v1889_v3 = vadd.f32 %v3215_v62, %v1850_v37  ;;  %v1816_v36 = vld [vmem:[#allocation2 + $0x70] sm:$0xff]  ;;  %vm1924_vm11 = vcmp.ge.f32.partialorder %v1891_v0, 0.0  ;;  %v1962_v14 = vmul.f32 %v3227_v48, %v1891_v0  ;;  %1785 = vst.msk [vmem:[#allocation2 + $0x90] sm:$0xff] %vm354_vm0, %v1753_v42  ;;  %v2540_v60 = vadd.f32 %v2539_v45, %v2538_v46 }
 0x180   : > { %v1855_v20 = vmul.f32 %v3208_v24, %v1816_v36  ;;  %v1754_v59 = vadd.f32 %v1684_v54, %v406_v19  ;;  %v1991_v56 = vsel %vm1921_vm10, %v1888_v2, %v1959_v51  ;;  %1783 = vst.msk [vmem:[#allocation2 + $0x80] sm:$0xff] %vm354_vm0, %v1751_v52  ;;  %v1676_v8 = vadd.f32 %v1675_v47, %v3200_v32 }
 0x181   : > { %vm1922_vm12 = vcmp.ge.f32.partialorder %v1889_v3, 0.0  ;;  %v1960_v39 = vmul.f32 %v3227_v48, %v1889_v3  ;;  %2023 = vst.msk [vmem:[%s3243_s25 + $0x40] sm:$0xff] %vm354_vm0, %v1991_v56  ;;  %v1994_v1 = vsel %vm1924_vm11, %v1891_v0, %v1962_v14  ;;  %v3334_v9 = vadd.f32 %v2537_v12, %v3126_v57 }
 0x182   : > { %v1894_v6 = vadd.f32 %v3215_v62, %v1855_v20  ;;  %v1814_v21 = vld [vmem:[#allocation2 + $0x60] sm:$0xff]  ;;  %1786 = vst.msk [vmem:[#allocation2 + $0x98] sm:$0xff] %vm354_vm0, %v1754_v59  ;;  %2026 = vst.msk [vmem:[%s3243_s25 + $0x58] sm:$0xff] %vm354_vm0, %v1994_v1  ;;  %v1817_v16 = vld [vmem:[#allocation2 + $0x78] sm:$0xff]  ;;  %v2541_v55 = vpop.f32.mrb[68].mxu1  ;;  %v2609_v22 = vpop.f32.mrb[68].mxu0  ;;  %v3340_v30 = vadd.f32 %v2540_v60, %v3128_v63  ;;  %v1752_v38 = vadd.f32 %v1676_v8, %v404_v61 }
 0x183   : > { %v1992_v40 = vsel %vm1922_vm12, %v1889_v3, %v1960_v39  ;;  %v1853_v15 = vmul.f32 %v3208_v24, %v1814_v21  ;;  %v1856_v32 = vmul.f32 %v3208_v24, %v1817_v16  ;;  %v1815_v57 = vld [vmem:[#allocation2 + $0x68] sm:$0xff]  ;;  %v2542_v25 = vpop.f32.mrb[69].mxu1  ;;  %v1688_v58 = vpop.f32.mrb[69].mxu0  ;;  %v1697_v63 = vadd.f32 %v2609_v22, %v3298_v34 }
 0x184   : > { %2024 = vst.msk [vmem:[%s3243_s25 + $0x48] sm:$0xff] %vm354_vm0, %v1992_v40  ;;  %vm1927_vm13 = vcmp.ge.f32.partialorder %v1894_v6, 0.0  ;;  %v1965_v13 = vmul.f32 %v3227_v48, %v1894_v6  ;;  %v1854_v44 = vmul.f32 %v3208_v24, %v1815_v57  ;;  %v2543_v27 = vadd.f32 %v2542_v25, %v2541_v55  ;;  %v2544_v53 = vpop.f32.mrb[70].mxu1  ;;  %v2610_v10 = vpop.f32.mrb[70].mxu0  ;;  %1784 = vst.msk [vmem:[#allocation2 + $0x88] sm:$0xff] %vm354_vm0, %v1752_v38  ;;  %v408_v20 = vld [vmem:[#allocation2 + $0xa8] sm:$0xff] }
 0x185   : > { %v1892_v26 = vadd.f32 %v3215_v62, %v1853_v15  ;;  %v1895_v49 = vadd.f32 %v3215_v62, %v1856_v32  ;;  %v1689_v2 = vadd.f32 %v1688_v58, %v3269_v43  ;;  %v1700_v37 = vadd.f32 %v2610_v10, %v3304_v18  ;;  %v2545_v12 = vpop.f32.mrb[71].mxu1  ;;  %v1691_v50 = vpop.f32.mrb[71].mxu0  ;;  %v413_v25 = vld [vmem:[#allocation2 + $0xd0] sm:$0xff] }
 0x186   : > { %v1997_v31 = vsel %vm1927_vm13, %v1894_v6, %v1965_v13  ;;  %v1893_v46 = vadd.f32 %v3215_v62, %v1854_v44  ;;  %v1820_v19 = vld [vmem:[#allocation2 + $0x90] sm:$0xff]  ;;  %v1757_v41 = vadd.f32 %v1697_v63, %v409_v7  ;;  %v2546_v39 = vadd.f32 %v2545_v12, %v2544_v53  ;;  %v412_v53 = vld [vmem:[#allocation2 + $0xc8] sm:$0xff] }
 0x187   : > { %2029 = vst.msk [vmem:[%s3243_s25 + $0x70] sm:$0xff] %vm354_vm0, %v1997_v31  ;;  %vm1925_vm14 = vcmp.ge.f32.partialorder %v1892_v26, 0.0  ;;  %v1963_v34 = vmul.f32 %v3227_v48, %v1892_v26  ;;  %vm1928_vm15 = vcmp.ge.f32.partialorder %v1895_v49, 0.0  ;;  %v1966_v0 = vmul.f32 %v3227_v48, %v1895_v49  ;;  %v1818_v18 = vld [vmem:[#allocation2 + $0x80] sm:$0xff] }
 0x188   : > { %v1859_v43 = vmul.f32 %v3208_v24, %v1820_v19  ;;  %v1755_v42 = vadd.f32 %v1689_v2, %v407_v28  ;;  %vm1926_vm1 = vcmp.ge.f32.partialorder %v1893_v46, 0.0  ;;  %v1964_v45 = vmul.f32 %v3227_v48, %v1893_v46  ;;  %1789 = vst.msk [vmem:[#allocation2 + $0xb0] sm:$0xff] %vm354_vm0, %v1757_v41  ;;  %v414_v2 = vld [vmem:[#allocation2 + $0xd8] sm:$0xff] }
 0x189   : > { %v1995_v54 = vsel %vm1925_vm14, %v1892_v26, %v1963_v34  ;;  %v1857_v47 = vmul.f32 %v3208_v24, %v1818_v18  ;;  %v1821_v51 = vld [vmem:[#allocation2 + $0x98] sm:$0xff]  ;;  %v1998_v3 = vsel %vm1928_vm15, %v1895_v49, %v1966_v0  ;;  %v1758_v14 = vadd.f32 %v1700_v37, %v410_v33 }
 0x18a   : > { %2027 = vst.msk [vmem:[%s3243_s25 + $0x60] sm:$0xff] %vm354_vm0, %v1995_v54  ;;  %v1898_v36 = vadd.f32 %v3215_v62, %v1859_v43  ;;  %v1860_v52 = vmul.f32 %v3208_v24, %v1821_v51  ;;  %1787 = vst.msk [vmem:[#allocation2 + $0xa0] sm:$0xff] %vm354_vm0, %v1755_v42  ;;  %v1996_v59 = vsel %vm1926_vm1, %v1893_v46, %v1964_v45  ;;  %v2547_v61 = vpop.f32.mrb[72].mxu1  ;;  %v2613_v1 = vpop.f32.mrb[72].mxu0 }
 0x18b   : > { %2030 = vst.msk [vmem:[%s3243_s25 + $0x78] sm:$0xff] %vm354_vm0, %v1998_v3  ;;  %v1896_v56 = vadd.f32 %v3215_v62, %v1857_v47  ;;  %v1692_v60 = vadd.f32 %v1691_v50, %v3275_v4  ;;  %2028 = vst.msk [vmem:[%s3243_s25 + $0x68] sm:$0xff] %vm354_vm0, %v1996_v59  ;;  %v1552_v8 = vadd.f32 %v2543_v27, %v3130_v5  ;;  %v2548_v40 = vpop.f32.mrb[73].mxu1  ;;  %v1704_v15 = vpop.f32.mrb[73].mxu0  ;;  %v1819_v4 = vld [vmem:[#allocation2 + $0x88] sm:$0xff]  ;;  %v411_v5 = vld [vmem:[#allocation2 + $0xc0] sm:$0xff] }
 0x18c   : > { %vm1931_vm2 = vcmp.ge.f32.partialorder %v1898_v36, 0.0  ;;  %v1969_v6 = vmul.f32 %v3227_v48, %v1898_v36  ;;  %v1899_v21 = vadd.f32 %v3215_v62, %v1860_v52  ;;  %1790 = vst.msk [vmem:[#allocation2 + $0xb8] sm:$0xff] %vm354_vm0, %v1758_v14  ;;  %v2549_v22 = vadd.f32 %v2548_v40, %v2547_v61  ;;  %v2550_v13 = vpop.f32.mrb[74].mxu1  ;;  %v2614_v32 = vpop.f32.mrb[74].mxu0  ;;  %v415_v52 = vld [vmem:[#allocation2 + $0xe0] sm:$0xff] }
 0x18d   : > { %vm1929_vm3 = vcmp.ge.f32.partialorder %v1896_v56, 0.0  ;;  %v1967_v16 = vmul.f32 %v3227_v48, %v1896_v56  ;;  %v1756_v55 = vadd.f32 %v1692_v60, %v408_v20  ;;  %v1858_v7 = vmul.f32 %v3208_v24, %v1819_v4  ;;  %v2551_v58 = vpop.f32.mrb[75].mxu1  ;;  %v1707_v26 = vpop.f32.mrb[75].mxu0 }
 0x18e   : > { %v2001_v57 = vsel %vm1931_vm2, %v1898_v36, %v1969_v6  ;;  %vm1932_vm4 = vcmp.ge.f32.partialorder %v1899_v21, 0.0  ;;  %v1970_v38 = vmul.f32 %v3227_v48, %v1899_v21  ;;  %v1713_v63 = vadd.f32 %v2613_v1, %v1552_v8 }
 0x18f   : > { %2033 = vst.msk [vmem:[%s3243_s25 + $0x90] sm:$0xff] %vm354_vm0, %v2001_v57  ;;  %v1999_v44 = vsel %vm1929_vm3, %v1896_v56, %v1967_v16  ;;  %1788 = vst.msk [vmem:[#allocation2 + $0xa8] sm:$0xff] %vm354_vm0, %v1756_v55  ;;  %v1705_v27 = vadd.f32 %v1704_v15, %v3334_v9  ;;  %v1555_v28 = vadd.f32 %v2546_v39, %v3132_v11  ;;  %v1824_v49 = vld [vmem:[#allocation2 + $0xb0] sm:$0xff]  ;;  %v416_v57 = vld [vmem:[#allocation2 + $0xe8] sm:$0xff] }
 0x190   : > { %2031 = vst.msk [vmem:[%s3243_s25 + $0x80] sm:$0xff] %vm354_vm0, %v1999_v44  ;;  %v2002_v10 = vsel %vm1932_vm4, %v1899_v21, %v1970_v38  ;;  %v1897_v31 = vadd.f32 %v3215_v62, %v1858_v7  ;;  %v2552_v37 = vadd.f32 %v2551_v58, %v2550_v13  ;;  %v1708_v12 = vadd.f32 %v1707_v26, %v3340_v30  ;;  %v417_v13 = vld [vmem:[#allocation2 + $0xf0] sm:$0xff] }
 0x191   : > { %2034 = vst.msk [vmem:[%s3243_s25 + $0x98] sm:$0xff] %vm354_vm0, %v2002_v10  ;;  %v1863_v50 = vmul.f32 %v3208_v24, %v1824_v49  ;;  %v1822_v34 = vld [vmem:[#allocation2 + $0xa0] sm:$0xff]  ;;  %v1761_v46 = vadd.f32 %v1713_v63, %v413_v25  ;;  %v1759_v9 = vadd.f32 %v1705_v27, %v411_v5  ;;  %v1716_v19 = vadd.f32 %v2614_v32, %v1555_v28  ;;  %v418_v27 = vld [vmem:[#allocation2 + $0xf8] sm:$0xff] }
 0x192   : > { %vm1930_vm5 = vcmp.ge.f32.partialorder %v1897_v31, 0.0  ;;  %v1968_v11 = vmul.f32 %v3227_v48, %v1897_v31  ;;  %v1861_v41 = vmul.f32 %v3208_v24, %v1822_v34  ;;  %v1760_v33 = vadd.f32 %v1708_v12, %v412_v53  ;;  %v2553_v18 = vpop.f32.mrb[76].mxu1  ;;  %v2617_v42 = vpop.f32.mrb[76].mxu0 }
 0x193   : > { %v1902_v0 = vadd.f32 %v3215_v62, %v1863_v50  ;;  %v1825_v43 = vld [vmem:[#allocation2 + $0xb8] sm:$0xff]  ;;  %1793 = vst.msk [vmem:[#allocation2 + $0xd0] sm:$0xff] %vm354_vm0, %v1761_v46  ;;  %1791 = vst.msk [vmem:[#allocation2 + $0xc0] sm:$0xff] %vm354_vm0, %v1759_v9  ;;  %v1762_v30 = vadd.f32 %v1716_v19, %v414_v2  ;;  %v1560_v54 = vadd.f32 %v2549_v22, %v3134_v17  ;;  %v2554_v36 = vpop.f32.mrb[77].mxu1  ;;  %v1720_v14 = vpop.f32.mrb[77].mxu0 }
 0x194   : > { %v1563_v45 = vadd.f32 %v2552_v37, %v3136_v23  ;;  %v2000_v47 = vsel %vm1930_vm5, %v1897_v31, %v1968_v11  ;;  %v1900_v51 = vadd.f32 %v3215_v62, %v1861_v41  ;;  %v1864_v3 = vmul.f32 %v3208_v24, %v1825_v43  ;;  %1792 = vst.msk [vmem:[#allocation2 + $0xc8] sm:$0xff] %vm354_vm0, %v1760_v33  ;;  %v2556_v59 = vpop.f32.mrb[78].mxu1  ;;  %v2618_v56 = vpop.f32.mrb[78].mxu0 }
 0x195   : > { %2032 = vst.msk [vmem:[%s3243_s25 + $0x88] sm:$0xff] %vm354_vm0, %v2000_v47  ;;  %vm1935_vm6 = vcmp.ge.f32.partialorder %v1902_v0, 0.0  ;;  %v1973_v20 = vmul.f32 %v3227_v48, %v1902_v0  ;;  %1794 = vst.msk [vmem:[#allocation2 + $0xd8] sm:$0xff] %vm354_vm0, %v1762_v30  ;;  %v2555_v17 = vadd.f32 %v2554_v36, %v2553_v18  ;;  %v1721_v23 = vadd.f32 %v1720_v14, %v1560_v54  ;;  %v2557_v1 = vpop.f32.mrb[79].mxu1  ;;  %v1723_v6 = vpop.f32.mrb[79].mxu0 }
 0x196   : > { %vm1933_vm7 = vcmp.ge.f32.partialorder %v1900_v51, 0.0  ;;  %v1971_v39 = vmul.f32 %v3227_v48, %v1900_v51  ;;  %v1903_v60 = vadd.f32 %v3215_v62, %v1864_v3  ;;  %v1823_v61 = vld [vmem:[#allocation2 + $0xa8] sm:$0xff]  ;;  %v2558_v55 = vadd.f32 %v2557_v1, %v2556_v59 }
 0x197   : > { %v2005_v21 = vsel %vm1935_vm6, %v1902_v0, %v1973_v20  ;;  %v1862_v8 = vmul.f32 %v3208_v24, %v1823_v61  ;;  %v1568_v40 = vadd.f32 %v2555_v17, %v3138_v29  ;;  %v1763_v15 = vadd.f32 %v1721_v23, %v415_v52 }
 0x198   : > { %2037 = vst.msk [vmem:[%s3243_s25 + $0xb0] sm:$0xff] %vm354_vm0, %v2005_v21  ;;  %v2003_v16 = vsel %vm1933_vm7, %v1900_v51, %v1971_v39  ;;  %vm1936_vm8 = vcmp.ge.f32.partialorder %v1903_v60, 0.0  ;;  %v1974_v4 = vmul.f32 %v3227_v48, %v1903_v60  ;;  %v1724_v38 = vadd.f32 %v1723_v6, %v1563_v45 }
 0x199   : > { %2035 = vst.msk [vmem:[%s3243_s25 + $0xa0] sm:$0xff] %vm354_vm0, %v2003_v16  ;;  %v1901_v22 = vadd.f32 %v3215_v62, %v1862_v8  ;;  %v1729_v32 = vadd.f32 %v2617_v42, %v1568_v40  ;;  %1795 = vst.msk [vmem:[#allocation2 + $0xe0] sm:$0xff] %vm354_vm0, %v1763_v15  ;;  %v1571_v5 = vadd.f32 %v2558_v55, %v3140_v35 }
 0x19a   : > { %v2006_v29 = vsel %vm1936_vm8, %v1903_v60, %v1974_v4  ;;  %v1828_v7 = vld [vmem:[#allocation2 + $0xd0] sm:$0xff]  ;;  %v1826_v25 = vld [vmem:[#allocation2 + $0xc0] sm:$0xff]  ;;  %v1764_v49 = vadd.f32 %v1724_v38, %v416_v57 }
 0x19b   : > { %2038 = vst.msk [vmem:[%s3243_s25 + $0xb8] sm:$0xff] %vm354_vm0, %v2006_v29  ;;  %vm1934_vm9 = vcmp.ge.f32.partialorder %v1901_v22, 0.0  ;;  %v1972_v58 = vmul.f32 %v3227_v48, %v1901_v22  ;;  %v1867_v26 = vmul.f32 %v3208_v24, %v1828_v7  ;;  %v1865_v44 = vmul.f32 %v3208_v24, %v1826_v25  ;;  %v1827_v63 = vld [vmem:[#allocation2 + $0xc8] sm:$0xff] }
 0x19c   : > { %v1829_v28 = vld [vmem:[#allocation2 + $0xd8] sm:$0xff]  ;;  %v1866_v53 = vmul.f32 %v3208_v24, %v1827_v63  ;;  %v1765_v10 = vadd.f32 %v1729_v32, %v417_v13  ;;  %v1732_v31 = vadd.f32 %v2618_v56, %v1571_v5  ;;  %1796 = vst.msk [vmem:[#allocation2 + $0xe8] sm:$0xff] %vm354_vm0, %v1764_v49 }
 0x19d   : > { %v2004_v2 = vsel %vm1934_vm9, %v1901_v22, %v1972_v58  ;;  %v1906_v35 = vadd.f32 %v3215_v62, %v1867_v26  ;;  %v1904_v37 = vadd.f32 %v3215_v62, %v1865_v44  ;;  %v1868_v12 = vmul.f32 %v3208_v24, %v1829_v28 }
 0x19e   : > { %2036 = vst.msk [vmem:[%s3243_s25 + $0xa8] sm:$0xff] %vm354_vm0, %v2004_v2  ;;  %v1905_v50 = vadd.f32 %v3215_v62, %v1866_v53  ;;  %1797 = vst.msk [vmem:[#allocation2 + $0xf0] sm:$0xff] %vm354_vm0, %v1765_v10  ;;  %v1766_v34 = vadd.f32 %v1732_v31, %v418_v27 }
 0x19f   : > { %vm1939_vm10 = vcmp.ge.f32.partialorder %v1906_v35, 0.0  ;;  %v1977_v46 = vmul.f32 %v3227_v48, %v1906_v35  ;;  %vm1937_vm11 = vcmp.ge.f32.partialorder %v1904_v37, 0.0  ;;  %v1975_v9 = vmul.f32 %v3227_v48, %v1904_v37 }
 0x1a0   : > { %v1907_v19 = vadd.f32 %v3215_v62, %v1868_v12  ;;  %vm1938_vm12 = vcmp.ge.f32.partialorder %v1905_v50, 0.0  ;;  %v1976_v11 = vmul.f32 %v3227_v48, %v1905_v50  ;;  %v1830_v41 = vld [vmem:[#allocation2 + $0xe0] sm:$0xff]  ;;  %1798 = vst.msk [vmem:[#allocation2 + $0xf8] sm:$0xff] %vm354_vm0, %v1766_v34 }
 0x1a1   : > { %v2009_v33 = vsel %vm1939_vm10, %v1906_v35, %v1977_v46  ;;  %v2007_v0 = vsel %vm1937_vm11, %v1904_v37, %v1975_v9  ;;  %v1869_v43 = vmul.f32 %v3208_v24, %v1830_v41 }
 0x1a2   : > { %2041 = vst.msk [vmem:[%s3243_s25 + $0xd0] sm:$0xff] %vm354_vm0, %v2009_v33  ;;  %2039 = vst.msk [vmem:[%s3243_s25 + $0xc0] sm:$0xff] %vm354_vm0, %v2007_v0  ;;  %vm1940_vm13 = vcmp.ge.f32.partialorder %v1907_v19, 0.0  ;;  %v1978_v30 = vmul.f32 %v3227_v48, %v1907_v19  ;;  %v2008_v18 = vsel %vm1938_vm12, %v1905_v50, %v1976_v11 }
 0x1a3   : > { %2040 = vst.msk [vmem:[%s3243_s25 + $0xc8] sm:$0xff] %vm354_vm0, %v2008_v18  ;;  %v1908_v42 = vadd.f32 %v3215_v62, %v1869_v43  ;;  %v1831_v51 = vld [vmem:[#allocation2 + $0xe8] sm:$0xff] }
 0x1a4   : > { %v2010_v54 = vsel %vm1940_vm13, %v1907_v19, %v1978_v30  ;;  %v1870_v36 = vmul.f32 %v3208_v24, %v1831_v51 }
 0x1a5   : > { %2042 = vst.msk [vmem:[%s3243_s25 + $0xd8] sm:$0xff] %vm354_vm0, %v2010_v54  ;;  %v1832_v45 = vld [vmem:[#allocation2 + $0xf0] sm:$0xff]  ;;  %vm1941_vm14 = vcmp.ge.f32.partialorder %v1908_v42, 0.0  ;;  %v1979_v47 = vmul.f32 %v3227_v48, %v1908_v42 }
 0x1a6   : > { %v1871_v3 = vmul.f32 %v3208_v24, %v1832_v45  ;;  %v1909_v23 = vadd.f32 %v3215_v62, %v1870_v36 }
 0x1a7   : > { %v2011_v52 = vsel %vm1941_vm14, %v1908_v42, %v1979_v47  ;;  %v1833_v14 = vld [vmem:[#allocation2 + $0xf8] sm:$0xff] }
 0x1a8   : > { %v1910_v20 = vadd.f32 %v3215_v62, %v1871_v3  ;;  %2043 = vst.msk [vmem:[%s3243_s25 + $0xe0] sm:$0xff] %vm354_vm0, %v2011_v52  ;;  %v1872_v17 = vmul.f32 %v3208_v24, %v1833_v14  ;;  %vm1942_vm1 = vcmp.ge.f32.partialorder %v1909_v23, 0.0  ;;  %v1980_v39 = vmul.f32 %v3227_v48, %v1909_v23 }
 0x1aa   : > { %vm1943_vm15 = vcmp.ge.f32.partialorder %v1910_v20, 0.0  ;;  %v1981_v59 = vmul.f32 %v3227_v48, %v1910_v20  ;;  %v1911_v56 = vadd.f32 %v3215_v62, %v1872_v17  ;;  %v2012_v1 = vsel %vm1942_vm1, %v1909_v23, %v1980_v39 }
 0x1ab   : > { %2044 = vst.msk [vmem:[%s3243_s25 + $0xe8] sm:$0xff] %vm354_vm0, %v2012_v1 }
 0x1ac   : > { %v2013_v60 = vsel %vm1943_vm15, %v1910_v20, %v1981_v59  ;;  %vm1944_vm2 = vcmp.ge.f32.partialorder %v1911_v56, 0.0  ;;  %v1982_v61 = vmul.f32 %v3227_v48, %v1911_v56 }
 0x1ad   : > { %2045 = vst.msk [vmem:[%s3243_s25 + $0xf0] sm:$0xff] %vm354_vm0, %v2013_v60 }
 0x1ae   : > { %v2014_v6 = vsel %vm1944_vm2, %v1911_v56, %v1982_v61 }
 0x1af   : > { %2046 = vst.msk [vmem:[%s3243_s25 + $0xf8] sm:$0xff] %vm354_vm0, %v2014_v6 }
 0x1b0 PF: > { %s15_s20 = sadd.s32 1, %s2831_s20   ;;  %s3482_s18 = smov %s2827_s19 }
 0x1b1   : > { %p12_p5 = scmp.ge.s32.totalorder %s15_s20, 4   ;;  %s3483_s19 = smov %s3485_s21 }
 0x1b3   :  { %14 = sbr.rel (!%p12_p5) target bundleno = 2 (0x2), region = 90 }

// kernel: iresnet_forward_pallas.19
= control target key start
LH: loop header
LB: loop body
LE: loop exit
PB: predicated region body
PF: predicated region fallthrough
CT: control target
= control target key end

     0   :  { %vm25_vm0 = vcmask 523264   ;;  %s1899_s1 = inlined_call_operand.vmem [shape: bf16[576,64], index: 1, kind: input, shape index: {}]   ;;  %s1900_s0 = inlined_call_operand.vmem [shape: bf16[128,576], index: 0, kind: input, shape index: {}]   ;;  %s1901_s2 = inlined_call_operand.vmem [shape: f32[1,64], index: 2, kind: input, shape index: {}]   ;;  %s1902_s3 = inlined_call_operand.vmem [shape: f32[1,64], index: 3, kind: input, shape index: {}]   ;;  %s1903_s4 = inlined_call_operand.vmem [shape: f32[128,64], index: 4, kind: input, shape index: {}]   ;;  %s1904_s5 = inlined_call_operand.vmem [shape: f32[128,64], index: 5, kind: output, shape index: {}]  }
   0x1   :  { %v1318_v0 = vld [vmem:[%s1899_s1 + $0x40] sm:$0xff]   ;;  %v1322_v4 = vld [vmem:[%s1899_s1 + $0x48] sm:$0xff]   ;;  %v1326_v8 = vld [vmem:[%s1899_s1 + $0x50] sm:$0xff]  }
   0x2   :  { %v1319_v1 = vld [vmem:[%s1899_s1 + $0xc0] sm:$0xff]   ;;  %1145 = vmatprep.subr.bf16.mxu0 %v1318_v0  ;;  %v1323_v5 = vld [vmem:[%s1899_s1 + $0xc8] sm:$0xff]   ;;  %v1327_v9 = vld [vmem:[%s1899_s1 + $0xd0] sm:$0xff]  }
   0x3   :  { %v1320_v2 = vld [vmem:[%s1899_s1] sm:$0xff]   ;;  %1209 = vmatprep.subr.bf16.mxu1 %v1319_v1  ;;  %v1324_v6 = vld [vmem:[%s1899_s1 + $0x8] sm:$0xff]   ;;  %v1328_v10 = vld [vmem:[%s1899_s1 + $0x10] sm:$0xff]  }
   0x4   :  { %v1321_v3 = vld [vmem:[%s1899_s1 + $0x80] sm:$0xff]   ;;  %1146 = vmatpush3.bf16.msra.mxu0 %v1320_v2  ;;  %v1325_v7 = vld [vmem:[%s1899_s1 + $0x88] sm:$0xff]   ;;  %v1329_v11 = vld [vmem:[%s1899_s1 + $0x90] sm:$0xff]  }
   0x5   :  { %1210 = vmatpush3.bf16.msra.mxu1 %v1321_v3  ;;  %1147 = vmatprep.subr.bf16.mxu0 %v1322_v4  ;;  %v1330_v12 = vld [vmem:[%s1899_s1 + $0x58] sm:$0xff]   ;;  %v1334_v16 = vld [vmem:[%s1899_s1 + $0x60] sm:$0xff]   ;;  %v1338_v20 = vld [vmem:[%s1899_s1 + $0x68] sm:$0xff]  }
   0x6   :  { %1211 = vmatprep.subr.bf16.mxu1 %v1323_v5  ;;  %v1331_v13 = vld [vmem:[%s1899_s1 + $0xd8] sm:$0xff]   ;;  %v1335_v17 = vld [vmem:[%s1899_s1 + $0xe0] sm:$0xff]   ;;  %v1339_v21 = vld [vmem:[%s1899_s1 + $0xe8] sm:$0xff]  }
   0x7   :  { %v1332_v14 = vld [vmem:[%s1899_s1 + $0x18] sm:$0xff]   ;;  %v1336_v18 = vld [vmem:[%s1899_s1 + $0x20] sm:$0xff]   ;;  %v1340_v22 = vld [vmem:[%s1899_s1 + $0x28] sm:$0xff]  }
   0x8   :  { %1148 = vmatpush3.bf16.msra.mxu0 %v1324_v6  ;;  %v1333_v15 = vld [vmem:[%s1899_s1 + $0x98] sm:$0xff]   ;;  %v1337_v19 = vld [vmem:[%s1899_s1 + $0xa0] sm:$0xff]   ;;  %v1341_v23 = vld [vmem:[%s1899_s1 + $0xa8] sm:$0xff]  }
   0x9   :  { %1212 = vmatpush3.bf16.msra.mxu1 %v1325_v7  ;;  %1149 = vmatprep.subr.bf16.mxu0 %v1326_v8  ;;  %v1342_v24 = vld [vmem:[%s1899_s1 + $0x70] sm:$0xff]   ;;  %v1346_v28 = vld [vmem:[%s1899_s1 + $0x78] sm:$0xff]   ;;  %v1355_v35 = vld [vmem:[%s1900_s0 + $0xc] ss:$20 sps:$4 sm:$0xff]  }
   0xa   :  { %1213 = vmatprep.subr.bf16.mxu1 %v1327_v9  ;;  %v1343_v25 = vld [vmem:[%s1899_s1 + $0xf0] sm:$0xff]   ;;  %v1347_v29 = vld [vmem:[%s1899_s1 + $0xf8] sm:$0xff]   ;;  %v1356_v36 = vld [vmem:[%s1899_s1 + $0x100] sm:$0xff]   ;;  %748 = vmatprep.mubr.bf16.mxu1 %v1355_v35 }
   0xb   :  { %v1344_v26 = vld [vmem:[%s1899_s1 + $0x30] sm:$0xff]   ;;  %v1348_v30 = vld [vmem:[%s1899_s1 + $0x38] sm:$0xff]   ;;  %v1357_v37 = vld [vmem:[%s1900_s0 + $0x2c] ss:$20 sps:$4 sm:$0xff]  }
   0xc   :  { %1150 = vmatpush3.bf16.msra.mxu0 %v1328_v10  ;;  %v1345_v27 = vld [vmem:[%s1899_s1 + $0xb0] sm:$0xff]   ;;  %v1349_v31 = vld [vmem:[%s1899_s1 + $0xb8] sm:$0xff]   ;;  %v1369_v42 = vld [vmem:[%s1899_s1 + $0x108] sm:$0xff]  }
   0xd   :  { %1214 = vmatpush3.bf16.msra.mxu1 %v1329_v11  ;;  %1151 = vmatprep.subr.bf16.mxu0 %v1330_v12  ;;  %v1350_v32 = vld [vmem:[%s1900_s0] ss:$20 sps:$4 sm:$0xff]   ;;  %v1352_v33 = vld [vmem:[%s1900_s0 + $0x4] ss:$20 sps:$4 sm:$0xff]   ;;  %v1353_v34 = vld [vmem:[%s1900_s0 + $0x8] ss:$20 sps:$4 sm:$0xff]  }
   0xe   :  { %1215 = vmatprep.subr.bf16.mxu1 %v1331_v13  ;;  %651 = vmatprep.mubr.bf16.mxu0 %v1352_v33  ;;  %v1359_v38 = vld [vmem:[%s1900_s0 + $0x34] ss:$20 sps:$4 sm:$0xff]   ;;  %v1362_v40 = vld [vmem:[%s1900_s0 + $0x30] ss:$20 sps:$4 sm:$0xff]   ;;  %v1368_v45 = vld [vmem:[%s1900_s0 + $0x58] ss:$20 sps:$4 sm:$0xff]  }
   0xf   :  { %v1361_v39 = vld [vmem:[%s1900_s0 + $0x28] ss:$20 sps:$4 sm:$0xff]   ;;  %v1367_v44 = vld [vmem:[%s1900_s0 + $0x50] ss:$20 sps:$4 sm:$0xff]   ;;  %v1374_v50 = vld [vmem:[%s1900_s0 + $0x78] ss:$20 sps:$4 sm:$0xff]  }
  0x10   :  { %1152 = vmatpush3.bf16.msra.mxu0 %v1332_v14  ;;  %v1363_v41 = vld [vmem:[%s1900_s0 + $0x54] ss:$20 sps:$4 sm:$0xff]   ;;  %v1365_v43 = vld [vmem:[%s1900_s0 + $0x5c] ss:$20 sps:$4 sm:$0xff]   ;;  %v1372_v48 = vld [vmem:[%s1900_s0 + $0x84] ss:$20 sps:$4 sm:$0xff]  }
  0x11   :  { %1216 = vmatpush3.bf16.msra.mxu1 %v1333_v15  ;;  %1153 = vmatprep.subr.bf16.mxu0 %v1334_v16  ;;  %v1382_v46 = vld [vmem:[%s1899_s1 + $0x110] sm:$0xff]   ;;  %v1395_v49 = vld [vmem:[%s1899_s1 + $0x118] sm:$0xff]   ;;  %v1378_v53 = vld [vmem:[%s1900_s0 + $0xac] ss:$20 sps:$4 sm:$0xff]   ;;  %v1410_v12 = vmov 0.0  }
  0x12   :  { %1217 = vmatprep.subr.bf16.mxu1 %v1335_v17  ;;  %v1370_v47 = vld [vmem:[%s1900_s0 + $0x7c] ss:$20 sps:$4 sm:$0xff]   ;;  %v1375_v51 = vld [vmem:[%s1900_s0 + $0x80] ss:$20 sps:$4 sm:$0xff]   ;;  %v1376_v52 = vld [vmem:[%s1900_s0 + $0xa4] ss:$20 sps:$4 sm:$0xff]  }
  0x13   :  { %v1380_v54 = vld [vmem:[%s1900_s0 + $0xa0] ss:$20 sps:$4 sm:$0xff]   ;;  %v1381_v55 = vld [vmem:[%s1900_s0 + $0xa8] ss:$20 sps:$4 sm:$0xff]   ;;  %v1388_v59 = vld [vmem:[%s1900_s0 + $0xd0] ss:$20 sps:$4 sm:$0xff]  }
  0x14   :  { %1154 = vmatpush3.bf16.msra.mxu0 %v1336_v18  ;;  %v1383_v56 = vld [vmem:[%s1900_s0 + $0xcc] ss:$20 sps:$4 sm:$0xff]   ;;  %v1385_v57 = vld [vmem:[%s1900_s0 + $0xd4] ss:$20 sps:$4 sm:$0xff]   ;;  %v1391_v61 = vld [vmem:[%s1900_s0 + $0xfc] ss:$20 sps:$4 sm:$0xff]  }
  0x15   :  { %1218 = vmatpush3.bf16.msra.mxu1 %v1337_v19  ;;  %1155 = vmatprep.subr.bf16.mxu0 %v1338_v20  ;;  %v1387_v58 = vld [vmem:[%s1900_s0 + $0xc8] ss:$20 sps:$4 sm:$0xff]   ;;  %v1393_v62 = vld [vmem:[%s1900_s0 + $0xf0] ss:$20 sps:$4 sm:$0xff]   ;;  %v1394_v63 = vld [vmem:[%s1900_s0 + $0xf8] ss:$20 sps:$4 sm:$0xff]  }
  0x16   :  { %1219 = vmatprep.subr.bf16.mxu1 %v1339_v21  ;;  %v1389_v60 = vld [vmem:[%s1900_s0 + $0xf4] ss:$20 sps:$4 sm:$0xff]   ;;  %v1396_v0 = vld [vmem:[%s1900_s0 + $0x11c] ss:$20 sps:$4 sm:$0xff]   ;;  %v1398_v1 = vld [vmem:[%s1900_s0 + $0x124] ss:$20 sps:$4 sm:$0xff]  }
  0x17   :  { %v1400_v2 = vld [vmem:[%s1900_s0 + $0x118] ss:$20 sps:$4 sm:$0xff]   ;;  %v1401_v3 = vld [vmem:[%s1900_s0 + $0x120] ss:$20 sps:$4 sm:$0xff]   ;;  %v1402_v4 = vld [vmem:[%s1900_s0 + $0x10] ss:$20 sps:$4 sm:$0xff]  }
  0x18   :  { %1156 = vmatpush3.bf16.msra.mxu0 %v1340_v22  ;;  %v1403_v5 = vld [vmem:[%s1900_s0 + $0xb0] ss:$20 sps:$4 sm:$0xff]   ;;  %v1404_v6 = vld [vmem:[%s1900_s0 + $0x38] ss:$20 sps:$4 sm:$0xff]   ;;  %v1406_v8 = vld [vmem:[%s1900_s0 + $0x60] ss:$20 sps:$4 sm:$0xff]  }
  0x19   :  { %1220 = vmatpush3.bf16.msra.mxu1 %v1341_v23  ;;  %1157 = vmatprep.subr.bf16.mxu0 %v1342_v24  ;;  %v1405_v7 = vld [vmem:[%s1900_s0 + $0xd8] ss:$20 sps:$4 sm:$0xff]   ;;  %v1407_v9 = vld [vmem:[%s1900_s0 + $0x100] ss:$20 sps:$4 sm:$0xff]   ;;  %v1408_v10 = vld [vmem:[%s1900_s0 + $0x88] ss:$20 sps:$4 sm:$0xff]  }
  0x1a   :  { %1221 = vmatprep.subr.bf16.mxu1 %v1343_v25  ;;  %v1409_v11 = vld [vmem:[%s1900_s0 + $0x128] ss:$20 sps:$4 sm:$0xff]   ;;  %28 = vst.msk [vmem:[#allocation2 + $0x10] sm:$0xff] %vm25_vm0, %v1410_v12  ;;  %26 = vst.msk [vmem:[#allocation2] sm:$0xff] %vm25_vm0, %v1410_v12 }
  0x1b   :  { %27 = vst.msk [vmem:[#allocation2 + $0x8] sm:$0xff] %vm25_vm0, %v1410_v12  ;;  %29 = vst.msk [vmem:[#allocation2 + $0x18] sm:$0xff] %vm25_vm0, %v1410_v12 }
  0x1c   :  { %1158 = vmatpush3.bf16.msra.mxu0 %v1344_v26  ;;  %30 = vst.msk [vmem:[#allocation2 + $0x20] sm:$0xff] %vm25_vm0, %v1410_v12  ;;  %31 = vst.msk [vmem:[#allocation2 + $0x28] sm:$0xff] %vm25_vm0, %v1410_v12 }
  0x1d   :  { %1222 = vmatpush3.bf16.msra.mxu1 %v1345_v27  ;;  %1159 = vmatprep.subr.bf16.mxu0 %v1346_v28  ;;  %32 = vst.msk [vmem:[#allocation2 + $0x30] sm:$0xff] %vm25_vm0, %v1410_v12  ;;  %33 = vst.msk [vmem:[#allocation2 + $0x38] sm:$0xff] %vm25_vm0, %v1410_v12 }
  0x1e   :  { %1223 = vmatprep.subr.bf16.mxu1 %v1347_v29  ;;  %34 = vst.msk [vmem:[#allocation2 + $0x40] sm:$0xff] %vm25_vm0, %v1410_v12  ;;  %35 = vst.msk [vmem:[#allocation2 + $0x48] sm:$0xff] %vm25_vm0, %v1410_v12 }
  0x1f   :  { %36 = vst.msk [vmem:[#allocation2 + $0x50] sm:$0xff] %vm25_vm0, %v1410_v12  ;;  %37 = vst.msk [vmem:[#allocation2 + $0x58] sm:$0xff] %vm25_vm0, %v1410_v12 }
  0x20   :  { %1160 = vmatpush3.bf16.msra.mxu0 %v1348_v30  ;;  %38 = vst.msk [vmem:[#allocation2 + $0x60] sm:$0xff] %vm25_vm0, %v1410_v12  ;;  %39 = vst.msk [vmem:[#allocation2 + $0x68] sm:$0xff] %vm25_vm0, %v1410_v12 }
  0x21   :  { %1224 = vmatpush3.bf16.msra.mxu1 %v1349_v31  ;;  %1285 = vmatprep.subr.bf16.mxu0 %v1356_v36  ;;  %40 = vst.msk [vmem:[#allocation2 + $0x70] sm:$0xff] %vm25_vm0, %v1410_v12  ;;  %41 = vst.msk [vmem:[#allocation2 + $0x78] sm:$0xff] %vm25_vm0, %v1410_v12 }
  0x22   :  { %1309 = vmatprep.subr.bf16.mxu1 %v1356_v36 }
  0x23   :  { %652 = vmatmul.mubr.bf16.vlgmr.msra.gmra.mrb[0].mxu0 %v1350_v32 }
  0x24   :  { %749 = vmatmul.mubr.bf16.vlgmr.msra.gmra.mrb[0].mxu1 %v1353_v34  ;;  %1286 = vmatpush3.bf16.msra.mxu0 %v1356_v36 }
  0x25   :  { %1313 = vmatpush3.bf16.msra.mxu1 %v1356_v36  ;;  %659 = vmatprep.mubr.bf16.mxu0 %v1357_v37 }
  0x26   :  { %756 = vmatprep.mubr.bf16.mxu1 %v1359_v38  ;;  %1287 = vmatprep.subr.bf16.mxu0 %v1369_v42 }
  0x27   :  { %1310 = vmatprep.subr.bf16.mxu1 %v1369_v42 }
  0x28   :  { %1288 = vmatpush3.bf16.msra.mxu0 %v1369_v42 }
  0x29   :  { %1314 = vmatpush3.bf16.msra.mxu1 %v1369_v42  ;;  %1289 = vmatprep.subr.bf16.mxu0 %v1382_v46 }
  0x2a   :  { %1311 = vmatprep.subr.bf16.mxu1 %v1382_v46 }
  0x2b   :  { %660 = vmatmul.mubr.bf16.gmra.mrb[4].mxu0 %v1361_v39 }
  0x2c   :  { %757 = vmatmul.mubr.bf16.gmra.mrb[4].mxu1 %v1362_v40  ;;  %667 = vmatprep.mubr.bf16.mxu0 %v1363_v41 }
  0x2d   :  { %764 = vmatprep.mubr.bf16.mxu1 %v1365_v43  ;;  %1290 = vmatpush3.bf16.msra.mxu0 %v1382_v46 }
  0x2e   :  { %1315 = vmatpush3.bf16.msra.mxu1 %v1382_v46  ;;  %1291 = vmatprep.subr.bf16.mxu0 %v1395_v49 }
  0x2f   :  { %1312 = vmatprep.subr.bf16.mxu1 %v1395_v49 }
  0x31   :  { %1292 = vmatpush3.bf16.msra.mxu0 %v1395_v49 }
  0x32   :  { %1316 = vmatpush3.bf16.msra.mxu1 %v1395_v49 }
  0x33   :  { %668 = vmatmul.mubr.bf16.gmra.mrb[8].mxu0 %v1367_v44 }
  0x34   :  { %765 = vmatmul.mubr.bf16.gmra.mrb[8].mxu1 %v1368_v45  ;;  %675 = vmatprep.mubr.bf16.mxu0 %v1370_v47 }
  0x35   :  { %772 = vmatprep.mubr.bf16.mxu1 %v1372_v48 }
  0x3b   :  { %676 = vmatmul.mubr.bf16.gmra.mrb[12].mxu0 %v1374_v50 }
  0x3c   :  { %773 = vmatmul.mubr.bf16.gmra.mrb[12].mxu1 %v1375_v51  ;;  %683 = vmatprep.mubr.bf16.mxu0 %v1376_v52 }
  0x3d   :  { %780 = vmatprep.mubr.bf16.mxu1 %v1378_v53 }
  0x43   :  { %684 = vmatmul.mubr.bf16.gmra.mrb[16].mxu0 %v1380_v54 }
  0x44   :  { %781 = vmatmul.mubr.bf16.gmra.mrb[16].mxu1 %v1381_v55  ;;  %691 = vmatprep.mubr.bf16.mxu0 %v1383_v56 }
  0x45   :  { %788 = vmatprep.mubr.bf16.mxu1 %v1385_v57 }
  0x4b   :  { %692 = vmatmul.mubr.bf16.gmra.mrb[20].mxu0 %v1387_v58 }
  0x4c   :  { %789 = vmatmul.mubr.bf16.gmra.mrb[20].mxu1 %v1388_v59  ;;  %699 = vmatprep.mubr.bf16.mxu0 %v1389_v60 }
  0x4d   :  { %796 = vmatprep.mubr.bf16.mxu1 %v1391_v61 }
  0x53   :  { %700 = vmatmul.mubr.bf16.gmra.mrb[24].mxu0 %v1393_v62 }
  0x54   :  { %797 = vmatmul.mubr.bf16.gmra.mrb[24].mxu1 %v1394_v63  ;;  %707 = vmatprep.mubr.bf16.mxu0 %v1396_v0 }
  0x55   :  { %804 = vmatprep.mubr.bf16.mxu1 %v1398_v1 }
  0x5b   :  { %708 = vmatmul.mubr.bf16.gmra.mrb[28].mxu0 %v1400_v2 }
  0x5c   :  { %805 = vmatmul.mubr.bf16.gmra.mrb[28].mxu1 %v1401_v3  ;;  %1293 = vmatprep.mubr.msk.bf16.mxu0 %vm25_vm0, %v1402_v4 }
  0x5d   :  { %1301 = vmatprep.mubr.msk.bf16.mxu1 %vm25_vm0, %v1403_v5 }
  0x63   :  { %1294 = vmatmul.mubr.msk.bf16.vlgmr.msra.gmra.mrb[32].mxu0 %vm25_vm0, %v1404_v6 }
  0x64   :  { %1302 = vmatmul.mubr.msk.bf16.vlgmr.msra.gmra.mrb[32].mxu1 %vm25_vm0, %v1405_v7  ;;  %1297 = vmatprep.mubr.msk.bf16.mxu0 %vm25_vm0, %v1406_v8 }
  0x65   :  { %1305 = vmatprep.mubr.msk.bf16.mxu1 %vm25_vm0, %v1407_v9 }
  0x6b   :  { %1298 = vmatmul.mubr.msk.bf16.gmra.mrb[36].mxu0 %vm25_vm0, %v1408_v10 }
  0x6c   :  { %1306 = vmatmul.mubr.msk.bf16.gmra.mrb[36].mxu1 %vm25_vm0, %v1409_v11 }
  0xf6   :  { %v1161_v13 = vpop.f32.mrb[0].mxu0 }
  0xf7   :  { %v1225_v14 = vpop.f32.mrb[0].mxu1  ;;  %v1162_v15 = vpop.f32.mrb[1].mxu0 }
  0xf8   :  { %v1163_v16 = vadd.f32 %v1162_v15, %v1161_v13  ;;  %v1226_v17 = vpop.f32.mrb[1].mxu1  ;;  %v1164_v18 = vpop.f32.mrb[2].mxu0 }
  0xf9   :  { %v1227_v19 = vadd.f32 %v1226_v17, %v1225_v14  ;;  %v1228_v20 = vpop.f32.mrb[2].mxu1  ;;  %v1165_v21 = vpop.f32.mrb[3].mxu0 }
  0xfa   :  { %v1166_v22 = vadd.f32 %v1165_v21, %v1164_v18  ;;  %v1229_v23 = vpop.f32.mrb[3].mxu1 }
  0xfb   :  { %v1230_v24 = vadd.f32 %v1229_v23, %v1228_v20  ;;  %v1693_v25 = vadd.f32 %v1227_v19, %v1163_v16 }
  0xfd   :  { %v1695_v26 = vadd.f32 %v1230_v24, %v1166_v22 }
  0xfe   :  { %v1167_v27 = vpop.f32.mrb[4].mxu0 }
  0xff   :  { %v1231_v28 = vpop.f32.mrb[4].mxu1  ;;  %v1168_v29 = vpop.f32.mrb[5].mxu0 }
 0x100   :  { %v1169_v30 = vadd.f32 %v1168_v29, %v1167_v27  ;;  %v1232_v31 = vpop.f32.mrb[5].mxu1  ;;  %v1170_v32 = vpop.f32.mrb[6].mxu0 }
 0x101   :  { %v1233_v33 = vadd.f32 %v1232_v31, %v1231_v28  ;;  %v1234_v34 = vpop.f32.mrb[6].mxu1  ;;  %v1171_v35 = vpop.f32.mrb[7].mxu0 }
 0x102   :  { %v1172_v36 = vadd.f32 %v1171_v35, %v1170_v32  ;;  %v1235_v37 = vpop.f32.mrb[7].mxu1 }
 0x103   :  { %v1236_v38 = vadd.f32 %v1235_v37, %v1234_v34  ;;  %v1697_v39 = vadd.f32 %v1233_v33, %v1169_v30 }
 0x105   :  { %v1699_v40 = vadd.f32 %v1236_v38, %v1172_v36 }
 0x106   :  { %v1173_v41 = vpop.f32.mrb[8].mxu0 }
 0x107   :  { %v1237_v42 = vpop.f32.mrb[8].mxu1  ;;  %v1174_v43 = vpop.f32.mrb[9].mxu0 }
 0x108   :  { %v1175_v44 = vadd.f32 %v1174_v43, %v1173_v41  ;;  %v1238_v45 = vpop.f32.mrb[9].mxu1  ;;  %v1176_v46 = vpop.f32.mrb[10].mxu0 }
 0x109   :  { %v1239_v47 = vadd.f32 %v1238_v45, %v1237_v42  ;;  %v1240_v48 = vpop.f32.mrb[10].mxu1  ;;  %v1177_v49 = vpop.f32.mrb[11].mxu0 }
 0x10a   :  { %v1178_v50 = vadd.f32 %v1177_v49, %v1176_v46  ;;  %v1241_v51 = vpop.f32.mrb[11].mxu1 }
 0x10b   :  { %v1242_v52 = vadd.f32 %v1241_v51, %v1240_v48  ;;  %v1701_v53 = vadd.f32 %v1239_v47, %v1175_v44 }
 0x10d   :  { %v1703_v54 = vadd.f32 %v1242_v52, %v1178_v50 }
 0x10e   :  { %v1179_v55 = vpop.f32.mrb[12].mxu0 }
 0x10f   :  { %v1243_v56 = vpop.f32.mrb[12].mxu1  ;;  %v1180_v57 = vpop.f32.mrb[13].mxu0 }
 0x110   :  { %v1181_v58 = vadd.f32 %v1180_v57, %v1179_v55  ;;  %v1244_v59 = vpop.f32.mrb[13].mxu1  ;;  %v1182_v60 = vpop.f32.mrb[14].mxu0 }
 0x111   :  { %v1245_v61 = vadd.f32 %v1244_v59, %v1243_v56  ;;  %v1246_v62 = vpop.f32.mrb[14].mxu1  ;;  %v1183_v63 = vpop.f32.mrb[15].mxu0 }
 0x112   :  { %v1184_v0 = vadd.f32 %v1183_v63, %v1182_v60  ;;  %v1247_v1 = vpop.f32.mrb[15].mxu1 }
 0x113   :  { %v1248_v2 = vadd.f32 %v1247_v1, %v1246_v62  ;;  %v1705_v3 = vadd.f32 %v1245_v61, %v1181_v58 }
 0x115   :  { %v1707_v4 = vadd.f32 %v1248_v2, %v1184_v0 }
 0x116   :  { %v1185_v5 = vpop.f32.mrb[16].mxu0 }
 0x117   :  { %v1249_v6 = vpop.f32.mrb[16].mxu1  ;;  %v1186_v7 = vpop.f32.mrb[17].mxu0 }
 0x118   :  { %v1187_v8 = vadd.f32 %v1186_v7, %v1185_v5  ;;  %v1250_v9 = vpop.f32.mrb[17].mxu1  ;;  %v1188_v10 = vpop.f32.mrb[18].mxu0  ;;  %v44_v5 = vld [vmem:[#allocation2 + $0x10] sm:$0xff] }
 0x119   :  { %v1251_v11 = vadd.f32 %v1250_v9, %v1249_v6  ;;  %v1252_v12 = vpop.f32.mrb[18].mxu1  ;;  %v1189_v13 = vpop.f32.mrb[19].mxu0 }
 0x11a   :  { %v1190_v14 = vadd.f32 %v1189_v13, %v1188_v10  ;;  %v1253_v15 = vpop.f32.mrb[19].mxu1  ;;  %v42_v10 = vld [vmem:[#allocation2] sm:$0xff] }
 0x11b   :  { %v1254_v16 = vadd.f32 %v1253_v15, %v1252_v12  ;;  %v783_v17 = vadd.f32 %v1251_v11, %v1187_v8  ;;  %v52_v8 = vld [vmem:[#allocation2 + $0x50] sm:$0xff] }
 0x11d   :  { %v1709_v18 = vadd.f32 %v1254_v16, %v1190_v14  ;;  %v50_v14 = vld [vmem:[#allocation2 + $0x40] sm:$0xff]  ;;  %v45_v16 = vld [vmem:[#allocation2 + $0x18] sm:$0xff] }
 0x11e   :  { %v1191_v19 = vpop.f32.mrb[20].mxu0 }
 0x11f   :  { %v1255_v20 = vpop.f32.mrb[20].mxu1  ;;  %v1192_v21 = vpop.f32.mrb[21].mxu0 }
 0x120   :  { %v1193_v22 = vadd.f32 %v1192_v21, %v1191_v19  ;;  %v1256_v23 = vpop.f32.mrb[21].mxu1  ;;  %v1194_v24 = vpop.f32.mrb[22].mxu0 }
 0x121   :  { %v1257_v27 = vadd.f32 %v1256_v23, %v1255_v20  ;;  %v1258_v28 = vpop.f32.mrb[22].mxu1  ;;  %v1195_v29 = vpop.f32.mrb[23].mxu0  ;;  %v53_v23 = vld [vmem:[#allocation2 + $0x58] sm:$0xff] }
 0x122   :  { %v1196_v30 = vadd.f32 %v1195_v29, %v1194_v24  ;;  %v1259_v31 = vpop.f32.mrb[23].mxu1 }
 0x123   :  { %v1260_v32 = vadd.f32 %v1259_v31, %v1258_v28  ;;  %v791_v33 = vadd.f32 %v1257_v27, %v1193_v22  ;;  %v43_v27 = vld [vmem:[#allocation2 + $0x8] sm:$0xff] }
 0x125   :  { %v794_v34 = vadd.f32 %v1260_v32, %v1196_v30  ;;  %v51_v32 = vld [vmem:[#allocation2 + $0x48] sm:$0xff] }
 0x126   :  { %v1197_v35 = vpop.f32.mrb[24].mxu0 }
 0x127   :  { %v1261_v36 = vpop.f32.mrb[24].mxu1  ;;  %v1198_v37 = vpop.f32.mrb[25].mxu0 }
 0x128   :  { %v1199_v38 = vadd.f32 %v1198_v37, %v1197_v35  ;;  %v1262_v41 = vpop.f32.mrb[25].mxu1  ;;  %v1200_v42 = vpop.f32.mrb[26].mxu0 }
 0x129   :  { %v1263_v43 = vadd.f32 %v1262_v41, %v1261_v36  ;;  %v1264_v44 = vpop.f32.mrb[26].mxu1  ;;  %v1201_v45 = vpop.f32.mrb[27].mxu0 }
 0x12a   :  { %v1202_v46 = vadd.f32 %v1201_v45, %v1200_v42  ;;  %v1265_v47 = vpop.f32.mrb[27].mxu1  ;;  %v46_v42 = vld [vmem:[#allocation2 + $0x20] sm:$0xff] }
 0x12b   :  { %v1266_v48 = vadd.f32 %v1265_v47, %v1264_v44  ;;  %v1711_v49 = vadd.f32 %v1263_v43, %v1199_v38  ;;  %v56_v38 = vld [vmem:[#allocation2 + $0x70] sm:$0xff]  ;;  %v1734_v44 = vld [vmem:[%s1901_s2] ss:$0 sm:$0xff] }
 0x12c   :  { %v54_v47 = vld [vmem:[#allocation2 + $0x60] sm:$0xff] }
 0x12d   :  { %v1713_v50 = vadd.f32 %v1266_v48, %v1202_v46 }
 0x12e   :  { %v1203_v51 = vpop.f32.mrb[28].mxu0 }
 0x12f   :  { %v1267_v52 = vpop.f32.mrb[28].mxu1  ;;  %v1204_v55 = vpop.f32.mrb[29].mxu0 }
 0x130   :  { %v1205_v56 = vadd.f32 %v1204_v55, %v1203_v51  ;;  %v1268_v57 = vpop.f32.mrb[29].mxu1  ;;  %v1206_v58 = vpop.f32.mrb[30].mxu0  ;;  %v49_v51 = vld [vmem:[#allocation2 + $0x38] sm:$0xff] }
 0x131   :  { %v1269_v59 = vadd.f32 %v1268_v57, %v1267_v52  ;;  %v1270_v60 = vpop.f32.mrb[30].mxu1  ;;  %v1207_v61 = vpop.f32.mrb[31].mxu0  ;;  %v57_v57 = vld [vmem:[#allocation2 + $0x78] sm:$0xff] }
 0x132   :  { %v1208_v62 = vadd.f32 %v1207_v61, %v1206_v58  ;;  %v1271_v63 = vpop.f32.mrb[31].mxu1 }
 0x133   :  { %v1272_v0 = vadd.f32 %v1271_v63, %v1270_v60  ;;  %v807_v1 = vadd.f32 %v1269_v59, %v1205_v56  ;;  %v47_v59 = vld [vmem:[#allocation2 + $0x28] sm:$0xff] }
 0x135   :  { %v1715_v2 = vadd.f32 %v1272_v0, %v1208_v62  ;;  %v1742_v62 = vld [vmem:[%s1902_s3] ss:$0 sm:$0xff] }
 0x136   :  { %v1295_v6 = vpop.f32.mrb[32].mxu0 }
 0x137   :  { %v856_v7 = vadd.f32 %v1295_v6, %v1697_v39  ;;  %v1303_v9 = vpop.f32.mrb[32].mxu1  ;;  %v847_v11 = vpop.f32.mrb[33].mxu0  ;;  %v1009_v6 = vld [vmem:[%s1903_s4 + $0x10] sm:$0xff] }
 0x138   :  { %v888_v12 = vadd.f32 %v1303_v9, %v791_v33  ;;  %v848_v13 = vadd.f32 %v847_v11, %v1693_v25  ;;  %v879_v15 = vpop.f32.mrb[33].mxu1  ;;  %v1296_v19 = vpop.f32.mrb[34].mxu0 }
 0x139   :  { %v912_v20 = vadd.f32 %v856_v7, %v44_v5  ;;  %v880_v21 = vadd.f32 %v879_v15, %v783_v17  ;;  %v859_v22 = vadd.f32 %v1296_v19, %v1699_v40  ;;  %v1304_v24 = vpop.f32.mrb[34].mxu1  ;;  %v850_v28 = vpop.f32.mrb[35].mxu0  ;;  %v55_v5 = vld [vmem:[#allocation2 + $0x68] sm:$0xff] }
 0x13a   :  { %v920_v39 = vadd.f32 %v888_v12, %v52_v8  ;;  %v910_v29 = vadd.f32 %v848_v13, %v42_v10  ;;  %v891_v30 = vadd.f32 %v1304_v24, %v794_v34  ;;  %v851_v31 = vadd.f32 %v850_v28, %v1695_v26  ;;  %v882_v33 = vpop.f32.mrb[35].mxu1  ;;  %v48_v26 = vld [vmem:[#allocation2 + $0x30] sm:$0xff] }
 0x13b   :  { %928 = vst.msk [vmem:[#allocation2 + $0x10] sm:$0xff] %vm25_vm0, %v912_v20  ;;  %v918_v25 = vadd.f32 %v880_v21, %v50_v14  ;;  %v913_v35 = vadd.f32 %v859_v22, %v45_v16  ;;  %v883_v36 = vadd.f32 %v882_v33, %v1709_v18 }
 0x13c   :  { %936 = vst.msk [vmem:[#allocation2 + $0x50] sm:$0xff] %vm25_vm0, %v920_v39  ;;  %926 = vst.msk [vmem:[#allocation2] sm:$0xff] %vm25_vm0, %v910_v29  ;;  %v921_v40 = vadd.f32 %v891_v30, %v53_v23  ;;  %v911_v17 = vadd.f32 %v851_v31, %v43_v27  ;;  %v1015_v39 = vld [vmem:[%s1903_s4 + $0x40] sm:$0xff]  ;;  %v1010_v29 = vld [vmem:[%s1903_s4 + $0x18] sm:$0xff] }
 0x13d   :  { %934 = vst.msk [vmem:[#allocation2 + $0x40] sm:$0xff] %vm25_vm0, %v918_v25  ;;  %929 = vst.msk [vmem:[#allocation2 + $0x18] sm:$0xff] %vm25_vm0, %v913_v35  ;;  %v919_v34 = vadd.f32 %v883_v36, %v51_v32  ;;  %v1018_v36 = vld [vmem:[%s1903_s4 + $0x58] sm:$0xff] }
 0x13e   :  { %937 = vst.msk [vmem:[#allocation2 + $0x58] sm:$0xff] %vm25_vm0, %v921_v40  ;;  %927 = vst.msk [vmem:[#allocation2 + $0x8] sm:$0xff] %vm25_vm0, %v911_v17  ;;  %v1299_v37 = vpop.f32.mrb[36].mxu0  ;;  %v1008_v40 = vld [vmem:[%s1903_s4 + $0x8] sm:$0xff] }
 0x13f   :  { %935 = vst.msk [vmem:[#allocation2 + $0x48] sm:$0xff] %vm25_vm0, %v919_v34  ;;  %v872_v18 = vadd.f32 %v1299_v37, %v1705_v3  ;;  %v1307_v41 = vpop.f32.mrb[36].mxu1  ;;  %v863_v43 = vpop.f32.mrb[37].mxu0 }
 0x140   :  { %v904_v45 = vadd.f32 %v1307_v41, %v807_v1  ;;  %v864_v46 = vadd.f32 %v863_v43, %v1701_v53  ;;  %v895_v48 = vpop.f32.mrb[37].mxu1  ;;  %v1300_v52 = vpop.f32.mrb[38].mxu0 }
 0x141   :  { %v916_v55 = vadd.f32 %v872_v18, %v48_v26  ;;  %v896_v56 = vadd.f32 %v895_v48, %v1711_v49  ;;  %v875_v3 = vadd.f32 %v1300_v52, %v1707_v4  ;;  %v1308_v58 = vpop.f32.mrb[38].mxu1  ;;  %v866_v60 = vpop.f32.mrb[39].mxu0  ;;  %v1013_v52 = vld [vmem:[%s1903_s4 + $0x30] sm:$0xff] }
 0x142   :  { %v947_v61 = vld [vmem:[#allocation2 + $0x10] sm:$0xff]  ;;  %v924_v53 = vadd.f32 %v904_v45, %v56_v38  ;;  %v914_v63 = vadd.f32 %v864_v46, %v46_v42  ;;  %v907_v0 = vadd.f32 %v1308_v58, %v1715_v2  ;;  %v867_v1 = vadd.f32 %v866_v60, %v1703_v54  ;;  %v898_v49 = vpop.f32.mrb[39].mxu1  ;;  %v1016_v38 = vld [vmem:[%s1903_s4 + $0x48] sm:$0xff] }
 0x143   :  { %v970_v4 = vmul.f32 %v1734_v44, %v947_v61  ;;  %v955_v7 = vld [vmem:[#allocation2 + $0x50] sm:$0xff]  ;;  %v945_v8 = vld [vmem:[#allocation2] sm:$0xff]  ;;  %932 = vst.msk [vmem:[#allocation2 + $0x30] sm:$0xff] %vm25_vm0, %v916_v55  ;;  %v922_v9 = vadd.f32 %v896_v56, %v54_v47  ;;  %v917_v10 = vadd.f32 %v875_v3, %v49_v51  ;;  %v899_v11 = vadd.f32 %v898_v49, %v1713_v50 }
 0x144   :  { %v978_v2 = vmul.f32 %v1734_v44, %v955_v7  ;;  %v1017_v54 = vld [vmem:[%s1903_s4 + $0x50] sm:$0xff]  ;;  %v968_v12 = vmul.f32 %v1734_v44, %v945_v8  ;;  %v953_v13 = vld [vmem:[#allocation2 + $0x40] sm:$0xff]  ;;  %v948_v14 = vld [vmem:[#allocation2 + $0x18] sm:$0xff]  ;;  %940 = vst.msk [vmem:[#allocation2 + $0x70] sm:$0xff] %vm25_vm0, %v924_v53  ;;  %v925_v15 = vadd.f32 %v907_v0, %v57_v57  ;;  %v915_v16 = vadd.f32 %v867_v1, %v47_v59 }
 0x145   :  { %930 = vst.msk [vmem:[#allocation2 + $0x20] sm:$0xff] %vm25_vm0, %v914_v63  ;;  %v993_v19 = vadd.f32 %v1742_v62, %v970_v4  ;;  %v1007_v50 = vld [vmem:[%s1903_s4] sm:$0xff]  ;;  %v976_v20 = vmul.f32 %v1734_v44, %v953_v13  ;;  %v971_v21 = vmul.f32 %v1734_v44, %v948_v14  ;;  %v956_v22 = vld [vmem:[#allocation2 + $0x58] sm:$0xff]  ;;  %v946_v23 = vld [vmem:[#allocation2 + $0x8] sm:$0xff]  ;;  %v923_v24 = vadd.f32 %v899_v11, %v55_v5 }
 0x146   :  { %938 = vst.msk [vmem:[#allocation2 + $0x60] sm:$0xff] %vm25_vm0, %v922_v9  ;;  %933 = vst.msk [vmem:[#allocation2 + $0x38] sm:$0xff] %vm25_vm0, %v917_v10  ;;  %v1001_v27 = vadd.f32 %v1742_v62, %v978_v2  ;;  %v991_v28 = vadd.f32 %v1742_v62, %v968_v12  ;;  %v979_v30 = vmul.f32 %v1734_v44, %v956_v22  ;;  %v954_v32 = vld [vmem:[#allocation2 + $0x48] sm:$0xff]  ;;  %v1021_v57 = vld [vmem:[%s1903_s4 + $0x70] sm:$0xff] }
 0x147   :  { %v969_v31 = vmul.f32 %v1734_v44, %v946_v23  ;;  %941 = vst.msk [vmem:[#allocation2 + $0x78] sm:$0xff] %vm25_vm0, %v925_v15  ;;  %931 = vst.msk [vmem:[#allocation2 + $0x28] sm:$0xff] %vm25_vm0, %v915_v16  ;;  %v1025_v33 = vadd.f32 %v1009_v6, %v993_v19  ;;  %v999_v25 = vadd.f32 %v1742_v62, %v976_v20  ;;  %v1011_v53 = vld [vmem:[%s1903_s4 + $0x20] sm:$0xff]  ;;  %v1014_v7 = vld [vmem:[%s1903_s4 + $0x38] sm:$0xff] }
 0x148   :  { %v994_v35 = vadd.f32 %v1742_v62, %v971_v21  ;;  %v977_v17 = vmul.f32 %v1734_v44, %v954_v32  ;;  %939 = vst.msk [vmem:[#allocation2 + $0x68] sm:$0xff] %vm25_vm0, %v923_v24  ;;  %v1033_v34 = vadd.f32 %v1017_v54, %v1001_v27  ;;  %v1023_v26 = vadd.f32 %v1007_v50, %v991_v28  ;;  %v1019_v6 = vld [vmem:[%s1903_s4 + $0x60] sm:$0xff]  ;;  %v1022_v12 = vld [vmem:[%s1903_s4 + $0x78] sm:$0xff]  ;;  %v1012_v13 = vld [vmem:[%s1903_s4 + $0x28] sm:$0xff] }
 0x149   :  { %v1002_v37 = vadd.f32 %v1742_v62, %v979_v30  ;;  %v992_v18 = vadd.f32 %v1742_v62, %v969_v31  ;;  %1041 = vst.msk [vmem:[%s1904_s5 + $0x10] sm:$0xff] %vm25_vm0, %v1025_v33  ;;  %v1031_v41 = vadd.f32 %v1015_v39, %v999_v25  ;;  %v1020_v20 = vld [vmem:[%s1903_s4 + $0x68] sm:$0xff] }
 0x14a   :  { %v1026_v42 = vadd.f32 %v1010_v29, %v994_v35  ;;  %v1000_v43 = vadd.f32 %v1742_v62, %v977_v17  ;;  %1049 = vst.msk [vmem:[%s1904_s5 + $0x50] sm:$0xff] %vm25_vm0, %v1033_v34  ;;  %1039 = vst.msk [vmem:[%s1904_s5] sm:$0xff] %vm25_vm0, %v1023_v26  ;;  %v951_v47 = vld [vmem:[#allocation2 + $0x30] sm:$0xff] }
 0x14b   :  { %v1034_v45 = vadd.f32 %v1018_v36, %v1002_v37  ;;  %v1024_v46 = vadd.f32 %v1008_v40, %v992_v18  ;;  %1047 = vst.msk [vmem:[%s1904_s5 + $0x40] sm:$0xff] %vm25_vm0, %v1031_v41  ;;  %v974_v51 = vmul.f32 %v1734_v44, %v951_v47  ;;  %v959_v55 = vld [vmem:[#allocation2 + $0x70] sm:$0xff] }
 0x14c   :  { %1042 = vst.msk [vmem:[%s1904_s5 + $0x18] sm:$0xff] %vm25_vm0, %v1026_v42  ;;  %v1032_v48 = vadd.f32 %v1016_v38, %v1000_v43  ;;  %v949_v56 = vld [vmem:[#allocation2 + $0x20] sm:$0xff]  ;;  %v982_v3 = vmul.f32 %v1734_v44, %v959_v55 }
 0x14d   :  { %1050 = vst.msk [vmem:[%s1904_s5 + $0x58] sm:$0xff] %vm25_vm0, %v1034_v45  ;;  %1040 = vst.msk [vmem:[%s1904_s5 + $0x8] sm:$0xff] %vm25_vm0, %v1024_v46  ;;  %v972_v58 = vmul.f32 %v1734_v44, %v949_v56  ;;  %v957_v59 = vld [vmem:[#allocation2 + $0x60] sm:$0xff]  ;;  %v952_v60 = vld [vmem:[#allocation2 + $0x38] sm:$0xff]  ;;  %v997_v61 = vadd.f32 %v1742_v62, %v974_v51 }
 0x14e   :  { %1048 = vst.msk [vmem:[%s1904_s5 + $0x48] sm:$0xff] %vm25_vm0, %v1032_v48  ;;  %v980_v63 = vmul.f32 %v1734_v44, %v957_v59  ;;  %v975_v0 = vmul.f32 %v1734_v44, %v952_v60  ;;  %v960_v1 = vld [vmem:[#allocation2 + $0x78] sm:$0xff]  ;;  %v950_v5 = vld [vmem:[#allocation2 + $0x28] sm:$0xff]  ;;  %v1005_v49 = vadd.f32 %v1742_v62, %v982_v3 }
 0x14f   :  { %v995_v4 = vadd.f32 %v1742_v62, %v972_v58  ;;  %v983_v8 = vmul.f32 %v1734_v44, %v960_v1  ;;  %v973_v9 = vmul.f32 %v1734_v44, %v950_v5  ;;  %v958_v10 = vld [vmem:[#allocation2 + $0x68] sm:$0xff]  ;;  %v1029_v11 = vadd.f32 %v1013_v52, %v997_v61 }
 0x150   :  { %v1003_v2 = vadd.f32 %v1742_v62, %v980_v63  ;;  %v998_v54 = vadd.f32 %v1742_v62, %v975_v0  ;;  %v981_v14 = vmul.f32 %v1734_v44, %v958_v10  ;;  %v1037_v15 = vadd.f32 %v1021_v57, %v1005_v49 }
 0x151   :  { %v1027_v16 = vadd.f32 %v1011_v53, %v995_v4  ;;  %v1006_v19 = vadd.f32 %v1742_v62, %v983_v8  ;;  %v996_v50 = vadd.f32 %v1742_v62, %v973_v9  ;;  %1045 = vst.msk [vmem:[%s1904_s5 + $0x30] sm:$0xff] %vm25_vm0, %v1029_v11 }
 0x152   :  { %v1035_v21 = vadd.f32 %v1019_v6, %v1003_v2  ;;  %v1030_v22 = vadd.f32 %v1014_v7, %v998_v54  ;;  %v1004_v23 = vadd.f32 %v1742_v62, %v981_v14  ;;  %1053 = vst.msk [vmem:[%s1904_s5 + $0x70] sm:$0xff] %vm25_vm0, %v1037_v15 }
 0x153   :  { %1043 = vst.msk [vmem:[%s1904_s5 + $0x20] sm:$0xff] %vm25_vm0, %v1027_v16  ;;  %v1038_v44 = vadd.f32 %v1022_v12, %v1006_v19  ;;  %v1028_v24 = vadd.f32 %v1012_v13, %v996_v50 }
 0x154   :  { %1051 = vst.msk [vmem:[%s1904_s5 + $0x60] sm:$0xff] %vm25_vm0, %v1035_v21  ;;  %1046 = vst.msk [vmem:[%s1904_s5 + $0x38] sm:$0xff] %vm25_vm0, %v1030_v22  ;;  %v1036_v62 = vadd.f32 %v1020_v20, %v1004_v23 }
 0x155   :  { %1054 = vst.msk [vmem:[%s1904_s5 + $0x78] sm:$0xff] %vm25_vm0, %v1038_v44  ;;  %1044 = vst.msk [vmem:[%s1904_s5 + $0x28] sm:$0xff] %vm25_vm0, %v1028_v24 }
 0x156   :  { %1052 = vst.msk [vmem:[%s1904_s5 + $0x68] sm:$0xff] %vm25_vm0, %v1036_v62 }

// kernel: iresnet_forward_pallas.18
= control target key start
LH: loop header
LB: loop body
LE: loop exit
PB: predicated region body
PF: predicated region fallthrough
CT: control target
= control target key end

     0   :  { %vm22_vm0 = vcmask 523264   ;;  %v461_v1 = vmov 0.0   ;;  %s669_s1 = inlined_call_operand.vmem [shape: bf16[64,64], index: 1, kind: input, shape index: {}]   ;;  %s670_s0 = inlined_call_operand.vmem [shape: bf16[128,64], index: 0, kind: input, shape index: {}]   ;;  %s671_s2 = inlined_call_operand.vmem [shape: f32[1,64], index: 2, kind: input, shape index: {}]   ;;  %s672_s3 = inlined_call_operand.vmem [shape: f32[1,64], index: 3, kind: input, shape index: {}]   ;;  %s673_s4 = inlined_call_operand.vmem [shape: f32[128,64], index: 4, kind: output, shape index: {}]  }
   0x1   :  { %v449_v0 = vld [vmem:[%s669_s1] sm:$0xff]   ;;  %25 = vst.msk [vmem:[#allocation2 + $0x10] sm:$0xff] %vm22_vm0, %v461_v1  ;;  %23 = vst.msk [vmem:[#allocation2] sm:$0xff] %vm22_vm0, %v461_v1  ;;  %v450_v2 = vld [vmem:[%s669_s1 + $0x8] sm:$0xff]  }
   0x2   :  { %24 = vst.msk [vmem:[#allocation2 + $0x8] sm:$0xff] %vm22_vm0, %v461_v1  ;;  %26 = vst.msk [vmem:[#allocation2 + $0x18] sm:$0xff] %vm22_vm0, %v461_v1  ;;  %416 = vmatprep.subr.bf16.mxu0 %v449_v0  ;;  %440 = vmatprep.subr.bf16.mxu1 %v449_v0  ;;  %v451_v3 = vld [vmem:[%s669_s1 + $0x10] sm:$0xff]   ;;  %v453_v4 = vld [vmem:[%s670_s0] sm:$0xff]  }
   0x3   :  { %27 = vst.msk [vmem:[#allocation2 + $0x20] sm:$0xff] %vm22_vm0, %v461_v1  ;;  %28 = vst.msk [vmem:[#allocation2 + $0x28] sm:$0xff] %vm22_vm0, %v461_v1  ;;  %417 = vmatpush3.bf16.msra.mxu0 %v449_v0  ;;  %444 = vmatpush3.bf16.msra.mxu1 %v449_v0  ;;  %v454_v5 = vld [vmem:[%s670_s0 + $0x20] sm:$0xff]   ;;  %v452_v6 = vld [vmem:[%s669_s1 + $0x18] sm:$0xff]  }
   0x4   :  { %29 = vst.msk [vmem:[#allocation2 + $0x30] sm:$0xff] %vm22_vm0, %v461_v1  ;;  %30 = vst.msk [vmem:[#allocation2 + $0x38] sm:$0xff] %vm22_vm0, %v461_v1  ;;  %418 = vmatprep.subr.bf16.mxu0 %v450_v2  ;;  %441 = vmatprep.subr.bf16.mxu1 %v450_v2  ;;  %v455_v7 = vld [vmem:[%s670_s0 + $0x8] sm:$0xff]   ;;  %v457_v9 = vld [vmem:[%s670_s0 + $0x10] sm:$0xff]  }
   0x5   :  { %31 = vst.msk [vmem:[#allocation2 + $0x40] sm:$0xff] %vm22_vm0, %v461_v1  ;;  %32 = vst.msk [vmem:[#allocation2 + $0x48] sm:$0xff] %vm22_vm0, %v461_v1  ;;  %424 = vmatprep.mubr.msk.bf16.mxu0 %vm22_vm0, %v453_v4  ;;  %432 = vmatprep.mubr.msk.bf16.mxu1 %vm22_vm0, %v454_v5  ;;  %v456_v8 = vld [vmem:[%s670_s0 + $0x28] sm:$0xff]   ;;  %v458_v10 = vld [vmem:[%s670_s0 + $0x30] sm:$0xff]  }
   0x6   :  { %33 = vst.msk [vmem:[#allocation2 + $0x50] sm:$0xff] %vm22_vm0, %v461_v1  ;;  %34 = vst.msk [vmem:[#allocation2 + $0x58] sm:$0xff] %vm22_vm0, %v461_v1  ;;  %v459_v11 = vld [vmem:[%s670_s0 + $0x18] sm:$0xff]   ;;  %v558_v41 = vld [vmem:[%s671_s2] ss:$0 sm:$0xff] }
   0x7   :  { %35 = vst.msk [vmem:[#allocation2 + $0x60] sm:$0xff] %vm22_vm0, %v461_v1  ;;  %36 = vst.msk [vmem:[#allocation2 + $0x68] sm:$0xff] %vm22_vm0, %v461_v1  ;;  %419 = vmatpush3.bf16.msra.mxu0 %v450_v2  ;;  %445 = vmatpush3.bf16.msra.mxu1 %v450_v2  ;;  %v460_v12 = vld [vmem:[%s670_s0 + $0x38] sm:$0xff]   ;;  %v563_v53 = vld [vmem:[%s672_s3] ss:$0 sm:$0xff] }
   0x8   :  { %37 = vst.msk [vmem:[#allocation2 + $0x70] sm:$0xff] %vm22_vm0, %v461_v1  ;;  %38 = vst.msk [vmem:[#allocation2 + $0x78] sm:$0xff] %vm22_vm0, %v461_v1  ;;  %420 = vmatprep.subr.bf16.mxu0 %v451_v3  ;;  %442 = vmatprep.subr.bf16.mxu1 %v451_v3  ;;  %v41_v13 = vld [vmem:[#allocation2 + $0x10] sm:$0xff]  ;;  %v39_v15 = vld [vmem:[#allocation2] sm:$0xff] }
   0x9   :  { %v42_v19 = vld [vmem:[#allocation2 + $0x18] sm:$0xff]  ;;  %v40_v25 = vld [vmem:[#allocation2 + $0x8] sm:$0xff] }
   0xa   :  { %v43_v39 = vld [vmem:[#allocation2 + $0x20] sm:$0xff]  ;;  %v44_v50 = vld [vmem:[#allocation2 + $0x28] sm:$0xff] }
   0xb   :  { %421 = vmatpush3.bf16.msra.mxu0 %v451_v3  ;;  %446 = vmatpush3.bf16.msra.mxu1 %v451_v3  ;;  %v45_v37 = vld [vmem:[#allocation2 + $0x30] sm:$0xff]  ;;  %v46_v44 = vld [vmem:[#allocation2 + $0x38] sm:$0xff] }
   0xc   :  { %422 = vmatprep.subr.bf16.mxu0 %v452_v6  ;;  %443 = vmatprep.subr.bf16.mxu1 %v452_v6  ;;  %v47_v16 = vld [vmem:[#allocation2 + $0x40] sm:$0xff]  ;;  %v48_v26 = vld [vmem:[#allocation2 + $0x48] sm:$0xff] }
   0xd   :  { %v49_v14 = vld [vmem:[#allocation2 + $0x50] sm:$0xff]  ;;  %v50_v20 = vld [vmem:[#allocation2 + $0x58] sm:$0xff] }
   0xe   :  { %v51_v40 = vld [vmem:[#allocation2 + $0x60] sm:$0xff]  ;;  %v52_v51 = vld [vmem:[#allocation2 + $0x68] sm:$0xff] }
   0xf   :  { %423 = vmatpush3.bf16.msra.mxu0 %v452_v6  ;;  %447 = vmatpush3.bf16.msra.mxu1 %v452_v6  ;;  %v53_v38 = vld [vmem:[#allocation2 + $0x70] sm:$0xff]  ;;  %v54_v45 = vld [vmem:[#allocation2 + $0x78] sm:$0xff] }
  0x12   :  { %425 = vmatmul.mubr.msk.bf16.vlgmr.msra.gmra.mrb[0].mxu0 %vm22_vm0, %v455_v7  ;;  %433 = vmatmul.mubr.msk.bf16.vlgmr.msra.gmra.mrb[0].mxu1 %vm22_vm0, %v456_v8 }
  0x13   :  { %428 = vmatprep.mubr.msk.bf16.mxu0 %vm22_vm0, %v457_v9  ;;  %436 = vmatprep.mubr.msk.bf16.mxu1 %vm22_vm0, %v458_v10 }
  0x1a   :  { %429 = vmatmul.mubr.msk.bf16.gmra.mrb[4].mxu0 %vm22_vm0, %v459_v11  ;;  %437 = vmatmul.mubr.msk.bf16.gmra.mrb[4].mxu1 %vm22_vm0, %v460_v12 }
  0xe5   :  { %v426_v17 = vpop.f32.mrb[0].mxu0  ;;  %v434_v18 = vpop.f32.mrb[0].mxu1 }
  0xe6   :  { %v267_v21 = vadd.f32 %v426_v17, %v41_v13  ;;  %v275_v22 = vadd.f32 %v434_v18, %v49_v14  ;;  %v202_v23 = vpop.f32.mrb[1].mxu0  ;;  %v234_v24 = vpop.f32.mrb[1].mxu1 }
  0xe7   :  { %v265_v27 = vadd.f32 %v202_v23, %v39_v15  ;;  %v273_v28 = vadd.f32 %v234_v24, %v47_v16  ;;  %v427_v29 = vpop.f32.mrb[2].mxu0  ;;  %v435_v30 = vpop.f32.mrb[2].mxu1 }
  0xe8   :  { %283 = vst.msk [vmem:[#allocation2 + $0x10] sm:$0xff] %vm22_vm0, %v267_v21  ;;  %291 = vst.msk [vmem:[#allocation2 + $0x50] sm:$0xff] %vm22_vm0, %v275_v22  ;;  %v268_v31 = vadd.f32 %v427_v29, %v42_v19  ;;  %v276_v32 = vadd.f32 %v435_v30, %v50_v20  ;;  %v205_v33 = vpop.f32.mrb[3].mxu0  ;;  %v237_v34 = vpop.f32.mrb[3].mxu1 }
  0xe9   :  { %281 = vst.msk [vmem:[#allocation2] sm:$0xff] %vm22_vm0, %v265_v27  ;;  %289 = vst.msk [vmem:[#allocation2 + $0x40] sm:$0xff] %vm22_vm0, %v273_v28  ;;  %v266_v35 = vadd.f32 %v205_v33, %v40_v25  ;;  %v274_v36 = vadd.f32 %v237_v34, %v48_v26 }
  0xea   :  { %284 = vst.msk [vmem:[#allocation2 + $0x18] sm:$0xff] %vm22_vm0, %v268_v31  ;;  %292 = vst.msk [vmem:[#allocation2 + $0x58] sm:$0xff] %vm22_vm0, %v276_v32 }
  0xeb   :  { %282 = vst.msk [vmem:[#allocation2 + $0x8] sm:$0xff] %vm22_vm0, %v266_v35  ;;  %290 = vst.msk [vmem:[#allocation2 + $0x48] sm:$0xff] %vm22_vm0, %v274_v36 }
  0xed   :  { %v430_v42 = vpop.f32.mrb[4].mxu0  ;;  %v438_v43 = vpop.f32.mrb[4].mxu1 }
  0xee   :  { %v271_v46 = vadd.f32 %v430_v42, %v45_v37  ;;  %v279_v47 = vadd.f32 %v438_v43, %v53_v38  ;;  %v218_v48 = vpop.f32.mrb[5].mxu0  ;;  %v250_v49 = vpop.f32.mrb[5].mxu1 }
  0xef   :  { %v302_v52 = vld [vmem:[#allocation2 + $0x10] sm:$0xff]  ;;  %v269_v55 = vadd.f32 %v218_v48, %v43_v39  ;;  %v277_v56 = vadd.f32 %v250_v49, %v51_v40  ;;  %v431_v57 = vpop.f32.mrb[6].mxu0  ;;  %v439_v58 = vpop.f32.mrb[6].mxu1 }
  0xf0   :  { %v310_v54 = vld [vmem:[#allocation2 + $0x50] sm:$0xff]  ;;  %v325_v59 = vmul.f32 %v558_v41, %v302_v52  ;;  %v300_v61 = vld [vmem:[#allocation2] sm:$0xff]  ;;  %287 = vst.msk [vmem:[#allocation2 + $0x30] sm:$0xff] %vm22_vm0, %v271_v46  ;;  %295 = vst.msk [vmem:[#allocation2 + $0x70] sm:$0xff] %vm22_vm0, %v279_v47  ;;  %v272_v63 = vadd.f32 %v431_v57, %v46_v44  ;;  %v280_v0 = vadd.f32 %v439_v58, %v54_v45  ;;  %v221_v1 = vpop.f32.mrb[7].mxu0  ;;  %v253_v2 = vpop.f32.mrb[7].mxu1 }
  0xf1   :  { %v333_v60 = vmul.f32 %v558_v41, %v310_v54  ;;  %v308_v62 = vld [vmem:[#allocation2 + $0x40] sm:$0xff]  ;;  %v323_v3 = vmul.f32 %v558_v41, %v300_v61  ;;  %v303_v5 = vld [vmem:[#allocation2 + $0x18] sm:$0xff]  ;;  %285 = vst.msk [vmem:[#allocation2 + $0x20] sm:$0xff] %vm22_vm0, %v269_v55  ;;  %293 = vst.msk [vmem:[#allocation2 + $0x60] sm:$0xff] %vm22_vm0, %v277_v56  ;;  %v270_v7 = vadd.f32 %v221_v1, %v44_v50 }
  0xf2   :  { %v331_v4 = vmul.f32 %v558_v41, %v308_v62  ;;  %v311_v6 = vld [vmem:[#allocation2 + $0x58] sm:$0xff]  ;;  %v278_v8 = vadd.f32 %v253_v2, %v52_v51  ;;  %v348_v9 = vadd.f32 %v563_v53, %v325_v59  ;;  %v326_v11 = vmul.f32 %v558_v41, %v303_v5  ;;  %v301_v13 = vld [vmem:[#allocation2 + $0x8] sm:$0xff]  ;;  %288 = vst.msk [vmem:[#allocation2 + $0x38] sm:$0xff] %vm22_vm0, %v272_v63 }
  0xf3   :  { %v356_v10 = vadd.f32 %v563_v53, %v333_v60  ;;  %v334_v12 = vmul.f32 %v558_v41, %v311_v6  ;;  %v309_v14 = vld [vmem:[#allocation2 + $0x48] sm:$0xff]  ;;  %296 = vst.msk [vmem:[#allocation2 + $0x78] sm:$0xff] %vm22_vm0, %v280_v0  ;;  %v346_v15 = vadd.f32 %v563_v53, %v323_v3  ;;  %v324_v17 = vmul.f32 %v558_v41, %v301_v13 }
  0xf4   :  { %v354_v16 = vadd.f32 %v563_v53, %v331_v4  ;;  %v332_v18 = vmul.f32 %v558_v41, %v309_v14  ;;  %286 = vst.msk [vmem:[#allocation2 + $0x28] sm:$0xff] %vm22_vm0, %v270_v7  ;;  %294 = vst.msk [vmem:[#allocation2 + $0x68] sm:$0xff] %vm22_vm0, %v278_v8  ;;  %v349_v19 = vadd.f32 %v563_v53, %v326_v11 }
  0xf5   :  { %364 = vst.msk [vmem:[%s673_s4 + $0x10] sm:$0xff] %vm22_vm0, %v348_v9  ;;  %372 = vst.msk [vmem:[%s673_s4 + $0x50] sm:$0xff] %vm22_vm0, %v356_v10  ;;  %v357_v20 = vadd.f32 %v563_v53, %v334_v12  ;;  %v347_v21 = vadd.f32 %v563_v53, %v324_v17 }
  0xf6   :  { %362 = vst.msk [vmem:[%s673_s4] sm:$0xff] %vm22_vm0, %v346_v15  ;;  %370 = vst.msk [vmem:[%s673_s4 + $0x40] sm:$0xff] %vm22_vm0, %v354_v16  ;;  %v355_v22 = vadd.f32 %v563_v53, %v332_v18 }
  0xf7   :  { %365 = vst.msk [vmem:[%s673_s4 + $0x18] sm:$0xff] %vm22_vm0, %v349_v19  ;;  %373 = vst.msk [vmem:[%s673_s4 + $0x58] sm:$0xff] %vm22_vm0, %v357_v20  ;;  %v306_v23 = vld [vmem:[#allocation2 + $0x30] sm:$0xff] }
  0xf8   :  { %363 = vst.msk [vmem:[%s673_s4 + $0x8] sm:$0xff] %vm22_vm0, %v347_v21  ;;  %371 = vst.msk [vmem:[%s673_s4 + $0x48] sm:$0xff] %vm22_vm0, %v355_v22  ;;  %v314_v24 = vld [vmem:[#allocation2 + $0x70] sm:$0xff]  ;;  %v329_v25 = vmul.f32 %v558_v41, %v306_v23  ;;  %v304_v27 = vld [vmem:[#allocation2 + $0x20] sm:$0xff] }
  0xf9   :  { %v337_v26 = vmul.f32 %v558_v41, %v314_v24  ;;  %v312_v28 = vld [vmem:[#allocation2 + $0x60] sm:$0xff]  ;;  %v327_v29 = vmul.f32 %v558_v41, %v304_v27  ;;  %v307_v31 = vld [vmem:[#allocation2 + $0x38] sm:$0xff] }
  0xfa   :  { %v335_v30 = vmul.f32 %v558_v41, %v312_v28  ;;  %v315_v32 = vld [vmem:[#allocation2 + $0x78] sm:$0xff]  ;;  %v352_v33 = vadd.f32 %v563_v53, %v329_v25  ;;  %v330_v35 = vmul.f32 %v558_v41, %v307_v31 }
  0xfb   :  { %v360_v34 = vadd.f32 %v563_v53, %v337_v26  ;;  %v338_v36 = vmul.f32 %v558_v41, %v315_v32  ;;  %v305_v37 = vld [vmem:[#allocation2 + $0x28] sm:$0xff]  ;;  %v350_v39 = vadd.f32 %v563_v53, %v327_v29 }
  0xfc   :  { %v313_v38 = vld [vmem:[#allocation2 + $0x68] sm:$0xff]  ;;  %v358_v40 = vadd.f32 %v563_v53, %v335_v30  ;;  %v328_v42 = vmul.f32 %v558_v41, %v305_v37  ;;  %368 = vst.msk [vmem:[%s673_s4 + $0x30] sm:$0xff] %vm22_vm0, %v352_v33  ;;  %v353_v44 = vadd.f32 %v563_v53, %v330_v35 }
  0xfd   :  { %v336_v43 = vmul.f32 %v558_v41, %v313_v38  ;;  %376 = vst.msk [vmem:[%s673_s4 + $0x70] sm:$0xff] %vm22_vm0, %v360_v34  ;;  %v361_v45 = vadd.f32 %v563_v53, %v338_v36  ;;  %366 = vst.msk [vmem:[%s673_s4 + $0x20] sm:$0xff] %vm22_vm0, %v350_v39 }
  0xfe   :  { %374 = vst.msk [vmem:[%s673_s4 + $0x60] sm:$0xff] %vm22_vm0, %v358_v40  ;;  %v351_v41 = vadd.f32 %v563_v53, %v328_v42  ;;  %369 = vst.msk [vmem:[%s673_s4 + $0x38] sm:$0xff] %vm22_vm0, %v353_v44 }
  0xff   :  { %v359_v46 = vadd.f32 %v563_v53, %v336_v43  ;;  %377 = vst.msk [vmem:[%s673_s4 + $0x78] sm:$0xff] %vm22_vm0, %v361_v45 }
 0x100   :  { %367 = vst.msk [vmem:[%s673_s4 + $0x28] sm:$0xff] %vm22_vm0, %v351_v41 }
 0x101   :  { %375 = vst.msk [vmem:[%s673_s4 + $0x68] sm:$0xff] %vm22_vm0, %v359_v46 }

// kernel: iresnet_forward_pallas.20
= control target key start
LH: loop header
LB: loop body
LE: loop exit
PB: predicated region body
PF: predicated region fallthrough
CT: control target
= control target key end

     0   :  { %vm25_vm0 = vcmask 523264   ;;  %s1897_s1 = inlined_call_operand.vmem [shape: bf16[576,64], index: 1, kind: input, shape index: {}]   ;;  %s1898_s0 = inlined_call_operand.vmem [shape: bf16[128,576], index: 0, kind: input, shape index: {}]   ;;  %s1899_s2 = inlined_call_operand.vmem [shape: f32[1,64], index: 2, kind: input, shape index: {}]   ;;  %s1900_s3 = inlined_call_operand.vmem [shape: f32[1,64], index: 3, kind: input, shape index: {}]   ;;  %s1901_s4 = inlined_call_operand.vmem [shape: f32[1,64], index: 4, kind: input, shape index: {}]   ;;  %s1902_s5 = inlined_call_operand.vmem [shape: f32[128,64], index: 5, kind: output, shape index: {}]  }
   0x1   :  { %v1342_v0 = vld [vmem:[%s1897_s1 + $0x40] sm:$0xff]   ;;  %v1346_v4 = vld [vmem:[%s1897_s1 + $0x48] sm:$0xff]   ;;  %v1350_v8 = vld [vmem:[%s1897_s1 + $0x50] sm:$0xff]  }
   0x2   :  { %v1343_v1 = vld [vmem:[%s1897_s1 + $0xc0] sm:$0xff]   ;;  %1169 = vmatprep.subr.bf16.mxu0 %v1342_v0  ;;  %v1347_v5 = vld [vmem:[%s1897_s1 + $0xc8] sm:$0xff]   ;;  %v1351_v9 = vld [vmem:[%s1897_s1 + $0xd0] sm:$0xff]  }
   0x3   :  { %v1344_v2 = vld [vmem:[%s1897_s1] sm:$0xff]   ;;  %1233 = vmatprep.subr.bf16.mxu1 %v1343_v1  ;;  %v1348_v6 = vld [vmem:[%s1897_s1 + $0x8] sm:$0xff]   ;;  %v1352_v10 = vld [vmem:[%s1897_s1 + $0x10] sm:$0xff]  }
   0x4   :  { %v1345_v3 = vld [vmem:[%s1897_s1 + $0x80] sm:$0xff]   ;;  %1170 = vmatpush3.bf16.msra.mxu0 %v1344_v2  ;;  %v1349_v7 = vld [vmem:[%s1897_s1 + $0x88] sm:$0xff]   ;;  %v1353_v11 = vld [vmem:[%s1897_s1 + $0x90] sm:$0xff]  }
   0x5   :  { %1234 = vmatpush3.bf16.msra.mxu1 %v1345_v3  ;;  %1171 = vmatprep.subr.bf16.mxu0 %v1346_v4  ;;  %v1354_v12 = vld [vmem:[%s1897_s1 + $0x58] sm:$0xff]   ;;  %v1358_v16 = vld [vmem:[%s1897_s1 + $0x60] sm:$0xff]   ;;  %v1362_v20 = vld [vmem:[%s1897_s1 + $0x68] sm:$0xff]  }
   0x6   :  { %1235 = vmatprep.subr.bf16.mxu1 %v1347_v5  ;;  %v1355_v13 = vld [vmem:[%s1897_s1 + $0xd8] sm:$0xff]   ;;  %v1359_v17 = vld [vmem:[%s1897_s1 + $0xe0] sm:$0xff]   ;;  %v1363_v21 = vld [vmem:[%s1897_s1 + $0xe8] sm:$0xff]  }
   0x7   :  { %v1356_v14 = vld [vmem:[%s1897_s1 + $0x18] sm:$0xff]   ;;  %v1360_v18 = vld [vmem:[%s1897_s1 + $0x20] sm:$0xff]   ;;  %v1364_v22 = vld [vmem:[%s1897_s1 + $0x28] sm:$0xff]  }
   0x8   :  { %1172 = vmatpush3.bf16.msra.mxu0 %v1348_v6  ;;  %v1357_v15 = vld [vmem:[%s1897_s1 + $0x98] sm:$0xff]   ;;  %v1361_v19 = vld [vmem:[%s1897_s1 + $0xa0] sm:$0xff]   ;;  %v1365_v23 = vld [vmem:[%s1897_s1 + $0xa8] sm:$0xff]  }
   0x9   :  { %1236 = vmatpush3.bf16.msra.mxu1 %v1349_v7  ;;  %1173 = vmatprep.subr.bf16.mxu0 %v1350_v8  ;;  %v1366_v24 = vld [vmem:[%s1897_s1 + $0x70] sm:$0xff]   ;;  %v1370_v28 = vld [vmem:[%s1897_s1 + $0x78] sm:$0xff]   ;;  %v1379_v35 = vld [vmem:[%s1898_s0 + $0xc] ss:$20 sps:$4 sm:$0xff]  }
   0xa   :  { %1237 = vmatprep.subr.bf16.mxu1 %v1351_v9  ;;  %v1367_v25 = vld [vmem:[%s1897_s1 + $0xf0] sm:$0xff]   ;;  %v1371_v29 = vld [vmem:[%s1897_s1 + $0xf8] sm:$0xff]   ;;  %v1380_v36 = vld [vmem:[%s1897_s1 + $0x100] sm:$0xff]   ;;  %748 = vmatprep.mubr.bf16.mxu1 %v1379_v35 }
   0xb   :  { %v1368_v26 = vld [vmem:[%s1897_s1 + $0x30] sm:$0xff]   ;;  %v1372_v30 = vld [vmem:[%s1897_s1 + $0x38] sm:$0xff]   ;;  %v1381_v37 = vld [vmem:[%s1898_s0 + $0x2c] ss:$20 sps:$4 sm:$0xff]  }
   0xc   :  { %1174 = vmatpush3.bf16.msra.mxu0 %v1352_v10  ;;  %v1369_v27 = vld [vmem:[%s1897_s1 + $0xb0] sm:$0xff]   ;;  %v1373_v31 = vld [vmem:[%s1897_s1 + $0xb8] sm:$0xff]   ;;  %v1393_v42 = vld [vmem:[%s1897_s1 + $0x108] sm:$0xff]  }
   0xd   :  { %1238 = vmatpush3.bf16.msra.mxu1 %v1353_v11  ;;  %1175 = vmatprep.subr.bf16.mxu0 %v1354_v12  ;;  %v1374_v32 = vld [vmem:[%s1898_s0] ss:$20 sps:$4 sm:$0xff]   ;;  %v1376_v33 = vld [vmem:[%s1898_s0 + $0x4] ss:$20 sps:$4 sm:$0xff]   ;;  %v1377_v34 = vld [vmem:[%s1898_s0 + $0x8] ss:$20 sps:$4 sm:$0xff]  }
   0xe   :  { %1239 = vmatprep.subr.bf16.mxu1 %v1355_v13  ;;  %651 = vmatprep.mubr.bf16.mxu0 %v1376_v33  ;;  %v1383_v38 = vld [vmem:[%s1898_s0 + $0x34] ss:$20 sps:$4 sm:$0xff]   ;;  %v1386_v40 = vld [vmem:[%s1898_s0 + $0x30] ss:$20 sps:$4 sm:$0xff]   ;;  %v1392_v45 = vld [vmem:[%s1898_s0 + $0x58] ss:$20 sps:$4 sm:$0xff]  }
   0xf   :  { %v1385_v39 = vld [vmem:[%s1898_s0 + $0x28] ss:$20 sps:$4 sm:$0xff]   ;;  %v1391_v44 = vld [vmem:[%s1898_s0 + $0x50] ss:$20 sps:$4 sm:$0xff]   ;;  %v1398_v50 = vld [vmem:[%s1898_s0 + $0x78] ss:$20 sps:$4 sm:$0xff]  }
  0x10   :  { %1176 = vmatpush3.bf16.msra.mxu0 %v1356_v14  ;;  %v1387_v41 = vld [vmem:[%s1898_s0 + $0x54] ss:$20 sps:$4 sm:$0xff]   ;;  %v1389_v43 = vld [vmem:[%s1898_s0 + $0x5c] ss:$20 sps:$4 sm:$0xff]   ;;  %v1396_v48 = vld [vmem:[%s1898_s0 + $0x84] ss:$20 sps:$4 sm:$0xff]  }
  0x11   :  { %1240 = vmatpush3.bf16.msra.mxu1 %v1357_v15  ;;  %1177 = vmatprep.subr.bf16.mxu0 %v1358_v16  ;;  %v1406_v46 = vld [vmem:[%s1897_s1 + $0x110] sm:$0xff]   ;;  %v1419_v49 = vld [vmem:[%s1897_s1 + $0x118] sm:$0xff]   ;;  %v1402_v53 = vld [vmem:[%s1898_s0 + $0xac] ss:$20 sps:$4 sm:$0xff]   ;;  %v1434_v12 = vmov 0.0  }
  0x12   :  { %1241 = vmatprep.subr.bf16.mxu1 %v1359_v17  ;;  %v1394_v47 = vld [vmem:[%s1898_s0 + $0x7c] ss:$20 sps:$4 sm:$0xff]   ;;  %v1399_v51 = vld [vmem:[%s1898_s0 + $0x80] ss:$20 sps:$4 sm:$0xff]   ;;  %v1400_v52 = vld [vmem:[%s1898_s0 + $0xa4] ss:$20 sps:$4 sm:$0xff]  }
  0x13   :  { %v1404_v54 = vld [vmem:[%s1898_s0 + $0xa0] ss:$20 sps:$4 sm:$0xff]   ;;  %v1405_v55 = vld [vmem:[%s1898_s0 + $0xa8] ss:$20 sps:$4 sm:$0xff]   ;;  %v1412_v59 = vld [vmem:[%s1898_s0 + $0xd0] ss:$20 sps:$4 sm:$0xff]  }
  0x14   :  { %1178 = vmatpush3.bf16.msra.mxu0 %v1360_v18  ;;  %v1407_v56 = vld [vmem:[%s1898_s0 + $0xcc] ss:$20 sps:$4 sm:$0xff]   ;;  %v1409_v57 = vld [vmem:[%s1898_s0 + $0xd4] ss:$20 sps:$4 sm:$0xff]   ;;  %v1415_v61 = vld [vmem:[%s1898_s0 + $0xfc] ss:$20 sps:$4 sm:$0xff]  }
  0x15   :  { %1242 = vmatpush3.bf16.msra.mxu1 %v1361_v19  ;;  %1179 = vmatprep.subr.bf16.mxu0 %v1362_v20  ;;  %v1411_v58 = vld [vmem:[%s1898_s0 + $0xc8] ss:$20 sps:$4 sm:$0xff]   ;;  %v1417_v62 = vld [vmem:[%s1898_s0 + $0xf0] ss:$20 sps:$4 sm:$0xff]   ;;  %v1418_v63 = vld [vmem:[%s1898_s0 + $0xf8] ss:$20 sps:$4 sm:$0xff]  }
  0x16   :  { %1243 = vmatprep.subr.bf16.mxu1 %v1363_v21  ;;  %v1413_v60 = vld [vmem:[%s1898_s0 + $0xf4] ss:$20 sps:$4 sm:$0xff]   ;;  %v1420_v0 = vld [vmem:[%s1898_s0 + $0x11c] ss:$20 sps:$4 sm:$0xff]   ;;  %v1422_v1 = vld [vmem:[%s1898_s0 + $0x124] ss:$20 sps:$4 sm:$0xff]  }
  0x17   :  { %v1424_v2 = vld [vmem:[%s1898_s0 + $0x118] ss:$20 sps:$4 sm:$0xff]   ;;  %v1425_v3 = vld [vmem:[%s1898_s0 + $0x120] ss:$20 sps:$4 sm:$0xff]   ;;  %v1426_v4 = vld [vmem:[%s1898_s0 + $0x10] ss:$20 sps:$4 sm:$0xff]  }
  0x18   :  { %1180 = vmatpush3.bf16.msra.mxu0 %v1364_v22  ;;  %v1427_v5 = vld [vmem:[%s1898_s0 + $0xb0] ss:$20 sps:$4 sm:$0xff]   ;;  %v1428_v6 = vld [vmem:[%s1898_s0 + $0x38] ss:$20 sps:$4 sm:$0xff]   ;;  %v1430_v8 = vld [vmem:[%s1898_s0 + $0x60] ss:$20 sps:$4 sm:$0xff]  }
  0x19   :  { %1244 = vmatpush3.bf16.msra.mxu1 %v1365_v23  ;;  %1181 = vmatprep.subr.bf16.mxu0 %v1366_v24  ;;  %v1429_v7 = vld [vmem:[%s1898_s0 + $0xd8] ss:$20 sps:$4 sm:$0xff]   ;;  %v1431_v9 = vld [vmem:[%s1898_s0 + $0x100] ss:$20 sps:$4 sm:$0xff]   ;;  %v1432_v10 = vld [vmem:[%s1898_s0 + $0x88] ss:$20 sps:$4 sm:$0xff]  }
  0x1a   :  { %1245 = vmatprep.subr.bf16.mxu1 %v1367_v25  ;;  %v1433_v11 = vld [vmem:[%s1898_s0 + $0x128] ss:$20 sps:$4 sm:$0xff]   ;;  %28 = vst.msk [vmem:[#allocation2 + $0x10] sm:$0xff] %vm25_vm0, %v1434_v12  ;;  %26 = vst.msk [vmem:[#allocation2] sm:$0xff] %vm25_vm0, %v1434_v12 }
  0x1b   :  { %27 = vst.msk [vmem:[#allocation2 + $0x8] sm:$0xff] %vm25_vm0, %v1434_v12  ;;  %29 = vst.msk [vmem:[#allocation2 + $0x18] sm:$0xff] %vm25_vm0, %v1434_v12 }
  0x1c   :  { %1182 = vmatpush3.bf16.msra.mxu0 %v1368_v26  ;;  %30 = vst.msk [vmem:[#allocation2 + $0x20] sm:$0xff] %vm25_vm0, %v1434_v12  ;;  %31 = vst.msk [vmem:[#allocation2 + $0x28] sm:$0xff] %vm25_vm0, %v1434_v12 }
  0x1d   :  { %1246 = vmatpush3.bf16.msra.mxu1 %v1369_v27  ;;  %1183 = vmatprep.subr.bf16.mxu0 %v1370_v28  ;;  %32 = vst.msk [vmem:[#allocation2 + $0x30] sm:$0xff] %vm25_vm0, %v1434_v12  ;;  %33 = vst.msk [vmem:[#allocation2 + $0x38] sm:$0xff] %vm25_vm0, %v1434_v12 }
  0x1e   :  { %1247 = vmatprep.subr.bf16.mxu1 %v1371_v29  ;;  %34 = vst.msk [vmem:[#allocation2 + $0x40] sm:$0xff] %vm25_vm0, %v1434_v12  ;;  %35 = vst.msk [vmem:[#allocation2 + $0x48] sm:$0xff] %vm25_vm0, %v1434_v12 }
  0x1f   :  { %36 = vst.msk [vmem:[#allocation2 + $0x50] sm:$0xff] %vm25_vm0, %v1434_v12  ;;  %37 = vst.msk [vmem:[#allocation2 + $0x58] sm:$0xff] %vm25_vm0, %v1434_v12 }
  0x20   :  { %1184 = vmatpush3.bf16.msra.mxu0 %v1372_v30  ;;  %38 = vst.msk [vmem:[#allocation2 + $0x60] sm:$0xff] %vm25_vm0, %v1434_v12  ;;  %39 = vst.msk [vmem:[#allocation2 + $0x68] sm:$0xff] %vm25_vm0, %v1434_v12 }
  0x21   :  { %1248 = vmatpush3.bf16.msra.mxu1 %v1373_v31  ;;  %1309 = vmatprep.subr.bf16.mxu0 %v1380_v36  ;;  %40 = vst.msk [vmem:[#allocation2 + $0x70] sm:$0xff] %vm25_vm0, %v1434_v12  ;;  %41 = vst.msk [vmem:[#allocation2 + $0x78] sm:$0xff] %vm25_vm0, %v1434_v12 }
  0x22   :  { %1333 = vmatprep.subr.bf16.mxu1 %v1380_v36 }
  0x23   :  { %652 = vmatmul.mubr.bf16.vlgmr.msra.gmra.mrb[0].mxu0 %v1374_v32 }
  0x24   :  { %749 = vmatmul.mubr.bf16.vlgmr.msra.gmra.mrb[0].mxu1 %v1377_v34  ;;  %1310 = vmatpush3.bf16.msra.mxu0 %v1380_v36 }
  0x25   :  { %1337 = vmatpush3.bf16.msra.mxu1 %v1380_v36  ;;  %659 = vmatprep.mubr.bf16.mxu0 %v1381_v37 }
  0x26   :  { %756 = vmatprep.mubr.bf16.mxu1 %v1383_v38  ;;  %1311 = vmatprep.subr.bf16.mxu0 %v1393_v42 }
  0x27   :  { %1334 = vmatprep.subr.bf16.mxu1 %v1393_v42 }
  0x28   :  { %1312 = vmatpush3.bf16.msra.mxu0 %v1393_v42 }
  0x29   :  { %1338 = vmatpush3.bf16.msra.mxu1 %v1393_v42  ;;  %1313 = vmatprep.subr.bf16.mxu0 %v1406_v46 }
  0x2a   :  { %1335 = vmatprep.subr.bf16.mxu1 %v1406_v46 }
  0x2b   :  { %660 = vmatmul.mubr.bf16.gmra.mrb[4].mxu0 %v1385_v39 }
  0x2c   :  { %757 = vmatmul.mubr.bf16.gmra.mrb[4].mxu1 %v1386_v40  ;;  %667 = vmatprep.mubr.bf16.mxu0 %v1387_v41 }
  0x2d   :  { %764 = vmatprep.mubr.bf16.mxu1 %v1389_v43  ;;  %1314 = vmatpush3.bf16.msra.mxu0 %v1406_v46 }
  0x2e   :  { %1339 = vmatpush3.bf16.msra.mxu1 %v1406_v46  ;;  %1315 = vmatprep.subr.bf16.mxu0 %v1419_v49 }
  0x2f   :  { %1336 = vmatprep.subr.bf16.mxu1 %v1419_v49 }
  0x31   :  { %1316 = vmatpush3.bf16.msra.mxu0 %v1419_v49 }
  0x32   :  { %1340 = vmatpush3.bf16.msra.mxu1 %v1419_v49 }
  0x33   :  { %668 = vmatmul.mubr.bf16.gmra.mrb[8].mxu0 %v1391_v44 }
  0x34   :  { %765 = vmatmul.mubr.bf16.gmra.mrb[8].mxu1 %v1392_v45  ;;  %675 = vmatprep.mubr.bf16.mxu0 %v1394_v47 }
  0x35   :  { %772 = vmatprep.mubr.bf16.mxu1 %v1396_v48 }
  0x3b   :  { %676 = vmatmul.mubr.bf16.gmra.mrb[12].mxu0 %v1398_v50 }
  0x3c   :  { %773 = vmatmul.mubr.bf16.gmra.mrb[12].mxu1 %v1399_v51  ;;  %683 = vmatprep.mubr.bf16.mxu0 %v1400_v52 }
  0x3d   :  { %780 = vmatprep.mubr.bf16.mxu1 %v1402_v53 }
  0x43   :  { %684 = vmatmul.mubr.bf16.gmra.mrb[16].mxu0 %v1404_v54 }
  0x44   :  { %781 = vmatmul.mubr.bf16.gmra.mrb[16].mxu1 %v1405_v55  ;;  %691 = vmatprep.mubr.bf16.mxu0 %v1407_v56 }
  0x45   :  { %788 = vmatprep.mubr.bf16.mxu1 %v1409_v57 }
  0x4b   :  { %692 = vmatmul.mubr.bf16.gmra.mrb[20].mxu0 %v1411_v58 }
  0x4c   :  { %789 = vmatmul.mubr.bf16.gmra.mrb[20].mxu1 %v1412_v59  ;;  %699 = vmatprep.mubr.bf16.mxu0 %v1413_v60 }
  0x4d   :  { %796 = vmatprep.mubr.bf16.mxu1 %v1415_v61 }
  0x53   :  { %700 = vmatmul.mubr.bf16.gmra.mrb[24].mxu0 %v1417_v62 }
  0x54   :  { %797 = vmatmul.mubr.bf16.gmra.mrb[24].mxu1 %v1418_v63  ;;  %707 = vmatprep.mubr.bf16.mxu0 %v1420_v0 }
  0x55   :  { %804 = vmatprep.mubr.bf16.mxu1 %v1422_v1 }
  0x5b   :  { %708 = vmatmul.mubr.bf16.gmra.mrb[28].mxu0 %v1424_v2 }
  0x5c   :  { %805 = vmatmul.mubr.bf16.gmra.mrb[28].mxu1 %v1425_v3  ;;  %1317 = vmatprep.mubr.msk.bf16.mxu0 %vm25_vm0, %v1426_v4 }
  0x5d   :  { %1325 = vmatprep.mubr.msk.bf16.mxu1 %vm25_vm0, %v1427_v5 }
  0x63   :  { %1318 = vmatmul.mubr.msk.bf16.vlgmr.msra.gmra.mrb[32].mxu0 %vm25_vm0, %v1428_v6 }
  0x64   :  { %1326 = vmatmul.mubr.msk.bf16.vlgmr.msra.gmra.mrb[32].mxu1 %vm25_vm0, %v1429_v7  ;;  %1321 = vmatprep.mubr.msk.bf16.mxu0 %vm25_vm0, %v1430_v8 }
  0x65   :  { %1329 = vmatprep.mubr.msk.bf16.mxu1 %vm25_vm0, %v1431_v9 }
  0x6b   :  { %1322 = vmatmul.mubr.msk.bf16.gmra.mrb[36].mxu0 %vm25_vm0, %v1432_v10 }
  0x6c   :  { %1330 = vmatmul.mubr.msk.bf16.gmra.mrb[36].mxu1 %vm25_vm0, %v1433_v11 }
  0xf6   :  { %v1185_v13 = vpop.f32.mrb[0].mxu0 }
  0xf7   :  { %v1249_v14 = vpop.f32.mrb[0].mxu1  ;;  %v1186_v15 = vpop.f32.mrb[1].mxu0 }
  0xf8   :  { %v1187_v16 = vadd.f32 %v1186_v15, %v1185_v13  ;;  %v1250_v17 = vpop.f32.mrb[1].mxu1  ;;  %v1188_v18 = vpop.f32.mrb[2].mxu0 }
  0xf9   :  { %v1251_v19 = vadd.f32 %v1250_v17, %v1249_v14  ;;  %v1252_v20 = vpop.f32.mrb[2].mxu1  ;;  %v1189_v21 = vpop.f32.mrb[3].mxu0 }
  0xfa   :  { %v1190_v22 = vadd.f32 %v1189_v21, %v1188_v18  ;;  %v1253_v23 = vpop.f32.mrb[3].mxu1 }
  0xfb   :  { %v1254_v24 = vadd.f32 %v1253_v23, %v1252_v20  ;;  %v1717_v25 = vadd.f32 %v1251_v19, %v1187_v16 }
  0xfd   :  { %v1719_v26 = vadd.f32 %v1254_v24, %v1190_v22 }
  0xfe   :  { %v1191_v27 = vpop.f32.mrb[4].mxu0 }
  0xff   :  { %v1255_v28 = vpop.f32.mrb[4].mxu1  ;;  %v1192_v29 = vpop.f32.mrb[5].mxu0 }
 0x100   :  { %v1193_v30 = vadd.f32 %v1192_v29, %v1191_v27  ;;  %v1256_v31 = vpop.f32.mrb[5].mxu1  ;;  %v1194_v32 = vpop.f32.mrb[6].mxu0 }
 0x101   :  { %v1257_v33 = vadd.f32 %v1256_v31, %v1255_v28  ;;  %v1258_v34 = vpop.f32.mrb[6].mxu1  ;;  %v1195_v35 = vpop.f32.mrb[7].mxu0 }
 0x102   :  { %v1196_v36 = vadd.f32 %v1195_v35, %v1194_v32  ;;  %v1259_v37 = vpop.f32.mrb[7].mxu1 }
 0x103   :  { %v1260_v38 = vadd.f32 %v1259_v37, %v1258_v34  ;;  %v1721_v39 = vadd.f32 %v1257_v33, %v1193_v30 }
 0x105   :  { %v1723_v40 = vadd.f32 %v1260_v38, %v1196_v36 }
 0x106   :  { %v1197_v41 = vpop.f32.mrb[8].mxu0 }
 0x107   :  { %v1261_v42 = vpop.f32.mrb[8].mxu1  ;;  %v1198_v43 = vpop.f32.mrb[9].mxu0 }
 0x108   :  { %v1199_v44 = vadd.f32 %v1198_v43, %v1197_v41  ;;  %v1262_v45 = vpop.f32.mrb[9].mxu1  ;;  %v1200_v46 = vpop.f32.mrb[10].mxu0 }
 0x109   :  { %v1263_v47 = vadd.f32 %v1262_v45, %v1261_v42  ;;  %v1264_v48 = vpop.f32.mrb[10].mxu1  ;;  %v1201_v49 = vpop.f32.mrb[11].mxu0 }
 0x10a   :  { %v1202_v50 = vadd.f32 %v1201_v49, %v1200_v46  ;;  %v1265_v51 = vpop.f32.mrb[11].mxu1 }
 0x10b   :  { %v1266_v52 = vadd.f32 %v1265_v51, %v1264_v48  ;;  %v1725_v53 = vadd.f32 %v1263_v47, %v1199_v44 }
 0x10d   :  { %v1727_v54 = vadd.f32 %v1266_v52, %v1202_v50 }
 0x10e   :  { %v1203_v55 = vpop.f32.mrb[12].mxu0 }
 0x10f   :  { %v1267_v56 = vpop.f32.mrb[12].mxu1  ;;  %v1204_v57 = vpop.f32.mrb[13].mxu0 }
 0x110   :  { %v1205_v58 = vadd.f32 %v1204_v57, %v1203_v55  ;;  %v1268_v59 = vpop.f32.mrb[13].mxu1  ;;  %v1206_v60 = vpop.f32.mrb[14].mxu0 }
 0x111   :  { %v1269_v61 = vadd.f32 %v1268_v59, %v1267_v56  ;;  %v1270_v62 = vpop.f32.mrb[14].mxu1  ;;  %v1207_v63 = vpop.f32.mrb[15].mxu0 }
 0x112   :  { %v1208_v0 = vadd.f32 %v1207_v63, %v1206_v60  ;;  %v1271_v1 = vpop.f32.mrb[15].mxu1 }
 0x113   :  { %v1272_v2 = vadd.f32 %v1271_v1, %v1270_v62  ;;  %v1729_v3 = vadd.f32 %v1269_v61, %v1205_v58 }
 0x115   :  { %v1731_v4 = vadd.f32 %v1272_v2, %v1208_v0 }
 0x116   :  { %v1209_v5 = vpop.f32.mrb[16].mxu0 }
 0x117   :  { %v1273_v6 = vpop.f32.mrb[16].mxu1  ;;  %v1210_v7 = vpop.f32.mrb[17].mxu0 }
 0x118   :  { %v1211_v8 = vadd.f32 %v1210_v7, %v1209_v5  ;;  %v1274_v9 = vpop.f32.mrb[17].mxu1  ;;  %v1212_v10 = vpop.f32.mrb[18].mxu0  ;;  %v44_v5 = vld [vmem:[#allocation2 + $0x10] sm:$0xff] }
 0x119   :  { %v1275_v11 = vadd.f32 %v1274_v9, %v1273_v6  ;;  %v1276_v12 = vpop.f32.mrb[18].mxu1  ;;  %v1213_v13 = vpop.f32.mrb[19].mxu0 }
 0x11a   :  { %v1214_v14 = vadd.f32 %v1213_v13, %v1212_v10  ;;  %v1277_v15 = vpop.f32.mrb[19].mxu1  ;;  %v42_v10 = vld [vmem:[#allocation2] sm:$0xff] }
 0x11b   :  { %v1278_v16 = vadd.f32 %v1277_v15, %v1276_v12  ;;  %v783_v17 = vadd.f32 %v1275_v11, %v1211_v8  ;;  %v52_v8 = vld [vmem:[#allocation2 + $0x50] sm:$0xff] }
 0x11d   :  { %v1733_v18 = vadd.f32 %v1278_v16, %v1214_v14  ;;  %v50_v14 = vld [vmem:[#allocation2 + $0x40] sm:$0xff]  ;;  %v45_v16 = vld [vmem:[#allocation2 + $0x18] sm:$0xff] }
 0x11e   :  { %v1215_v19 = vpop.f32.mrb[20].mxu0 }
 0x11f   :  { %v1279_v20 = vpop.f32.mrb[20].mxu1  ;;  %v1216_v21 = vpop.f32.mrb[21].mxu0 }
 0x120   :  { %v1217_v22 = vadd.f32 %v1216_v21, %v1215_v19  ;;  %v1280_v23 = vpop.f32.mrb[21].mxu1  ;;  %v1218_v24 = vpop.f32.mrb[22].mxu0 }
 0x121   :  { %v1281_v27 = vadd.f32 %v1280_v23, %v1279_v20  ;;  %v1282_v28 = vpop.f32.mrb[22].mxu1  ;;  %v1219_v29 = vpop.f32.mrb[23].mxu0  ;;  %v53_v23 = vld [vmem:[#allocation2 + $0x58] sm:$0xff] }
 0x122   :  { %v1220_v30 = vadd.f32 %v1219_v29, %v1218_v24  ;;  %v1283_v31 = vpop.f32.mrb[23].mxu1 }
 0x123   :  { %v1284_v32 = vadd.f32 %v1283_v31, %v1282_v28  ;;  %v791_v33 = vadd.f32 %v1281_v27, %v1217_v22  ;;  %v43_v27 = vld [vmem:[#allocation2 + $0x8] sm:$0xff] }
 0x125   :  { %v794_v34 = vadd.f32 %v1284_v32, %v1220_v30  ;;  %v51_v32 = vld [vmem:[#allocation2 + $0x48] sm:$0xff] }
 0x126   :  { %v1221_v35 = vpop.f32.mrb[24].mxu0 }
 0x127   :  { %v1285_v36 = vpop.f32.mrb[24].mxu1  ;;  %v1222_v37 = vpop.f32.mrb[25].mxu0 }
 0x128   :  { %v1223_v38 = vadd.f32 %v1222_v37, %v1221_v35  ;;  %v1286_v41 = vpop.f32.mrb[25].mxu1  ;;  %v1224_v42 = vpop.f32.mrb[26].mxu0 }
 0x129   :  { %v1287_v43 = vadd.f32 %v1286_v41, %v1285_v36  ;;  %v1288_v44 = vpop.f32.mrb[26].mxu1  ;;  %v1225_v45 = vpop.f32.mrb[27].mxu0 }
 0x12a   :  { %v1226_v46 = vadd.f32 %v1225_v45, %v1224_v42  ;;  %v1289_v47 = vpop.f32.mrb[27].mxu1  ;;  %v46_v42 = vld [vmem:[#allocation2 + $0x20] sm:$0xff] }
 0x12b   :  { %v1290_v48 = vadd.f32 %v1289_v47, %v1288_v44  ;;  %v1735_v49 = vadd.f32 %v1287_v43, %v1223_v38  ;;  %v56_v38 = vld [vmem:[#allocation2 + $0x70] sm:$0xff]  ;;  %v1758_v44 = vld [vmem:[%s1899_s2] ss:$0 sm:$0xff] }
 0x12c   :  { %v54_v47 = vld [vmem:[#allocation2 + $0x60] sm:$0xff] }
 0x12d   :  { %v1737_v50 = vadd.f32 %v1290_v48, %v1226_v46 }
 0x12e   :  { %v1227_v51 = vpop.f32.mrb[28].mxu0 }
 0x12f   :  { %v1291_v52 = vpop.f32.mrb[28].mxu1  ;;  %v1228_v55 = vpop.f32.mrb[29].mxu0 }
 0x130   :  { %v1229_v56 = vadd.f32 %v1228_v55, %v1227_v51  ;;  %v1292_v57 = vpop.f32.mrb[29].mxu1  ;;  %v1230_v58 = vpop.f32.mrb[30].mxu0  ;;  %v49_v51 = vld [vmem:[#allocation2 + $0x38] sm:$0xff] }
 0x131   :  { %v1293_v59 = vadd.f32 %v1292_v57, %v1291_v52  ;;  %v1294_v60 = vpop.f32.mrb[30].mxu1  ;;  %v1231_v61 = vpop.f32.mrb[31].mxu0  ;;  %v57_v57 = vld [vmem:[#allocation2 + $0x78] sm:$0xff] }
 0x132   :  { %v1232_v62 = vadd.f32 %v1231_v61, %v1230_v58  ;;  %v1295_v63 = vpop.f32.mrb[31].mxu1 }
 0x133   :  { %v1296_v0 = vadd.f32 %v1295_v63, %v1294_v60  ;;  %v807_v1 = vadd.f32 %v1293_v59, %v1229_v56  ;;  %v47_v59 = vld [vmem:[#allocation2 + $0x28] sm:$0xff] }
 0x135   :  { %v1739_v2 = vadd.f32 %v1296_v0, %v1232_v62  ;;  %v1766_v62 = vld [vmem:[%s1900_s3] ss:$0 sm:$0xff] }
 0x136   :  { %v1319_v6 = vpop.f32.mrb[32].mxu0 }
 0x137   :  { %v856_v7 = vadd.f32 %v1319_v6, %v1721_v39  ;;  %v1327_v9 = vpop.f32.mrb[32].mxu1  ;;  %v847_v11 = vpop.f32.mrb[33].mxu0 }
 0x138   :  { %v888_v12 = vadd.f32 %v1327_v9, %v791_v33  ;;  %v848_v13 = vadd.f32 %v847_v11, %v1717_v25  ;;  %v879_v15 = vpop.f32.mrb[33].mxu1  ;;  %v1320_v19 = vpop.f32.mrb[34].mxu0  ;;  %v1776_v11 = vld [vmem:[%s1901_s4] ss:$0 sm:$0xff] }
 0x139   :  { %v912_v20 = vadd.f32 %v856_v7, %v44_v5  ;;  %v880_v21 = vadd.f32 %v879_v15, %v783_v17  ;;  %v859_v22 = vadd.f32 %v1320_v19, %v1723_v40  ;;  %v1328_v24 = vpop.f32.mrb[34].mxu1  ;;  %v850_v28 = vpop.f32.mrb[35].mxu0  ;;  %v55_v5 = vld [vmem:[#allocation2 + $0x68] sm:$0xff] }
 0x13a   :  { %v920_v39 = vadd.f32 %v888_v12, %v52_v8  ;;  %v910_v29 = vadd.f32 %v848_v13, %v42_v10  ;;  %v891_v30 = vadd.f32 %v1328_v24, %v794_v34  ;;  %v851_v31 = vadd.f32 %v850_v28, %v1719_v26  ;;  %v882_v33 = vpop.f32.mrb[35].mxu1  ;;  %v48_v26 = vld [vmem:[#allocation2 + $0x30] sm:$0xff] }
 0x13b   :  { %928 = vst.msk [vmem:[#allocation2 + $0x10] sm:$0xff] %vm25_vm0, %v912_v20  ;;  %v918_v25 = vadd.f32 %v880_v21, %v50_v14  ;;  %v913_v35 = vadd.f32 %v859_v22, %v45_v16  ;;  %v883_v36 = vadd.f32 %v882_v33, %v1733_v18 }
 0x13c   :  { %936 = vst.msk [vmem:[#allocation2 + $0x50] sm:$0xff] %vm25_vm0, %v920_v39  ;;  %926 = vst.msk [vmem:[#allocation2] sm:$0xff] %vm25_vm0, %v910_v29  ;;  %v921_v40 = vadd.f32 %v891_v30, %v53_v23  ;;  %v911_v17 = vadd.f32 %v851_v31, %v43_v27 }
 0x13d   :  { %934 = vst.msk [vmem:[#allocation2 + $0x40] sm:$0xff] %vm25_vm0, %v918_v25  ;;  %929 = vst.msk [vmem:[#allocation2 + $0x18] sm:$0xff] %vm25_vm0, %v913_v35  ;;  %v919_v34 = vadd.f32 %v883_v36, %v51_v32 }
 0x13e   :  { %937 = vst.msk [vmem:[#allocation2 + $0x58] sm:$0xff] %vm25_vm0, %v921_v40  ;;  %927 = vst.msk [vmem:[#allocation2 + $0x8] sm:$0xff] %vm25_vm0, %v911_v17  ;;  %v1323_v37 = vpop.f32.mrb[36].mxu0 }
 0x13f   :  { %935 = vst.msk [vmem:[#allocation2 + $0x48] sm:$0xff] %vm25_vm0, %v919_v34  ;;  %v872_v18 = vadd.f32 %v1323_v37, %v1729_v3  ;;  %v1331_v41 = vpop.f32.mrb[36].mxu1  ;;  %v863_v43 = vpop.f32.mrb[37].mxu0 }
 0x140   :  { %v904_v45 = vadd.f32 %v1331_v41, %v807_v1  ;;  %v864_v46 = vadd.f32 %v863_v43, %v1725_v53  ;;  %v895_v48 = vpop.f32.mrb[37].mxu1  ;;  %v1324_v52 = vpop.f32.mrb[38].mxu0 }
 0x141   :  { %v916_v55 = vadd.f32 %v872_v18, %v48_v26  ;;  %v896_v56 = vadd.f32 %v895_v48, %v1735_v49  ;;  %v875_v3 = vadd.f32 %v1324_v52, %v1731_v4  ;;  %v1332_v58 = vpop.f32.mrb[38].mxu1  ;;  %v866_v60 = vpop.f32.mrb[39].mxu0 }
 0x142   :  { %v947_v61 = vld [vmem:[#allocation2 + $0x10] sm:$0xff]  ;;  %v924_v53 = vadd.f32 %v904_v45, %v56_v38  ;;  %v914_v63 = vadd.f32 %v864_v46, %v46_v42  ;;  %v907_v0 = vadd.f32 %v1332_v58, %v1739_v2  ;;  %v867_v1 = vadd.f32 %v866_v60, %v1727_v54  ;;  %v898_v49 = vpop.f32.mrb[39].mxu1 }
 0x143   :  { %v970_v4 = vmul.f32 %v1758_v44, %v947_v61  ;;  %v955_v6 = vld [vmem:[#allocation2 + $0x50] sm:$0xff]  ;;  %v945_v7 = vld [vmem:[#allocation2] sm:$0xff]  ;;  %932 = vst.msk [vmem:[#allocation2 + $0x30] sm:$0xff] %vm25_vm0, %v916_v55  ;;  %v922_v8 = vadd.f32 %v896_v56, %v54_v47  ;;  %v917_v9 = vadd.f32 %v875_v3, %v49_v51  ;;  %v899_v10 = vadd.f32 %v898_v49, %v1737_v50 }
 0x144   :  { %v978_v2 = vmul.f32 %v1758_v44, %v955_v6  ;;  %v968_v54 = vmul.f32 %v1758_v44, %v945_v7  ;;  %v953_v12 = vld [vmem:[#allocation2 + $0x40] sm:$0xff]  ;;  %v948_v13 = vld [vmem:[#allocation2 + $0x18] sm:$0xff]  ;;  %940 = vst.msk [vmem:[#allocation2 + $0x70] sm:$0xff] %vm25_vm0, %v924_v53  ;;  %930 = vst.msk [vmem:[#allocation2 + $0x20] sm:$0xff] %vm25_vm0, %v914_v63  ;;  %v925_v14 = vadd.f32 %v907_v0, %v57_v57 }
 0x145   :  { %v915_v15 = vadd.f32 %v867_v1, %v47_v59  ;;  %v993_v16 = vadd.f32 %v1766_v62, %v970_v4  ;;  %v976_v50 = vmul.f32 %v1758_v44, %v953_v12  ;;  %v971_v19 = vmul.f32 %v1758_v44, %v948_v13  ;;  %v956_v20 = vld [vmem:[#allocation2 + $0x58] sm:$0xff]  ;;  %v946_v21 = vld [vmem:[#allocation2 + $0x8] sm:$0xff]  ;;  %938 = vst.msk [vmem:[#allocation2 + $0x60] sm:$0xff] %vm25_vm0, %v922_v8 }
 0x146   :  { %933 = vst.msk [vmem:[#allocation2 + $0x38] sm:$0xff] %vm25_vm0, %v917_v9  ;;  %v923_v22 = vadd.f32 %v899_v10, %v55_v5  ;;  %v1001_v23 = vadd.f32 %v1766_v62, %v978_v2  ;;  %v991_v24 = vadd.f32 %v1766_v62, %v968_v54  ;;  %v979_v27 = vmul.f32 %v1758_v44, %v956_v20  ;;  %v954_v33 = vld [vmem:[#allocation2 + $0x48] sm:$0xff] }
 0x147   :  { %v969_v28 = vmul.f32 %v1758_v44, %v946_v21  ;;  %941 = vst.msk [vmem:[#allocation2 + $0x78] sm:$0xff] %vm25_vm0, %v925_v14  ;;  %931 = vst.msk [vmem:[#allocation2 + $0x28] sm:$0xff] %vm25_vm0, %v915_v15  ;;  %vm1010_vm1 = vcmp.ge.f32.partialorder %v993_v16, 0.0  ;;  %v1032_v39 = vmul.f32 %v1776_v11, %v993_v16  ;;  %v999_v29 = vadd.f32 %v1766_v62, %v976_v50 }
 0x148   :  { %v994_v30 = vadd.f32 %v1766_v62, %v971_v19  ;;  %939 = vst.msk [vmem:[#allocation2 + $0x68] sm:$0xff] %vm25_vm0, %v923_v22  ;;  %vm1018_vm2 = vcmp.ge.f32.partialorder %v1001_v23, 0.0  ;;  %v1040_v31 = vmul.f32 %v1776_v11, %v1001_v23  ;;  %vm1008_vm3 = vcmp.ge.f32.partialorder %v991_v24, 0.0 }
 0x149   :  { %v1030_v32 = vmul.f32 %v1776_v11, %v991_v24  ;;  %v1048_v25 = vsel %vm1010_vm1, %v993_v16, %v1032_v39  ;;  %vm1016_vm4 = vcmp.ge.f32.partialorder %v999_v29, 0.0  ;;  %v1038_v35 = vmul.f32 %v1776_v11, %v999_v29 }
 0x14a   :  { %vm1011_vm5 = vcmp.ge.f32.partialorder %v994_v30, 0.0  ;;  %1064 = vst.msk [vmem:[%s1902_s5 + $0x10] sm:$0xff] %vm25_vm0, %v1048_v25  ;;  %v1056_v36 = vsel %vm1018_vm2, %v1001_v23, %v1040_v31  ;;  %v1033_v17 = vmul.f32 %v1776_v11, %v994_v30  ;;  %v1002_v34 = vadd.f32 %v1766_v62, %v979_v27  ;;  %v951_v26 = vld [vmem:[#allocation2 + $0x30] sm:$0xff] }
 0x14b   :  { %v1046_v40 = vsel %vm1008_vm3, %v991_v24, %v1030_v32  ;;  %1072 = vst.msk [vmem:[%s1902_s5 + $0x50] sm:$0xff] %vm25_vm0, %v1056_v36  ;;  %v1054_v37 = vsel %vm1016_vm4, %v999_v29, %v1038_v35  ;;  %v992_v18 = vadd.f32 %v1766_v62, %v969_v28  ;;  %v977_v38 = vmul.f32 %v1758_v44, %v954_v33  ;;  %v959_v42 = vld [vmem:[#allocation2 + $0x70] sm:$0xff]  ;;  %v949_v43 = vld [vmem:[#allocation2 + $0x20] sm:$0xff] }
 0x14c   :  { %1062 = vst.msk [vmem:[%s1902_s5] sm:$0xff] %vm25_vm0, %v1046_v40  ;;  %v974_v41 = vmul.f32 %v1758_v44, %v951_v26  ;;  %1070 = vst.msk [vmem:[%s1902_s5 + $0x40] sm:$0xff] %vm25_vm0, %v1054_v37  ;;  %v1049_v45 = vsel %vm1011_vm5, %v994_v30, %v1033_v17  ;;  %vm1019_vm6 = vcmp.ge.f32.partialorder %v1002_v34, 0.0  ;;  %v1041_v46 = vmul.f32 %v1776_v11, %v1002_v34  ;;  %v957_v48 = vld [vmem:[#allocation2 + $0x60] sm:$0xff] }
 0x14d   :  { %v982_v47 = vmul.f32 %v1758_v44, %v959_v42  ;;  %1065 = vst.msk [vmem:[%s1902_s5 + $0x18] sm:$0xff] %vm25_vm0, %v1049_v45  ;;  %vm1009_vm7 = vcmp.ge.f32.partialorder %v992_v18, 0.0  ;;  %v1031_v51 = vmul.f32 %v1776_v11, %v992_v18  ;;  %v1000_v52 = vadd.f32 %v1766_v62, %v977_v38  ;;  %v952_v59 = vld [vmem:[#allocation2 + $0x38] sm:$0xff] }
 0x14e   :  { %v997_v55 = vadd.f32 %v1766_v62, %v974_v41  ;;  %v1057_v56 = vsel %vm1019_vm6, %v1002_v34, %v1041_v46  ;;  %v972_v57 = vmul.f32 %v1758_v44, %v949_v43  ;;  %v980_v58 = vmul.f32 %v1758_v44, %v957_v48  ;;  %v960_v60 = vld [vmem:[#allocation2 + $0x78] sm:$0xff]  ;;  %v950_v7 = vld [vmem:[#allocation2 + $0x28] sm:$0xff] }
 0x14f   :  { %v1005_v3 = vadd.f32 %v1766_v62, %v982_v47  ;;  %1073 = vst.msk [vmem:[%s1902_s5 + $0x58] sm:$0xff] %vm25_vm0, %v1057_v56  ;;  %v1047_v61 = vsel %vm1009_vm7, %v992_v18, %v1031_v51  ;;  %vm1017_vm8 = vcmp.ge.f32.partialorder %v1000_v52, 0.0  ;;  %v1039_v53 = vmul.f32 %v1776_v11, %v1000_v52  ;;  %v958_v8 = vld [vmem:[#allocation2 + $0x68] sm:$0xff] }
 0x150   :  { %vm1014_vm9 = vcmp.ge.f32.partialorder %v997_v55, 0.0  ;;  %1063 = vst.msk [vmem:[%s1902_s5 + $0x8] sm:$0xff] %vm25_vm0, %v1047_v61  ;;  %v1036_v63 = vmul.f32 %v1776_v11, %v997_v55  ;;  %v995_v1 = vadd.f32 %v1766_v62, %v972_v57  ;;  %v1003_v49 = vadd.f32 %v1766_v62, %v980_v58 }
 0x151   :  { %vm1022_vm10 = vcmp.ge.f32.partialorder %v1005_v3, 0.0  ;;  %v1044_v0 = vmul.f32 %v1776_v11, %v1005_v3  ;;  %v1055_v5 = vsel %vm1017_vm8, %v1000_v52, %v1039_v53  ;;  %v975_v4 = vmul.f32 %v1758_v44, %v952_v59 }
 0x152   :  { %v983_v6 = vmul.f32 %v1758_v44, %v960_v60  ;;  %1071 = vst.msk [vmem:[%s1902_s5 + $0x48] sm:$0xff] %vm25_vm0, %v1055_v5  ;;  %v1052_v9 = vsel %vm1014_vm9, %v997_v55, %v1036_v63  ;;  %vm1012_vm11 = vcmp.ge.f32.partialorder %v995_v1, 0.0  ;;  %v1034_v2 = vmul.f32 %v1776_v11, %v995_v1 }
 0x153   :  { %v1060_v10 = vsel %vm1022_vm10, %v1005_v3, %v1044_v0  ;;  %1068 = vst.msk [vmem:[%s1902_s5 + $0x30] sm:$0xff] %vm25_vm0, %v1052_v9  ;;  %vm1020_vm12 = vcmp.ge.f32.partialorder %v1003_v49, 0.0  ;;  %v1042_v54 = vmul.f32 %v1776_v11, %v1003_v49  ;;  %v998_v12 = vadd.f32 %v1766_v62, %v975_v4 }
 0x154   :  { %1076 = vst.msk [vmem:[%s1902_s5 + $0x70] sm:$0xff] %vm25_vm0, %v1060_v10  ;;  %v1006_v13 = vadd.f32 %v1766_v62, %v983_v6  ;;  %v1050_v14 = vsel %vm1012_vm11, %v995_v1, %v1034_v2  ;;  %v973_v15 = vmul.f32 %v1758_v44, %v950_v7  ;;  %v981_v16 = vmul.f32 %v1758_v44, %v958_v8 }
 0x155   :  { %1066 = vst.msk [vmem:[%s1902_s5 + $0x20] sm:$0xff] %vm25_vm0, %v1050_v14  ;;  %v1058_v50 = vsel %vm1020_vm12, %v1003_v49, %v1042_v54  ;;  %vm1015_vm13 = vcmp.ge.f32.partialorder %v998_v12, 0.0  ;;  %v1037_v19 = vmul.f32 %v1776_v11, %v998_v12 }
 0x156   :  { %vm1023_vm14 = vcmp.ge.f32.partialorder %v1006_v13, 0.0  ;;  %1074 = vst.msk [vmem:[%s1902_s5 + $0x60] sm:$0xff] %vm25_vm0, %v1058_v50  ;;  %v1045_v20 = vmul.f32 %v1776_v11, %v1006_v13  ;;  %v996_v21 = vadd.f32 %v1766_v62, %v973_v15  ;;  %v1004_v44 = vadd.f32 %v1766_v62, %v981_v16 }
 0x157   :  { %v1053_v22 = vsel %vm1015_vm13, %v998_v12, %v1037_v19 }
 0x158   :  { %1069 = vst.msk [vmem:[%s1902_s5 + $0x38] sm:$0xff] %vm25_vm0, %v1053_v22  ;;  %v1061_v23 = vsel %vm1023_vm14, %v1006_v13, %v1045_v20  ;;  %vm1013_vm15 = vcmp.ge.f32.partialorder %v996_v21, 0.0  ;;  %v1035_v24 = vmul.f32 %v1776_v11, %v996_v21  ;;  %vm1021_vm1 = vcmp.ge.f32.partialorder %v1004_v44, 0.0 }
 0x159   :  { %1077 = vst.msk [vmem:[%s1902_s5 + $0x78] sm:$0xff] %vm25_vm0, %v1061_v23  ;;  %v1043_v27 = vmul.f32 %v1776_v11, %v1004_v44 }
 0x15a   :  { %v1051_v28 = vsel %vm1013_vm15, %v996_v21, %v1035_v24 }
 0x15b   :  { %1067 = vst.msk [vmem:[%s1902_s5 + $0x28] sm:$0xff] %vm25_vm0, %v1051_v28  ;;  %v1059_v62 = vsel %vm1021_vm1, %v1004_v44, %v1043_v27 }
 0x15c   :  { %1075 = vst.msk [vmem:[%s1902_s5 + $0x68] sm:$0xff] %vm25_vm0, %v1059_v62 }

// kernel: iresnet_forward_pallas.22
= control target key start
LH: loop header
LB: loop body
LE: loop exit
PB: predicated region body
PF: predicated region fallthrough
CT: control target
= control target key end

     0   :  { %vm593_vm0 = vcmask 523264   ;;  %s1849_s1 = inlined_call_operand.vmem [shape: bf16[576,128], index: 1, kind: input, shape index: {}]   ;;  %s1850_s0 = inlined_call_operand.vmem [shape: bf16[128,576], index: 0, kind: input, shape index: {}]   ;;  %s1851_s2 = inlined_call_operand.vmem [shape: f32[1,128], index: 2, kind: input, shape index: {}]   ;;  %s1852_s3 = inlined_call_operand.vmem [shape: f32[1,128], index: 3, kind: input, shape index: {}]   ;;  %s1853_s4 = inlined_call_operand.vmem [shape: f32[1,128], index: 4, kind: input, shape index: {}]   ;;  %s1854_s5 = inlined_call_operand.vmem [shape: f32[128,128], index: 5, kind: output, shape index: {}]  }
   0x1   :  { %v1340_v0 = vld [vmem:[%s1849_s1 + $0x40] sm:$0xff]   ;;  %v1344_v4 = vld [vmem:[%s1849_s1 + $0x48] sm:$0xff]   ;;  %v1348_v8 = vld [vmem:[%s1849_s1 + $0x50] sm:$0xff]  }
   0x2   :  { %v1341_v1 = vld [vmem:[%s1849_s1 + $0xc0] sm:$0xff]   ;;  %1168 = vmatprep.subr.bf16.mxu0 %v1340_v0  ;;  %v1345_v5 = vld [vmem:[%s1849_s1 + $0xc8] sm:$0xff]   ;;  %v1349_v9 = vld [vmem:[%s1849_s1 + $0xd0] sm:$0xff]  }
   0x3   :  { %v1342_v2 = vld [vmem:[%s1849_s1] sm:$0xff]   ;;  %1232 = vmatprep.subr.bf16.mxu1 %v1341_v1  ;;  %v1346_v6 = vld [vmem:[%s1849_s1 + $0x8] sm:$0xff]   ;;  %v1350_v10 = vld [vmem:[%s1849_s1 + $0x10] sm:$0xff]  }
   0x4   :  { %v1343_v3 = vld [vmem:[%s1849_s1 + $0x80] sm:$0xff]   ;;  %1169 = vmatpush3.bf16.msra.mxu0 %v1342_v2  ;;  %v1347_v7 = vld [vmem:[%s1849_s1 + $0x88] sm:$0xff]   ;;  %v1351_v11 = vld [vmem:[%s1849_s1 + $0x90] sm:$0xff]  }
   0x5   :  { %1233 = vmatpush3.bf16.msra.mxu1 %v1343_v3  ;;  %1170 = vmatprep.subr.bf16.mxu0 %v1344_v4  ;;  %v1352_v12 = vld [vmem:[%s1849_s1 + $0x58] sm:$0xff]   ;;  %v1356_v16 = vld [vmem:[%s1849_s1 + $0x60] sm:$0xff]   ;;  %v1360_v20 = vld [vmem:[%s1849_s1 + $0x68] sm:$0xff]  }
   0x6   :  { %1234 = vmatprep.subr.bf16.mxu1 %v1345_v5  ;;  %v1353_v13 = vld [vmem:[%s1849_s1 + $0xd8] sm:$0xff]   ;;  %v1357_v17 = vld [vmem:[%s1849_s1 + $0xe0] sm:$0xff]   ;;  %v1361_v21 = vld [vmem:[%s1849_s1 + $0xe8] sm:$0xff]  }
   0x7   :  { %v1354_v14 = vld [vmem:[%s1849_s1 + $0x18] sm:$0xff]   ;;  %v1358_v18 = vld [vmem:[%s1849_s1 + $0x20] sm:$0xff]   ;;  %v1362_v22 = vld [vmem:[%s1849_s1 + $0x28] sm:$0xff]  }
   0x8   :  { %1171 = vmatpush3.bf16.msra.mxu0 %v1346_v6  ;;  %v1355_v15 = vld [vmem:[%s1849_s1 + $0x98] sm:$0xff]   ;;  %v1359_v19 = vld [vmem:[%s1849_s1 + $0xa0] sm:$0xff]   ;;  %v1363_v23 = vld [vmem:[%s1849_s1 + $0xa8] sm:$0xff]  }
   0x9   :  { %1235 = vmatpush3.bf16.msra.mxu1 %v1347_v7  ;;  %1172 = vmatprep.subr.bf16.mxu0 %v1348_v8  ;;  %v1364_v24 = vld [vmem:[%s1849_s1 + $0x70] sm:$0xff]   ;;  %v1368_v28 = vld [vmem:[%s1849_s1 + $0x78] sm:$0xff]   ;;  %v1377_v35 = vld [vmem:[%s1850_s0 + $0xc] ss:$20 sps:$4 sm:$0xff]  }
   0xa   :  { %1236 = vmatprep.subr.bf16.mxu1 %v1349_v9  ;;  %v1365_v25 = vld [vmem:[%s1849_s1 + $0xf0] sm:$0xff]   ;;  %v1369_v29 = vld [vmem:[%s1849_s1 + $0xf8] sm:$0xff]   ;;  %v1378_v36 = vld [vmem:[%s1849_s1 + $0x100] sm:$0xff]   ;;  %747 = vmatprep.mubr.bf16.mxu1 %v1377_v35 }
   0xb   :  { %v1366_v26 = vld [vmem:[%s1849_s1 + $0x30] sm:$0xff]   ;;  %v1370_v30 = vld [vmem:[%s1849_s1 + $0x38] sm:$0xff]   ;;  %v1379_v37 = vld [vmem:[%s1850_s0 + $0x2c] ss:$20 sps:$4 sm:$0xff]  }
   0xc   :  { %1173 = vmatpush3.bf16.msra.mxu0 %v1350_v10  ;;  %v1367_v27 = vld [vmem:[%s1849_s1 + $0xb0] sm:$0xff]   ;;  %v1371_v31 = vld [vmem:[%s1849_s1 + $0xb8] sm:$0xff]   ;;  %v1391_v42 = vld [vmem:[%s1849_s1 + $0x108] sm:$0xff]  }
   0xd   :  { %1237 = vmatpush3.bf16.msra.mxu1 %v1351_v11  ;;  %1174 = vmatprep.subr.bf16.mxu0 %v1352_v12  ;;  %v1372_v32 = vld [vmem:[%s1850_s0] ss:$20 sps:$4 sm:$0xff]   ;;  %v1374_v33 = vld [vmem:[%s1850_s0 + $0x4] ss:$20 sps:$4 sm:$0xff]   ;;  %v1375_v34 = vld [vmem:[%s1850_s0 + $0x8] ss:$20 sps:$4 sm:$0xff]  }
   0xe   :  { %1238 = vmatprep.subr.bf16.mxu1 %v1353_v13  ;;  %650 = vmatprep.mubr.bf16.mxu0 %v1374_v33  ;;  %v1381_v38 = vld [vmem:[%s1850_s0 + $0x34] ss:$20 sps:$4 sm:$0xff]   ;;  %v1384_v40 = vld [vmem:[%s1850_s0 + $0x30] ss:$20 sps:$4 sm:$0xff]   ;;  %v1390_v45 = vld [vmem:[%s1850_s0 + $0x58] ss:$20 sps:$4 sm:$0xff]  }
   0xf   :  { %v1383_v39 = vld [vmem:[%s1850_s0 + $0x28] ss:$20 sps:$4 sm:$0xff]   ;;  %v1389_v44 = vld [vmem:[%s1850_s0 + $0x50] ss:$20 sps:$4 sm:$0xff]   ;;  %v1396_v50 = vld [vmem:[%s1850_s0 + $0x78] ss:$20 sps:$4 sm:$0xff]  }
  0x10   :  { %1175 = vmatpush3.bf16.msra.mxu0 %v1354_v14  ;;  %v1385_v41 = vld [vmem:[%s1850_s0 + $0x54] ss:$20 sps:$4 sm:$0xff]   ;;  %v1387_v43 = vld [vmem:[%s1850_s0 + $0x5c] ss:$20 sps:$4 sm:$0xff]   ;;  %v1394_v48 = vld [vmem:[%s1850_s0 + $0x84] ss:$20 sps:$4 sm:$0xff]  }
  0x11   :  { %1239 = vmatpush3.bf16.msra.mxu1 %v1355_v15  ;;  %1176 = vmatprep.subr.bf16.mxu0 %v1356_v16  ;;  %v1404_v46 = vld [vmem:[%s1849_s1 + $0x110] sm:$0xff]   ;;  %v1417_v49 = vld [vmem:[%s1849_s1 + $0x118] sm:$0xff]   ;;  %v1400_v53 = vld [vmem:[%s1850_s0 + $0xac] ss:$20 sps:$4 sm:$0xff]  }
  0x12   :  { %1240 = vmatprep.subr.bf16.mxu1 %v1357_v17  ;;  %v1392_v47 = vld [vmem:[%s1850_s0 + $0x7c] ss:$20 sps:$4 sm:$0xff]   ;;  %v1397_v51 = vld [vmem:[%s1850_s0 + $0x80] ss:$20 sps:$4 sm:$0xff]   ;;  %v1398_v52 = vld [vmem:[%s1850_s0 + $0xa4] ss:$20 sps:$4 sm:$0xff]  }
  0x13   :  { %v1402_v54 = vld [vmem:[%s1850_s0 + $0xa0] ss:$20 sps:$4 sm:$0xff]   ;;  %v1403_v55 = vld [vmem:[%s1850_s0 + $0xa8] ss:$20 sps:$4 sm:$0xff]   ;;  %v1410_v59 = vld [vmem:[%s1850_s0 + $0xd0] ss:$20 sps:$4 sm:$0xff]  }
  0x14   :  { %1177 = vmatpush3.bf16.msra.mxu0 %v1358_v18  ;;  %v1405_v56 = vld [vmem:[%s1850_s0 + $0xcc] ss:$20 sps:$4 sm:$0xff]   ;;  %v1407_v57 = vld [vmem:[%s1850_s0 + $0xd4] ss:$20 sps:$4 sm:$0xff]   ;;  %v1413_v61 = vld [vmem:[%s1850_s0 + $0xfc] ss:$20 sps:$4 sm:$0xff]  }
  0x15   :  { %1241 = vmatpush3.bf16.msra.mxu1 %v1359_v19  ;;  %1178 = vmatprep.subr.bf16.mxu0 %v1360_v20  ;;  %v1409_v58 = vld [vmem:[%s1850_s0 + $0xc8] ss:$20 sps:$4 sm:$0xff]   ;;  %v1415_v62 = vld [vmem:[%s1850_s0 + $0xf0] ss:$20 sps:$4 sm:$0xff]   ;;  %v1416_v63 = vld [vmem:[%s1850_s0 + $0xf8] ss:$20 sps:$4 sm:$0xff]  }
  0x16   :  { %1242 = vmatprep.subr.bf16.mxu1 %v1361_v21  ;;  %v1411_v60 = vld [vmem:[%s1850_s0 + $0xf4] ss:$20 sps:$4 sm:$0xff]   ;;  %v1418_v0 = vld [vmem:[%s1850_s0 + $0x11c] ss:$20 sps:$4 sm:$0xff]   ;;  %v1420_v1 = vld [vmem:[%s1850_s0 + $0x124] ss:$20 sps:$4 sm:$0xff]  }
  0x17   :  { %v1422_v2 = vld [vmem:[%s1850_s0 + $0x118] ss:$20 sps:$4 sm:$0xff]   ;;  %v1423_v3 = vld [vmem:[%s1850_s0 + $0x120] ss:$20 sps:$4 sm:$0xff]   ;;  %v1424_v4 = vld [vmem:[%s1850_s0 + $0x10] ss:$20 sps:$4 sm:$0xff]  }
  0x18   :  { %1179 = vmatpush3.bf16.msra.mxu0 %v1362_v22  ;;  %v1425_v5 = vld [vmem:[%s1850_s0 + $0xb0] ss:$20 sps:$4 sm:$0xff]   ;;  %v1426_v6 = vld [vmem:[%s1850_s0 + $0x38] ss:$20 sps:$4 sm:$0xff]   ;;  %v1428_v8 = vld [vmem:[%s1850_s0 + $0x60] ss:$20 sps:$4 sm:$0xff]  }
  0x19   :  { %1243 = vmatpush3.bf16.msra.mxu1 %v1363_v23  ;;  %1180 = vmatprep.subr.bf16.mxu0 %v1364_v24  ;;  %v1427_v7 = vld [vmem:[%s1850_s0 + $0xd8] ss:$20 sps:$4 sm:$0xff]   ;;  %v1429_v9 = vld [vmem:[%s1850_s0 + $0x100] ss:$20 sps:$4 sm:$0xff]   ;;  %v1430_v10 = vld [vmem:[%s1850_s0 + $0x88] ss:$20 sps:$4 sm:$0xff]  }
  0x1a   :  { %1244 = vmatprep.subr.bf16.mxu1 %v1365_v25  ;;  %v1431_v11 = vld [vmem:[%s1850_s0 + $0x128] ss:$20 sps:$4 sm:$0xff]  }
  0x1c   :  { %1181 = vmatpush3.bf16.msra.mxu0 %v1366_v26 }
  0x1d   :  { %1245 = vmatpush3.bf16.msra.mxu1 %v1367_v27  ;;  %1182 = vmatprep.subr.bf16.mxu0 %v1368_v28 }
  0x1e   :  { %1246 = vmatprep.subr.bf16.mxu1 %v1369_v29 }
  0x20   :  { %1183 = vmatpush3.bf16.msra.mxu0 %v1370_v30 }
  0x21   :  { %1247 = vmatpush3.bf16.msra.mxu1 %v1371_v31  ;;  %1308 = vmatprep.subr.bf16.mxu0 %v1378_v36 }
  0x22   :  { %1332 = vmatprep.subr.bf16.mxu1 %v1378_v36 }
  0x23   :  { %651 = vmatmul.mubr.bf16.vlgmr.msra.gmra.mrb[0].mxu0 %v1372_v32 }
  0x24   :  { %748 = vmatmul.mubr.bf16.vlgmr.msra.gmra.mrb[0].mxu1 %v1375_v34  ;;  %1309 = vmatpush3.bf16.msra.mxu0 %v1378_v36 }
  0x25   :  { %1336 = vmatpush3.bf16.msra.mxu1 %v1378_v36  ;;  %658 = vmatprep.mubr.bf16.mxu0 %v1379_v37 }
  0x26   :  { %755 = vmatprep.mubr.bf16.mxu1 %v1381_v38  ;;  %1310 = vmatprep.subr.bf16.mxu0 %v1391_v42 }
  0x27   :  { %1333 = vmatprep.subr.bf16.mxu1 %v1391_v42 }
  0x28   :  { %1311 = vmatpush3.bf16.msra.mxu0 %v1391_v42 }
  0x29   :  { %1337 = vmatpush3.bf16.msra.mxu1 %v1391_v42  ;;  %1312 = vmatprep.subr.bf16.mxu0 %v1404_v46 }
  0x2a   :  { %1334 = vmatprep.subr.bf16.mxu1 %v1404_v46 }
  0x2b   :  { %659 = vmatmul.mubr.bf16.gmra.mrb[4].mxu0 %v1383_v39 }
  0x2c   :  { %756 = vmatmul.mubr.bf16.gmra.mrb[4].mxu1 %v1384_v40  ;;  %666 = vmatprep.mubr.bf16.mxu0 %v1385_v41 }
  0x2d   :  { %763 = vmatprep.mubr.bf16.mxu1 %v1387_v43  ;;  %1313 = vmatpush3.bf16.msra.mxu0 %v1404_v46 }
  0x2e   :  { %1338 = vmatpush3.bf16.msra.mxu1 %v1404_v46  ;;  %1314 = vmatprep.subr.bf16.mxu0 %v1417_v49 }
  0x2f   :  { %1335 = vmatprep.subr.bf16.mxu1 %v1417_v49 }
  0x31   :  { %1315 = vmatpush3.bf16.msra.mxu0 %v1417_v49 }
  0x32   :  { %1339 = vmatpush3.bf16.msra.mxu1 %v1417_v49 }
  0x33   :  { %667 = vmatmul.mubr.bf16.gmra.mrb[8].mxu0 %v1389_v44 }
  0x34   :  { %764 = vmatmul.mubr.bf16.gmra.mrb[8].mxu1 %v1390_v45  ;;  %674 = vmatprep.mubr.bf16.mxu0 %v1392_v47 }
  0x35   :  { %771 = vmatprep.mubr.bf16.mxu1 %v1394_v48 }
  0x3b   :  { %675 = vmatmul.mubr.bf16.gmra.mrb[12].mxu0 %v1396_v50 }
  0x3c   :  { %772 = vmatmul.mubr.bf16.gmra.mrb[12].mxu1 %v1397_v51  ;;  %682 = vmatprep.mubr.bf16.mxu0 %v1398_v52 }
  0x3d   :  { %779 = vmatprep.mubr.bf16.mxu1 %v1400_v53 }
  0x43   :  { %683 = vmatmul.mubr.bf16.gmra.mrb[16].mxu0 %v1402_v54 }
  0x44   :  { %780 = vmatmul.mubr.bf16.gmra.mrb[16].mxu1 %v1403_v55  ;;  %690 = vmatprep.mubr.bf16.mxu0 %v1405_v56 }
  0x45   :  { %787 = vmatprep.mubr.bf16.mxu1 %v1407_v57 }
  0x4b   :  { %691 = vmatmul.mubr.bf16.gmra.mrb[20].mxu0 %v1409_v58 }
  0x4c   :  { %788 = vmatmul.mubr.bf16.gmra.mrb[20].mxu1 %v1410_v59  ;;  %698 = vmatprep.mubr.bf16.mxu0 %v1411_v60 }
  0x4d   :  { %795 = vmatprep.mubr.bf16.mxu1 %v1413_v61 }
  0x53   :  { %699 = vmatmul.mubr.bf16.gmra.mrb[24].mxu0 %v1415_v62 }
  0x54   :  { %796 = vmatmul.mubr.bf16.gmra.mrb[24].mxu1 %v1416_v63  ;;  %706 = vmatprep.mubr.bf16.mxu0 %v1418_v0 }
  0x55   :  { %803 = vmatprep.mubr.bf16.mxu1 %v1420_v1 }
  0x5b   :  { %707 = vmatmul.mubr.bf16.gmra.mrb[28].mxu0 %v1422_v2 }
  0x5c   :  { %804 = vmatmul.mubr.bf16.gmra.mrb[28].mxu1 %v1423_v3  ;;  %1316 = vmatprep.mubr.msk.bf16.mxu0 %vm593_vm0, %v1424_v4 }
  0x5d   :  { %1324 = vmatprep.mubr.msk.bf16.mxu1 %vm593_vm0, %v1425_v5 }
  0x63   :  { %1317 = vmatmul.mubr.msk.bf16.vlgmr.msra.gmra.mrb[32].mxu0 %vm593_vm0, %v1426_v6 }
  0x64   :  { %1325 = vmatmul.mubr.msk.bf16.vlgmr.msra.gmra.mrb[32].mxu1 %vm593_vm0, %v1427_v7  ;;  %1320 = vmatprep.mubr.msk.bf16.mxu0 %vm593_vm0, %v1428_v8 }
  0x65   :  { %1328 = vmatprep.mubr.msk.bf16.mxu1 %vm593_vm0, %v1429_v9 }
  0x6b   :  { %1321 = vmatmul.mubr.msk.bf16.gmra.mrb[36].mxu0 %vm593_vm0, %v1430_v10 }
  0x6c   :  { %1329 = vmatmul.mubr.msk.bf16.gmra.mrb[36].mxu1 %vm593_vm0, %v1431_v11 }
  0xf6   :  { %v1184_v12 = vpop.f32.mrb[0].mxu0 }
  0xf7   :  { %v1248_v13 = vpop.f32.mrb[0].mxu1  ;;  %v1185_v14 = vpop.f32.mrb[1].mxu0 }
  0xf8   :  { %v1186_v15 = vadd.f32 %v1185_v14, %v1184_v12  ;;  %v1249_v16 = vpop.f32.mrb[1].mxu1  ;;  %v1187_v17 = vpop.f32.mrb[2].mxu0 }
  0xf9   :  { %v1250_v18 = vadd.f32 %v1249_v16, %v1248_v13  ;;  %v1251_v19 = vpop.f32.mrb[2].mxu1  ;;  %v1188_v20 = vpop.f32.mrb[3].mxu0 }
  0xfa   :  { %v1189_v21 = vadd.f32 %v1188_v20, %v1187_v17  ;;  %v1252_v22 = vpop.f32.mrb[3].mxu1 }
  0xfb   :  { %v1253_v23 = vadd.f32 %v1252_v22, %v1251_v19  ;;  %v1698_v24 = vadd.f32 %v1250_v18, %v1186_v15 }
  0xfd   :  { %v1700_v25 = vadd.f32 %v1253_v23, %v1189_v21 }
  0xfe   :  { %v1190_v26 = vpop.f32.mrb[4].mxu0 }
  0xff   :  { %v1254_v27 = vpop.f32.mrb[4].mxu1  ;;  %v1191_v28 = vpop.f32.mrb[5].mxu0 }
 0x100   :  { %v1192_v29 = vadd.f32 %v1191_v28, %v1190_v26  ;;  %v1255_v30 = vpop.f32.mrb[5].mxu1  ;;  %v1193_v31 = vpop.f32.mrb[6].mxu0 }
 0x101   :  { %v1256_v32 = vadd.f32 %v1255_v30, %v1254_v27  ;;  %v1257_v33 = vpop.f32.mrb[6].mxu1  ;;  %v1194_v34 = vpop.f32.mrb[7].mxu0 }
 0x102   :  { %v1195_v35 = vadd.f32 %v1194_v34, %v1193_v31  ;;  %v1258_v36 = vpop.f32.mrb[7].mxu1 }
 0x103   :  { %v1259_v37 = vadd.f32 %v1258_v36, %v1257_v33  ;;  %v1702_v38 = vadd.f32 %v1256_v32, %v1192_v29 }
 0x105   :  { %v1704_v39 = vadd.f32 %v1259_v37, %v1195_v35 }
 0x106   :  { %v1196_v40 = vpop.f32.mrb[8].mxu0 }
 0x107   :  { %v1260_v41 = vpop.f32.mrb[8].mxu1  ;;  %v1197_v42 = vpop.f32.mrb[9].mxu0 }
 0x108   :  { %v1198_v43 = vadd.f32 %v1197_v42, %v1196_v40  ;;  %v1261_v44 = vpop.f32.mrb[9].mxu1  ;;  %v1199_v45 = vpop.f32.mrb[10].mxu0 }
 0x109   :  { %v1262_v46 = vadd.f32 %v1261_v44, %v1260_v41  ;;  %v1263_v47 = vpop.f32.mrb[10].mxu1  ;;  %v1200_v48 = vpop.f32.mrb[11].mxu0 }
 0x10a   :  { %v1201_v49 = vadd.f32 %v1200_v48, %v1199_v45  ;;  %v1264_v50 = vpop.f32.mrb[11].mxu1 }
 0x10b   :  { %v1265_v51 = vadd.f32 %v1264_v50, %v1263_v47  ;;  %v1706_v52 = vadd.f32 %v1262_v46, %v1198_v43 }
 0x10d   :  { %v1708_v53 = vadd.f32 %v1265_v51, %v1201_v49 }
 0x10e   :  { %v1202_v54 = vpop.f32.mrb[12].mxu0 }
 0x10f   :  { %v1266_v55 = vpop.f32.mrb[12].mxu1  ;;  %v1203_v56 = vpop.f32.mrb[13].mxu0 }
 0x110   :  { %v1204_v57 = vadd.f32 %v1203_v56, %v1202_v54  ;;  %v1267_v58 = vpop.f32.mrb[13].mxu1  ;;  %v1205_v59 = vpop.f32.mrb[14].mxu0 }
 0x111   :  { %v1268_v60 = vadd.f32 %v1267_v58, %v1266_v55  ;;  %v1269_v61 = vpop.f32.mrb[14].mxu1  ;;  %v1206_v62 = vpop.f32.mrb[15].mxu0 }
 0x112   :  { %v1207_v63 = vadd.f32 %v1206_v62, %v1205_v59  ;;  %v1270_v0 = vpop.f32.mrb[15].mxu1 }
 0x113   :  { %v1271_v1 = vadd.f32 %v1270_v0, %v1269_v61  ;;  %v1710_v2 = vadd.f32 %v1268_v60, %v1204_v57 }
 0x115   :  { %v1712_v3 = vadd.f32 %v1271_v1, %v1207_v63 }
 0x116   :  { %v1208_v4 = vpop.f32.mrb[16].mxu0 }
 0x117   :  { %v1272_v5 = vpop.f32.mrb[16].mxu1  ;;  %v1209_v6 = vpop.f32.mrb[17].mxu0 }
 0x118   :  { %v1210_v7 = vadd.f32 %v1209_v6, %v1208_v4  ;;  %v1273_v8 = vpop.f32.mrb[17].mxu1  ;;  %v1211_v9 = vpop.f32.mrb[18].mxu0 }
 0x119   :  { %v1274_v10 = vadd.f32 %v1273_v8, %v1272_v5  ;;  %v1275_v11 = vpop.f32.mrb[18].mxu1  ;;  %v1212_v12 = vpop.f32.mrb[19].mxu0  ;;  %v1727_v5 = vld [vmem:[%s1851_s2] ss:$0 sm:$0xff] }
 0x11a   :  { %v1213_v13 = vadd.f32 %v1212_v12, %v1211_v9  ;;  %v1276_v14 = vpop.f32.mrb[19].mxu1  ;;  %v1733_v9 = vld [vmem:[%s1852_s3] ss:$0 sm:$0xff] }
 0x11b   :  { %v1277_v15 = vadd.f32 %v1276_v14, %v1275_v11  ;;  %v782_v16 = vadd.f32 %v1274_v10, %v1210_v7 }
 0x11d   :  { %v1714_v17 = vadd.f32 %v1277_v15, %v1213_v13 }
 0x11e   :  { %v1214_v18 = vpop.f32.mrb[20].mxu0 }
 0x11f   :  { %v1278_v19 = vpop.f32.mrb[20].mxu1  ;;  %v1215_v20 = vpop.f32.mrb[21].mxu0 }
 0x120   :  { %v1216_v21 = vadd.f32 %v1215_v20, %v1214_v18  ;;  %v1279_v22 = vpop.f32.mrb[21].mxu1  ;;  %v1217_v23 = vpop.f32.mrb[22].mxu0 }
 0x121   :  { %v1280_v26 = vadd.f32 %v1279_v22, %v1278_v19  ;;  %v1281_v27 = vpop.f32.mrb[22].mxu1  ;;  %v1218_v28 = vpop.f32.mrb[23].mxu0 }
 0x122   :  { %v1219_v29 = vadd.f32 %v1218_v28, %v1217_v23  ;;  %v1282_v30 = vpop.f32.mrb[23].mxu1 }
 0x123   :  { %v1283_v31 = vadd.f32 %v1282_v30, %v1281_v27  ;;  %v790_v32 = vadd.f32 %v1280_v26, %v1216_v21 }
 0x125   :  { %v793_v33 = vadd.f32 %v1283_v31, %v1219_v29 }
 0x126   :  { %v1220_v34 = vpop.f32.mrb[24].mxu0 }
 0x127   :  { %v1284_v35 = vpop.f32.mrb[24].mxu1  ;;  %v1221_v36 = vpop.f32.mrb[25].mxu0 }
 0x128   :  { %v1222_v37 = vadd.f32 %v1221_v36, %v1220_v34  ;;  %v1285_v40 = vpop.f32.mrb[25].mxu1  ;;  %v1223_v41 = vpop.f32.mrb[26].mxu0 }
 0x129   :  { %v1286_v42 = vadd.f32 %v1285_v40, %v1284_v35  ;;  %v1287_v43 = vpop.f32.mrb[26].mxu1  ;;  %v1224_v44 = vpop.f32.mrb[27].mxu0 }
 0x12a   :  { %v1225_v45 = vadd.f32 %v1224_v44, %v1223_v41  ;;  %v1288_v46 = vpop.f32.mrb[27].mxu1 }
 0x12b   :  { %v1289_v47 = vadd.f32 %v1288_v46, %v1287_v43  ;;  %v1716_v48 = vadd.f32 %v1286_v42, %v1222_v37 }
 0x12d   :  { %v1718_v49 = vadd.f32 %v1289_v47, %v1225_v45 }
 0x12e   :  { %v1226_v50 = vpop.f32.mrb[28].mxu0 }
 0x12f   :  { %v1290_v51 = vpop.f32.mrb[28].mxu1  ;;  %v1227_v54 = vpop.f32.mrb[29].mxu0 }
 0x130   :  { %v1228_v55 = vadd.f32 %v1227_v54, %v1226_v50  ;;  %v1291_v56 = vpop.f32.mrb[29].mxu1  ;;  %v1229_v57 = vpop.f32.mrb[30].mxu0 }
 0x131   :  { %v1292_v58 = vadd.f32 %v1291_v56, %v1290_v51  ;;  %v1293_v59 = vpop.f32.mrb[30].mxu1  ;;  %v1230_v60 = vpop.f32.mrb[31].mxu0 }
 0x132   :  { %v1231_v61 = vadd.f32 %v1230_v60, %v1229_v57  ;;  %v1294_v62 = vpop.f32.mrb[31].mxu1 }
 0x133   :  { %v1295_v63 = vadd.f32 %v1294_v62, %v1293_v59  ;;  %v1720_v0 = vadd.f32 %v1292_v58, %v1228_v55 }
 0x135   :  { %v1722_v1 = vadd.f32 %v1295_v63, %v1231_v61 }
 0x136   :  { %v1318_v4 = vpop.f32.mrb[32].mxu0 }
 0x137   :  { %v855_v6 = vadd.f32 %v1318_v4, %v1702_v38  ;;  %v1326_v7 = vpop.f32.mrb[32].mxu1  ;;  %v846_v8 = vpop.f32.mrb[33].mxu0  ;;  %v1741_v38 = vld [vmem:[%s1853_s4] ss:$0 sm:$0xff] }
 0x138   :  { %v887_v10 = vadd.f32 %v1326_v7, %v790_v32  ;;  %v847_v11 = vadd.f32 %v846_v8, %v1698_v24  ;;  %v878_v12 = vpop.f32.mrb[33].mxu1  ;;  %v1319_v13 = vpop.f32.mrb[34].mxu0 }
 0x139   :  { %v969_v14 = vmul.f32 %v1727_v5, %v855_v6  ;;  %v879_v15 = vadd.f32 %v878_v12, %v782_v16  ;;  %v858_v18 = vadd.f32 %v1319_v13, %v1704_v39  ;;  %v1327_v19 = vpop.f32.mrb[34].mxu1  ;;  %v849_v20 = vpop.f32.mrb[35].mxu0 }
 0x13a   :  { %v977_v21 = vmul.f32 %v1727_v5, %v887_v10  ;;  %v967_v22 = vmul.f32 %v1727_v5, %v847_v11  ;;  %v890_v23 = vadd.f32 %v1327_v19, %v793_v33  ;;  %v850_v24 = vadd.f32 %v849_v20, %v1700_v25  ;;  %v881_v26 = vpop.f32.mrb[35].mxu1 }
 0x13b   :  { %v992_v27 = vadd.f32 %v1733_v9, %v969_v14  ;;  %v975_v16 = vmul.f32 %v1727_v5, %v879_v15  ;;  %v970_v39 = vmul.f32 %v1727_v5, %v858_v18  ;;  %v882_v28 = vadd.f32 %v881_v26, %v1714_v17 }
 0x13c   :  { %v1000_v29 = vadd.f32 %v1733_v9, %v977_v21  ;;  %v990_v30 = vadd.f32 %v1733_v9, %v967_v22  ;;  %v978_v31 = vmul.f32 %v1727_v5, %v890_v23  ;;  %v968_v32 = vmul.f32 %v1727_v5, %v850_v24 }
 0x13d   :  { %vm1009_vm1 = vcmp.ge.f32.partialorder %v992_v27, 0.0  ;;  %v1031_v25 = vmul.f32 %v1741_v38, %v992_v27  ;;  %v998_v33 = vadd.f32 %v1733_v9, %v975_v16  ;;  %v993_v34 = vadd.f32 %v1733_v9, %v970_v39 }
 0x13e   :  { %vm1017_vm2 = vcmp.ge.f32.partialorder %v1000_v29, 0.0  ;;  %v1039_v35 = vmul.f32 %v1741_v38, %v1000_v29  ;;  %vm1007_vm3 = vcmp.ge.f32.partialorder %v990_v30, 0.0  ;;  %v1029_v17 = vmul.f32 %v1741_v38, %v990_v30  ;;  %v1322_v36 = vpop.f32.mrb[36].mxu0 }
 0x13f   :  { %v1047_v37 = vsel %vm1009_vm1, %v992_v27, %v1031_v25  ;;  %vm1015_vm4 = vcmp.ge.f32.partialorder %v998_v33, 0.0  ;;  %v1037_v40 = vmul.f32 %v1741_v38, %v998_v33  ;;  %vm1010_vm5 = vcmp.ge.f32.partialorder %v993_v34, 0.0  ;;  %v1330_v41 = vpop.f32.mrb[36].mxu1  ;;  %v862_v42 = vpop.f32.mrb[37].mxu0 }
 0x140   :  { %1063 = vst [vmem:[%s1854_s5 + $0x10] sm:$0xff] %v1047_v37  ;;  %v1055_v43 = vsel %vm1017_vm2, %v1000_v29, %v1039_v35  ;;  %v1045_v44 = vsel %vm1007_vm3, %v990_v30, %v1029_v17  ;;  %v1032_v45 = vmul.f32 %v1741_v38, %v993_v34  ;;  %v1001_v46 = vadd.f32 %v1733_v9, %v978_v31  ;;  %v894_v47 = vpop.f32.mrb[37].mxu1  ;;  %v1323_v50 = vpop.f32.mrb[38].mxu0 }
 0x141   :  { %1071 = vst [vmem:[%s1854_s5 + $0x50] sm:$0xff] %v1055_v43  ;;  %1061 = vst [vmem:[%s1854_s5] sm:$0xff] %v1045_v44  ;;  %v1053_v51 = vsel %vm1015_vm4, %v998_v33, %v1037_v40  ;;  %v991_v54 = vadd.f32 %v1733_v9, %v968_v32  ;;  %v976_v55 = vmul.f32 %v1727_v5, %v882_v28  ;;  %v1331_v57 = vpop.f32.mrb[38].mxu1  ;;  %v865_v58 = vpop.f32.mrb[39].mxu0 }
 0x142   :  { %v871_v56 = vadd.f32 %v1322_v36, %v1710_v2  ;;  %1069 = vst [vmem:[%s1854_s5 + $0x40] sm:$0xff] %v1053_v51  ;;  %v1048_v59 = vsel %vm1010_vm5, %v993_v34, %v1032_v45  ;;  %vm1018_vm6 = vcmp.ge.f32.partialorder %v1001_v46, 0.0  ;;  %v1040_v60 = vmul.f32 %v1741_v38, %v1001_v46  ;;  %v897_v62 = vpop.f32.mrb[39].mxu1 }
 0x143   :  { %v903_v61 = vadd.f32 %v1330_v41, %v1720_v0  ;;  %1064 = vst [vmem:[%s1854_s5 + $0x18] sm:$0xff] %v1048_v59  ;;  %vm1008_vm7 = vcmp.ge.f32.partialorder %v991_v54, 0.0  ;;  %v1030_v2 = vmul.f32 %v1741_v38, %v991_v54  ;;  %v999_v63 = vadd.f32 %v1733_v9, %v976_v55 }
 0x144   :  { %v973_v4 = vmul.f32 %v1727_v5, %v871_v56  ;;  %v1056_v6 = vsel %vm1018_vm6, %v1001_v46, %v1040_v60  ;;  %v863_v8 = vadd.f32 %v862_v42, %v1706_v52  ;;  %v895_v10 = vadd.f32 %v894_v47, %v1716_v48 }
 0x145   :  { %v981_v7 = vmul.f32 %v1727_v5, %v903_v61  ;;  %1072 = vst [vmem:[%s1854_s5 + $0x58] sm:$0xff] %v1056_v6  ;;  %v1046_v0 = vsel %vm1008_vm7, %v991_v54, %v1030_v2  ;;  %vm1016_vm8 = vcmp.ge.f32.partialorder %v999_v63, 0.0  ;;  %v1038_v11 = vmul.f32 %v1741_v38, %v999_v63 }
 0x146   :  { %v996_v12 = vadd.f32 %v1733_v9, %v973_v4  ;;  %1062 = vst [vmem:[%s1854_s5 + $0x8] sm:$0xff] %v1046_v0  ;;  %v971_v52 = vmul.f32 %v1727_v5, %v863_v8  ;;  %v979_v48 = vmul.f32 %v1727_v5, %v895_v10  ;;  %v874_v14 = vadd.f32 %v1323_v50, %v1712_v3 }
 0x147   :  { %v1004_v13 = vadd.f32 %v1733_v9, %v981_v7  ;;  %v1054_v15 = vsel %vm1016_vm8, %v999_v63, %v1038_v11  ;;  %v906_v19 = vadd.f32 %v1331_v57, %v1722_v1  ;;  %v866_v26 = vadd.f32 %v865_v58, %v1708_v53 }
 0x148   :  { %vm1013_vm9 = vcmp.ge.f32.partialorder %v996_v12, 0.0  ;;  %v1035_v18 = vmul.f32 %v1741_v38, %v996_v12  ;;  %1070 = vst [vmem:[%s1854_s5 + $0x48] sm:$0xff] %v1054_v15  ;;  %v994_v21 = vadd.f32 %v1733_v9, %v971_v52  ;;  %v1002_v22 = vadd.f32 %v1733_v9, %v979_v48 }
 0x149   :  { %vm1021_vm10 = vcmp.ge.f32.partialorder %v1004_v13, 0.0  ;;  %v1043_v20 = vmul.f32 %v1741_v38, %v1004_v13  ;;  %v974_v3 = vmul.f32 %v1727_v5, %v874_v14  ;;  %v982_v24 = vmul.f32 %v1727_v5, %v906_v19 }
 0x14a   :  { %v1051_v23 = vsel %vm1013_vm9, %v996_v12, %v1035_v18  ;;  %vm1011_vm11 = vcmp.ge.f32.partialorder %v994_v21, 0.0  ;;  %v1033_v27 = vmul.f32 %v1741_v38, %v994_v21  ;;  %vm1019_vm12 = vcmp.ge.f32.partialorder %v1002_v22, 0.0 }
 0x14b   :  { %1067 = vst [vmem:[%s1854_s5 + $0x30] sm:$0xff] %v1051_v23  ;;  %v1059_v1 = vsel %vm1021_vm10, %v1004_v13, %v1043_v20  ;;  %v1041_v16 = vmul.f32 %v1741_v38, %v1002_v22  ;;  %v997_v39 = vadd.f32 %v1733_v9, %v974_v3  ;;  %v1005_v28 = vadd.f32 %v1733_v9, %v982_v24 }
 0x14c   :  { %1075 = vst [vmem:[%s1854_s5 + $0x70] sm:$0xff] %v1059_v1  ;;  %v972_v53 = vmul.f32 %v1727_v5, %v866_v26  ;;  %v1049_v29 = vsel %vm1011_vm11, %v994_v21, %v1033_v27  ;;  %v898_v30 = vadd.f32 %v897_v62, %v1718_v49 }
 0x14d   :  { %1065 = vst [vmem:[%s1854_s5 + $0x20] sm:$0xff] %v1049_v29  ;;  %v1057_v31 = vsel %vm1019_vm12, %v1002_v22, %v1041_v16  ;;  %vm1014_vm13 = vcmp.ge.f32.partialorder %v997_v39, 0.0  ;;  %v1036_v32 = vmul.f32 %v1741_v38, %v997_v39  ;;  %vm1022_vm14 = vcmp.ge.f32.partialorder %v1005_v28, 0.0 }
 0x14e   :  { %1073 = vst [vmem:[%s1854_s5 + $0x60] sm:$0xff] %v1057_v31  ;;  %v1044_v25 = vmul.f32 %v1741_v38, %v1005_v28  ;;  %v995_v33 = vadd.f32 %v1733_v9, %v972_v53  ;;  %v980_v34 = vmul.f32 %v1727_v5, %v898_v30 }
 0x14f   :  { %v1052_v49 = vsel %vm1014_vm13, %v997_v39, %v1036_v32 }
 0x150   :  { %1068 = vst [vmem:[%s1854_s5 + $0x38] sm:$0xff] %v1052_v49  ;;  %v1060_v35 = vsel %vm1022_vm14, %v1005_v28, %v1044_v25  ;;  %vm1012_vm15 = vcmp.ge.f32.partialorder %v995_v33, 0.0  ;;  %v1034_v17 = vmul.f32 %v1741_v38, %v995_v33  ;;  %v1003_v36 = vadd.f32 %v1733_v9, %v980_v34 }
 0x151   :  { %1076 = vst [vmem:[%s1854_s5 + $0x78] sm:$0xff] %v1060_v35 }
 0x152   :  { %v1050_v37 = vsel %vm1012_vm15, %v995_v33, %v1034_v17  ;;  %vm1020_vm0 = vcmp.ge.f32.partialorder %v1003_v36, 0.0  ;;  %v1042_v40 = vmul.f32 %v1741_v38, %v1003_v36 }
 0x153   :  { %1066 = vst [vmem:[%s1854_s5 + $0x28] sm:$0xff] %v1050_v37 }
 0x154   :  { %v1058_v5 = vsel %vm1020_vm0, %v1003_v36, %v1042_v40 }
 0x155   :  { %1074 = vst [vmem:[%s1854_s5 + $0x68] sm:$0xff] %v1058_v5 }

// kernel: iresnet_forward_pallas.23
= control target key start
LH: loop header
LB: loop body
LE: loop exit
PB: predicated region body
PF: predicated region fallthrough
CT: control target
= control target key end

     0   :  { %vm76_vm0 = vcmask 523264   ;;  %s272_s1 = inlined_call_operand.vmem [shape: bf16[64,128], index: 1, kind: input, shape index: {}]   ;;  %s273_s0 = inlined_call_operand.vmem [shape: bf16[32,64], index: 0, kind: input, shape index: {}]   ;;  %s274_s2 = inlined_call_operand.vmem [shape: f32[1,128], index: 2, kind: input, shape index: {}]   ;;  %s275_s3 = inlined_call_operand.vmem [shape: f32[1,128], index: 3, kind: input, shape index: {}]   ;;  %s276_s4 = inlined_call_operand.vmem [shape: f32[32,128], index: 4, kind: output, shape index: {}]  }
   0x1   :  { %v205_v0 = vld [vmem:[%s272_s1] sm:$0xff]   ;;  %v206_v1 = vld [vmem:[%s272_s1 + $0x8] sm:$0xff]   ;;  %v207_v2 = vld [vmem:[%s272_s1 + $0x10] sm:$0xff]  }
   0x2   :  { %193 = vmatprep.subr.bf16.mxu0 %v205_v0  ;;  %v209_v3 = vld [vmem:[%s273_s0] sm:$0xff]   ;;  %v208_v4 = vld [vmem:[%s272_s1 + $0x18] sm:$0xff]   ;;  %v210_v5 = vld [vmem:[%s273_s0 + $0x8] sm:$0xff]  }
   0x3   :  { %194 = vmatpush3.bf16.msra.mxu0 %v205_v0  ;;  %201 = vmatprep.mubr.msk.bf16.mxu0 %vm76_vm0, %v209_v3  ;;  %v185_v6 = vld [vmem:[%s274_s2] ss:$0 sm:$0xff] }
   0x4   :  { %195 = vmatprep.subr.bf16.mxu0 %v206_v1  ;;  %v186_v8 = vld [vmem:[%s275_s3] ss:$0 sm:$0xff] }
   0x7   :  { %196 = vmatpush3.bf16.msra.mxu0 %v206_v1 }
   0x8   :  { %197 = vmatprep.subr.bf16.mxu0 %v207_v2 }
   0xb   :  { %198 = vmatpush3.bf16.msra.mxu0 %v207_v2 }
   0xc   :  { %199 = vmatprep.subr.bf16.mxu0 %v208_v4 }
   0xf   :  { %200 = vmatpush3.bf16.msra.mxu0 %v208_v4 }
  0x12   :  { %202 = vmatmul.mubr.msk.bf16.vlgmr.msra.gmra.mrb[0].mxu0 %vm76_vm0, %v210_v5 }
  0xe5   :  { %v203_v7 = vpop.f32.mrb[0].mxu0 }
  0xe6   :  { %v156_v9 = vmul.f32 %v203_v7, %v185_v6  ;;  %v117_v10 = vpop.f32.mrb[1].mxu0 }
  0xe7   :  { %v154_v11 = vmul.f32 %v185_v6, %v117_v10  ;;  %v204_v12 = vpop.f32.mrb[2].mxu0 }
  0xe8   :  { %v167_v13 = vadd.f32 %v186_v8, %v156_v9  ;;  %v157_v14 = vmul.f32 %v204_v12, %v185_v6  ;;  %v120_v15 = vpop.f32.mrb[3].mxu0 }
  0xe9   :  { %v165_v16 = vadd.f32 %v186_v8, %v154_v11  ;;  %v155_v17 = vmul.f32 %v185_v6, %v120_v15 }
  0xea   :  { %171 = vst [vmem:[%s276_s4 + $0x10] sm:$0xff] %v167_v13  ;;  %v168_v18 = vadd.f32 %v186_v8, %v157_v14 }
  0xeb   :  { %169 = vst [vmem:[%s276_s4] sm:$0xff] %v165_v16  ;;  %v166_v19 = vadd.f32 %v186_v8, %v155_v17 }
  0xec   :  { %172 = vst [vmem:[%s276_s4 + $0x18] sm:$0xff] %v168_v18 }
  0xed   :  { %170 = vst [vmem:[%s276_s4 + $0x8] sm:$0xff] %v166_v19 }

// kernel: iresnet_forward_pallas.24
= control target key start
LH: loop header
LB: loop body
LE: loop exit
PB: predicated region body
PF: predicated region fallthrough
CT: control target
= control target key end

     0   :  { %s1681_s1 = inlined_call_operand.vmem [shape: bf16[1152,128], index: 1, kind: input, shape index: {}]   ;;  %s1682_s0 = inlined_call_operand.vmem [shape: bf16[32,1152], index: 0, kind: input, shape index: {}]   ;;  %s1683_s2 = inlined_call_operand.vmem [shape: f32[1,128], index: 2, kind: input, shape index: {}]   ;;  %s1684_s3 = inlined_call_operand.vmem [shape: f32[1,128], index: 3, kind: input, shape index: {}]   ;;  %s1685_s4 = inlined_call_operand.vmem [shape: f32[32,128], index: 4, kind: input, shape index: {}]   ;;  %s1686_s5 = inlined_call_operand.vmem [shape: f32[32,128], index: 5, kind: output, shape index: {}]  }
   0x1   :  { %v1253_v0 = vld [vmem:[%s1681_s1 + $0x40] sm:$0xff]   ;;  %v1257_v4 = vld [vmem:[%s1681_s1 + $0x48] sm:$0xff]   ;;  %v1261_v8 = vld [vmem:[%s1681_s1 + $0x50] sm:$0xff]  }
   0x2   :  { %v1254_v1 = vld [vmem:[%s1681_s1 + $0xc0] sm:$0xff]   ;;  %1111 = vmatprep.subr.bf16.mxu0 %v1253_v0  ;;  %v1258_v5 = vld [vmem:[%s1681_s1 + $0xc8] sm:$0xff]   ;;  %v1262_v9 = vld [vmem:[%s1681_s1 + $0xd0] sm:$0xff]  }
   0x3   :  { %v1255_v2 = vld [vmem:[%s1681_s1] sm:$0xff]   ;;  %1139 = vmatprep.subr.bf16.mxu1 %v1254_v1  ;;  %v1259_v6 = vld [vmem:[%s1681_s1 + $0x8] sm:$0xff]   ;;  %v1263_v10 = vld [vmem:[%s1681_s1 + $0x10] sm:$0xff]  }
   0x4   :  { %v1256_v3 = vld [vmem:[%s1681_s1 + $0x80] sm:$0xff]   ;;  %1112 = vmatpush3.bf16.msra.mxu0 %v1255_v2  ;;  %v1260_v7 = vld [vmem:[%s1681_s1 + $0x88] sm:$0xff]   ;;  %v1264_v11 = vld [vmem:[%s1681_s1 + $0x90] sm:$0xff]  }
   0x5   :  { %1140 = vmatpush3.bf16.msra.mxu1 %v1256_v3  ;;  %1113 = vmatprep.subr.bf16.mxu0 %v1257_v4  ;;  %v1265_v12 = vld [vmem:[%s1681_s1 + $0x58] sm:$0xff]   ;;  %v1269_v16 = vld [vmem:[%s1681_s1 + $0x60] sm:$0xff]   ;;  %v1273_v20 = vld [vmem:[%s1681_s1 + $0x68] sm:$0xff]  }
   0x6   :  { %1141 = vmatprep.subr.bf16.mxu1 %v1258_v5  ;;  %v1266_v13 = vld [vmem:[%s1681_s1 + $0xd8] sm:$0xff]   ;;  %v1270_v17 = vld [vmem:[%s1681_s1 + $0xe0] sm:$0xff]   ;;  %v1274_v21 = vld [vmem:[%s1681_s1 + $0xe8] sm:$0xff]  }
   0x7   :  { %v1267_v14 = vld [vmem:[%s1681_s1 + $0x18] sm:$0xff]   ;;  %v1271_v18 = vld [vmem:[%s1681_s1 + $0x20] sm:$0xff]   ;;  %v1275_v22 = vld [vmem:[%s1681_s1 + $0x28] sm:$0xff]  }
   0x8   :  { %1114 = vmatpush3.bf16.msra.mxu0 %v1259_v6  ;;  %v1268_v15 = vld [vmem:[%s1681_s1 + $0x98] sm:$0xff]   ;;  %v1272_v19 = vld [vmem:[%s1681_s1 + $0xa0] sm:$0xff]   ;;  %v1276_v23 = vld [vmem:[%s1681_s1 + $0xa8] sm:$0xff]  }
   0x9   :  { %1142 = vmatpush3.bf16.msra.mxu1 %v1260_v7  ;;  %1115 = vmatprep.subr.bf16.mxu0 %v1261_v8  ;;  %v1277_v24 = vld [vmem:[%s1681_s1 + $0x70] sm:$0xff]   ;;  %v1281_v28 = vld [vmem:[%s1681_s1 + $0x78] sm:$0xff]   ;;  %v1285_v32 = vld [vmem:[%s1682_s0] ss:$36 sps:$4 sm:$0xff]  }
   0xa   :  { %1143 = vmatprep.subr.bf16.mxu1 %v1262_v9  ;;  %v1278_v25 = vld [vmem:[%s1681_s1 + $0xf0] sm:$0xff]   ;;  %v1282_v29 = vld [vmem:[%s1681_s1 + $0xf8] sm:$0xff]   ;;  %v1287_v33 = vld [vmem:[%s1682_s0 + $0x4] ss:$36 sps:$4 sm:$0xff]  }
   0xb   :  { %v1279_v26 = vld [vmem:[%s1681_s1 + $0x30] sm:$0xff]   ;;  %v1283_v30 = vld [vmem:[%s1681_s1 + $0x38] sm:$0xff]   ;;  %v1288_v34 = vld [vmem:[%s1682_s0 + $0x8] ss:$36 sps:$4 sm:$0xff]   ;;  %753 = vmatprep.mubr.bf16.mxu0 %v1287_v33 }
   0xc   :  { %1116 = vmatpush3.bf16.msra.mxu0 %v1263_v10  ;;  %v1280_v27 = vld [vmem:[%s1681_s1 + $0xb0] sm:$0xff]   ;;  %v1284_v31 = vld [vmem:[%s1681_s1 + $0xb8] sm:$0xff]   ;;  %v1291_v36 = vld [vmem:[%s1681_s1 + $0x140] sm:$0xff]  }
   0xd   :  { %1144 = vmatpush3.bf16.msra.mxu1 %v1264_v11  ;;  %1117 = vmatprep.subr.bf16.mxu0 %v1265_v12  ;;  %v1290_v35 = vld [vmem:[%s1682_s0 + $0xc] ss:$36 sps:$4 sm:$0xff]   ;;  %v1292_v37 = vld [vmem:[%s1681_s1 + $0x100] sm:$0xff]   ;;  %v1303_v48 = vld [vmem:[%s1681_s1 + $0x158] sm:$0xff]  }
   0xe   :  { %1145 = vmatprep.subr.bf16.mxu1 %v1266_v13  ;;  %802 = vmatprep.mubr.bf16.mxu1 %v1290_v35  ;;  %v1293_v38 = vld [vmem:[%s1681_s1 + $0x1c0] sm:$0xff]   ;;  %v1295_v40 = vld [vmem:[%s1681_s1 + $0x148] sm:$0xff]   ;;  %v1299_v44 = vld [vmem:[%s1681_s1 + $0x150] sm:$0xff]  }
   0xf   :  { %v1294_v39 = vld [vmem:[%s1681_s1 + $0x180] sm:$0xff]   ;;  %v1296_v41 = vld [vmem:[%s1681_s1 + $0x108] sm:$0xff]   ;;  %v1300_v45 = vld [vmem:[%s1681_s1 + $0x110] sm:$0xff]  }
  0x10   :  { %1118 = vmatpush3.bf16.msra.mxu0 %v1267_v14  ;;  %v1297_v42 = vld [vmem:[%s1681_s1 + $0x1c8] sm:$0xff]   ;;  %v1301_v46 = vld [vmem:[%s1681_s1 + $0x1d0] sm:$0xff]   ;;  %v1304_v49 = vld [vmem:[%s1681_s1 + $0x118] sm:$0xff]  }
  0x11   :  { %1146 = vmatpush3.bf16.msra.mxu1 %v1268_v15  ;;  %1119 = vmatprep.subr.bf16.mxu0 %v1269_v16  ;;  %v1298_v43 = vld [vmem:[%s1681_s1 + $0x188] sm:$0xff]   ;;  %v1302_v47 = vld [vmem:[%s1681_s1 + $0x190] sm:$0xff]   ;;  %v1305_v50 = vld [vmem:[%s1681_s1 + $0x1d8] sm:$0xff]  }
  0x12   :  { %1147 = vmatprep.subr.bf16.mxu1 %v1270_v17  ;;  %v1306_v51 = vld [vmem:[%s1681_s1 + $0x198] sm:$0xff]   ;;  %v1307_v52 = vld [vmem:[%s1681_s1 + $0x160] sm:$0xff]   ;;  %v1311_v56 = vld [vmem:[%s1681_s1 + $0x168] sm:$0xff]  }
  0x13   :  { %v1308_v53 = vld [vmem:[%s1681_s1 + $0x120] sm:$0xff]   ;;  %v1312_v57 = vld [vmem:[%s1682_s0 + $0x4c] ss:$36 sps:$4 sm:$0xff]   ;;  %v1314_v58 = vld [vmem:[%s1682_s0 + $0x54] ss:$36 sps:$4 sm:$0xff]  }
  0x14   :  { %1120 = vmatpush3.bf16.msra.mxu0 %v1271_v18  ;;  %v1309_v54 = vld [vmem:[%s1681_s1 + $0x1e0] sm:$0xff]   ;;  %v1316_v59 = vld [vmem:[%s1681_s1 + $0x128] sm:$0xff]   ;;  %v1318_v61 = vld [vmem:[%s1682_s0 + $0x50] ss:$36 sps:$4 sm:$0xff]  }
  0x15   :  { %1148 = vmatpush3.bf16.msra.mxu1 %v1272_v19  ;;  %1121 = vmatprep.subr.bf16.mxu0 %v1273_v20  ;;  %v1310_v55 = vld [vmem:[%s1681_s1 + $0x1a0] sm:$0xff]   ;;  %v1317_v60 = vld [vmem:[%s1682_s0 + $0x48] ss:$36 sps:$4 sm:$0xff]   ;;  %v1321_v0 = vld [vmem:[%s1681_s1 + $0x170] sm:$0xff]  }
  0x16   :  { %1149 = vmatprep.subr.bf16.mxu1 %v1274_v21  ;;  %v1319_v62 = vld [vmem:[%s1681_s1 + $0x1e8] sm:$0xff]   ;;  %v1322_v1 = vld [vmem:[%s1681_s1 + $0x130] sm:$0xff]   ;;  %v1325_v4 = vld [vmem:[%s1681_s1 + $0x178] sm:$0xff]  }
  0x17   :  { %v1320_v63 = vld [vmem:[%s1681_s1 + $0x1a8] sm:$0xff]   ;;  %v1323_v2 = vld [vmem:[%s1681_s1 + $0x1f0] sm:$0xff]   ;;  %v1326_v5 = vld [vmem:[%s1681_s1 + $0x138] sm:$0xff]  }
  0x18   :  { %1122 = vmatpush3.bf16.msra.mxu0 %v1275_v22  ;;  %v1324_v3 = vld [vmem:[%s1681_s1 + $0x1b0] sm:$0xff]   ;;  %v1327_v6 = vld [vmem:[%s1681_s1 + $0x1f8] sm:$0xff]   ;;  %v1332_v10 = vld [vmem:[%s1681_s1 + $0x200] sm:$0xff]  }
  0x19   :  { %1150 = vmatpush3.bf16.msra.mxu1 %v1276_v23  ;;  %1123 = vmatprep.subr.bf16.mxu0 %v1277_v24  ;;  %v1328_v7 = vld [vmem:[%s1682_s0 + $0x10] ss:$36 sps:$4 sm:$0xff]   ;;  %v1331_v9 = vld [vmem:[%s1681_s1 + $0x1b8] sm:$0xff]   ;;  %v1336_v13 = vld [vmem:[%s1681_s1 + $0x208] sm:$0xff]  }
  0x1a   :  { %1151 = vmatprep.subr.bf16.mxu1 %v1278_v25  ;;  %v1330_v8 = vld [vmem:[%s1682_s0 + $0x14] ss:$36 sps:$4 sm:$0xff]   ;;  %v1335_v12 = vld [vmem:[%s1682_s0 + $0x1c] ss:$36 sps:$4 sm:$0xff]   ;;  %v1341_v17 = vld [vmem:[%s1682_s0 + $0x64] ss:$36 sps:$4 sm:$0xff]  }
  0x1b   :  { %v1333_v11 = vld [vmem:[%s1682_s0 + $0x18] ss:$36 sps:$4 sm:$0xff]   ;;  %v1340_v16 = vld [vmem:[%s1681_s1 + $0x210] sm:$0xff]   ;;  %v1343_v18 = vld [vmem:[%s1682_s0 + $0x60] ss:$36 sps:$4 sm:$0xff]  }
  0x1c   :  { %1124 = vmatpush3.bf16.msra.mxu0 %v1279_v26  ;;  %v1337_v14 = vld [vmem:[%s1682_s0 + $0x5c] ss:$36 sps:$4 sm:$0xff]   ;;  %v1346_v22 = vld [vmem:[%s1681_s1 + $0x228] sm:$0xff]   ;;  %v1347_v23 = vld [vmem:[%s1681_s1 + $0x230] sm:$0xff]  }
  0x1d   :  { %1152 = vmatpush3.bf16.msra.mxu1 %v1280_v27  ;;  %1125 = vmatprep.subr.bf16.mxu0 %v1281_v28  ;;  %v1339_v15 = vld [vmem:[%s1682_s0 + $0x58] ss:$36 sps:$4 sm:$0xff]   ;;  %v1345_v20 = vld [vmem:[%s1681_s1 + $0x220] sm:$0xff]   ;;  %v1350_v25 = vld [vmem:[%s1682_s0 + $0x68] ss:$36 sps:$4 sm:$0xff]  }
  0x1e   :  { %1153 = vmatprep.subr.bf16.mxu1 %v1282_v29  ;;  %v1344_v19 = vld [vmem:[%s1681_s1 + $0x218] sm:$0xff]   ;;  %v1349_v21 = vld [vmem:[%s1682_s0 + $0x20] ss:$36 sps:$4 sm:$0xff]  }
  0x1f   :  { %v1348_v24 = vld [vmem:[%s1681_s1 + $0x238] sm:$0xff]  }
  0x20   :  { %1126 = vmatpush3.bf16.msra.mxu0 %v1283_v30 }
  0x21   :  { %1154 = vmatpush3.bf16.msra.mxu1 %v1284_v31  ;;  %1167 = vmatprep.subr.bf16.mxu0 %v1291_v36 }
  0x22   :  { %1195 = vmatprep.subr.bf16.mxu1 %v1293_v38 }
  0x23   :  { %754 = vmatmul.mubr.bf16.vlgmr.msra.gmra.mrb[0].mxu0 %v1285_v32 }
  0x24   :  { %803 = vmatmul.mubr.bf16.vlgmr.msra.gmra.mrb[0].mxu1 %v1288_v34  ;;  %1168 = vmatpush3.bf16.msra.mxu0 %v1292_v37 }
  0x25   :  { %1196 = vmatpush3.bf16.msra.mxu1 %v1294_v39  ;;  %1169 = vmatprep.subr.bf16.mxu0 %v1295_v40 }
  0x26   :  { %1197 = vmatprep.subr.bf16.mxu1 %v1297_v42  ;;  %761 = vmatprep.mubr.bf16.mxu0 %v1312_v57 }
  0x27   :  { %810 = vmatprep.mubr.bf16.mxu1 %v1314_v58 }
  0x28   :  { %1170 = vmatpush3.bf16.msra.mxu0 %v1296_v41 }
  0x29   :  { %1198 = vmatpush3.bf16.msra.mxu1 %v1298_v43  ;;  %1171 = vmatprep.subr.bf16.mxu0 %v1299_v44 }
  0x2a   :  { %1199 = vmatprep.subr.bf16.mxu1 %v1301_v46 }
  0x2b   :  { %762 = vmatmul.mubr.bf16.gmra.mrb[4].mxu0 %v1317_v60 }
  0x2c   :  { %1172 = vmatpush3.bf16.msra.mxu0 %v1300_v45  ;;  %811 = vmatmul.mubr.bf16.gmra.mrb[4].mxu1 %v1318_v61 }
  0x2d   :  { %1200 = vmatpush3.bf16.msra.mxu1 %v1302_v47  ;;  %1173 = vmatprep.subr.bf16.mxu0 %v1303_v48 }
  0x2e   :  { %1201 = vmatprep.subr.bf16.mxu1 %v1305_v50  ;;  %851 = vmatprep.mubr.bf16.mxu0 %v1330_v8 }
  0x2f   :  { %900 = vmatprep.mubr.bf16.mxu1 %v1335_v12 }
  0x30   :  { %1174 = vmatpush3.bf16.msra.mxu0 %v1304_v49 }
  0x31   :  { %1202 = vmatpush3.bf16.msra.mxu1 %v1306_v51  ;;  %1175 = vmatprep.subr.bf16.mxu0 %v1307_v52 }
  0x32   :  { %1203 = vmatprep.subr.bf16.mxu1 %v1309_v54 }
  0x34   :  { %1176 = vmatpush3.bf16.msra.mxu0 %v1308_v53 }
  0x35   :  { %1204 = vmatpush3.bf16.msra.mxu1 %v1310_v55  ;;  %1177 = vmatprep.subr.bf16.mxu0 %v1311_v56 }
  0x36   :  { %1205 = vmatprep.subr.bf16.mxu1 %v1319_v62 }
  0x38   :  { %1178 = vmatpush3.bf16.msra.mxu0 %v1316_v59 }
  0x39   :  { %1206 = vmatpush3.bf16.msra.mxu1 %v1320_v63  ;;  %1179 = vmatprep.subr.bf16.mxu0 %v1321_v0 }
  0x3a   :  { %1207 = vmatprep.subr.bf16.mxu1 %v1323_v2 }
  0x3c   :  { %1180 = vmatpush3.bf16.msra.mxu0 %v1322_v1 }
  0x3d   :  { %1208 = vmatpush3.bf16.msra.mxu1 %v1324_v3  ;;  %1181 = vmatprep.subr.bf16.mxu0 %v1325_v4 }
  0x3e   :  { %1209 = vmatprep.subr.bf16.mxu1 %v1327_v6 }
  0x40   :  { %1182 = vmatpush3.bf16.msra.mxu0 %v1326_v5 }
  0x41   :  { %1210 = vmatpush3.bf16.msra.mxu1 %v1331_v9  ;;  %1233 = vmatprep.subr.bf16.mxu0 %v1332_v10 }
  0x43   :  { %852 = vmatmul.mubr.bf16.vlgmr.msra.gmra.mrb[8].mxu0 %v1328_v7 }
  0x44   :  { %1234 = vmatpush3.bf16.msra.mxu0 %v1332_v10  ;;  %901 = vmatmul.mubr.bf16.vlgmr.msra.gmra.mrb[8].mxu1 %v1333_v11 }
  0x45   :  { %1235 = vmatprep.subr.bf16.mxu0 %v1336_v13  ;;  %859 = vmatprep.mubr.bf16.mxu0 %v1337_v14 }
  0x46   :  { %908 = vmatprep.mubr.bf16.mxu1 %v1341_v17 }
  0x48   :  { %1236 = vmatpush3.bf16.msra.mxu0 %v1336_v13 }
  0x49   :  { %1237 = vmatprep.subr.bf16.mxu0 %v1340_v16 }
  0x4b   :  { %860 = vmatmul.mubr.bf16.gmra.mrb[12].mxu0 %v1339_v15 }
  0x4c   :  { %1238 = vmatpush3.bf16.msra.mxu0 %v1340_v16  ;;  %909 = vmatmul.mubr.bf16.gmra.mrb[12].mxu1 %v1343_v18 }
  0x4d   :  { %1239 = vmatprep.subr.bf16.mxu0 %v1344_v19  ;;  %1249 = vmatprep.mubr.bf16.mxu0 %v1349_v21 }
  0x50   :  { %1240 = vmatpush3.bf16.msra.mxu0 %v1344_v19 }
  0x51   :  { %1241 = vmatprep.subr.bf16.mxu0 %v1345_v20 }
  0x54   :  { %1242 = vmatpush3.bf16.msra.mxu0 %v1345_v20 }
  0x55   :  { %1243 = vmatprep.subr.bf16.mxu0 %v1346_v22 }
  0x58   :  { %1244 = vmatpush3.bf16.msra.mxu0 %v1346_v22 }
  0x59   :  { %1245 = vmatprep.subr.bf16.mxu0 %v1347_v23 }
  0x5c   :  { %1246 = vmatpush3.bf16.msra.mxu0 %v1347_v23  ;;  %v1109_v23 = vld [vmem:[%s1683_s2] ss:$0 sm:$0xff] }
  0x5d   :  { %1247 = vmatprep.subr.bf16.mxu0 %v1348_v24 }
  0x60   :  { %1248 = vmatpush3.bf16.msra.mxu0 %v1348_v24 }
  0x63   :  { %1250 = vmatmul.mubr.bf16.vlgmr.msra.gmra.mrb[16].mxu0 %v1350_v25 }
  0xf6   :  { %v1127_v26 = vpop.f32.mrb[0].mxu0 }
  0xf7   :  { %v1155_v27 = vpop.f32.mrb[0].mxu1  ;;  %v1128_v28 = vpop.f32.mrb[1].mxu0 }
  0xf8   :  { %v1129_v29 = vadd.f32 %v1128_v28, %v1127_v26  ;;  %v1156_v30 = vpop.f32.mrb[1].mxu1  ;;  %v1130_v31 = vpop.f32.mrb[2].mxu0  ;;  %v1110_v26 = vld [vmem:[%s1684_s3] ss:$0 sm:$0xff] }
  0xf9   :  { %v1157_v32 = vadd.f32 %v1156_v30, %v1155_v27  ;;  %v1158_v33 = vpop.f32.mrb[2].mxu1  ;;  %v1131_v34 = vpop.f32.mrb[3].mxu0 }
  0xfa   :  { %v1132_v35 = vadd.f32 %v1131_v34, %v1130_v31  ;;  %v1159_v36 = vpop.f32.mrb[3].mxu1 }
  0xfb   :  { %v805_v37 = vadd.f32 %v1157_v32, %v1129_v29  ;;  %v1160_v38 = vadd.f32 %v1159_v36, %v1158_v33  ;;  %v1005_v32 = vld [vmem:[%s1685_s4 + $0x10] sm:$0xff]  ;;  %v1003_v36 = vld [vmem:[%s1685_s4] sm:$0xff] }
  0xfd   :  { %v808_v39 = vadd.f32 %v1160_v38, %v1132_v35 }
  0xfe   :  { %v1133_v40 = vpop.f32.mrb[4].mxu0 }
  0xff   :  { %v1161_v41 = vpop.f32.mrb[4].mxu1  ;;  %v1134_v42 = vpop.f32.mrb[5].mxu0 }
 0x100   :  { %v1162_v43 = vpop.f32.mrb[5].mxu1  ;;  %v1135_v44 = vadd.f32 %v1134_v42, %v1133_v40  ;;  %v1136_v46 = vpop.f32.mrb[6].mxu0 }
 0x101   :  { %v1163_v45 = vadd.f32 %v1162_v43, %v1161_v41  ;;  %v1164_v47 = vpop.f32.mrb[6].mxu1  ;;  %v1137_v48 = vpop.f32.mrb[7].mxu0  ;;  %v1004_v43 = vld [vmem:[%s1685_s4 + $0x8] sm:$0xff] }
 0x102   :  { %v1165_v49 = vpop.f32.mrb[7].mxu1  ;;  %v1138_v51 = vadd.f32 %v1137_v48, %v1136_v46 }
 0x103   :  { %v813_v50 = vadd.f32 %v1163_v45, %v1135_v44  ;;  %v1166_v52 = vadd.f32 %v1165_v49, %v1164_v47 }
 0x105   :  { %v816_v53 = vadd.f32 %v1166_v52, %v1138_v51 }
 0x116   :  { %v1183_v54 = vpop.f32.mrb[8].mxu0 }
 0x117   :  { %v1184_v55 = vpop.f32.mrb[9].mxu0  ;;  %v1211_v58 = vpop.f32.mrb[8].mxu1 }
 0x118   :  { %v1185_v56 = vadd.f32 %v1184_v55, %v1183_v54  ;;  %v1186_v57 = vpop.f32.mrb[10].mxu0  ;;  %v1212_v62 = vpop.f32.mrb[9].mxu1 }
 0x119   :  { %v1187_v59 = vpop.f32.mrb[11].mxu0  ;;  %v1213_v63 = vadd.f32 %v1212_v62, %v1211_v58  ;;  %v1214_v0 = vpop.f32.mrb[10].mxu1 }
 0x11a   :  { %v854_v60 = vadd.f32 %v1185_v56, %v805_v37  ;;  %v1188_v61 = vadd.f32 %v1187_v59, %v1186_v57  ;;  %v1215_v2 = vpop.f32.mrb[11].mxu1 }
 0x11b   :  { %v1216_v3 = vadd.f32 %v1215_v2, %v1214_v0 }
 0x11c   :  { %v857_v1 = vadd.f32 %v1188_v61, %v808_v39  ;;  %v903_v4 = vadd.f32 %v1213_v63, %v854_v60  ;;  %v1006_v39 = vld [vmem:[%s1685_s4 + $0x18] sm:$0xff] }
 0x11e   :  { %v1189_v5 = vpop.f32.mrb[12].mxu0  ;;  %v906_v7 = vadd.f32 %v1216_v3, %v857_v1 }
 0x11f   :  { %v1190_v6 = vpop.f32.mrb[13].mxu0  ;;  %v1217_v10 = vpop.f32.mrb[12].mxu1 }
 0x120   :  { %v1191_v8 = vadd.f32 %v1190_v6, %v1189_v5  ;;  %v1192_v9 = vpop.f32.mrb[14].mxu0  ;;  %v1218_v14 = vpop.f32.mrb[13].mxu1 }
 0x121   :  { %v1193_v11 = vpop.f32.mrb[15].mxu0  ;;  %v1219_v15 = vadd.f32 %v1218_v14, %v1217_v10  ;;  %v1220_v16 = vpop.f32.mrb[14].mxu1 }
 0x122   :  { %v862_v12 = vadd.f32 %v1191_v8, %v813_v50  ;;  %v1194_v13 = vadd.f32 %v1193_v11, %v1192_v9  ;;  %v1221_v18 = vpop.f32.mrb[15].mxu1 }
 0x123   :  { %v1222_v19 = vadd.f32 %v1221_v18, %v1220_v16 }
 0x124   :  { %v865_v17 = vadd.f32 %v1194_v13, %v816_v53  ;;  %v911_v20 = vadd.f32 %v1219_v15, %v862_v12 }
 0x126   :  { %v914_v21 = vadd.f32 %v1222_v19, %v865_v17 }
 0x136   :  { %v1251_v22 = vpop.f32.mrb[16].mxu0 }
 0x137   :  { %v960_v24 = vadd.f32 %v1251_v22, %v911_v20  ;;  %v951_v25 = vpop.f32.mrb[17].mxu0 }
 0x138   :  { %v952_v27 = vadd.f32 %v951_v25, %v903_v4  ;;  %v1252_v28 = vpop.f32.mrb[18].mxu0 }
 0x139   :  { %v990_v29 = vmul.f32 %v1109_v23, %v960_v24  ;;  %v963_v30 = vadd.f32 %v1252_v28, %v914_v21  ;;  %v954_v31 = vpop.f32.mrb[19].mxu0 }
 0x13a   :  { %v988_v33 = vmul.f32 %v1109_v23, %v952_v27  ;;  %v955_v34 = vadd.f32 %v954_v31, %v906_v7 }
 0x13b   :  { %v1001_v35 = vadd.f32 %v1110_v26, %v990_v29  ;;  %v991_v37 = vmul.f32 %v1109_v23, %v963_v30 }
 0x13c   :  { %v999_v38 = vadd.f32 %v1110_v26, %v988_v33  ;;  %v989_v40 = vmul.f32 %v1109_v23, %v955_v34 }
 0x13d   :  { %v1009_v41 = vadd.f32 %v1005_v32, %v1001_v35  ;;  %v1002_v42 = vadd.f32 %v1110_v26, %v991_v37 }
 0x13e   :  { %v1007_v44 = vadd.f32 %v1003_v36, %v999_v38  ;;  %v1000_v45 = vadd.f32 %v1110_v26, %v989_v40 }
 0x13f   :  { %1013 = vst [vmem:[%s1686_s5 + $0x10] sm:$0xff] %v1009_v41  ;;  %v1010_v46 = vadd.f32 %v1006_v39, %v1002_v42 }
 0x140   :  { %1011 = vst [vmem:[%s1686_s5] sm:$0xff] %v1007_v44  ;;  %v1008_v47 = vadd.f32 %v1004_v43, %v1000_v45 }
 0x141   :  { %1014 = vst [vmem:[%s1686_s5 + $0x18] sm:$0xff] %v1010_v46 }
 0x142   :  { %1012 = vst [vmem:[%s1686_s5 + $0x8] sm:$0xff] %v1008_v47 }

// kernel: iresnet_forward_pallas.25
= control target key start
LH: loop header
LB: loop body
LE: loop exit
PB: predicated region body
PF: predicated region fallthrough
CT: control target
= control target key end

     0   :  { %s1684_s1 = inlined_call_operand.vmem [shape: bf16[1152,128], index: 1, kind: input, shape index: {}]   ;;  %s1685_s0 = inlined_call_operand.vmem [shape: bf16[32,1152], index: 0, kind: input, shape index: {}]   ;;  %s1686_s2 = inlined_call_operand.vmem [shape: f32[1,128], index: 2, kind: input, shape index: {}]   ;;  %s1687_s3 = inlined_call_operand.vmem [shape: f32[1,128], index: 3, kind: input, shape index: {}]   ;;  %s1688_s4 = inlined_call_operand.vmem [shape: f32[1,128], index: 4, kind: input, shape index: {}]   ;;  %s1689_s5 = inlined_call_operand.vmem [shape: f32[32,128], index: 5, kind: output, shape index: {}]  }
   0x1   :  { %v1265_v0 = vld [vmem:[%s1684_s1 + $0x40] sm:$0xff]   ;;  %v1269_v4 = vld [vmem:[%s1684_s1 + $0x48] sm:$0xff]   ;;  %v1273_v8 = vld [vmem:[%s1684_s1 + $0x50] sm:$0xff]  }
   0x2   :  { %v1266_v1 = vld [vmem:[%s1684_s1 + $0xc0] sm:$0xff]   ;;  %1123 = vmatprep.subr.bf16.mxu0 %v1265_v0  ;;  %v1270_v5 = vld [vmem:[%s1684_s1 + $0xc8] sm:$0xff]   ;;  %v1274_v9 = vld [vmem:[%s1684_s1 + $0xd0] sm:$0xff]  }
   0x3   :  { %v1267_v2 = vld [vmem:[%s1684_s1] sm:$0xff]   ;;  %1151 = vmatprep.subr.bf16.mxu1 %v1266_v1  ;;  %v1271_v6 = vld [vmem:[%s1684_s1 + $0x8] sm:$0xff]   ;;  %v1275_v10 = vld [vmem:[%s1684_s1 + $0x10] sm:$0xff]  }
   0x4   :  { %v1268_v3 = vld [vmem:[%s1684_s1 + $0x80] sm:$0xff]   ;;  %1124 = vmatpush3.bf16.msra.mxu0 %v1267_v2  ;;  %v1272_v7 = vld [vmem:[%s1684_s1 + $0x88] sm:$0xff]   ;;  %v1276_v11 = vld [vmem:[%s1684_s1 + $0x90] sm:$0xff]  }
   0x5   :  { %1152 = vmatpush3.bf16.msra.mxu1 %v1268_v3  ;;  %1125 = vmatprep.subr.bf16.mxu0 %v1269_v4  ;;  %v1277_v12 = vld [vmem:[%s1684_s1 + $0x58] sm:$0xff]   ;;  %v1281_v16 = vld [vmem:[%s1684_s1 + $0x60] sm:$0xff]   ;;  %v1285_v20 = vld [vmem:[%s1684_s1 + $0x68] sm:$0xff]  }
   0x6   :  { %1153 = vmatprep.subr.bf16.mxu1 %v1270_v5  ;;  %v1278_v13 = vld [vmem:[%s1684_s1 + $0xd8] sm:$0xff]   ;;  %v1282_v17 = vld [vmem:[%s1684_s1 + $0xe0] sm:$0xff]   ;;  %v1286_v21 = vld [vmem:[%s1684_s1 + $0xe8] sm:$0xff]  }
   0x7   :  { %v1279_v14 = vld [vmem:[%s1684_s1 + $0x18] sm:$0xff]   ;;  %v1283_v18 = vld [vmem:[%s1684_s1 + $0x20] sm:$0xff]   ;;  %v1287_v22 = vld [vmem:[%s1684_s1 + $0x28] sm:$0xff]  }
   0x8   :  { %1126 = vmatpush3.bf16.msra.mxu0 %v1271_v6  ;;  %v1280_v15 = vld [vmem:[%s1684_s1 + $0x98] sm:$0xff]   ;;  %v1284_v19 = vld [vmem:[%s1684_s1 + $0xa0] sm:$0xff]   ;;  %v1288_v23 = vld [vmem:[%s1684_s1 + $0xa8] sm:$0xff]  }
   0x9   :  { %1154 = vmatpush3.bf16.msra.mxu1 %v1272_v7  ;;  %1127 = vmatprep.subr.bf16.mxu0 %v1273_v8  ;;  %v1289_v24 = vld [vmem:[%s1684_s1 + $0x70] sm:$0xff]   ;;  %v1293_v28 = vld [vmem:[%s1684_s1 + $0x78] sm:$0xff]   ;;  %v1297_v32 = vld [vmem:[%s1685_s0] ss:$36 sps:$4 sm:$0xff]  }
   0xa   :  { %1155 = vmatprep.subr.bf16.mxu1 %v1274_v9  ;;  %v1290_v25 = vld [vmem:[%s1684_s1 + $0xf0] sm:$0xff]   ;;  %v1294_v29 = vld [vmem:[%s1684_s1 + $0xf8] sm:$0xff]   ;;  %v1299_v33 = vld [vmem:[%s1685_s0 + $0x4] ss:$36 sps:$4 sm:$0xff]  }
   0xb   :  { %v1291_v26 = vld [vmem:[%s1684_s1 + $0x30] sm:$0xff]   ;;  %v1295_v30 = vld [vmem:[%s1684_s1 + $0x38] sm:$0xff]   ;;  %v1300_v34 = vld [vmem:[%s1685_s0 + $0x8] ss:$36 sps:$4 sm:$0xff]   ;;  %753 = vmatprep.mubr.bf16.mxu0 %v1299_v33 }
   0xc   :  { %1128 = vmatpush3.bf16.msra.mxu0 %v1275_v10  ;;  %v1292_v27 = vld [vmem:[%s1684_s1 + $0xb0] sm:$0xff]   ;;  %v1296_v31 = vld [vmem:[%s1684_s1 + $0xb8] sm:$0xff]   ;;  %v1303_v36 = vld [vmem:[%s1684_s1 + $0x140] sm:$0xff]  }
   0xd   :  { %1156 = vmatpush3.bf16.msra.mxu1 %v1276_v11  ;;  %1129 = vmatprep.subr.bf16.mxu0 %v1277_v12  ;;  %v1302_v35 = vld [vmem:[%s1685_s0 + $0xc] ss:$36 sps:$4 sm:$0xff]   ;;  %v1304_v37 = vld [vmem:[%s1684_s1 + $0x100] sm:$0xff]   ;;  %v1315_v48 = vld [vmem:[%s1684_s1 + $0x158] sm:$0xff]  }
   0xe   :  { %1157 = vmatprep.subr.bf16.mxu1 %v1278_v13  ;;  %802 = vmatprep.mubr.bf16.mxu1 %v1302_v35  ;;  %v1305_v38 = vld [vmem:[%s1684_s1 + $0x1c0] sm:$0xff]   ;;  %v1307_v40 = vld [vmem:[%s1684_s1 + $0x148] sm:$0xff]   ;;  %v1311_v44 = vld [vmem:[%s1684_s1 + $0x150] sm:$0xff]  }
   0xf   :  { %v1306_v39 = vld [vmem:[%s1684_s1 + $0x180] sm:$0xff]   ;;  %v1308_v41 = vld [vmem:[%s1684_s1 + $0x108] sm:$0xff]   ;;  %v1312_v45 = vld [vmem:[%s1684_s1 + $0x110] sm:$0xff]  }
  0x10   :  { %1130 = vmatpush3.bf16.msra.mxu0 %v1279_v14  ;;  %v1309_v42 = vld [vmem:[%s1684_s1 + $0x1c8] sm:$0xff]   ;;  %v1313_v46 = vld [vmem:[%s1684_s1 + $0x1d0] sm:$0xff]   ;;  %v1316_v49 = vld [vmem:[%s1684_s1 + $0x118] sm:$0xff]  }
  0x11   :  { %1158 = vmatpush3.bf16.msra.mxu1 %v1280_v15  ;;  %1131 = vmatprep.subr.bf16.mxu0 %v1281_v16  ;;  %v1310_v43 = vld [vmem:[%s1684_s1 + $0x188] sm:$0xff]   ;;  %v1314_v47 = vld [vmem:[%s1684_s1 + $0x190] sm:$0xff]   ;;  %v1317_v50 = vld [vmem:[%s1684_s1 + $0x1d8] sm:$0xff]  }
  0x12   :  { %1159 = vmatprep.subr.bf16.mxu1 %v1282_v17  ;;  %v1318_v51 = vld [vmem:[%s1684_s1 + $0x198] sm:$0xff]   ;;  %v1319_v52 = vld [vmem:[%s1684_s1 + $0x160] sm:$0xff]   ;;  %v1323_v56 = vld [vmem:[%s1684_s1 + $0x168] sm:$0xff]  }
  0x13   :  { %v1320_v53 = vld [vmem:[%s1684_s1 + $0x120] sm:$0xff]   ;;  %v1324_v57 = vld [vmem:[%s1685_s0 + $0x4c] ss:$36 sps:$4 sm:$0xff]   ;;  %v1326_v58 = vld [vmem:[%s1685_s0 + $0x54] ss:$36 sps:$4 sm:$0xff]  }
  0x14   :  { %1132 = vmatpush3.bf16.msra.mxu0 %v1283_v18  ;;  %v1321_v54 = vld [vmem:[%s1684_s1 + $0x1e0] sm:$0xff]   ;;  %v1328_v59 = vld [vmem:[%s1684_s1 + $0x128] sm:$0xff]   ;;  %v1330_v61 = vld [vmem:[%s1685_s0 + $0x50] ss:$36 sps:$4 sm:$0xff]  }
  0x15   :  { %1160 = vmatpush3.bf16.msra.mxu1 %v1284_v19  ;;  %1133 = vmatprep.subr.bf16.mxu0 %v1285_v20  ;;  %v1322_v55 = vld [vmem:[%s1684_s1 + $0x1a0] sm:$0xff]   ;;  %v1329_v60 = vld [vmem:[%s1685_s0 + $0x48] ss:$36 sps:$4 sm:$0xff]   ;;  %v1333_v0 = vld [vmem:[%s1684_s1 + $0x170] sm:$0xff]  }
  0x16   :  { %1161 = vmatprep.subr.bf16.mxu1 %v1286_v21  ;;  %v1331_v62 = vld [vmem:[%s1684_s1 + $0x1e8] sm:$0xff]   ;;  %v1334_v1 = vld [vmem:[%s1684_s1 + $0x130] sm:$0xff]   ;;  %v1337_v4 = vld [vmem:[%s1684_s1 + $0x178] sm:$0xff]  }
  0x17   :  { %v1332_v63 = vld [vmem:[%s1684_s1 + $0x1a8] sm:$0xff]   ;;  %v1335_v2 = vld [vmem:[%s1684_s1 + $0x1f0] sm:$0xff]   ;;  %v1338_v5 = vld [vmem:[%s1684_s1 + $0x138] sm:$0xff]  }
  0x18   :  { %1134 = vmatpush3.bf16.msra.mxu0 %v1287_v22  ;;  %v1336_v3 = vld [vmem:[%s1684_s1 + $0x1b0] sm:$0xff]   ;;  %v1339_v6 = vld [vmem:[%s1684_s1 + $0x1f8] sm:$0xff]   ;;  %v1344_v10 = vld [vmem:[%s1684_s1 + $0x200] sm:$0xff]  }
  0x19   :  { %1162 = vmatpush3.bf16.msra.mxu1 %v1288_v23  ;;  %1135 = vmatprep.subr.bf16.mxu0 %v1289_v24  ;;  %v1340_v7 = vld [vmem:[%s1685_s0 + $0x10] ss:$36 sps:$4 sm:$0xff]   ;;  %v1343_v9 = vld [vmem:[%s1684_s1 + $0x1b8] sm:$0xff]   ;;  %v1348_v13 = vld [vmem:[%s1684_s1 + $0x208] sm:$0xff]  }
  0x1a   :  { %1163 = vmatprep.subr.bf16.mxu1 %v1290_v25  ;;  %v1342_v8 = vld [vmem:[%s1685_s0 + $0x14] ss:$36 sps:$4 sm:$0xff]   ;;  %v1347_v12 = vld [vmem:[%s1685_s0 + $0x1c] ss:$36 sps:$4 sm:$0xff]   ;;  %v1353_v17 = vld [vmem:[%s1685_s0 + $0x64] ss:$36 sps:$4 sm:$0xff]  }
  0x1b   :  { %v1345_v11 = vld [vmem:[%s1685_s0 + $0x18] ss:$36 sps:$4 sm:$0xff]   ;;  %v1352_v16 = vld [vmem:[%s1684_s1 + $0x210] sm:$0xff]   ;;  %v1355_v18 = vld [vmem:[%s1685_s0 + $0x60] ss:$36 sps:$4 sm:$0xff]  }
  0x1c   :  { %1136 = vmatpush3.bf16.msra.mxu0 %v1291_v26  ;;  %v1349_v14 = vld [vmem:[%s1685_s0 + $0x5c] ss:$36 sps:$4 sm:$0xff]   ;;  %v1358_v22 = vld [vmem:[%s1684_s1 + $0x228] sm:$0xff]   ;;  %v1359_v23 = vld [vmem:[%s1684_s1 + $0x230] sm:$0xff]  }
  0x1d   :  { %1164 = vmatpush3.bf16.msra.mxu1 %v1292_v27  ;;  %1137 = vmatprep.subr.bf16.mxu0 %v1293_v28  ;;  %v1351_v15 = vld [vmem:[%s1685_s0 + $0x58] ss:$36 sps:$4 sm:$0xff]   ;;  %v1357_v20 = vld [vmem:[%s1684_s1 + $0x220] sm:$0xff]   ;;  %v1362_v25 = vld [vmem:[%s1685_s0 + $0x68] ss:$36 sps:$4 sm:$0xff]  }
  0x1e   :  { %1165 = vmatprep.subr.bf16.mxu1 %v1294_v29  ;;  %v1356_v19 = vld [vmem:[%s1684_s1 + $0x218] sm:$0xff]   ;;  %v1361_v21 = vld [vmem:[%s1685_s0 + $0x20] ss:$36 sps:$4 sm:$0xff]  }
  0x1f   :  { %v1360_v24 = vld [vmem:[%s1684_s1 + $0x238] sm:$0xff]  }
  0x20   :  { %1138 = vmatpush3.bf16.msra.mxu0 %v1295_v30 }
  0x21   :  { %1166 = vmatpush3.bf16.msra.mxu1 %v1296_v31  ;;  %1179 = vmatprep.subr.bf16.mxu0 %v1303_v36 }
  0x22   :  { %1207 = vmatprep.subr.bf16.mxu1 %v1305_v38 }
  0x23   :  { %754 = vmatmul.mubr.bf16.vlgmr.msra.gmra.mrb[0].mxu0 %v1297_v32 }
  0x24   :  { %803 = vmatmul.mubr.bf16.vlgmr.msra.gmra.mrb[0].mxu1 %v1300_v34  ;;  %1180 = vmatpush3.bf16.msra.mxu0 %v1304_v37 }
  0x25   :  { %1208 = vmatpush3.bf16.msra.mxu1 %v1306_v39  ;;  %1181 = vmatprep.subr.bf16.mxu0 %v1307_v40 }
  0x26   :  { %1209 = vmatprep.subr.bf16.mxu1 %v1309_v42  ;;  %761 = vmatprep.mubr.bf16.mxu0 %v1324_v57 }
  0x27   :  { %810 = vmatprep.mubr.bf16.mxu1 %v1326_v58 }
  0x28   :  { %1182 = vmatpush3.bf16.msra.mxu0 %v1308_v41 }
  0x29   :  { %1210 = vmatpush3.bf16.msra.mxu1 %v1310_v43  ;;  %1183 = vmatprep.subr.bf16.mxu0 %v1311_v44 }
  0x2a   :  { %1211 = vmatprep.subr.bf16.mxu1 %v1313_v46 }
  0x2b   :  { %762 = vmatmul.mubr.bf16.gmra.mrb[4].mxu0 %v1329_v60 }
  0x2c   :  { %1184 = vmatpush3.bf16.msra.mxu0 %v1312_v45  ;;  %811 = vmatmul.mubr.bf16.gmra.mrb[4].mxu1 %v1330_v61 }
  0x2d   :  { %1212 = vmatpush3.bf16.msra.mxu1 %v1314_v47  ;;  %1185 = vmatprep.subr.bf16.mxu0 %v1315_v48 }
  0x2e   :  { %1213 = vmatprep.subr.bf16.mxu1 %v1317_v50  ;;  %851 = vmatprep.mubr.bf16.mxu0 %v1342_v8 }
  0x2f   :  { %900 = vmatprep.mubr.bf16.mxu1 %v1347_v12 }
  0x30   :  { %1186 = vmatpush3.bf16.msra.mxu0 %v1316_v49 }
  0x31   :  { %1214 = vmatpush3.bf16.msra.mxu1 %v1318_v51  ;;  %1187 = vmatprep.subr.bf16.mxu0 %v1319_v52 }
  0x32   :  { %1215 = vmatprep.subr.bf16.mxu1 %v1321_v54 }
  0x34   :  { %1188 = vmatpush3.bf16.msra.mxu0 %v1320_v53 }
  0x35   :  { %1216 = vmatpush3.bf16.msra.mxu1 %v1322_v55  ;;  %1189 = vmatprep.subr.bf16.mxu0 %v1323_v56 }
  0x36   :  { %1217 = vmatprep.subr.bf16.mxu1 %v1331_v62 }
  0x38   :  { %1190 = vmatpush3.bf16.msra.mxu0 %v1328_v59 }
  0x39   :  { %1218 = vmatpush3.bf16.msra.mxu1 %v1332_v63  ;;  %1191 = vmatprep.subr.bf16.mxu0 %v1333_v0 }
  0x3a   :  { %1219 = vmatprep.subr.bf16.mxu1 %v1335_v2 }
  0x3c   :  { %1192 = vmatpush3.bf16.msra.mxu0 %v1334_v1 }
  0x3d   :  { %1220 = vmatpush3.bf16.msra.mxu1 %v1336_v3  ;;  %1193 = vmatprep.subr.bf16.mxu0 %v1337_v4 }
  0x3e   :  { %1221 = vmatprep.subr.bf16.mxu1 %v1339_v6 }
  0x40   :  { %1194 = vmatpush3.bf16.msra.mxu0 %v1338_v5 }
  0x41   :  { %1222 = vmatpush3.bf16.msra.mxu1 %v1343_v9  ;;  %1245 = vmatprep.subr.bf16.mxu0 %v1344_v10 }
  0x43   :  { %852 = vmatmul.mubr.bf16.vlgmr.msra.gmra.mrb[8].mxu0 %v1340_v7 }
  0x44   :  { %1246 = vmatpush3.bf16.msra.mxu0 %v1344_v10  ;;  %901 = vmatmul.mubr.bf16.vlgmr.msra.gmra.mrb[8].mxu1 %v1345_v11 }
  0x45   :  { %1247 = vmatprep.subr.bf16.mxu0 %v1348_v13  ;;  %859 = vmatprep.mubr.bf16.mxu0 %v1349_v14 }
  0x46   :  { %908 = vmatprep.mubr.bf16.mxu1 %v1353_v17 }
  0x48   :  { %1248 = vmatpush3.bf16.msra.mxu0 %v1348_v13 }
  0x49   :  { %1249 = vmatprep.subr.bf16.mxu0 %v1352_v16 }
  0x4b   :  { %860 = vmatmul.mubr.bf16.gmra.mrb[12].mxu0 %v1351_v15 }
  0x4c   :  { %1250 = vmatpush3.bf16.msra.mxu0 %v1352_v16  ;;  %909 = vmatmul.mubr.bf16.gmra.mrb[12].mxu1 %v1355_v18 }
  0x4d   :  { %1251 = vmatprep.subr.bf16.mxu0 %v1356_v19  ;;  %1261 = vmatprep.mubr.bf16.mxu0 %v1361_v21 }
  0x50   :  { %1252 = vmatpush3.bf16.msra.mxu0 %v1356_v19 }
  0x51   :  { %1253 = vmatprep.subr.bf16.mxu0 %v1357_v20 }
  0x54   :  { %1254 = vmatpush3.bf16.msra.mxu0 %v1357_v20 }
  0x55   :  { %1255 = vmatprep.subr.bf16.mxu0 %v1358_v22 }
  0x58   :  { %1256 = vmatpush3.bf16.msra.mxu0 %v1358_v22 }
  0x59   :  { %1257 = vmatprep.subr.bf16.mxu0 %v1359_v23 }
  0x5c   :  { %1258 = vmatpush3.bf16.msra.mxu0 %v1359_v23  ;;  %v1120_v23 = vld [vmem:[%s1686_s2] ss:$0 sm:$0xff] }
  0x5d   :  { %1259 = vmatprep.subr.bf16.mxu0 %v1360_v24 }
  0x60   :  { %1260 = vmatpush3.bf16.msra.mxu0 %v1360_v24 }
  0x63   :  { %1262 = vmatmul.mubr.bf16.vlgmr.msra.gmra.mrb[16].mxu0 %v1362_v25 }
  0xf6   :  { %v1139_v26 = vpop.f32.mrb[0].mxu0 }
  0xf7   :  { %v1167_v27 = vpop.f32.mrb[0].mxu1  ;;  %v1140_v28 = vpop.f32.mrb[1].mxu0 }
  0xf8   :  { %v1141_v29 = vadd.f32 %v1140_v28, %v1139_v26  ;;  %v1168_v30 = vpop.f32.mrb[1].mxu1  ;;  %v1142_v31 = vpop.f32.mrb[2].mxu0  ;;  %v1121_v26 = vld [vmem:[%s1687_s3] ss:$0 sm:$0xff] }
  0xf9   :  { %v1169_v32 = vadd.f32 %v1168_v30, %v1167_v27  ;;  %v1170_v33 = vpop.f32.mrb[2].mxu1  ;;  %v1143_v34 = vpop.f32.mrb[3].mxu0 }
  0xfa   :  { %v1144_v35 = vadd.f32 %v1143_v34, %v1142_v31  ;;  %v1171_v36 = vpop.f32.mrb[3].mxu1 }
  0xfb   :  { %v805_v37 = vadd.f32 %v1169_v32, %v1141_v29  ;;  %v1172_v38 = vadd.f32 %v1171_v36, %v1170_v33  ;;  %v1122_v32 = vld [vmem:[%s1688_s4] ss:$0 sm:$0xff] }
  0xfd   :  { %v808_v39 = vadd.f32 %v1172_v38, %v1144_v35 }
  0xfe   :  { %v1145_v40 = vpop.f32.mrb[4].mxu0 }
  0xff   :  { %v1173_v41 = vpop.f32.mrb[4].mxu1  ;;  %v1146_v42 = vpop.f32.mrb[5].mxu0 }
 0x100   :  { %v1174_v43 = vpop.f32.mrb[5].mxu1  ;;  %v1147_v44 = vadd.f32 %v1146_v42, %v1145_v40  ;;  %v1148_v46 = vpop.f32.mrb[6].mxu0 }
 0x101   :  { %v1175_v45 = vadd.f32 %v1174_v43, %v1173_v41  ;;  %v1176_v47 = vpop.f32.mrb[6].mxu1  ;;  %v1149_v48 = vpop.f32.mrb[7].mxu0 }
 0x102   :  { %v1177_v49 = vpop.f32.mrb[7].mxu1  ;;  %v1150_v51 = vadd.f32 %v1149_v48, %v1148_v46 }
 0x103   :  { %v813_v50 = vadd.f32 %v1175_v45, %v1147_v44  ;;  %v1178_v52 = vadd.f32 %v1177_v49, %v1176_v47 }
 0x105   :  { %v816_v53 = vadd.f32 %v1178_v52, %v1150_v51 }
 0x116   :  { %v1195_v54 = vpop.f32.mrb[8].mxu0 }
 0x117   :  { %v1196_v55 = vpop.f32.mrb[9].mxu0  ;;  %v1223_v58 = vpop.f32.mrb[8].mxu1 }
 0x118   :  { %v1197_v56 = vadd.f32 %v1196_v55, %v1195_v54  ;;  %v1198_v57 = vpop.f32.mrb[10].mxu0  ;;  %v1224_v62 = vpop.f32.mrb[9].mxu1 }
 0x119   :  { %v1199_v59 = vpop.f32.mrb[11].mxu0  ;;  %v1225_v63 = vadd.f32 %v1224_v62, %v1223_v58  ;;  %v1226_v0 = vpop.f32.mrb[10].mxu1 }
 0x11a   :  { %v854_v60 = vadd.f32 %v1197_v56, %v805_v37  ;;  %v1200_v61 = vadd.f32 %v1199_v59, %v1198_v57  ;;  %v1227_v2 = vpop.f32.mrb[11].mxu1 }
 0x11b   :  { %v1228_v3 = vadd.f32 %v1227_v2, %v1226_v0 }
 0x11c   :  { %v857_v1 = vadd.f32 %v1200_v61, %v808_v39  ;;  %v903_v4 = vadd.f32 %v1225_v63, %v854_v60 }
 0x11e   :  { %v1201_v5 = vpop.f32.mrb[12].mxu0  ;;  %v906_v7 = vadd.f32 %v1228_v3, %v857_v1 }
 0x11f   :  { %v1202_v6 = vpop.f32.mrb[13].mxu0  ;;  %v1229_v10 = vpop.f32.mrb[12].mxu1 }
 0x120   :  { %v1203_v8 = vadd.f32 %v1202_v6, %v1201_v5  ;;  %v1204_v9 = vpop.f32.mrb[14].mxu0  ;;  %v1230_v14 = vpop.f32.mrb[13].mxu1 }
 0x121   :  { %v1205_v11 = vpop.f32.mrb[15].mxu0  ;;  %v1231_v15 = vadd.f32 %v1230_v14, %v1229_v10  ;;  %v1232_v16 = vpop.f32.mrb[14].mxu1 }
 0x122   :  { %v862_v12 = vadd.f32 %v1203_v8, %v813_v50  ;;  %v1206_v13 = vadd.f32 %v1205_v11, %v1204_v9  ;;  %v1233_v18 = vpop.f32.mrb[15].mxu1 }
 0x123   :  { %v1234_v19 = vadd.f32 %v1233_v18, %v1232_v16 }
 0x124   :  { %v865_v17 = vadd.f32 %v1206_v13, %v816_v53  ;;  %v911_v20 = vadd.f32 %v1231_v15, %v862_v12 }
 0x126   :  { %v914_v21 = vadd.f32 %v1234_v19, %v865_v17 }
 0x136   :  { %v1263_v22 = vpop.f32.mrb[16].mxu0 }
 0x137   :  { %v960_v24 = vadd.f32 %v1263_v22, %v911_v20  ;;  %v951_v25 = vpop.f32.mrb[17].mxu0 }
 0x138   :  { %v952_v27 = vadd.f32 %v951_v25, %v903_v4  ;;  %v1264_v28 = vpop.f32.mrb[18].mxu0 }
 0x139   :  { %v990_v29 = vmul.f32 %v1120_v23, %v960_v24  ;;  %v963_v30 = vadd.f32 %v1264_v28, %v914_v21  ;;  %v954_v31 = vpop.f32.mrb[19].mxu0 }
 0x13a   :  { %v988_v33 = vmul.f32 %v1120_v23, %v952_v27  ;;  %v955_v34 = vadd.f32 %v954_v31, %v906_v7 }
 0x13b   :  { %v1001_v35 = vadd.f32 %v1121_v26, %v990_v29  ;;  %v991_v36 = vmul.f32 %v1120_v23, %v963_v30 }
 0x13c   :  { %v999_v37 = vadd.f32 %v1121_v26, %v988_v33  ;;  %v989_v38 = vmul.f32 %v1120_v23, %v955_v34 }
 0x13d   :  { %vm1006_vm0 = vcmp.ge.f32.partialorder %v1001_v35, 0.0  ;;  %v1016_v39 = vmul.f32 %v1122_v32, %v1001_v35  ;;  %v1002_v40 = vadd.f32 %v1121_v26, %v991_v36 }
 0x13e   :  { %vm1004_vm1 = vcmp.ge.f32.partialorder %v999_v37, 0.0  ;;  %v1014_v41 = vmul.f32 %v1122_v32, %v999_v37  ;;  %v1000_v42 = vadd.f32 %v1121_v26, %v989_v38 }
 0x13f   :  { %v1020_v43 = vsel %vm1006_vm0, %v1001_v35, %v1016_v39  ;;  %vm1007_vm2 = vcmp.ge.f32.partialorder %v1002_v40, 0.0  ;;  %v1017_v44 = vmul.f32 %v1122_v32, %v1002_v40 }
 0x140   :  { %1024 = vst [vmem:[%s1689_s5 + $0x10] sm:$0xff] %v1020_v43  ;;  %v1018_v45 = vsel %vm1004_vm1, %v999_v37, %v1014_v41  ;;  %vm1005_vm3 = vcmp.ge.f32.partialorder %v1000_v42, 0.0  ;;  %v1015_v46 = vmul.f32 %v1122_v32, %v1000_v42 }
 0x141   :  { %1022 = vst [vmem:[%s1689_s5] sm:$0xff] %v1018_v45  ;;  %v1021_v47 = vsel %vm1007_vm2, %v1002_v40, %v1017_v44 }
 0x142   :  { %1025 = vst [vmem:[%s1689_s5 + $0x18] sm:$0xff] %v1021_v47  ;;  %v1019_v48 = vsel %vm1005_vm3, %v1000_v42, %v1015_v46 }
 0x143   :  { %1023 = vst [vmem:[%s1689_s5 + $0x8] sm:$0xff] %v1019_v48 }

// kernel: iresnet_forward_pallas.27
= control target key start
LH: loop header
LB: loop body
LE: loop exit
PB: predicated region body
PF: predicated region fallthrough
CT: control target
= control target key end

     0   :  { %s2400_s1 = inlined_call_operand.vmem [shape: bf16[1152,256], index: 1, kind: input, shape index: {}]   ;;  %s2401_s0 = inlined_call_operand.vmem [shape: bf16[32,1152], index: 0, kind: input, shape index: {}]   ;;  %s2402_s2 = inlined_call_operand.vmem [shape: f32[1,256], index: 2, kind: input, shape index: {}]   ;;  %s2403_s3 = inlined_call_operand.vmem [shape: f32[1,256], index: 3, kind: input, shape index: {}]   ;;  %s2404_s4 = inlined_call_operand.vmem [shape: f32[1,256], index: 4, kind: input, shape index: {}]   ;;  %s2405_s5 = inlined_call_operand.vmem [shape: f32[32,256], index: 5, kind: output, shape index: {}]  }
   0x1   :  { %v1608_v0 = vld [vmem:[%s2400_s1 + $0x4] ss:$8 sps:$4 sm:$0xff]   ;;  %v1612_v2 = vld [vmem:[%s2400_s1] ss:$8 sps:$4 sm:$0xff]   ;;  %v1614_v4 = vld [vmem:[%s2400_s1 + $0x14] ss:$8 sps:$4 sm:$0xff]  }
   0x2   :  { %v1610_v1 = vld [vmem:[%s2400_s1 + $0x204] ss:$8 sps:$4 sm:$0xff]   ;;  %1017 = vmatprep.subr.bf16.mxu1 %v1608_v0  ;;  %v1613_v3 = vld [vmem:[%s2400_s1 + $0x200] ss:$8 sps:$4 sm:$0xff]   ;;  %v1616_v5 = vld [vmem:[%s2400_s1 + $0x214] ss:$8 sps:$4 sm:$0xff]  }
   0x3   :  { %1123 = vmatprep.subr.bf16.mxu0 %v1610_v1  ;;  %1018 = vmatpush1.bf16.msra.mxu1 %v1612_v2  ;;  %v1618_v6 = vld [vmem:[%s2400_s1 + $0x10] ss:$8 sps:$4 sm:$0xff]   ;;  %v1620_v8 = vld [vmem:[%s2400_s1 + $0x24] ss:$8 sps:$4 sm:$0xff]   ;;  %v1624_v10 = vld [vmem:[%s2400_s1 + $0x20] ss:$8 sps:$4 sm:$0xff]  }
   0x4   :  { %1124 = vmatpush1.bf16.msra.mxu0 %v1613_v3  ;;  %1019 = vmatprep.subr.bf16.mxu1 %v1614_v4  ;;  %v1619_v7 = vld [vmem:[%s2400_s1 + $0x210] ss:$8 sps:$4 sm:$0xff]   ;;  %v1622_v9 = vld [vmem:[%s2400_s1 + $0x224] ss:$8 sps:$4 sm:$0xff]   ;;  %v1625_v11 = vld [vmem:[%s2400_s1 + $0x220] ss:$8 sps:$4 sm:$0xff]  }
   0x5   :  { %1125 = vmatprep.subr.bf16.mxu0 %v1616_v5  ;;  %v1626_v12 = vld [vmem:[%s2400_s1 + $0x34] ss:$8 sps:$4 sm:$0xff]   ;;  %v1630_v14 = vld [vmem:[%s2400_s1 + $0x30] ss:$8 sps:$4 sm:$0xff]   ;;  %v1632_v16 = vld [vmem:[%s2400_s1 + $0x44] ss:$8 sps:$4 sm:$0xff]  }
   0x6   :  { %v1628_v13 = vld [vmem:[%s2400_s1 + $0x234] ss:$8 sps:$4 sm:$0xff]   ;;  %v1631_v15 = vld [vmem:[%s2400_s1 + $0x230] ss:$8 sps:$4 sm:$0xff]   ;;  %v1634_v17 = vld [vmem:[%s2400_s1 + $0x244] ss:$8 sps:$4 sm:$0xff]  }
   0x7   :  { %1020 = vmatpush1.bf16.msra.mxu1 %v1618_v6  ;;  %v1636_v18 = vld [vmem:[%s2400_s1 + $0x40] ss:$8 sps:$4 sm:$0xff]   ;;  %v1638_v20 = vld [vmem:[%s2400_s1 + $0x54] ss:$8 sps:$4 sm:$0xff]   ;;  %v1642_v22 = vld [vmem:[%s2400_s1 + $0x50] ss:$8 sps:$4 sm:$0xff]  }
   0x8   :  { %1126 = vmatpush1.bf16.msra.mxu0 %v1619_v7  ;;  %1021 = vmatprep.subr.bf16.mxu1 %v1620_v8  ;;  %v1637_v19 = vld [vmem:[%s2400_s1 + $0x240] ss:$8 sps:$4 sm:$0xff]   ;;  %v1640_v21 = vld [vmem:[%s2400_s1 + $0x254] ss:$8 sps:$4 sm:$0xff]   ;;  %v1643_v23 = vld [vmem:[%s2400_s1 + $0x250] ss:$8 sps:$4 sm:$0xff]  }
   0x9   :  { %1127 = vmatprep.subr.bf16.mxu0 %v1622_v9  ;;  %v1644_v24 = vld [vmem:[%s2400_s1 + $0x64] ss:$8 sps:$4 sm:$0xff]   ;;  %v1648_v26 = vld [vmem:[%s2400_s1 + $0x60] ss:$8 sps:$4 sm:$0xff]   ;;  %v1650_v28 = vld [vmem:[%s2400_s1 + $0x74] ss:$8 sps:$4 sm:$0xff]  }
   0xa   :  { %v1646_v25 = vld [vmem:[%s2400_s1 + $0x264] ss:$8 sps:$4 sm:$0xff]   ;;  %v1649_v27 = vld [vmem:[%s2400_s1 + $0x260] ss:$8 sps:$4 sm:$0xff]   ;;  %v1652_v29 = vld [vmem:[%s2400_s1 + $0x274] ss:$8 sps:$4 sm:$0xff]  }
   0xb   :  { %1022 = vmatpush1.bf16.msra.mxu1 %v1624_v10  ;;  %v1654_v30 = vld [vmem:[%s2400_s1 + $0x70] ss:$8 sps:$4 sm:$0xff]   ;;  %v1656_v32 = vld [vmem:[%s2400_s1 + $0x84] ss:$8 sps:$4 sm:$0xff]   ;;  %v1660_v34 = vld [vmem:[%s2400_s1 + $0x80] ss:$8 sps:$4 sm:$0xff]  }
   0xc   :  { %1128 = vmatpush1.bf16.msra.mxu0 %v1625_v11  ;;  %1023 = vmatprep.subr.bf16.mxu1 %v1626_v12  ;;  %v1655_v31 = vld [vmem:[%s2400_s1 + $0x270] ss:$8 sps:$4 sm:$0xff]   ;;  %v1658_v33 = vld [vmem:[%s2400_s1 + $0x284] ss:$8 sps:$4 sm:$0xff]   ;;  %v1661_v35 = vld [vmem:[%s2400_s1 + $0x280] ss:$8 sps:$4 sm:$0xff]  }
   0xd   :  { %1129 = vmatprep.subr.bf16.mxu0 %v1628_v13  ;;  %v1662_v36 = vld [vmem:[%s2400_s1 + $0x94] ss:$8 sps:$4 sm:$0xff]   ;;  %v1666_v38 = vld [vmem:[%s2400_s1 + $0x90] ss:$8 sps:$4 sm:$0xff]   ;;  %v1668_v40 = vld [vmem:[%s2400_s1 + $0xa4] ss:$8 sps:$4 sm:$0xff]  }
   0xe   :  { %v1664_v37 = vld [vmem:[%s2400_s1 + $0x294] ss:$8 sps:$4 sm:$0xff]   ;;  %v1667_v39 = vld [vmem:[%s2400_s1 + $0x290] ss:$8 sps:$4 sm:$0xff]   ;;  %v1670_v41 = vld [vmem:[%s2400_s1 + $0x2a4] ss:$8 sps:$4 sm:$0xff]  }
   0xf   :  { %1024 = vmatpush1.bf16.msra.mxu1 %v1630_v14  ;;  %v1672_v42 = vld [vmem:[%s2400_s1 + $0xa0] ss:$8 sps:$4 sm:$0xff]   ;;  %v1674_v44 = vld [vmem:[%s2400_s1 + $0xb4] ss:$8 sps:$4 sm:$0xff]   ;;  %v1678_v46 = vld [vmem:[%s2400_s1 + $0xb0] ss:$8 sps:$4 sm:$0xff]  }
  0x10   :  { %1130 = vmatpush1.bf16.msra.mxu0 %v1631_v15  ;;  %1025 = vmatprep.subr.bf16.mxu1 %v1632_v16  ;;  %v1673_v43 = vld [vmem:[%s2400_s1 + $0x2a0] ss:$8 sps:$4 sm:$0xff]   ;;  %v1676_v45 = vld [vmem:[%s2400_s1 + $0x2b4] ss:$8 sps:$4 sm:$0xff]   ;;  %v1679_v47 = vld [vmem:[%s2400_s1 + $0x2b0] ss:$8 sps:$4 sm:$0xff]  }
  0x11   :  { %1131 = vmatprep.subr.bf16.mxu0 %v1634_v17  ;;  %v1706_v48 = vld [vmem:[%s2401_s0 + $0x4] ss:$36 sps:$4 sm:$0xff]   ;;  %v1712_v51 = vld [vmem:[%s2401_s0 + $0x14] ss:$36 sps:$4 sm:$0xff]  }
  0x12   :  { %v1680_v49 = vld [vmem:[%s2400_s1 + $0xc4] ss:$8 sps:$4 sm:$0xff]   ;;  %1049 = vmatprep.mubr.bf16.mxu1 %v1706_v48  ;;  %v1684_v52 = vld [vmem:[%s2400_s1 + $0xc0] ss:$8 sps:$4 sm:$0xff]   ;;  %v1686_v54 = vld [vmem:[%s2400_s1 + $0xd4] ss:$8 sps:$4 sm:$0xff]   ;;  %1155 = vmatprep.mubr.bf16.mxu0 %v1712_v51 }
  0x13   :  { %1026 = vmatpush1.bf16.msra.mxu1 %v1636_v18  ;;  %v1682_v50 = vld [vmem:[%s2400_s1 + $0x2c4] ss:$8 sps:$4 sm:$0xff]   ;;  %v1685_v53 = vld [vmem:[%s2400_s1 + $0x2c0] ss:$8 sps:$4 sm:$0xff]   ;;  %v1688_v55 = vld [vmem:[%s2400_s1 + $0x2d4] ss:$8 sps:$4 sm:$0xff]  }
  0x14   :  { %1132 = vmatpush1.bf16.msra.mxu0 %v1637_v19  ;;  %1027 = vmatprep.subr.bf16.mxu1 %v1638_v20  ;;  %v1690_v56 = vld [vmem:[%s2400_s1 + $0xd0] ss:$8 sps:$4 sm:$0xff]   ;;  %v1692_v58 = vld [vmem:[%s2400_s1 + $0xe4] ss:$8 sps:$4 sm:$0xff]   ;;  %v1696_v60 = vld [vmem:[%s2400_s1 + $0xe0] ss:$8 sps:$4 sm:$0xff]  }
  0x15   :  { %1133 = vmatprep.subr.bf16.mxu0 %v1640_v21  ;;  %v1691_v57 = vld [vmem:[%s2400_s1 + $0x2d0] ss:$8 sps:$4 sm:$0xff]   ;;  %v1694_v59 = vld [vmem:[%s2400_s1 + $0x2e4] ss:$8 sps:$4 sm:$0xff]   ;;  %v1697_v61 = vld [vmem:[%s2400_s1 + $0x2e0] ss:$8 sps:$4 sm:$0xff]  }
  0x16   :  { %v1698_v62 = vld [vmem:[%s2400_s1 + $0xf4] ss:$8 sps:$4 sm:$0xff]   ;;  %v1702_v0 = vld [vmem:[%s2400_s1 + $0xf0] ss:$8 sps:$4 sm:$0xff]   ;;  %v1709_v2 = vld [vmem:[%s2400_s1 + $0x104] ss:$8 sps:$4 sm:$0xff]  }
  0x17   :  { %1028 = vmatpush1.bf16.msra.mxu1 %v1642_v22  ;;  %v1700_v63 = vld [vmem:[%s2400_s1 + $0x2f4] ss:$8 sps:$4 sm:$0xff]   ;;  %v1703_v1 = vld [vmem:[%s2400_s1 + $0x2f0] ss:$8 sps:$4 sm:$0xff]   ;;  %v1715_v3 = vld [vmem:[%s2400_s1 + $0x304] ss:$8 sps:$4 sm:$0xff]  }
  0x18   :  { %1134 = vmatpush1.bf16.msra.mxu0 %v1643_v23  ;;  %1029 = vmatprep.subr.bf16.mxu1 %v1644_v24  ;;  %v1704_v4 = vld [vmem:[%s2401_s0] ss:$36 sps:$4 sm:$0xff]   ;;  %v1710_v6 = vld [vmem:[%s2401_s0 + $0x10] ss:$36 sps:$4 sm:$0xff]  }
  0x19   :  { %1135 = vmatprep.subr.bf16.mxu0 %v1646_v25  ;;  %v1707_v5 = vld [vmem:[%s2400_s1 + $0x100] ss:$8 sps:$4 sm:$0xff]   ;;  %v1718_v8 = vld [vmem:[%s2400_s1 + $0x114] ss:$8 sps:$4 sm:$0xff]   ;;  %v1716_v10 = vld [vmem:[%s2400_s1 + $0x110] ss:$8 sps:$4 sm:$0xff]  }
  0x1a   :  { %v1713_v7 = vld [vmem:[%s2400_s1 + $0x300] ss:$8 sps:$4 sm:$0xff]   ;;  %v1721_v9 = vld [vmem:[%s2400_s1 + $0x314] ss:$8 sps:$4 sm:$0xff]   ;;  %v1719_v11 = vld [vmem:[%s2400_s1 + $0x310] ss:$8 sps:$4 sm:$0xff]  }
  0x1b   :  { %1030 = vmatpush1.bf16.msra.mxu1 %v1648_v26  ;;  %v1724_v12 = vld [vmem:[%s2400_s1 + $0x124] ss:$8 sps:$4 sm:$0xff]   ;;  %v1722_v14 = vld [vmem:[%s2400_s1 + $0x120] ss:$8 sps:$4 sm:$0xff]   ;;  %v1730_v16 = vld [vmem:[%s2400_s1 + $0x134] ss:$8 sps:$4 sm:$0xff]  }
  0x1c   :  { %1136 = vmatpush1.bf16.msra.mxu0 %v1649_v27  ;;  %1031 = vmatprep.subr.bf16.mxu1 %v1650_v28  ;;  %v1727_v13 = vld [vmem:[%s2400_s1 + $0x324] ss:$8 sps:$4 sm:$0xff]   ;;  %v1725_v15 = vld [vmem:[%s2400_s1 + $0x320] ss:$8 sps:$4 sm:$0xff]   ;;  %v1733_v17 = vld [vmem:[%s2400_s1 + $0x334] ss:$8 sps:$4 sm:$0xff]  }
  0x1d   :  { %1137 = vmatprep.subr.bf16.mxu0 %v1652_v29  ;;  %v1728_v18 = vld [vmem:[%s2400_s1 + $0x130] ss:$8 sps:$4 sm:$0xff]   ;;  %v1736_v20 = vld [vmem:[%s2400_s1 + $0x144] ss:$8 sps:$4 sm:$0xff]   ;;  %v1734_v22 = vld [vmem:[%s2400_s1 + $0x140] ss:$8 sps:$4 sm:$0xff]  }
  0x1e   :  { %v1731_v19 = vld [vmem:[%s2400_s1 + $0x330] ss:$8 sps:$4 sm:$0xff]   ;;  %v1739_v21 = vld [vmem:[%s2400_s1 + $0x344] ss:$8 sps:$4 sm:$0xff]   ;;  %v1737_v23 = vld [vmem:[%s2400_s1 + $0x340] ss:$8 sps:$4 sm:$0xff]  }
  0x1f   :  { %1032 = vmatpush1.bf16.msra.mxu1 %v1654_v30  ;;  %v1742_v24 = vld [vmem:[%s2400_s1 + $0x154] ss:$8 sps:$4 sm:$0xff]   ;;  %v1740_v26 = vld [vmem:[%s2400_s1 + $0x150] ss:$8 sps:$4 sm:$0xff]   ;;  %v1748_v28 = vld [vmem:[%s2400_s1 + $0x164] ss:$8 sps:$4 sm:$0xff]  }
  0x20   :  { %1138 = vmatpush1.bf16.msra.mxu0 %v1655_v31  ;;  %1033 = vmatprep.subr.bf16.mxu1 %v1656_v32  ;;  %v1745_v25 = vld [vmem:[%s2400_s1 + $0x354] ss:$8 sps:$4 sm:$0xff]   ;;  %v1743_v27 = vld [vmem:[%s2400_s1 + $0x350] ss:$8 sps:$4 sm:$0xff]   ;;  %v1798_v31 = vld [vmem:[%s2401_s0 + $0x48] ss:$36 sps:$4 sm:$0xff]  }
  0x21   :  { %1139 = vmatprep.subr.bf16.mxu0 %v1658_v33  ;;  %v1794_v29 = vld [vmem:[%s2401_s0 + $0x4c] ss:$36 sps:$4 sm:$0xff]   ;;  %v1796_v30 = vld [vmem:[%s2401_s0 + $0x5c] ss:$36 sps:$4 sm:$0xff]  }
  0x22   :  { %v1751_v32 = vld [vmem:[%s2400_s1 + $0x364] ss:$8 sps:$4 sm:$0xff]   ;;  %v1802_v33 = vld [vmem:[%s2401_s0 + $0x58] ss:$36 sps:$4 sm:$0xff]  }
  0x23   :  { %1034 = vmatpush1.bf16.msra.mxu1 %v1660_v34  ;;  %v1746_v34 = vld [vmem:[%s2400_s1 + $0x160] ss:$8 sps:$4 sm:$0xff]   ;;  %v1764_v48 = vld [vmem:[%s2400_s1 + $0x190] ss:$8 sps:$4 sm:$0xff]   ;;  %v1775_v51 = vld [vmem:[%s2400_s1 + $0x3a4] ss:$8 sps:$4 sm:$0xff]  }
  0x24   :  { %1140 = vmatpush1.bf16.msra.mxu0 %v1661_v35  ;;  %1035 = vmatprep.subr.bf16.mxu1 %v1662_v36  ;;  %v1749_v35 = vld [vmem:[%s2400_s1 + $0x360] ss:$8 sps:$4 sm:$0xff]   ;;  %v1754_v36 = vld [vmem:[%s2400_s1 + $0x174] ss:$8 sps:$4 sm:$0xff]  }
  0x25   :  { %1141 = vmatprep.subr.bf16.mxu0 %v1664_v37  ;;  %v1757_v37 = vld [vmem:[%s2400_s1 + $0x374] ss:$8 sps:$4 sm:$0xff]  }
  0x27   :  { %1036 = vmatpush1.bf16.msra.mxu1 %v1666_v38  ;;  %v1752_v38 = vld [vmem:[%s2400_s1 + $0x170] ss:$8 sps:$4 sm:$0xff]  }
  0x28   :  { %1142 = vmatpush1.bf16.msra.mxu0 %v1667_v39  ;;  %1037 = vmatprep.subr.bf16.mxu1 %v1668_v40  ;;  %v1755_v39 = vld [vmem:[%s2400_s1 + $0x370] ss:$8 sps:$4 sm:$0xff]   ;;  %v1760_v40 = vld [vmem:[%s2400_s1 + $0x184] ss:$8 sps:$4 sm:$0xff]  }
  0x29   :  { %1143 = vmatprep.subr.bf16.mxu0 %v1670_v41  ;;  %v1814_v41 = vld [vmem:[%s2401_s0 + $0xc] ss:$36 sps:$4 sm:$0xff]  }
  0x2b   :  { %1038 = vmatpush1.bf16.msra.mxu1 %v1672_v42  ;;  %v1763_v42 = vld [vmem:[%s2400_s1 + $0x384] ss:$8 sps:$4 sm:$0xff]  }
  0x2c   :  { %1144 = vmatpush1.bf16.msra.mxu0 %v1673_v43  ;;  %1039 = vmatprep.subr.bf16.mxu1 %v1674_v44  ;;  %v1817_v43 = vld [vmem:[%s2401_s0 + $0x1c] ss:$36 sps:$4 sm:$0xff]  }
  0x2d   :  { %1145 = vmatprep.subr.bf16.mxu0 %v1676_v45  ;;  %v1758_v44 = vld [vmem:[%s2400_s1 + $0x180] ss:$8 sps:$4 sm:$0xff]  }
  0x2e   :  { %v1761_v45 = vld [vmem:[%s2400_s1 + $0x380] ss:$8 sps:$4 sm:$0xff]  }
  0x2f   :  { %1040 = vmatpush1.bf16.msra.mxu1 %v1678_v46  ;;  %v1766_v46 = vld [vmem:[%s2400_s1 + $0x194] ss:$8 sps:$4 sm:$0xff]  }
  0x30   :  { %1146 = vmatpush1.bf16.msra.mxu0 %v1679_v47  ;;  %1041 = vmatprep.subr.bf16.mxu1 %v1680_v49  ;;  %v1769_v47 = vld [vmem:[%s2400_s1 + $0x394] ss:$8 sps:$4 sm:$0xff]   ;;  %v1767_v49 = vld [vmem:[%s2400_s1 + $0x390] ss:$8 sps:$4 sm:$0xff]  }
  0x31   :  { %1147 = vmatprep.subr.bf16.mxu0 %v1682_v50  ;;  %v1772_v50 = vld [vmem:[%s2400_s1 + $0x1a4] ss:$8 sps:$4 sm:$0xff]  }
  0x33   :  { %1042 = vmatpush1.bf16.msra.mxu1 %v1684_v52  ;;  %v1770_v52 = vld [vmem:[%s2400_s1 + $0x1a0] ss:$8 sps:$4 sm:$0xff]  }
  0x34   :  { %1148 = vmatpush1.bf16.msra.mxu0 %v1685_v53  ;;  %1043 = vmatprep.subr.bf16.mxu1 %v1686_v54  ;;  %v1773_v53 = vld [vmem:[%s2400_s1 + $0x3a0] ss:$8 sps:$4 sm:$0xff]   ;;  %v1778_v54 = vld [vmem:[%s2400_s1 + $0x1b4] ss:$8 sps:$4 sm:$0xff]  }
  0x35   :  { %1149 = vmatprep.subr.bf16.mxu0 %v1688_v55  ;;  %v1781_v55 = vld [vmem:[%s2400_s1 + $0x3b4] ss:$8 sps:$4 sm:$0xff]  }
  0x37   :  { %1044 = vmatpush1.bf16.msra.mxu1 %v1690_v56  ;;  %v1776_v56 = vld [vmem:[%s2400_s1 + $0x1b0] ss:$8 sps:$4 sm:$0xff]  }
  0x38   :  { %1150 = vmatpush1.bf16.msra.mxu0 %v1691_v57  ;;  %1045 = vmatprep.subr.bf16.mxu1 %v1692_v58  ;;  %v1779_v57 = vld [vmem:[%s2400_s1 + $0x3b0] ss:$8 sps:$4 sm:$0xff]   ;;  %v1784_v58 = vld [vmem:[%s2400_s1 + $0x1c4] ss:$8 sps:$4 sm:$0xff]  }
  0x39   :  { %1151 = vmatprep.subr.bf16.mxu0 %v1694_v59  ;;  %v1787_v59 = vld [vmem:[%s2400_s1 + $0x3c4] ss:$8 sps:$4 sm:$0xff]  }
  0x3b   :  { %1046 = vmatpush1.bf16.msra.mxu1 %v1696_v60  ;;  %v1782_v60 = vld [vmem:[%s2400_s1 + $0x1c0] ss:$8 sps:$4 sm:$0xff]  }
  0x3c   :  { %1152 = vmatpush1.bf16.msra.mxu0 %v1697_v61  ;;  %1047 = vmatprep.subr.bf16.mxu1 %v1698_v62  ;;  %v1785_v61 = vld [vmem:[%s2400_s1 + $0x3c0] ss:$8 sps:$4 sm:$0xff]   ;;  %v1790_v62 = vld [vmem:[%s2400_s1 + $0x1d4] ss:$8 sps:$4 sm:$0xff]  }
  0x3d   :  { %1153 = vmatprep.subr.bf16.mxu0 %v1700_v63  ;;  %v1793_v63 = vld [vmem:[%s2400_s1 + $0x3d4] ss:$8 sps:$4 sm:$0xff]  }
  0x3f   :  { %1048 = vmatpush1.bf16.msra.mxu1 %v1702_v0  ;;  %v1788_v0 = vld [vmem:[%s2400_s1 + $0x1d0] ss:$8 sps:$4 sm:$0xff]  }
  0x40   :  { %1154 = vmatpush1.bf16.msra.mxu0 %v1703_v1  ;;  %1070 = vmatprep.subr.bf16.mxu1 %v1709_v2  ;;  %v1791_v1 = vld [vmem:[%s2400_s1 + $0x3d0] ss:$8 sps:$4 sm:$0xff]   ;;  %v1801_v2 = vld [vmem:[%s2400_s1 + $0x1e4] ss:$8 sps:$4 sm:$0xff]  }
  0x41   :  { %1176 = vmatprep.subr.bf16.mxu0 %v1715_v3  ;;  %v1805_v3 = vld [vmem:[%s2400_s1 + $0x3e4] ss:$8 sps:$4 sm:$0xff]  }
  0x42   :  { %1050 = vmatmul.mubr.bf16.vlgmr.msra.gmra.mrb[0].mxu1 %v1704_v4  ;;  %v1799_v4 = vld [vmem:[%s2400_s1 + $0x1e0] ss:$8 sps:$4 sm:$0xff]  }
  0x43   :  { %1156 = vmatmul.mubr.bf16.vlgmr.msra.gmra.mrb[0].mxu0 %v1710_v6  ;;  %1071 = vmatpush1.bf16.msra.mxu1 %v1707_v5  ;;  %v1803_v5 = vld [vmem:[%s2400_s1 + $0x3e0] ss:$8 sps:$4 sm:$0xff]   ;;  %v1808_v6 = vld [vmem:[%s2400_s1 + $0x1f4] ss:$8 sps:$4 sm:$0xff]  }
  0x44   :  { %1177 = vmatpush1.bf16.msra.mxu0 %v1713_v7  ;;  %1072 = vmatprep.subr.bf16.mxu1 %v1718_v8  ;;  %v1811_v7 = vld [vmem:[%s2400_s1 + $0x3f4] ss:$8 sps:$4 sm:$0xff]   ;;  %v1806_v8 = vld [vmem:[%s2400_s1 + $0x1f0] ss:$8 sps:$4 sm:$0xff]  }
  0x45   :  { %1178 = vmatprep.subr.bf16.mxu0 %v1721_v9  ;;  %1059 = vmatprep.mubr.bf16.mxu1 %v1794_v29  ;;  %v1809_v9 = vld [vmem:[%s2400_s1 + $0x3f0] ss:$8 sps:$4 sm:$0xff]   ;;  %v1844_v29 = vld [vmem:[%s2400_s1 + $0x464] ss:$8 sps:$4 sm:$0xff]  }
  0x46   :  { %1165 = vmatprep.mubr.bf16.mxu0 %v1796_v30  ;;  %v1842_v30 = vld [vmem:[%s2400_s1 + $0x460] ss:$8 sps:$4 sm:$0xff]  }
  0x47   :  { %1073 = vmatpush1.bf16.msra.mxu1 %v1716_v10  ;;  %v1820_v10 = vld [vmem:[%s2400_s1 + $0x404] ss:$8 sps:$4 sm:$0xff]  }
  0x48   :  { %1179 = vmatpush1.bf16.msra.mxu0 %v1719_v11  ;;  %1074 = vmatprep.subr.bf16.mxu1 %v1724_v12  ;;  %v1812_v11 = vld [vmem:[%s2401_s0 + $0x8] ss:$36 sps:$4 sm:$0xff]   ;;  %v1815_v12 = vld [vmem:[%s2401_s0 + $0x18] ss:$36 sps:$4 sm:$0xff]  }
  0x49   :  { %1180 = vmatprep.subr.bf16.mxu0 %v1727_v13  ;;  %v1818_v13 = vld [vmem:[%s2400_s1 + $0x400] ss:$8 sps:$4 sm:$0xff]  }
  0x4a   :  { %1060 = vmatmul.mubr.bf16.gmra.mrb[4].mxu1 %v1798_v31  ;;  %v1847_v31 = vld [vmem:[%s2400_s1 + $0x474] ss:$8 sps:$4 sm:$0xff]  }
  0x4b   :  { %1075 = vmatpush1.bf16.msra.mxu1 %v1722_v14  ;;  %1166 = vmatmul.mubr.bf16.gmra.mrb[4].mxu0 %v1802_v33  ;;  %v1823_v14 = vld [vmem:[%s2400_s1 + $0x414] ss:$8 sps:$4 sm:$0xff]   ;;  %v1848_v33 = vld [vmem:[%s2401_s0 + $0x20] ss:$36 sps:$4 sm:$0xff]  }
  0x4c   :  { %1181 = vmatpush1.bf16.msra.mxu0 %v1725_v15  ;;  %1076 = vmatprep.subr.bf16.mxu1 %v1730_v16  ;;  %v1824_v15 = vld [vmem:[%s2401_s0 + $0x54] ss:$36 sps:$4 sm:$0xff]   ;;  %v1826_v16 = vld [vmem:[%s2401_s0 + $0x64] ss:$36 sps:$4 sm:$0xff]  }
  0x4d   :  { %1182 = vmatprep.subr.bf16.mxu0 %v1733_v17  ;;  %1102 = vmatprep.mubr.bf16.mxu1 %v1814_v41  ;;  %v1821_v17 = vld [vmem:[%s2400_s1 + $0x410] ss:$8 sps:$4 sm:$0xff]  }
  0x4e   :  { %1208 = vmatprep.mubr.bf16.mxu0 %v1817_v43 }
  0x4f   :  { %1077 = vmatpush1.bf16.msra.mxu1 %v1728_v18  ;;  %v1832_v18 = vld [vmem:[%s2400_s1 + $0x424] ss:$8 sps:$4 sm:$0xff]  }
  0x50   :  { %1183 = vmatpush1.bf16.msra.mxu0 %v1731_v19  ;;  %1078 = vmatprep.subr.bf16.mxu1 %v1736_v20  ;;  %v1828_v19 = vld [vmem:[%s2401_s0 + $0x50] ss:$36 sps:$4 sm:$0xff]   ;;  %v1829_v20 = vld [vmem:[%s2401_s0 + $0x60] ss:$36 sps:$4 sm:$0xff]  }
  0x51   :  { %1184 = vmatprep.subr.bf16.mxu0 %v1739_v21  ;;  %v1830_v21 = vld [vmem:[%s2400_s1 + $0x420] ss:$8 sps:$4 sm:$0xff]  }
  0x53   :  { %1079 = vmatpush1.bf16.msra.mxu1 %v1734_v22  ;;  %v1835_v22 = vld [vmem:[%s2400_s1 + $0x434] ss:$8 sps:$4 sm:$0xff]  }
  0x54   :  { %1185 = vmatpush1.bf16.msra.mxu0 %v1737_v23  ;;  %1080 = vmatprep.subr.bf16.mxu1 %v1742_v24  ;;  %v1833_v23 = vld [vmem:[%s2400_s1 + $0x430] ss:$8 sps:$4 sm:$0xff]   ;;  %v1838_v24 = vld [vmem:[%s2400_s1 + $0x444] ss:$8 sps:$4 sm:$0xff]  }
  0x55   :  { %1186 = vmatprep.subr.bf16.mxu0 %v1745_v25  ;;  %v1850_v25 = vmov 0  }
  0x57   :  { %1081 = vmatpush1.bf16.msra.mxu1 %v1740_v26  ;;  %v1836_v26 = vld [vmem:[%s2400_s1 + $0x440] ss:$8 sps:$4 sm:$0xff]  }
  0x58   :  { %1187 = vmatpush1.bf16.msra.mxu0 %v1743_v27  ;;  %1082 = vmatprep.subr.bf16.mxu1 %v1748_v28  ;;  %v1841_v27 = vld [vmem:[%s2400_s1 + $0x454] ss:$8 sps:$4 sm:$0xff]   ;;  %v1839_v28 = vld [vmem:[%s2400_s1 + $0x450] ss:$8 sps:$4 sm:$0xff]  }
  0x59   :  { %1188 = vmatprep.subr.bf16.mxu0 %v1751_v32  ;;  %v1845_v32 = vld [vmem:[%s2400_s1 + $0x470] ss:$8 sps:$4 sm:$0xff]  }
  0x5b   :  { %1083 = vmatpush1.bf16.msra.mxu1 %v1746_v34  ;;  %v1849_v34 = vld [vmem:[%s2401_s0 + $0x68] ss:$36 sps:$4 sm:$0xff]  }
  0x5c   :  { %1189 = vmatpush1.bf16.msra.mxu0 %v1749_v35  ;;  %1084 = vmatprep.subr.bf16.mxu1 %v1754_v36 }
  0x5d   :  { %1190 = vmatprep.subr.bf16.mxu0 %v1757_v37 }
  0x5f   :  { %1085 = vmatpush1.bf16.msra.mxu1 %v1752_v38 }
  0x60   :  { %1191 = vmatpush1.bf16.msra.mxu0 %v1755_v39  ;;  %1086 = vmatprep.subr.bf16.mxu1 %v1760_v40 }
  0x61   :  { %1192 = vmatprep.subr.bf16.mxu0 %v1763_v42 }
  0x63   :  { %1087 = vmatpush1.bf16.msra.mxu1 %v1758_v44 }
  0x64   :  { %1193 = vmatpush1.bf16.msra.mxu0 %v1761_v45  ;;  %1088 = vmatprep.subr.bf16.mxu1 %v1766_v46 }
  0x65   :  { %1194 = vmatprep.subr.bf16.mxu0 %v1769_v47 }
  0x67   :  { %1089 = vmatpush1.bf16.msra.mxu1 %v1764_v48 }
  0x68   :  { %1195 = vmatpush1.bf16.msra.mxu0 %v1767_v49  ;;  %1090 = vmatprep.subr.bf16.mxu1 %v1772_v50 }
  0x69   :  { %1196 = vmatprep.subr.bf16.mxu0 %v1775_v51  ;;  %v1311_v51 = vlaneseq }
  0x6b   :  { %1091 = vmatpush1.bf16.msra.mxu1 %v1770_v52  ;;  %v1312_v52 = vshrl.u32 %v1311_v51, 7 }
  0x6c   :  { %1197 = vmatpush1.bf16.msra.mxu0 %v1773_v53  ;;  %1092 = vmatprep.subr.bf16.mxu1 %v1778_v54  ;;  %v1309_v54 = vld [vmem:[%s2402_s2] sm:$0x3] }
  0x6d   :  { %1198 = vmatprep.subr.bf16.mxu0 %v1781_v55  ;;  %v1313_v53 = vsub.s32 0, %v1312_v52  ;;  %v1317_v55 = vsub.s32 1, %v1312_v52 }
  0x6f   :  { %1093 = vmatpush1.bf16.msra.mxu1 %v1776_v56  ;;  %v1329_v56 = vld [vmem:[%s2403_s3] sm:$0x3] }
  0x70   :  { %1199 = vmatpush1.bf16.msra.mxu0 %v1779_v57  ;;  %1094 = vmatprep.subr.bf16.mxu1 %v1784_v58  ;;  %v1314_v57 = vrot.slane %v1309_v54, %v1313_v53  ;;  %v1349_v58 = vld [vmem:[%s2404_s4] sm:$0x3] }
  0x71   :  { %1200 = vmatprep.subr.bf16.mxu0 %v1787_v59 }
  0x73   :  { %1095 = vmatpush1.bf16.msra.mxu1 %v1782_v60 }
  0x74   :  { %1201 = vmatpush1.bf16.msra.mxu0 %v1785_v61  ;;  %1096 = vmatprep.subr.bf16.mxu1 %v1790_v62  ;;  %v1318_v61 = vrot.slane %v1309_v54, %v1317_v55 }
  0x75   :  { %1202 = vmatprep.subr.bf16.mxu0 %v1793_v63  ;;  %v1334_v63 = vrot.slane %v1329_v56, %v1313_v53 }
  0x77   :  { %1097 = vmatpush1.bf16.msra.mxu1 %v1788_v0 }
  0x78   :  { %1203 = vmatpush1.bf16.msra.mxu0 %v1791_v1  ;;  %1098 = vmatprep.subr.bf16.mxu1 %v1801_v2  ;;  %v1338_v2 = vrot.slane %v1329_v56, %v1317_v55 }
  0x79   :  { %1204 = vmatprep.subr.bf16.mxu0 %v1805_v3 }
  0x7b   :  { %1099 = vmatpush1.bf16.msra.mxu1 %v1799_v4  ;;  %v1362_v4 = vrot.slane %v1349_v58, %v1313_v53 }
  0x7c   :  { %1205 = vmatpush1.bf16.msra.mxu0 %v1803_v5  ;;  %1100 = vmatprep.subr.bf16.mxu1 %v1808_v6  ;;  %v1366_v6 = vrot.slane %v1349_v58, %v1317_v55 }
  0x7d   :  { %1206 = vmatprep.subr.bf16.mxu0 %v1811_v7 }
  0x7f   :  { %1101 = vmatpush1.bf16.msra.mxu1 %v1806_v8 }
  0x80   :  { %1207 = vmatpush1.bf16.msra.mxu0 %v1809_v9  ;;  %1559 = vmatprep.subr.bf16.mxu1 %v1820_v10 }
  0x81   :  { %1229 = vmatprep.subr.bf16.mxu0 %v1820_v10 }
  0x82   :  { %1103 = vmatmul.mubr.bf16.vlgmr.msra.gmra.mrb[0].mxu1 %v1812_v11 }
  0x83   :  { %1209 = vmatmul.mubr.bf16.vlgmr.msra.gmra.mrb[0].mxu0 %v1815_v12  ;;  %1567 = vmatpush1.bf16.msra.mxu1 %v1818_v13 }
  0x84   :  { %1230 = vmatpush1.bf16.msra.mxu0 %v1818_v13  ;;  %1560 = vmatprep.subr.bf16.mxu1 %v1823_v14 }
  0x85   :  { %1231 = vmatprep.subr.bf16.mxu0 %v1823_v14  ;;  %1112 = vmatprep.mubr.bf16.mxu1 %v1824_v15 }
  0x86   :  { %1218 = vmatprep.mubr.bf16.mxu0 %v1826_v16 }
  0x87   :  { %1568 = vmatpush1.bf16.msra.mxu1 %v1821_v17 }
  0x88   :  { %1232 = vmatpush1.bf16.msra.mxu0 %v1821_v17  ;;  %1561 = vmatprep.subr.bf16.mxu1 %v1832_v18 }
  0x89   :  { %1233 = vmatprep.subr.bf16.mxu0 %v1832_v18 }
  0x8a   :  { %1113 = vmatmul.mubr.bf16.gmra.mrb[4].mxu1 %v1828_v19 }
  0x8b   :  { %1219 = vmatmul.mubr.bf16.gmra.mrb[4].mxu0 %v1829_v20  ;;  %1569 = vmatpush1.bf16.msra.mxu1 %v1830_v21 }
  0x8c   :  { %1234 = vmatpush1.bf16.msra.mxu0 %v1830_v21  ;;  %1562 = vmatprep.subr.bf16.mxu1 %v1835_v22 }
  0x8d   :  { %1235 = vmatprep.subr.bf16.mxu0 %v1835_v22  ;;  %1261 = vmatprep.mubr.bf16.mxu0 %v1850_v25 }
  0x8e   :  { %1271 = vmatprep.mubr.bf16.mxu1 %v1850_v25 }
  0x8f   :  { %1570 = vmatpush1.bf16.msra.mxu1 %v1833_v23 }
  0x90   :  { %1236 = vmatpush1.bf16.msra.mxu0 %v1833_v23  ;;  %1563 = vmatprep.subr.bf16.mxu1 %v1838_v24 }
  0x91   :  { %1237 = vmatprep.subr.bf16.mxu0 %v1838_v24 }
  0x93   :  { %1571 = vmatpush1.bf16.msra.mxu1 %v1836_v26 }
  0x94   :  { %1238 = vmatpush1.bf16.msra.mxu0 %v1836_v26  ;;  %1564 = vmatprep.subr.bf16.mxu1 %v1841_v27 }
  0x95   :  { %1239 = vmatprep.subr.bf16.mxu0 %v1841_v27 }
  0x97   :  { %1572 = vmatpush1.bf16.msra.mxu1 %v1839_v28 }
  0x98   :  { %1240 = vmatpush1.bf16.msra.mxu0 %v1839_v28  ;;  %1565 = vmatprep.subr.bf16.mxu1 %v1844_v29 }
  0x99   :  { %1241 = vmatprep.subr.bf16.mxu0 %v1844_v29 }
  0x9b   :  { %1573 = vmatpush1.bf16.msra.mxu1 %v1842_v30 }
  0x9c   :  { %1242 = vmatpush1.bf16.msra.mxu0 %v1842_v30  ;;  %1566 = vmatprep.subr.bf16.mxu1 %v1847_v31 }
  0x9d   :  { %1243 = vmatprep.subr.bf16.mxu0 %v1847_v31 }
  0x9f   :  { %1574 = vmatpush1.bf16.msra.mxu1 %v1845_v32 }
  0xa0   :  { %1244 = vmatpush1.bf16.msra.mxu0 %v1845_v32 }
  0xa2   :  { %1272 = vmatmul.mubr.bf16.vlgmr.msra.gmra.mrb[8].mxu1 %v1849_v34 }
  0xa3   :  { %1262 = vmatmul.mubr.bf16.vlgmr.msra.gmra.mrb[0].mxu0 %v1848_v33 }
 0x155   :  { %v1104_v35 = vpop.f32.mrb[0].mxu1 }
 0x156   :  { %v1106_v36 = vpop.f32.mrb[1].mxu1 }
 0x157   :  { %v1108_v37 = vpop.f32.mrb[2].mxu1 }
 0x158   :  { %v1110_v38 = vpop.f32.mrb[3].mxu1 }
 0x15d   :  { %v1114_v39 = vpop.f32.mrb[4].mxu1 }
 0x15e   :  { %v1220_v40 = vpop.f32.mrb[4].mxu0  ;;  %v1116_v42 = vpop.f32.mrb[5].mxu1 }
 0x15f   :  { %v1579_v41 = vadd.f32 %v1220_v40, %v1114_v39  ;;  %v1222_v43 = vpop.f32.mrb[5].mxu0  ;;  %v1118_v45 = vpop.f32.mrb[6].mxu1 }
 0x160   :  { %v1581_v44 = vadd.f32 %v1222_v43, %v1116_v42  ;;  %v1224_v46 = vpop.f32.mrb[6].mxu0  ;;  %v1120_v48 = vpop.f32.mrb[7].mxu1 }
 0x161   :  { %v1583_v47 = vadd.f32 %v1224_v46, %v1118_v45  ;;  %v1226_v49 = vpop.f32.mrb[7].mxu0 }
 0x162   :  { %v1585_v50 = vadd.f32 %v1226_v49, %v1120_v48 }
 0x175   :  { %v1273_v60 = vpop.f32.mrb[8].mxu1 }
 0x176   :  { %v1263_v59 = vpop.f32.mrb[0].mxu0  ;;  %v1580_v0 = vadd.f32 %v1579_v41, %v1273_v60  ;;  %v1275_v3 = vpop.f32.mrb[9].mxu1 }
 0x177   :  { %v1575_v62 = vadd.f32 %v1263_v59, %v1104_v35  ;;  %v1265_v1 = vpop.f32.mrb[1].mxu0  ;;  %v1582_v7 = vadd.f32 %v1581_v44, %v1275_v3  ;;  %v1277_v9 = vpop.f32.mrb[10].mxu1 }
 0x178   :  { %v1576_v5 = vadd.f32 %v1265_v1, %v1106_v36  ;;  %v1267_v8 = vpop.f32.mrb[2].mxu0  ;;  %v1325_v11 = vmul.f32 %v1580_v0, %v1314_v57  ;;  %v1584_v13 = vadd.f32 %v1583_v47, %v1277_v9  ;;  %v1279_v15 = vpop.f32.mrb[11].mxu1 }
 0x179   :  { %v1321_v10 = vmul.f32 %v1575_v62, %v1314_v57  ;;  %v1577_v12 = vadd.f32 %v1267_v8, %v1108_v37  ;;  %v1269_v14 = vpop.f32.mrb[3].mxu0  ;;  %v1326_v17 = vmul.f32 %v1582_v7, %v1318_v61  ;;  %v1586_v19 = vadd.f32 %v1585_v50, %v1279_v15 }
 0x17a   :  { %v1322_v16 = vmul.f32 %v1576_v5, %v1318_v61  ;;  %v1578_v18 = vadd.f32 %v1269_v14, %v1110_v38  ;;  %v1345_v21 = vadd.f32 %v1334_v63, %v1325_v11  ;;  %v1327_v23 = vmul.f32 %v1584_v13, %v1314_v57 }
 0x17b   :  { %v1341_v20 = vadd.f32 %v1334_v63, %v1321_v10  ;;  %v1323_v22 = vmul.f32 %v1577_v12, %v1314_v57  ;;  %v1346_v25 = vadd.f32 %v1338_v2, %v1326_v17  ;;  %v1328_v27 = vmul.f32 %v1586_v19, %v1318_v61 }
 0x17c   :  { %v1342_v24 = vadd.f32 %v1338_v2, %v1322_v16  ;;  %v1324_v26 = vmul.f32 %v1578_v18, %v1318_v61  ;;  %vm1354_vm1 = vcmp.ge.f32.partialorder %v1345_v21, 0.0  ;;  %v1373_v29 = vmul.f32 %v1362_v4, %v1345_v21 }
 0x17d   :  { %vm1350_vm0 = vcmp.ge.f32.partialorder %v1341_v20, 0.0  ;;  %v1369_v28 = vmul.f32 %v1362_v4, %v1341_v20  ;;  %vm1355_vm3 = vcmp.ge.f32.partialorder %v1346_v25, 0.0  ;;  %v1374_v31 = vmul.f32 %v1366_v6, %v1346_v25 }
 0x17e   :  { %vm1351_vm2 = vcmp.ge.f32.partialorder %v1342_v24, 0.0  ;;  %v1370_v30 = vmul.f32 %v1366_v6, %v1342_v24  ;;  %v1381_v33 = vsel %vm1354_vm1, %v1345_v21, %v1373_v29  ;;  %v1343_v34 = vadd.f32 %v1334_v63, %v1323_v22 }
 0x17f   :  { %v1377_v32 = vsel %vm1350_vm0, %v1341_v20, %v1369_v28  ;;  %v1347_v35 = vadd.f32 %v1334_v63, %v1327_v23  ;;  %1389 = vst [vmem:[%s2405_s5 + $0x20] sm:$0xff] %v1381_v33  ;;  %v1382_v37 = vsel %vm1355_vm3, %v1346_v25, %v1374_v31  ;;  %v1344_v38 = vadd.f32 %v1338_v2, %v1324_v26 }
 0x180   :  { %1385 = vst [vmem:[%s2405_s5] sm:$0xff] %v1377_v32  ;;  %v1378_v36 = vsel %vm1351_vm2, %v1342_v24, %v1370_v30  ;;  %v1348_v39 = vadd.f32 %v1338_v2, %v1328_v27  ;;  %1390 = vst [vmem:[%s2405_s5 + $0x28] sm:$0xff] %v1382_v37  ;;  %vm1352_vm4 = vcmp.ge.f32.partialorder %v1343_v34, 0.0  ;;  %v1371_v40 = vmul.f32 %v1362_v4, %v1343_v34 }
 0x181   :  { %1386 = vst [vmem:[%s2405_s5 + $0x8] sm:$0xff] %v1378_v36  ;;  %vm1356_vm5 = vcmp.ge.f32.partialorder %v1347_v35, 0.0  ;;  %v1375_v41 = vmul.f32 %v1362_v4, %v1347_v35  ;;  %vm1353_vm6 = vcmp.ge.f32.partialorder %v1344_v38, 0.0  ;;  %v1372_v42 = vmul.f32 %v1366_v6, %v1344_v38 }
 0x182   :  { %vm1357_vm7 = vcmp.ge.f32.partialorder %v1348_v39, 0.0  ;;  %v1376_v43 = vmul.f32 %v1366_v6, %v1348_v39  ;;  %v1379_v44 = vsel %vm1352_vm4, %v1343_v34, %v1371_v40 }
 0x183   :  { %v1383_v45 = vsel %vm1356_vm5, %v1347_v35, %v1375_v41  ;;  %1387 = vst [vmem:[%s2405_s5 + $0x10] sm:$0xff] %v1379_v44  ;;  %v1380_v46 = vsel %vm1353_vm6, %v1344_v38, %v1372_v42 }
 0x184   :  { %1391 = vst [vmem:[%s2405_s5 + $0x30] sm:$0xff] %v1383_v45  ;;  %v1384_v47 = vsel %vm1357_vm7, %v1348_v39, %v1376_v43  ;;  %1388 = vst [vmem:[%s2405_s5 + $0x18] sm:$0xff] %v1380_v46 }
 0x185   :  { %1392 = vst [vmem:[%s2405_s5 + $0x38] sm:$0xff] %v1384_v47 }

// kernel: iresnet_forward_pallas.28
= control target key start
LH: loop header
LB: loop body
LE: loop exit
PB: predicated region body
PF: predicated region fallthrough
CT: control target
= control target key end

     0   :  { %v248_v1 = vmov 0   ;;  %v175_v18 = vlaneseq  ;;  %s337_s1 = inlined_call_operand.vmem [shape: bf16[128,256], index: 1, kind: input, shape index: {}]   ;;  %s338_s0 = inlined_call_operand.vmem [shape: bf16[8,128], index: 0, kind: input, shape index: {}]   ;;  %s339_s2 = inlined_call_operand.vmem [shape: f32[1,256], index: 2, kind: input, shape index: {}]   ;;  %s340_s3 = inlined_call_operand.vmem [shape: f32[1,256], index: 3, kind: input, shape index: {}]   ;;  %s341_s4 = inlined_call_operand.vmem [shape: f32[8,256], index: 4, kind: output, shape index: {}]  }
   0x1   :  { %v224_v0 = vld [vmem:[%s337_s1 + $0x4] ss:$8 sps:$4 sm:$0xff]   ;;  %155 = vmatprep.mubr.bf16.mxu0 %v248_v1  ;;  %v226_v2 = vld [vmem:[%s337_s1] ss:$8 sps:$4 sm:$0xff]   ;;  %v227_v3 = vld [vmem:[%s337_s1 + $0x14] ss:$8 sps:$4 sm:$0xff]  }
   0x2   :  { %123 = vmatprep.subr.bf16.mxu0 %v224_v0  ;;  %v229_v4 = vld [vmem:[%s337_s1 + $0x10] ss:$8 sps:$4 sm:$0xff]   ;;  %v230_v5 = vld [vmem:[%s337_s1 + $0x24] ss:$8 sps:$4 sm:$0xff]   ;;  %v232_v6 = vld [vmem:[%s337_s1 + $0x20] ss:$8 sps:$4 sm:$0xff]  }
   0x3   :  { %124 = vmatpush1.bf16.msra.mxu0 %v226_v2  ;;  %v233_v7 = vld [vmem:[%s337_s1 + $0x34] ss:$8 sps:$4 sm:$0xff]   ;;  %v235_v8 = vld [vmem:[%s337_s1 + $0x30] ss:$8 sps:$4 sm:$0xff]   ;;  %v236_v9 = vld [vmem:[%s337_s1 + $0x44] ss:$8 sps:$4 sm:$0xff]  }
   0x4   :  { %125 = vmatprep.subr.bf16.mxu0 %v227_v3  ;;  %v238_v10 = vld [vmem:[%s337_s1 + $0x40] ss:$8 sps:$4 sm:$0xff]   ;;  %v239_v11 = vld [vmem:[%s337_s1 + $0x54] ss:$8 sps:$4 sm:$0xff]   ;;  %v241_v12 = vld [vmem:[%s337_s1 + $0x50] ss:$8 sps:$4 sm:$0xff]  }
   0x5   :  { %v242_v13 = vld [vmem:[%s337_s1 + $0x64] ss:$8 sps:$4 sm:$0xff]   ;;  %v244_v14 = vld [vmem:[%s337_s1 + $0x60] ss:$8 sps:$4 sm:$0xff]   ;;  %v245_v15 = vld [vmem:[%s337_s1 + $0x74] ss:$8 sps:$4 sm:$0xff]  }
   0x6   :  { %v247_v16 = vld [vmem:[%s337_s1 + $0x70] ss:$8 sps:$4 sm:$0xff]   ;;  %v26_v17 = vld [vmem:[%s338_s0] sm:$0xf]  ;;  %v176_v19 = vshrl.u32 %v175_v18, 7 }
   0x7   :  { %126 = vmatpush1.bf16.msra.mxu0 %v229_v4  ;;  %v173_v21 = vld [vmem:[%s339_s2] sm:$0x3] }
   0x8   :  { %127 = vmatprep.subr.bf16.mxu0 %v230_v5  ;;  %v177_v20 = vsub.s32 0, %v176_v19  ;;  %v181_v22 = vsub.s32 1, %v176_v19  ;;  %v187_v23 = vld [vmem:[%s340_s3] sm:$0x3] }
   0xa   :  { %v178_v24 = vrot.slane %v173_v21, %v177_v20  ;;  %v182_v25 = vrot.slane %v173_v21, %v181_v22  ;;  %v192_v26 = vrot.slane %v187_v23, %v177_v20  ;;  %v196_v28 = vrot.slane %v187_v23, %v181_v22 }
   0xb   :  { %128 = vmatpush1.bf16.msra.mxu0 %v232_v6 }
   0xc   :  { %129 = vmatprep.subr.bf16.mxu0 %v233_v7 }
   0xf   :  { %130 = vmatpush1.bf16.msra.mxu0 %v235_v8 }
  0x10   :  { %131 = vmatprep.subr.bf16.mxu0 %v236_v9 }
  0x13   :  { %132 = vmatpush1.bf16.msra.mxu0 %v238_v10 }
  0x14   :  { %133 = vmatprep.subr.bf16.mxu0 %v239_v11 }
  0x17   :  { %134 = vmatpush1.bf16.msra.mxu0 %v241_v12 }
  0x18   :  { %135 = vmatprep.subr.bf16.mxu0 %v242_v13 }
  0x1b   :  { %136 = vmatpush1.bf16.msra.mxu0 %v244_v14 }
  0x1c   :  { %137 = vmatprep.subr.bf16.mxu0 %v245_v15 }
  0x1f   :  { %138 = vmatpush1.bf16.msra.mxu0 %v247_v16 }
  0x22   :  { %156 = vmatmul.mubr.bf16.vlgmr.msra.gmra.mrb[0].mxu0 %v26_v17 }
  0xf5   :  { %v157_v27 = vpop.f32.mrb[0].mxu0 }
  0xf6   :  { %v185_v29 = vmul.f32 %v178_v24, %v157_v27  ;;  %v159_v30 = vpop.f32.mrb[1].mxu0 }
  0xf7   :  { %v186_v31 = vmul.f32 %v182_v25, %v159_v30  ;;  %v161_v32 = vpop.f32.mrb[2].mxu0 }
  0xf8   :  { %v199_v33 = vadd.f32 %v192_v26, %v185_v29  ;;  %v162_v34 = vpop.f32.mrb[3].mxu0 }
  0xf9   :  { %v200_v35 = vadd.f32 %v196_v28, %v186_v31 }
  0xfa   :  { %201 = vst [vmem:[%s341_s4] sm:$0xff] %v199_v33 }
  0xfb   :  { %202 = vst [vmem:[%s341_s4 + $0x8] sm:$0xff] %v200_v35 }

// kernel: iresnet_forward_pallas.29
= control target key start
LH: loop header
LB: loop body
LE: loop exit
PB: predicated region body
PF: predicated region fallthrough
CT: control target
= control target key end

     0   :  { %s2172_s18 = smov 0   ;;  %s2174_s19 = smov 0   ;;  %s2394_s0 = inlined_call_operand.vmem [shape: bf16[8,2304], index: 0, kind: input, shape index: {}]   ;;  %s2395_s1 = inlined_call_operand.vmem [shape: bf16[2304,256], index: 1, kind: input, shape index: {}]   ;;  %s2396_s2 = inlined_call_operand.vmem [shape: f32[1,256], index: 2, kind: input, shape index: {}]   ;;  %s2397_s3 = inlined_call_operand.vmem [shape: f32[1,256], index: 3, kind: input, shape index: {}]   ;;  %s2398_s4 = inlined_call_operand.vmem [shape: f32[8,256], index: 4, kind: input, shape index: {}]   ;;  %s2399_s5 = inlined_call_operand.vmem [shape: f32[8,256], index: 5, kind: output, shape index: {}]  }
   0x1   :  { %s2176_s20 = smov 0  }
   0x2 LB: > { %s27_s21 = sadd.s32 1, %s2134_s19  ;;  %p1701_p0 = scmp.ge.s32.totalorder %s2138_s20, 1  ;;  %s2138_s20 = sphi %s2176_s20, %s15_s20   ;;  %s2134_s19 = sphi %s2174_s19, %s2401_s19   ;;  %s2130_s18 = sphi %s2172_s18, %s2400_s18  }
   0x3   : > { %p28_p1 = scmp.ge.s32.totalorder %s27_s21, 2  ;;  %p271_p2 = scmp.lt.s32.totalorder %s2138_s20, 3 }
   0x5   : > { %s2403_s21 = smov (%p28_p1, %s27_s21), 0  ;;  %p272_p3 = pnand %p1701_p0, %p271_p2 }
   0x6   : > { %s334_s22 = smul.u32 (!%p272_p3), 9, %s2130_s18  ;;  %p1705_p6 = scmp.ne.s32.totalorder (!%p272_p3), %s2130_s18, 0 }
   0x7   : > { %275 = sbr.rel (%p272_p3) target bundleno = 417 (0x1a1), region = 40 }
   0x8   : > { %s344_s23 = smul.u32 (!%p272_p3), 144, %s2130_s18  ;;  %p337_p4 = scmp.lt.s32.totalorder (!%p272_p3), %s334_s22, 17 }
   0xa   : > { %p346_p5 = scmp.lt.s32.totalorder (!%p272_p3), %s344_s23, 287 }
   0xe   : > { %s2405_s22 = smov (!%p337_p4, %s334_s22), 17  ;;  %s2407_s23 = smov (!%p346_p5, %s344_s23), 287 }
   0xf   : > { %s1702_s24 = sshll.u32 %s2405_s22, 2  ;;  %s1864_s28 = sshll.u32 %s2407_s23, 3  ;;  %v2140_v0 = vmov (!%p1705_p6), 0.0  }
  0x10   : > { %s2197_s27 = scalar_lea.vmem %s2394_s0, %s1702_s24  ;;  %s2202_s6 = scalar_lea.vmem %s2395_s1, %s1864_s28  ;;  %391 = vst [vmem:[#allocation2] sm:$0xff] (!%p1705_p6), %v2140_v0  ;;  %392 = vst [vmem:[#allocation2 + $0x8] sm:$0xff] (!%p1705_p6), %v2140_v0 }
  0x11   : > { %390 = sbr.rel (%p1705_p6) target bundleno = 24 (0x18), region = 44 }
  0x18 PF: > { %v1891_v1 = vld [vmem:[%s2202_s6 + $0x4] ss:$8 sps:$4 sm:$0xff]   ;;  %v1895_v3 = vld [vmem:[%s2202_s6] ss:$8 sps:$4 sm:$0xff]   ;;  %v1897_v5 = vld [vmem:[%s2202_s6 + $0x14] ss:$8 sps:$4 sm:$0xff]  }
  0x19   : > { %v1893_v2 = vld [vmem:[%s2202_s6 + $0x104] ss:$8 sps:$4 sm:$0xff]   ;;  %1296 = vmatprep.subr.bf16.mxu0 %v1891_v1  ;;  %v1896_v4 = vld [vmem:[%s2202_s6 + $0x100] ss:$8 sps:$4 sm:$0xff]   ;;  %v1899_v6 = vld [vmem:[%s2202_s6 + $0x114] ss:$8 sps:$4 sm:$0xff]  }
  0x1a   : > { %1337 = vmatprep.subr.bf16.mxu1 %v1893_v2  ;;  %1297 = vmatpush1.bf16.msra.mxu0 %v1895_v3  ;;  %v1901_v7 = vld [vmem:[%s2202_s6 + $0x10] ss:$8 sps:$4 sm:$0xff]   ;;  %v1903_v9 = vld [vmem:[%s2202_s6 + $0x24] ss:$8 sps:$4 sm:$0xff]   ;;  %v1907_v11 = vld [vmem:[%s2202_s6 + $0x20] ss:$8 sps:$4 sm:$0xff]  }
  0x1b   : > { %1338 = vmatpush1.bf16.msra.mxu1 %v1896_v4  ;;  %1298 = vmatprep.subr.bf16.mxu0 %v1897_v5  ;;  %v1902_v8 = vld [vmem:[%s2202_s6 + $0x110] ss:$8 sps:$4 sm:$0xff]   ;;  %v1905_v10 = vld [vmem:[%s2202_s6 + $0x124] ss:$8 sps:$4 sm:$0xff]   ;;  %v1908_v12 = vld [vmem:[%s2202_s6 + $0x120] ss:$8 sps:$4 sm:$0xff]  }
  0x1c   : > { %1339 = vmatprep.subr.bf16.mxu1 %v1899_v6  ;;  %v1909_v13 = vld [vmem:[%s2202_s6 + $0x34] ss:$8 sps:$4 sm:$0xff]   ;;  %v1913_v15 = vld [vmem:[%s2202_s6 + $0x30] ss:$8 sps:$4 sm:$0xff]   ;;  %v1915_v17 = vld [vmem:[%s2202_s6 + $0x44] ss:$8 sps:$4 sm:$0xff]  }
  0x1d   : > { %v1911_v14 = vld [vmem:[%s2202_s6 + $0x134] ss:$8 sps:$4 sm:$0xff]   ;;  %v1914_v16 = vld [vmem:[%s2202_s6 + $0x130] ss:$8 sps:$4 sm:$0xff]   ;;  %v1917_v18 = vld [vmem:[%s2202_s6 + $0x144] ss:$8 sps:$4 sm:$0xff]  }
  0x1e   : > { %1299 = vmatpush1.bf16.msra.mxu0 %v1901_v7  ;;  %v1919_v19 = vld [vmem:[%s2202_s6 + $0x40] ss:$8 sps:$4 sm:$0xff]   ;;  %v1921_v21 = vld [vmem:[%s2202_s6 + $0x54] ss:$8 sps:$4 sm:$0xff]   ;;  %v1925_v23 = vld [vmem:[%s2202_s6 + $0x50] ss:$8 sps:$4 sm:$0xff]  }
  0x1f   : > { %1340 = vmatpush1.bf16.msra.mxu1 %v1902_v8  ;;  %1300 = vmatprep.subr.bf16.mxu0 %v1903_v9  ;;  %v1920_v20 = vld [vmem:[%s2202_s6 + $0x140] ss:$8 sps:$4 sm:$0xff]   ;;  %v1923_v22 = vld [vmem:[%s2202_s6 + $0x154] ss:$8 sps:$4 sm:$0xff]   ;;  %v1926_v24 = vld [vmem:[%s2202_s6 + $0x150] ss:$8 sps:$4 sm:$0xff]  }
  0x20   : > { %1341 = vmatprep.subr.bf16.mxu1 %v1905_v10  ;;  %v1927_v25 = vld [vmem:[%s2202_s6 + $0x64] ss:$8 sps:$4 sm:$0xff]   ;;  %v1931_v27 = vld [vmem:[%s2202_s6 + $0x60] ss:$8 sps:$4 sm:$0xff]   ;;  %v1933_v29 = vld [vmem:[%s2202_s6 + $0x74] ss:$8 sps:$4 sm:$0xff]  }
  0x21   : > { %v1929_v26 = vld [vmem:[%s2202_s6 + $0x164] ss:$8 sps:$4 sm:$0xff]   ;;  %v1932_v28 = vld [vmem:[%s2202_s6 + $0x160] ss:$8 sps:$4 sm:$0xff]   ;;  %v1935_v30 = vld [vmem:[%s2202_s6 + $0x174] ss:$8 sps:$4 sm:$0xff]  }
  0x22   : > { %1301 = vmatpush1.bf16.msra.mxu0 %v1907_v11  ;;  %v1937_v31 = vld [vmem:[%s2202_s6 + $0x70] ss:$8 sps:$4 sm:$0xff]   ;;  %v1939_v33 = vld [vmem:[%s2202_s6 + $0x84] ss:$8 sps:$4 sm:$0xff]   ;;  %v1943_v35 = vld [vmem:[%s2202_s6 + $0x80] ss:$8 sps:$4 sm:$0xff]  }
  0x23   : > { %1342 = vmatpush1.bf16.msra.mxu1 %v1908_v12  ;;  %1302 = vmatprep.subr.bf16.mxu0 %v1909_v13  ;;  %v1938_v32 = vld [vmem:[%s2202_s6 + $0x170] ss:$8 sps:$4 sm:$0xff]   ;;  %v1941_v34 = vld [vmem:[%s2202_s6 + $0x184] ss:$8 sps:$4 sm:$0xff]   ;;  %v1944_v36 = vld [vmem:[%s2202_s6 + $0x180] ss:$8 sps:$4 sm:$0xff]  }
  0x24   : > { %1343 = vmatprep.subr.bf16.mxu1 %v1911_v14  ;;  %v1945_v37 = vld [vmem:[%s2202_s6 + $0x94] ss:$8 sps:$4 sm:$0xff]   ;;  %v1949_v39 = vld [vmem:[%s2202_s6 + $0x90] ss:$8 sps:$4 sm:$0xff]   ;;  %v1951_v41 = vld [vmem:[%s2202_s6 + $0xa4] ss:$8 sps:$4 sm:$0xff]  }
  0x25   : > { %v1947_v38 = vld [vmem:[%s2202_s6 + $0x194] ss:$8 sps:$4 sm:$0xff]   ;;  %v1950_v40 = vld [vmem:[%s2202_s6 + $0x190] ss:$8 sps:$4 sm:$0xff]   ;;  %v1953_v42 = vld [vmem:[%s2202_s6 + $0x1a4] ss:$8 sps:$4 sm:$0xff]  }
  0x26   : > { %1303 = vmatpush1.bf16.msra.mxu0 %v1913_v15  ;;  %v1955_v43 = vld [vmem:[%s2202_s6 + $0xa0] ss:$8 sps:$4 sm:$0xff]   ;;  %v1957_v45 = vld [vmem:[%s2202_s6 + $0xb4] ss:$8 sps:$4 sm:$0xff]   ;;  %v1961_v50 = vld [vmem:[%s2202_s6 + $0xb0] ss:$8 sps:$4 sm:$0xff]  }
  0x27   : > { %1344 = vmatpush1.bf16.msra.mxu1 %v1914_v16  ;;  %1304 = vmatprep.subr.bf16.mxu0 %v1915_v17  ;;  %v1956_v44 = vld [vmem:[%s2202_s6 + $0x1a0] ss:$8 sps:$4 sm:$0xff]   ;;  %v1959_v46 = vld [vmem:[%s2202_s6 + $0x1b4] ss:$8 sps:$4 sm:$0xff]   ;;  %v1962_v51 = vld [vmem:[%s2202_s6 + $0x1b0] ss:$8 sps:$4 sm:$0xff]  }
  0x28   : > { %1345 = vmatprep.subr.bf16.mxu1 %v1917_v18  ;;  %v395_v47 = vld [vmem:[%s2197_s27] sm:$0xff]  ;;  %v396_v49 = vld [vmem:[%s2197_s27 + $0x8] sm:$0xff]  ;;  %v1969_v57 = vld [vmem:[%s2202_s6 + $0xd4] ss:$8 sps:$4 sm:$0xff]   ;;  %p1859_p7 = scmp.ne.s32.totalorder %s2130_s18, 1 }
  0x29   : > { %v1707_v48 = vcombine.high %v395_v47, %v395_v47  ;;  %v1709_v52 = vcombine.high %v396_v49, %v396_v49  ;;  %v1963_v53 = vld [vmem:[%s2202_s6 + $0xc4] ss:$8 sps:$4 sm:$0xff]   ;;  %v1967_v55 = vld [vmem:[%s2202_s6 + $0xc0] ss:$8 sps:$4 sm:$0xff]   ;;  %v1971_v58 = vld [vmem:[%s2202_s6 + $0x1d4] ss:$8 sps:$4 sm:$0xff]   ;;  %v1706_v7 = vcombine.low %v395_v47, %v395_v47  ;;  %v1708_v8 = vcombine.low %v396_v49, %v396_v49 }
  0x2a   : > { %1305 = vmatpush1.bf16.msra.mxu0 %v1919_v19  ;;  %v1965_v54 = vld [vmem:[%s2202_s6 + $0x1c4] ss:$8 sps:$4 sm:$0xff]   ;;  %v1968_v56 = vld [vmem:[%s2202_s6 + $0x1c0] ss:$8 sps:$4 sm:$0xff]   ;;  %v1973_v59 = vld [vmem:[%s2202_s6 + $0xd0] ss:$8 sps:$4 sm:$0xff]  }
  0x2b   : > { %1346 = vmatpush1.bf16.msra.mxu1 %v1920_v20  ;;  %1306 = vmatprep.subr.bf16.mxu0 %v1921_v21  ;;  %v1974_v60 = vld [vmem:[%s2202_s6 + $0x1d0] ss:$8 sps:$4 sm:$0xff]   ;;  %v1975_v61 = vld [vmem:[%s2202_s6 + $0xe4] ss:$8 sps:$4 sm:$0xff]   ;;  %v1979_v63 = vld [vmem:[%s2202_s6 + $0xe0] ss:$8 sps:$4 sm:$0xff]  }
  0x2c   : > { %1347 = vmatprep.subr.bf16.mxu1 %v1923_v22  ;;  %1328 = vmatprep.mubr.bf16.mxu0 %v1707_v48  ;;  %v1977_v62 = vld [vmem:[%s2202_s6 + $0x1e4] ss:$8 sps:$4 sm:$0xff]   ;;  %v1980_v0 = vld [vmem:[%s2202_s6 + $0x1e0] ss:$8 sps:$4 sm:$0xff]   ;;  %v1981_v1 = vld [vmem:[%s2202_s6 + $0xf4] ss:$8 sps:$4 sm:$0xff]  }
  0x2d   : > { %1369 = vmatprep.mubr.bf16.mxu1 %v1709_v52  ;;  %v1983_v2 = vld [vmem:[%s2202_s6 + $0x1f4] ss:$8 sps:$4 sm:$0xff]   ;;  %v1985_v3 = vld [vmem:[%s2202_s6 + $0xf0] ss:$8 sps:$4 sm:$0xff]   ;;  %v1993_v5 = vld [vmem:[%s2202_s6 + $0x204] ss:$8 sps:$4 sm:$0xff]  }
  0x2e   : > { %1307 = vmatpush1.bf16.msra.mxu0 %v1925_v23  ;;  %v1986_v4 = vld [vmem:[%s2202_s6 + $0x1f0] ss:$8 sps:$4 sm:$0xff]   ;;  %v1996_v6 = vld [vmem:[%s2202_s6 + $0x304] ss:$8 sps:$4 sm:$0xff]   ;;  %v1991_v9 = vld [vmem:[%s2202_s6 + $0x200] ss:$8 sps:$4 sm:$0xff]  }
  0x2f   : > { %1348 = vmatpush1.bf16.msra.mxu1 %v1926_v24  ;;  %1308 = vmatprep.subr.bf16.mxu0 %v1927_v25  ;;  %v1994_v10 = vld [vmem:[%s2202_s6 + $0x300] ss:$8 sps:$4 sm:$0xff]   ;;  %v1999_v11 = vld [vmem:[%s2202_s6 + $0x214] ss:$8 sps:$4 sm:$0xff]   ;;  %v1997_v13 = vld [vmem:[%s2202_s6 + $0x210] ss:$8 sps:$4 sm:$0xff]  }
  0x30   : > { %1349 = vmatprep.subr.bf16.mxu1 %v1929_v26  ;;  %v2002_v12 = vld [vmem:[%s2202_s6 + $0x314] ss:$8 sps:$4 sm:$0xff]   ;;  %v2000_v14 = vld [vmem:[%s2202_s6 + $0x310] ss:$8 sps:$4 sm:$0xff]   ;;  %v2005_v15 = vld [vmem:[%s2202_s6 + $0x224] ss:$8 sps:$4 sm:$0xff]  }
  0x31   : > { %v2008_v16 = vld [vmem:[%s2202_s6 + $0x324] ss:$8 sps:$4 sm:$0xff]   ;;  %v2003_v17 = vld [vmem:[%s2202_s6 + $0x220] ss:$8 sps:$4 sm:$0xff]   ;;  %v2011_v19 = vld [vmem:[%s2202_s6 + $0x234] ss:$8 sps:$4 sm:$0xff]  }
  0x32   : > { %1309 = vmatpush1.bf16.msra.mxu0 %v1931_v27  ;;  %v2006_v18 = vld [vmem:[%s2202_s6 + $0x320] ss:$8 sps:$4 sm:$0xff]   ;;  %v2014_v20 = vld [vmem:[%s2202_s6 + $0x334] ss:$8 sps:$4 sm:$0xff]   ;;  %v2009_v21 = vld [vmem:[%s2202_s6 + $0x230] ss:$8 sps:$4 sm:$0xff]  }
  0x33   : > { %1350 = vmatpush1.bf16.msra.mxu1 %v1932_v28  ;;  %1310 = vmatprep.subr.bf16.mxu0 %v1933_v29  ;;  %v2012_v22 = vld [vmem:[%s2202_s6 + $0x330] ss:$8 sps:$4 sm:$0xff]   ;;  %v2017_v23 = vld [vmem:[%s2202_s6 + $0x244] ss:$8 sps:$4 sm:$0xff]   ;;  %v2015_v25 = vld [vmem:[%s2202_s6 + $0x240] ss:$8 sps:$4 sm:$0xff]  }
  0x34   : > { %1351 = vmatprep.subr.bf16.mxu1 %v1935_v30  ;;  %v2020_v24 = vld [vmem:[%s2202_s6 + $0x344] ss:$8 sps:$4 sm:$0xff]   ;;  %v2018_v26 = vld [vmem:[%s2202_s6 + $0x340] ss:$8 sps:$4 sm:$0xff]   ;;  %v2023_v27 = vld [vmem:[%s2202_s6 + $0x254] ss:$8 sps:$4 sm:$0xff]  }
  0x35   : > { %v2026_v28 = vld [vmem:[%s2202_s6 + $0x354] ss:$8 sps:$4 sm:$0xff]   ;;  %v2021_v29 = vld [vmem:[%s2202_s6 + $0x250] ss:$8 sps:$4 sm:$0xff]   ;;  %v2056_v52 = vld [vmem:[%s2202_s6 + $0x3a4] ss:$8 sps:$4 sm:$0xff]  }
  0x36   : > { %1311 = vmatpush1.bf16.msra.mxu0 %v1937_v31  ;;  %v2024_v30 = vld [vmem:[%s2202_s6 + $0x350] ss:$8 sps:$4 sm:$0xff]   ;;  %v2029_v31 = vld [vmem:[%s2202_s6 + $0x264] ss:$8 sps:$4 sm:$0xff]   ;;  %v2047_v47 = vld [vmem:[%s2202_s6 + $0x294] ss:$8 sps:$4 sm:$0xff]  }
  0x37   : > { %1352 = vmatpush1.bf16.msra.mxu1 %v1938_v32  ;;  %1312 = vmatprep.subr.bf16.mxu0 %v1939_v33  ;;  %v2032_v32 = vld [vmem:[%s2202_s6 + $0x364] ss:$8 sps:$4 sm:$0xff]   ;;  %v2298_v33 = vld [vmem:[%s2197_s27 + $0x10] sm:$0xff] }
  0x38   : > { %1353 = vmatprep.subr.bf16.mxu1 %v1941_v34  ;;  %v2027_v34 = vld [vmem:[%s2202_s6 + $0x260] ss:$8 sps:$4 sm:$0xff]   ;;  %v2050_v48 = vld [vmem:[%s2202_s6 + $0x394] ss:$8 sps:$4 sm:$0xff]   ;;  %v2045_v49 = vld [vmem:[%s2202_s6 + $0x290] ss:$8 sps:$4 sm:$0xff]  }
  0x3a   : > { %1313 = vmatpush1.bf16.msra.mxu0 %v1943_v35  ;;  %v2030_v35 = vld [vmem:[%s2202_s6 + $0x360] ss:$8 sps:$4 sm:$0xff]  }
  0x3b   : > { %1354 = vmatpush1.bf16.msra.mxu1 %v1944_v36  ;;  %1314 = vmatprep.subr.bf16.mxu0 %v1945_v37  ;;  %v1711_v36 = vcombine.high %v2298_v33, %v2298_v33  ;;  %v2305_v37 = vld [vmem:[%s2197_s27 + $0x18] sm:$0xff] }
  0x3c   : > { %1355 = vmatprep.subr.bf16.mxu1 %v1947_v38  ;;  %v2035_v38 = vld [vmem:[%s2202_s6 + $0x274] ss:$8 sps:$4 sm:$0xff]  }
  0x3e   : > { %1315 = vmatpush1.bf16.msra.mxu0 %v1949_v39  ;;  %v1713_v39 = vcombine.high %v2305_v37, %v2305_v37 }
  0x3f   : > { %1356 = vmatpush1.bf16.msra.mxu1 %v1950_v40  ;;  %1316 = vmatprep.subr.bf16.mxu0 %v1951_v41  ;;  %v2038_v40 = vld [vmem:[%s2202_s6 + $0x374] ss:$8 sps:$4 sm:$0xff]   ;;  %v2033_v41 = vld [vmem:[%s2202_s6 + $0x270] ss:$8 sps:$4 sm:$0xff]  }
  0x40   : > { %1357 = vmatprep.subr.bf16.mxu1 %v1953_v42  ;;  %v2036_v42 = vld [vmem:[%s2202_s6 + $0x370] ss:$8 sps:$4 sm:$0xff]  }
  0x42   : > { %1317 = vmatpush1.bf16.msra.mxu0 %v1955_v43  ;;  %v2041_v43 = vld [vmem:[%s2202_s6 + $0x284] ss:$8 sps:$4 sm:$0xff]  }
  0x43   : > { %1358 = vmatpush1.bf16.msra.mxu1 %v1956_v44  ;;  %1318 = vmatprep.subr.bf16.mxu0 %v1957_v45  ;;  %v2044_v44 = vld [vmem:[%s2202_s6 + $0x384] ss:$8 sps:$4 sm:$0xff]   ;;  %v2039_v45 = vld [vmem:[%s2202_s6 + $0x280] ss:$8 sps:$4 sm:$0xff]  }
  0x44   : > { %1359 = vmatprep.subr.bf16.mxu1 %v1959_v46  ;;  %v2042_v46 = vld [vmem:[%s2202_s6 + $0x380] ss:$8 sps:$4 sm:$0xff]  }
  0x46   : > { %1319 = vmatpush1.bf16.msra.mxu0 %v1961_v50  ;;  %v2048_v50 = vld [vmem:[%s2202_s6 + $0x390] ss:$8 sps:$4 sm:$0xff]  }
  0x47   : > { %1360 = vmatpush1.bf16.msra.mxu1 %v1962_v51  ;;  %1320 = vmatprep.subr.bf16.mxu0 %v1963_v53  ;;  %v2053_v51 = vld [vmem:[%s2202_s6 + $0x2a4] ss:$8 sps:$4 sm:$0xff]   ;;  %v2051_v53 = vld [vmem:[%s2202_s6 + $0x2a0] ss:$8 sps:$4 sm:$0xff]  }
  0x48   : > { %1361 = vmatprep.subr.bf16.mxu1 %v1965_v54  ;;  %v2054_v54 = vld [vmem:[%s2202_s6 + $0x3a0] ss:$8 sps:$4 sm:$0xff]  }
  0x4a   : > { %1321 = vmatpush1.bf16.msra.mxu0 %v1967_v55  ;;  %v2059_v55 = vld [vmem:[%s2202_s6 + $0x2b4] ss:$8 sps:$4 sm:$0xff]  }
  0x4b   : > { %1362 = vmatpush1.bf16.msra.mxu1 %v1968_v56  ;;  %1322 = vmatprep.subr.bf16.mxu0 %v1969_v57  ;;  %v2062_v56 = vld [vmem:[%s2202_s6 + $0x3b4] ss:$8 sps:$4 sm:$0xff]   ;;  %v2057_v57 = vld [vmem:[%s2202_s6 + $0x2b0] ss:$8 sps:$4 sm:$0xff]  }
  0x4c   : > { %1363 = vmatprep.subr.bf16.mxu1 %v1971_v58  ;;  %v2060_v58 = vld [vmem:[%s2202_s6 + $0x3b0] ss:$8 sps:$4 sm:$0xff]  }
  0x4e   : > { %1323 = vmatpush1.bf16.msra.mxu0 %v1973_v59  ;;  %v2065_v59 = vld [vmem:[%s2202_s6 + $0x2c4] ss:$8 sps:$4 sm:$0xff]  }
  0x4f   : > { %1364 = vmatpush1.bf16.msra.mxu1 %v1974_v60  ;;  %1324 = vmatprep.subr.bf16.mxu0 %v1975_v61  ;;  %v2068_v60 = vld [vmem:[%s2202_s6 + $0x3c4] ss:$8 sps:$4 sm:$0xff]   ;;  %v2063_v61 = vld [vmem:[%s2202_s6 + $0x2c0] ss:$8 sps:$4 sm:$0xff]  }
  0x50   : > { %1365 = vmatprep.subr.bf16.mxu1 %v1977_v62  ;;  %v2066_v62 = vld [vmem:[%s2202_s6 + $0x3c0] ss:$8 sps:$4 sm:$0xff]  }
  0x52   : > { %1325 = vmatpush1.bf16.msra.mxu0 %v1979_v63  ;;  %v2071_v63 = vld [vmem:[%s2202_s6 + $0x2d4] ss:$8 sps:$4 sm:$0xff]  }
  0x53   : > { %1366 = vmatpush1.bf16.msra.mxu1 %v1980_v0  ;;  %1326 = vmatprep.subr.bf16.mxu0 %v1981_v1  ;;  %v2074_v0 = vld [vmem:[%s2202_s6 + $0x3d4] ss:$8 sps:$4 sm:$0xff]   ;;  %v2069_v1 = vld [vmem:[%s2202_s6 + $0x2d0] ss:$8 sps:$4 sm:$0xff]  }
  0x54   : > { %1367 = vmatprep.subr.bf16.mxu1 %v1983_v2  ;;  %v2072_v2 = vld [vmem:[%s2202_s6 + $0x3d0] ss:$8 sps:$4 sm:$0xff]  }
  0x56   : > { %1327 = vmatpush1.bf16.msra.mxu0 %v1985_v3  ;;  %v2077_v3 = vld [vmem:[%s2202_s6 + $0x2e4] ss:$8 sps:$4 sm:$0xff]  }
  0x57   : > { %1368 = vmatpush1.bf16.msra.mxu1 %v1986_v4  ;;  %1378 = vmatprep.subr.bf16.mxu0 %v1993_v5  ;;  %v2080_v4 = vld [vmem:[%s2202_s6 + $0x3e4] ss:$8 sps:$4 sm:$0xff]   ;;  %v2075_v5 = vld [vmem:[%s2202_s6 + $0x2e0] ss:$8 sps:$4 sm:$0xff]  }
  0x58   : > { %1419 = vmatprep.subr.bf16.mxu1 %v1996_v6  ;;  %v2078_v6 = vld [vmem:[%s2202_s6 + $0x3e0] ss:$8 sps:$4 sm:$0xff]  }
  0x59   : > { %1329 = vmatmul.mubr.bf16.vlgmr.msra.gmra.mrb[0].mxu0 %v1706_v7  ;;  %v2083_v7 = vld [vmem:[%s2202_s6 + $0x2f4] ss:$8 sps:$4 sm:$0xff]  }
  0x5a   : > { %1370 = vmatmul.mubr.bf16.vlgmr.msra.gmra.mrb[0].mxu1 %v1708_v8  ;;  %1379 = vmatpush1.bf16.msra.mxu0 %v1991_v9  ;;  %v2086_v8 = vld [vmem:[%s2202_s6 + $0x3f4] ss:$8 sps:$4 sm:$0xff]   ;;  %v2081_v9 = vld [vmem:[%s2202_s6 + $0x2f0] ss:$8 sps:$4 sm:$0xff]  }
  0x5b   : > { %1420 = vmatpush1.bf16.msra.mxu1 %v1994_v10  ;;  %1380 = vmatprep.subr.bf16.mxu0 %v1999_v11  ;;  %v2084_v10 = vld [vmem:[%s2202_s6 + $0x3f0] ss:$8 sps:$4 sm:$0xff]   ;;  %v2091_v11 = vld [vmem:[%s2202_s6 + $0x404] ss:$8 sps:$4 sm:$0xff]  }
  0x5c   : > { %1421 = vmatprep.subr.bf16.mxu1 %v2002_v12  ;;  %1410 = vmatprep.mubr.bf16.mxu0 %v1711_v36  ;;  %v1710_v12 = vcombine.low %v2298_v33, %v2298_v33 }
  0x5d   : > { %1451 = vmatprep.mubr.bf16.mxu1 %v1713_v39 }
  0x5e   : > { %1381 = vmatpush1.bf16.msra.mxu0 %v1997_v13  ;;  %v1712_v13 = vcombine.low %v2305_v37, %v2305_v37 }
  0x5f   : > { %1422 = vmatpush1.bf16.msra.mxu1 %v2000_v14  ;;  %1382 = vmatprep.subr.bf16.mxu0 %v2005_v15  ;;  %v2089_v14 = vld [vmem:[%s2202_s6 + $0x400] ss:$8 sps:$4 sm:$0xff]   ;;  %v2096_v15 = vld [vmem:[%s2202_s6 + $0x414] ss:$8 sps:$4 sm:$0xff]  }
  0x60   : > { %1423 = vmatprep.subr.bf16.mxu1 %v2008_v16  ;;  %v2094_v16 = vld [vmem:[%s2202_s6 + $0x410] ss:$8 sps:$4 sm:$0xff]  }
  0x62   : > { %1383 = vmatpush1.bf16.msra.mxu0 %v2003_v17  ;;  %v2141_v17 = vmov 0  }
  0x63   : > { %1424 = vmatpush1.bf16.msra.mxu1 %v2006_v18  ;;  %1384 = vmatprep.subr.bf16.mxu0 %v2011_v19  ;;  %v2099_v18 = vld [vmem:[%s2202_s6 + $0x424] ss:$8 sps:$4 sm:$0xff]   ;;  %v2097_v19 = vld [vmem:[%s2202_s6 + $0x420] ss:$8 sps:$4 sm:$0xff]  }
  0x64   : > { %1425 = vmatprep.subr.bf16.mxu1 %v2014_v20  ;;  %v2102_v20 = vld [vmem:[%s2202_s6 + $0x434] ss:$8 sps:$4 sm:$0xff]  }
  0x66   : > { %1385 = vmatpush1.bf16.msra.mxu0 %v2009_v21  ;;  %v2100_v21 = vld [vmem:[%s2202_s6 + $0x430] ss:$8 sps:$4 sm:$0xff]  }
  0x67   : > { %1426 = vmatpush1.bf16.msra.mxu1 %v2012_v22  ;;  %1386 = vmatprep.subr.bf16.mxu0 %v2017_v23  ;;  %v2105_v22 = vld [vmem:[%s2202_s6 + $0x444] ss:$8 sps:$4 sm:$0xff]   ;;  %v2103_v23 = vld [vmem:[%s2202_s6 + $0x440] ss:$8 sps:$4 sm:$0xff]  }
  0x68   : > { %1427 = vmatprep.subr.bf16.mxu1 %v2020_v24  ;;  %v2108_v24 = vld [vmem:[%s2202_s6 + $0x454] ss:$8 sps:$4 sm:$0xff]  }
  0x6a   : > { %1387 = vmatpush1.bf16.msra.mxu0 %v2015_v25  ;;  %v2106_v25 = vld [vmem:[%s2202_s6 + $0x450] ss:$8 sps:$4 sm:$0xff]  }
  0x6b   : > { %1428 = vmatpush1.bf16.msra.mxu1 %v2018_v26  ;;  %1388 = vmatprep.subr.bf16.mxu0 %v2023_v27  ;;  %v2111_v26 = vld [vmem:[%s2202_s6 + $0x464] ss:$8 sps:$4 sm:$0xff]   ;;  %v2109_v27 = vld [vmem:[%s2202_s6 + $0x460] ss:$8 sps:$4 sm:$0xff]  }
  0x6c   : > { %1429 = vmatprep.subr.bf16.mxu1 %v2026_v28  ;;  %v2114_v28 = vld [vmem:[%s2202_s6 + $0x474] ss:$8 sps:$4 sm:$0xff]  }
  0x6e   : > { %1389 = vmatpush1.bf16.msra.mxu0 %v2021_v29  ;;  %v2112_v29 = vld [vmem:[%s2202_s6 + $0x470] ss:$8 sps:$4 sm:$0xff]  }
  0x6f   : > { %1430 = vmatpush1.bf16.msra.mxu1 %v2024_v30  ;;  %1390 = vmatprep.subr.bf16.mxu0 %v2029_v31  ;;  %v2115_v30 = vld [vmem:[%s2197_s27 + $0x20] ss:$0 sps:$4 sm:$0xff]  }
  0x70   : > { %1431 = vmatprep.subr.bf16.mxu1 %v2032_v32 }
  0x72   : > { %1391 = vmatpush1.bf16.msra.mxu0 %v2027_v34 }
  0x73   : > { %1432 = vmatpush1.bf16.msra.mxu1 %v2030_v35  ;;  %1392 = vmatprep.subr.bf16.mxu0 %v2035_v38 }
  0x74   : > { %1433 = vmatprep.subr.bf16.mxu1 %v2038_v40 }
  0x76   : > { %1393 = vmatpush1.bf16.msra.mxu0 %v2033_v41 }
  0x77   : > { %1434 = vmatpush1.bf16.msra.mxu1 %v2036_v42  ;;  %1394 = vmatprep.subr.bf16.mxu0 %v2041_v43 }
  0x78   : > { %1435 = vmatprep.subr.bf16.mxu1 %v2044_v44 }
  0x7a   : > { %1395 = vmatpush1.bf16.msra.mxu0 %v2039_v45 }
  0x7b   : > { %1436 = vmatpush1.bf16.msra.mxu1 %v2042_v46  ;;  %1396 = vmatprep.subr.bf16.mxu0 %v2047_v47 }
  0x7c   : > { %1437 = vmatprep.subr.bf16.mxu1 %v2050_v48 }
  0x7e   : > { %1397 = vmatpush1.bf16.msra.mxu0 %v2045_v49 }
  0x7f   : > { %1438 = vmatpush1.bf16.msra.mxu1 %v2048_v50  ;;  %1398 = vmatprep.subr.bf16.mxu0 %v2053_v51 }
  0x80   : > { %1439 = vmatprep.subr.bf16.mxu1 %v2056_v52 }
  0x82   : > { %1399 = vmatpush1.bf16.msra.mxu0 %v2051_v53  ;;  %v393_v53 = vld [vmem:[#allocation2] sm:$0xff] }
  0x83   : > { %1440 = vmatpush1.bf16.msra.mxu1 %v2054_v54  ;;  %1400 = vmatprep.subr.bf16.mxu0 %v2059_v55 }
  0x84   : > { %1441 = vmatprep.subr.bf16.mxu1 %v2062_v56  ;;  %v394_v56 = vld [vmem:[#allocation2 + $0x8] sm:$0xff] }
  0x86   : > { %1401 = vmatpush1.bf16.msra.mxu0 %v2057_v57 }
  0x87   : > { %1442 = vmatpush1.bf16.msra.mxu1 %v2060_v58  ;;  %1402 = vmatprep.subr.bf16.mxu0 %v2065_v59 }
  0x88   : > { %1443 = vmatprep.subr.bf16.mxu1 %v2068_v60 }
  0x8a   : > { %1403 = vmatpush1.bf16.msra.mxu0 %v2063_v61 }
  0x8b   : > { %1444 = vmatpush1.bf16.msra.mxu1 %v2066_v62  ;;  %1404 = vmatprep.subr.bf16.mxu0 %v2071_v63  ;;  %v1513_v63 = vlaneseq (!%p1859_p7) }
  0x8c   : > { %1445 = vmatprep.subr.bf16.mxu1 %v2074_v0 }
  0x8d   : > { %v1514_v0 = vshrl.u32 (!%p1859_p7), %v1513_v63, 7 }
  0x8e   : > { %1405 = vmatpush1.bf16.msra.mxu0 %v2069_v1  ;;  %v1511_v1 = vld [vmem:[%s2396_s2] sm:$0x3] (!%p1859_p7) }
  0x8f   : > { %1446 = vmatpush1.bf16.msra.mxu1 %v2072_v2  ;;  %1406 = vmatprep.subr.bf16.mxu0 %v2077_v3  ;;  %v1525_v2 = vld [vmem:[%s2397_s3] sm:$0x3] (!%p1859_p7)  ;;  %v1515_v3 = vsub.s32 (!%p1859_p7), 0, %v1514_v0 }
  0x90   : > { %1447 = vmatprep.subr.bf16.mxu1 %v2080_v4  ;;  %v1519_v4 = vsub.s32 (!%p1859_p7), 1, %v1514_v0 }
  0x92   : > { %1407 = vmatpush1.bf16.msra.mxu0 %v2075_v5 }
  0x93   : > { %1448 = vmatpush1.bf16.msra.mxu1 %v2078_v6  ;;  %1408 = vmatprep.subr.bf16.mxu0 %v2083_v7  ;;  %v1516_v7 = vrot.slane (!%p1859_p7), %v1511_v1, %v1515_v3 }
  0x94   : > { %1449 = vmatprep.subr.bf16.mxu1 %v2086_v8  ;;  %v1530_v8 = vrot.slane (!%p1859_p7), %v1525_v2, %v1515_v3 }
  0x96   : > { %1409 = vmatpush1.bf16.msra.mxu0 %v2081_v9  ;;  %v1520_v9 = vrot.slane (!%p1859_p7), %v1511_v1, %v1519_v4 }
  0x97   : > { %1450 = vmatpush1.bf16.msra.mxu1 %v2084_v10  ;;  %1460 = vmatprep.subr.bf16.mxu0 %v2091_v11  ;;  %v1534_v10 = vrot.slane (!%p1859_p7), %v1525_v2, %v1519_v4 }
  0x99   : > { %1411 = vmatmul.mubr.bf16.vlgmr.msra.gmra.mrb[4].mxu0 %v1710_v12 }
  0x9a   : > { %1452 = vmatmul.mubr.bf16.vlgmr.msra.gmra.mrb[4].mxu1 %v1712_v13  ;;  %1461 = vmatpush1.bf16.msra.mxu0 %v2089_v14  ;;  %v1539_v13 = vld [vmem:[%s2398_s4] sm:$0xff] (!%p1859_p7)  ;;  %v1540_v14 = vld [vmem:[%s2398_s4 + $0x8] sm:$0xff] (!%p1859_p7) }
  0x9b   : > { %1492 = vmatprep.mubr.bf16.mxu0 %v2141_v17  ;;  %1462 = vmatprep.subr.bf16.mxu0 %v2096_v15 }
  0x9e   : > { %1463 = vmatpush1.bf16.msra.mxu0 %v2094_v16 }
  0x9f   : > { %1464 = vmatprep.subr.bf16.mxu0 %v2099_v18 }
  0xa2   : > { %1465 = vmatpush1.bf16.msra.mxu0 %v2097_v19 }
  0xa3   : > { %1466 = vmatprep.subr.bf16.mxu0 %v2102_v20 }
  0xa6   : > { %1467 = vmatpush1.bf16.msra.mxu0 %v2100_v21 }
  0xa7   : > { %1468 = vmatprep.subr.bf16.mxu0 %v2105_v22 }
  0xaa   : > { %1469 = vmatpush1.bf16.msra.mxu0 %v2103_v23 }
  0xab   : > { %1470 = vmatprep.subr.bf16.mxu0 %v2108_v24 }
  0xae   : > { %1471 = vmatpush1.bf16.msra.mxu0 %v2106_v25 }
  0xaf   : > { %1472 = vmatprep.subr.bf16.mxu0 %v2111_v26 }
  0xb2   : > { %1473 = vmatpush1.bf16.msra.mxu0 %v2109_v27 }
  0xb3   : > { %1474 = vmatprep.subr.bf16.mxu0 %v2114_v28 }
  0xb6   : > { %1475 = vmatpush1.bf16.msra.mxu0 %v2112_v29 }
  0xb9   : > { %1493 = vmatmul.mubr.bf16.vlgmr.msra.gmra.mrb[8].mxu0 %v2115_v30 }
 0x12c   : > { %v1330_v31 = vpop.f32.mrb[0].mxu0 }
 0x12d   : > { %v1371_v32 = vpop.f32.mrb[0].mxu1  ;;  %v1332_v34 = vpop.f32.mrb[1].mxu0 }
 0x12e   : > { %v1372_v33 = vadd.f32 %v1371_v32, %v1330_v31  ;;  %v1373_v35 = vpop.f32.mrb[1].mxu1  ;;  %v1334_v37 = vpop.f32.mrb[2].mxu0 }
 0x12f   : > { %v1374_v36 = vadd.f32 %v1373_v35, %v1332_v34  ;;  %v1375_v38 = vpop.f32.mrb[2].mxu1  ;;  %v1335_v39 = vpop.f32.mrb[3].mxu0 }
 0x130   : > { %v1376_v40 = vpop.f32.mrb[3].mxu1 }
 0x16c   : > { %v1412_v41 = vpop.f32.mrb[4].mxu0 }
 0x16d   : > { %v1453_v42 = vpop.f32.mrb[4].mxu1  ;;  %v1413_v43 = vadd.f32 %v1412_v41, %v1372_v33  ;;  %v1414_v44 = vpop.f32.mrb[5].mxu0 }
 0x16e   : > { %v1455_v45 = vpop.f32.mrb[5].mxu1  ;;  %v1415_v46 = vadd.f32 %v1414_v44, %v1374_v36  ;;  %v1416_v47 = vpop.f32.mrb[6].mxu0 }
 0x16f   : > { %v1457_v48 = vpop.f32.mrb[6].mxu1  ;;  %v1454_v49 = vadd.f32 %v1453_v42, %v1413_v43  ;;  %v1417_v50 = vpop.f32.mrb[7].mxu0 }
 0x170   : > { %v1458_v51 = vpop.f32.mrb[7].mxu1  ;;  %v1456_v52 = vadd.f32 %v1455_v45, %v1415_v46 }
 0x18c   : > { %v1494_v54 = vpop.f32.mrb[8].mxu0  ;;  %1508 = sbr.rel (%p1859_p7) target bundleno = 417 (0x1a1), region = 48 }
 0x18d   : > { %v1495_v55 = vadd.f32 %v1494_v54, %v1454_v49  ;;  %v1496_v57 = vpop.f32.mrb[9].mxu0 }
 0x18e   : > { %v1497_v58 = vadd.f32 %v1496_v57, %v1456_v52  ;;  %v1498_v59 = vpop.f32.mrb[10].mxu0 }
 0x18f   : > { %v1501_v60 = vadd.f32 %v1495_v55, %v393_v53  ;;  %v1499_v61 = vpop.f32.mrb[11].mxu0 }
 0x190   : > { %v1502_v62 = vadd.f32 %v1497_v58, %v394_v56 }
 0x191   : > { %1503 = vst [vmem:[#allocation2] sm:$0xff] %v1501_v60 }
 0x192   : > { %1504 = vst [vmem:[#allocation2 + $0x8] sm:$0xff] %v1502_v62 }
 0x198   : > { %v1509_v5 = vld [vmem:[#allocation2] sm:$0xff] }
 0x199   : > { %v1510_v6 = vld [vmem:[#allocation2 + $0x8] sm:$0xff]  ;;  %v1523_v11 = vmul.f32 %v1516_v7, %v1509_v5 }
 0x19a   : > { %v1524_v12 = vmul.f32 %v1520_v9, %v1510_v6 }
 0x19b   : > { %v1537_v15 = vadd.f32 %v1530_v8, %v1523_v11 }
 0x19c   : > { %v1538_v16 = vadd.f32 %v1534_v10, %v1524_v12 }
 0x19d   : > { %v1541_v17 = vadd.f32 %v1539_v13, %v1537_v15 }
 0x19e   : > { %v1542_v18 = vadd.f32 %v1540_v14, %v1538_v16 }
 0x19f   : > { %1543 = vst [vmem:[%s2399_s5] sm:$0xff] %v1541_v17 }
 0x1a0   : > { %1544 = vst [vmem:[%s2399_s5 + $0x8] sm:$0xff] %v1542_v18 }
 0x1a1 PF: > { %s15_s20 = sadd.s32 1, %s2138_s20   ;;  %s2400_s18 = smov %s2134_s19 }
 0x1a2   : > { %p12_p8 = scmp.ge.s32.totalorder %s15_s20, 4   ;;  %s2401_s19 = smov %s2403_s21 }
 0x1a4   :  { %14 = sbr.rel (!%p12_p8) target bundleno = 2 (0x2), region = 90 }

// kernel: iresnet_forward_pallas.30
= control target key start
LH: loop header
LB: loop body
LE: loop exit
PB: predicated region body
PF: predicated region fallthrough
CT: control target
= control target key end

     0   :  { %s2160_s18 = smov 0   ;;  %s2162_s19 = smov 0   ;;  %s2379_s0 = inlined_call_operand.vmem [shape: bf16[8,2304], index: 0, kind: input, shape index: {}]   ;;  %s2380_s1 = inlined_call_operand.vmem [shape: bf16[2304,256], index: 1, kind: input, shape index: {}]   ;;  %s2381_s2 = inlined_call_operand.vmem [shape: f32[1,256], index: 2, kind: input, shape index: {}]   ;;  %s2382_s3 = inlined_call_operand.vmem [shape: f32[1,256], index: 3, kind: input, shape index: {}]   ;;  %s2383_s4 = inlined_call_operand.vmem [shape: f32[1,256], index: 4, kind: input, shape index: {}]   ;;  %s2384_s5 = inlined_call_operand.vmem [shape: f32[8,256], index: 5, kind: output, shape index: {}]  }
   0x1   :  { %s2164_s20 = smov 0  }
   0x2 LB: > { %s27_s21 = sadd.s32 1, %s2122_s19  ;;  %p1689_p0 = scmp.ge.s32.totalorder %s2126_s20, 1  ;;  %s2126_s20 = sphi %s2164_s20, %s15_s20   ;;  %s2122_s19 = sphi %s2162_s19, %s2386_s19   ;;  %s2118_s18 = sphi %s2160_s18, %s2385_s18  }
   0x3   : > { %p28_p1 = scmp.ge.s32.totalorder %s27_s21, 2  ;;  %p264_p2 = scmp.lt.s32.totalorder %s2126_s20, 3 }
   0x5   : > { %s2388_s21 = smov (%p28_p1, %s27_s21), 0  ;;  %p265_p3 = pnand %p1689_p0, %p264_p2 }
   0x6   : > { %s322_s22 = smul.u32 (!%p265_p3), 9, %s2118_s18  ;;  %p1693_p6 = scmp.ne.s32.totalorder (!%p265_p3), %s2118_s18, 0 }
   0x7   : > { %268 = sbr.rel (%p265_p3) target bundleno = 418 (0x1a2), region = 40 }
   0x8   : > { %s332_s23 = smul.u32 (!%p265_p3), 144, %s2118_s18  ;;  %p325_p4 = scmp.lt.s32.totalorder (!%p265_p3), %s322_s22, 17 }
   0xa   : > { %p334_p5 = scmp.lt.s32.totalorder (!%p265_p3), %s332_s23, 287 }
   0xe   : > { %s2390_s22 = smov (!%p325_p4, %s322_s22), 17  ;;  %s2392_s23 = smov (!%p334_p5, %s332_s23), 287 }
   0xf   : > { %s1690_s24 = sshll.u32 %s2390_s22, 2  ;;  %s1852_s28 = sshll.u32 %s2392_s23, 3  ;;  %v2128_v0 = vmov (!%p1693_p6), 0.0  }
  0x10   : > { %s2185_s27 = scalar_lea.vmem %s2379_s0, %s1690_s24  ;;  %s2190_s6 = scalar_lea.vmem %s2380_s1, %s1852_s28  ;;  %374 = vst [vmem:[#allocation2] sm:$0xff] (!%p1693_p6), %v2128_v0  ;;  %375 = vst [vmem:[#allocation2 + $0x8] sm:$0xff] (!%p1693_p6), %v2128_v0 }
  0x11   : > { %373 = sbr.rel (%p1693_p6) target bundleno = 24 (0x18), region = 44 }
  0x18 PF: > { %v1879_v1 = vld [vmem:[%s2190_s6 + $0x4] ss:$8 sps:$4 sm:$0xff]   ;;  %v1883_v3 = vld [vmem:[%s2190_s6] ss:$8 sps:$4 sm:$0xff]   ;;  %v1885_v5 = vld [vmem:[%s2190_s6 + $0x14] ss:$8 sps:$4 sm:$0xff]  }
  0x19   : > { %v1881_v2 = vld [vmem:[%s2190_s6 + $0x104] ss:$8 sps:$4 sm:$0xff]   ;;  %1279 = vmatprep.subr.bf16.mxu0 %v1879_v1  ;;  %v1884_v4 = vld [vmem:[%s2190_s6 + $0x100] ss:$8 sps:$4 sm:$0xff]   ;;  %v1887_v6 = vld [vmem:[%s2190_s6 + $0x114] ss:$8 sps:$4 sm:$0xff]  }
  0x1a   : > { %1320 = vmatprep.subr.bf16.mxu1 %v1881_v2  ;;  %1280 = vmatpush1.bf16.msra.mxu0 %v1883_v3  ;;  %v1889_v7 = vld [vmem:[%s2190_s6 + $0x10] ss:$8 sps:$4 sm:$0xff]   ;;  %v1891_v9 = vld [vmem:[%s2190_s6 + $0x24] ss:$8 sps:$4 sm:$0xff]   ;;  %v1895_v11 = vld [vmem:[%s2190_s6 + $0x20] ss:$8 sps:$4 sm:$0xff]  }
  0x1b   : > { %1321 = vmatpush1.bf16.msra.mxu1 %v1884_v4  ;;  %1281 = vmatprep.subr.bf16.mxu0 %v1885_v5  ;;  %v1890_v8 = vld [vmem:[%s2190_s6 + $0x110] ss:$8 sps:$4 sm:$0xff]   ;;  %v1893_v10 = vld [vmem:[%s2190_s6 + $0x124] ss:$8 sps:$4 sm:$0xff]   ;;  %v1896_v12 = vld [vmem:[%s2190_s6 + $0x120] ss:$8 sps:$4 sm:$0xff]  }
  0x1c   : > { %1322 = vmatprep.subr.bf16.mxu1 %v1887_v6  ;;  %v1897_v13 = vld [vmem:[%s2190_s6 + $0x34] ss:$8 sps:$4 sm:$0xff]   ;;  %v1901_v15 = vld [vmem:[%s2190_s6 + $0x30] ss:$8 sps:$4 sm:$0xff]   ;;  %v1903_v17 = vld [vmem:[%s2190_s6 + $0x44] ss:$8 sps:$4 sm:$0xff]  }
  0x1d   : > { %v1899_v14 = vld [vmem:[%s2190_s6 + $0x134] ss:$8 sps:$4 sm:$0xff]   ;;  %v1902_v16 = vld [vmem:[%s2190_s6 + $0x130] ss:$8 sps:$4 sm:$0xff]   ;;  %v1905_v18 = vld [vmem:[%s2190_s6 + $0x144] ss:$8 sps:$4 sm:$0xff]  }
  0x1e   : > { %1282 = vmatpush1.bf16.msra.mxu0 %v1889_v7  ;;  %v1907_v19 = vld [vmem:[%s2190_s6 + $0x40] ss:$8 sps:$4 sm:$0xff]   ;;  %v1909_v21 = vld [vmem:[%s2190_s6 + $0x54] ss:$8 sps:$4 sm:$0xff]   ;;  %v1913_v23 = vld [vmem:[%s2190_s6 + $0x50] ss:$8 sps:$4 sm:$0xff]  }
  0x1f   : > { %1323 = vmatpush1.bf16.msra.mxu1 %v1890_v8  ;;  %1283 = vmatprep.subr.bf16.mxu0 %v1891_v9  ;;  %v1908_v20 = vld [vmem:[%s2190_s6 + $0x140] ss:$8 sps:$4 sm:$0xff]   ;;  %v1911_v22 = vld [vmem:[%s2190_s6 + $0x154] ss:$8 sps:$4 sm:$0xff]   ;;  %v1914_v24 = vld [vmem:[%s2190_s6 + $0x150] ss:$8 sps:$4 sm:$0xff]  }
  0x20   : > { %1324 = vmatprep.subr.bf16.mxu1 %v1893_v10  ;;  %v1915_v25 = vld [vmem:[%s2190_s6 + $0x64] ss:$8 sps:$4 sm:$0xff]   ;;  %v1919_v27 = vld [vmem:[%s2190_s6 + $0x60] ss:$8 sps:$4 sm:$0xff]   ;;  %v1921_v29 = vld [vmem:[%s2190_s6 + $0x74] ss:$8 sps:$4 sm:$0xff]  }
  0x21   : > { %v1917_v26 = vld [vmem:[%s2190_s6 + $0x164] ss:$8 sps:$4 sm:$0xff]   ;;  %v1920_v28 = vld [vmem:[%s2190_s6 + $0x160] ss:$8 sps:$4 sm:$0xff]   ;;  %v1923_v30 = vld [vmem:[%s2190_s6 + $0x174] ss:$8 sps:$4 sm:$0xff]  }
  0x22   : > { %1284 = vmatpush1.bf16.msra.mxu0 %v1895_v11  ;;  %v1925_v31 = vld [vmem:[%s2190_s6 + $0x70] ss:$8 sps:$4 sm:$0xff]   ;;  %v1927_v33 = vld [vmem:[%s2190_s6 + $0x84] ss:$8 sps:$4 sm:$0xff]   ;;  %v1931_v35 = vld [vmem:[%s2190_s6 + $0x80] ss:$8 sps:$4 sm:$0xff]  }
  0x23   : > { %1325 = vmatpush1.bf16.msra.mxu1 %v1896_v12  ;;  %1285 = vmatprep.subr.bf16.mxu0 %v1897_v13  ;;  %v1926_v32 = vld [vmem:[%s2190_s6 + $0x170] ss:$8 sps:$4 sm:$0xff]   ;;  %v1929_v34 = vld [vmem:[%s2190_s6 + $0x184] ss:$8 sps:$4 sm:$0xff]   ;;  %v1932_v36 = vld [vmem:[%s2190_s6 + $0x180] ss:$8 sps:$4 sm:$0xff]  }
  0x24   : > { %1326 = vmatprep.subr.bf16.mxu1 %v1899_v14  ;;  %v1933_v37 = vld [vmem:[%s2190_s6 + $0x94] ss:$8 sps:$4 sm:$0xff]   ;;  %v1937_v39 = vld [vmem:[%s2190_s6 + $0x90] ss:$8 sps:$4 sm:$0xff]   ;;  %v1939_v41 = vld [vmem:[%s2190_s6 + $0xa4] ss:$8 sps:$4 sm:$0xff]  }
  0x25   : > { %v1935_v38 = vld [vmem:[%s2190_s6 + $0x194] ss:$8 sps:$4 sm:$0xff]   ;;  %v1938_v40 = vld [vmem:[%s2190_s6 + $0x190] ss:$8 sps:$4 sm:$0xff]   ;;  %v1941_v42 = vld [vmem:[%s2190_s6 + $0x1a4] ss:$8 sps:$4 sm:$0xff]  }
  0x26   : > { %1286 = vmatpush1.bf16.msra.mxu0 %v1901_v15  ;;  %v1943_v43 = vld [vmem:[%s2190_s6 + $0xa0] ss:$8 sps:$4 sm:$0xff]   ;;  %v1945_v45 = vld [vmem:[%s2190_s6 + $0xb4] ss:$8 sps:$4 sm:$0xff]   ;;  %v1949_v50 = vld [vmem:[%s2190_s6 + $0xb0] ss:$8 sps:$4 sm:$0xff]  }
  0x27   : > { %1327 = vmatpush1.bf16.msra.mxu1 %v1902_v16  ;;  %1287 = vmatprep.subr.bf16.mxu0 %v1903_v17  ;;  %v1944_v44 = vld [vmem:[%s2190_s6 + $0x1a0] ss:$8 sps:$4 sm:$0xff]   ;;  %v1947_v46 = vld [vmem:[%s2190_s6 + $0x1b4] ss:$8 sps:$4 sm:$0xff]   ;;  %v1950_v51 = vld [vmem:[%s2190_s6 + $0x1b0] ss:$8 sps:$4 sm:$0xff]  }
  0x28   : > { %1328 = vmatprep.subr.bf16.mxu1 %v1905_v18  ;;  %v378_v47 = vld [vmem:[%s2185_s27] sm:$0xff]  ;;  %v379_v49 = vld [vmem:[%s2185_s27 + $0x8] sm:$0xff]  ;;  %v1957_v57 = vld [vmem:[%s2190_s6 + $0xd4] ss:$8 sps:$4 sm:$0xff]   ;;  %p1847_p7 = scmp.ne.s32.totalorder %s2118_s18, 1 }
  0x29   : > { %v1695_v48 = vcombine.high %v378_v47, %v378_v47  ;;  %v1697_v52 = vcombine.high %v379_v49, %v379_v49  ;;  %v1951_v53 = vld [vmem:[%s2190_s6 + $0xc4] ss:$8 sps:$4 sm:$0xff]   ;;  %v1955_v55 = vld [vmem:[%s2190_s6 + $0xc0] ss:$8 sps:$4 sm:$0xff]   ;;  %v1959_v58 = vld [vmem:[%s2190_s6 + $0x1d4] ss:$8 sps:$4 sm:$0xff]   ;;  %v1694_v7 = vcombine.low %v378_v47, %v378_v47  ;;  %v1696_v8 = vcombine.low %v379_v49, %v379_v49 }
  0x2a   : > { %1288 = vmatpush1.bf16.msra.mxu0 %v1907_v19  ;;  %v1953_v54 = vld [vmem:[%s2190_s6 + $0x1c4] ss:$8 sps:$4 sm:$0xff]   ;;  %v1956_v56 = vld [vmem:[%s2190_s6 + $0x1c0] ss:$8 sps:$4 sm:$0xff]   ;;  %v1961_v59 = vld [vmem:[%s2190_s6 + $0xd0] ss:$8 sps:$4 sm:$0xff]  }
  0x2b   : > { %1329 = vmatpush1.bf16.msra.mxu1 %v1908_v20  ;;  %1289 = vmatprep.subr.bf16.mxu0 %v1909_v21  ;;  %v1962_v60 = vld [vmem:[%s2190_s6 + $0x1d0] ss:$8 sps:$4 sm:$0xff]   ;;  %v1963_v61 = vld [vmem:[%s2190_s6 + $0xe4] ss:$8 sps:$4 sm:$0xff]   ;;  %v1967_v63 = vld [vmem:[%s2190_s6 + $0xe0] ss:$8 sps:$4 sm:$0xff]  }
  0x2c   : > { %1330 = vmatprep.subr.bf16.mxu1 %v1911_v22  ;;  %1311 = vmatprep.mubr.bf16.mxu0 %v1695_v48  ;;  %v1965_v62 = vld [vmem:[%s2190_s6 + $0x1e4] ss:$8 sps:$4 sm:$0xff]   ;;  %v1968_v0 = vld [vmem:[%s2190_s6 + $0x1e0] ss:$8 sps:$4 sm:$0xff]   ;;  %v1969_v1 = vld [vmem:[%s2190_s6 + $0xf4] ss:$8 sps:$4 sm:$0xff]  }
  0x2d   : > { %1352 = vmatprep.mubr.bf16.mxu1 %v1697_v52  ;;  %v1971_v2 = vld [vmem:[%s2190_s6 + $0x1f4] ss:$8 sps:$4 sm:$0xff]   ;;  %v1973_v3 = vld [vmem:[%s2190_s6 + $0xf0] ss:$8 sps:$4 sm:$0xff]   ;;  %v1981_v5 = vld [vmem:[%s2190_s6 + $0x204] ss:$8 sps:$4 sm:$0xff]  }
  0x2e   : > { %1290 = vmatpush1.bf16.msra.mxu0 %v1913_v23  ;;  %v1974_v4 = vld [vmem:[%s2190_s6 + $0x1f0] ss:$8 sps:$4 sm:$0xff]   ;;  %v1984_v6 = vld [vmem:[%s2190_s6 + $0x304] ss:$8 sps:$4 sm:$0xff]   ;;  %v1979_v9 = vld [vmem:[%s2190_s6 + $0x200] ss:$8 sps:$4 sm:$0xff]  }
  0x2f   : > { %1331 = vmatpush1.bf16.msra.mxu1 %v1914_v24  ;;  %1291 = vmatprep.subr.bf16.mxu0 %v1915_v25  ;;  %v1982_v10 = vld [vmem:[%s2190_s6 + $0x300] ss:$8 sps:$4 sm:$0xff]   ;;  %v1987_v11 = vld [vmem:[%s2190_s6 + $0x214] ss:$8 sps:$4 sm:$0xff]   ;;  %v1985_v13 = vld [vmem:[%s2190_s6 + $0x210] ss:$8 sps:$4 sm:$0xff]  }
  0x30   : > { %1332 = vmatprep.subr.bf16.mxu1 %v1917_v26  ;;  %v1990_v12 = vld [vmem:[%s2190_s6 + $0x314] ss:$8 sps:$4 sm:$0xff]   ;;  %v1988_v14 = vld [vmem:[%s2190_s6 + $0x310] ss:$8 sps:$4 sm:$0xff]   ;;  %v1993_v15 = vld [vmem:[%s2190_s6 + $0x224] ss:$8 sps:$4 sm:$0xff]  }
  0x31   : > { %v1996_v16 = vld [vmem:[%s2190_s6 + $0x324] ss:$8 sps:$4 sm:$0xff]   ;;  %v1991_v17 = vld [vmem:[%s2190_s6 + $0x220] ss:$8 sps:$4 sm:$0xff]   ;;  %v1999_v19 = vld [vmem:[%s2190_s6 + $0x234] ss:$8 sps:$4 sm:$0xff]  }
  0x32   : > { %1292 = vmatpush1.bf16.msra.mxu0 %v1919_v27  ;;  %v1994_v18 = vld [vmem:[%s2190_s6 + $0x320] ss:$8 sps:$4 sm:$0xff]   ;;  %v2002_v20 = vld [vmem:[%s2190_s6 + $0x334] ss:$8 sps:$4 sm:$0xff]   ;;  %v1997_v21 = vld [vmem:[%s2190_s6 + $0x230] ss:$8 sps:$4 sm:$0xff]  }
  0x33   : > { %1333 = vmatpush1.bf16.msra.mxu1 %v1920_v28  ;;  %1293 = vmatprep.subr.bf16.mxu0 %v1921_v29  ;;  %v2000_v22 = vld [vmem:[%s2190_s6 + $0x330] ss:$8 sps:$4 sm:$0xff]   ;;  %v2005_v23 = vld [vmem:[%s2190_s6 + $0x244] ss:$8 sps:$4 sm:$0xff]   ;;  %v2003_v25 = vld [vmem:[%s2190_s6 + $0x240] ss:$8 sps:$4 sm:$0xff]  }
  0x34   : > { %1334 = vmatprep.subr.bf16.mxu1 %v1923_v30  ;;  %v2008_v24 = vld [vmem:[%s2190_s6 + $0x344] ss:$8 sps:$4 sm:$0xff]   ;;  %v2006_v26 = vld [vmem:[%s2190_s6 + $0x340] ss:$8 sps:$4 sm:$0xff]   ;;  %v2011_v27 = vld [vmem:[%s2190_s6 + $0x254] ss:$8 sps:$4 sm:$0xff]  }
  0x35   : > { %v2014_v28 = vld [vmem:[%s2190_s6 + $0x354] ss:$8 sps:$4 sm:$0xff]   ;;  %v2009_v29 = vld [vmem:[%s2190_s6 + $0x250] ss:$8 sps:$4 sm:$0xff]   ;;  %v2044_v52 = vld [vmem:[%s2190_s6 + $0x3a4] ss:$8 sps:$4 sm:$0xff]  }
  0x36   : > { %1294 = vmatpush1.bf16.msra.mxu0 %v1925_v31  ;;  %v2012_v30 = vld [vmem:[%s2190_s6 + $0x350] ss:$8 sps:$4 sm:$0xff]   ;;  %v2017_v31 = vld [vmem:[%s2190_s6 + $0x264] ss:$8 sps:$4 sm:$0xff]   ;;  %v2035_v47 = vld [vmem:[%s2190_s6 + $0x294] ss:$8 sps:$4 sm:$0xff]  }
  0x37   : > { %1335 = vmatpush1.bf16.msra.mxu1 %v1926_v32  ;;  %1295 = vmatprep.subr.bf16.mxu0 %v1927_v33  ;;  %v2020_v32 = vld [vmem:[%s2190_s6 + $0x364] ss:$8 sps:$4 sm:$0xff]   ;;  %v2286_v33 = vld [vmem:[%s2185_s27 + $0x10] sm:$0xff] }
  0x38   : > { %1336 = vmatprep.subr.bf16.mxu1 %v1929_v34  ;;  %v2015_v34 = vld [vmem:[%s2190_s6 + $0x260] ss:$8 sps:$4 sm:$0xff]   ;;  %v2038_v48 = vld [vmem:[%s2190_s6 + $0x394] ss:$8 sps:$4 sm:$0xff]   ;;  %v2033_v49 = vld [vmem:[%s2190_s6 + $0x290] ss:$8 sps:$4 sm:$0xff]  }
  0x3a   : > { %1296 = vmatpush1.bf16.msra.mxu0 %v1931_v35  ;;  %v2018_v35 = vld [vmem:[%s2190_s6 + $0x360] ss:$8 sps:$4 sm:$0xff]  }
  0x3b   : > { %1337 = vmatpush1.bf16.msra.mxu1 %v1932_v36  ;;  %1297 = vmatprep.subr.bf16.mxu0 %v1933_v37  ;;  %v1699_v36 = vcombine.high %v2286_v33, %v2286_v33  ;;  %v2293_v37 = vld [vmem:[%s2185_s27 + $0x18] sm:$0xff] }
  0x3c   : > { %1338 = vmatprep.subr.bf16.mxu1 %v1935_v38  ;;  %v2023_v38 = vld [vmem:[%s2190_s6 + $0x274] ss:$8 sps:$4 sm:$0xff]  }
  0x3e   : > { %1298 = vmatpush1.bf16.msra.mxu0 %v1937_v39  ;;  %v1701_v39 = vcombine.high %v2293_v37, %v2293_v37 }
  0x3f   : > { %1339 = vmatpush1.bf16.msra.mxu1 %v1938_v40  ;;  %1299 = vmatprep.subr.bf16.mxu0 %v1939_v41  ;;  %v2026_v40 = vld [vmem:[%s2190_s6 + $0x374] ss:$8 sps:$4 sm:$0xff]   ;;  %v2021_v41 = vld [vmem:[%s2190_s6 + $0x270] ss:$8 sps:$4 sm:$0xff]  }
  0x40   : > { %1340 = vmatprep.subr.bf16.mxu1 %v1941_v42  ;;  %v2024_v42 = vld [vmem:[%s2190_s6 + $0x370] ss:$8 sps:$4 sm:$0xff]  }
  0x42   : > { %1300 = vmatpush1.bf16.msra.mxu0 %v1943_v43  ;;  %v2029_v43 = vld [vmem:[%s2190_s6 + $0x284] ss:$8 sps:$4 sm:$0xff]  }
  0x43   : > { %1341 = vmatpush1.bf16.msra.mxu1 %v1944_v44  ;;  %1301 = vmatprep.subr.bf16.mxu0 %v1945_v45  ;;  %v2032_v44 = vld [vmem:[%s2190_s6 + $0x384] ss:$8 sps:$4 sm:$0xff]   ;;  %v2027_v45 = vld [vmem:[%s2190_s6 + $0x280] ss:$8 sps:$4 sm:$0xff]  }
  0x44   : > { %1342 = vmatprep.subr.bf16.mxu1 %v1947_v46  ;;  %v2030_v46 = vld [vmem:[%s2190_s6 + $0x380] ss:$8 sps:$4 sm:$0xff]  }
  0x46   : > { %1302 = vmatpush1.bf16.msra.mxu0 %v1949_v50  ;;  %v2036_v50 = vld [vmem:[%s2190_s6 + $0x390] ss:$8 sps:$4 sm:$0xff]  }
  0x47   : > { %1343 = vmatpush1.bf16.msra.mxu1 %v1950_v51  ;;  %1303 = vmatprep.subr.bf16.mxu0 %v1951_v53  ;;  %v2041_v51 = vld [vmem:[%s2190_s6 + $0x2a4] ss:$8 sps:$4 sm:$0xff]   ;;  %v2039_v53 = vld [vmem:[%s2190_s6 + $0x2a0] ss:$8 sps:$4 sm:$0xff]  }
  0x48   : > { %1344 = vmatprep.subr.bf16.mxu1 %v1953_v54  ;;  %v2042_v54 = vld [vmem:[%s2190_s6 + $0x3a0] ss:$8 sps:$4 sm:$0xff]  }
  0x4a   : > { %1304 = vmatpush1.bf16.msra.mxu0 %v1955_v55  ;;  %v2047_v55 = vld [vmem:[%s2190_s6 + $0x2b4] ss:$8 sps:$4 sm:$0xff]  }
  0x4b   : > { %1345 = vmatpush1.bf16.msra.mxu1 %v1956_v56  ;;  %1305 = vmatprep.subr.bf16.mxu0 %v1957_v57  ;;  %v2050_v56 = vld [vmem:[%s2190_s6 + $0x3b4] ss:$8 sps:$4 sm:$0xff]   ;;  %v2045_v57 = vld [vmem:[%s2190_s6 + $0x2b0] ss:$8 sps:$4 sm:$0xff]  }
  0x4c   : > { %1346 = vmatprep.subr.bf16.mxu1 %v1959_v58  ;;  %v2048_v58 = vld [vmem:[%s2190_s6 + $0x3b0] ss:$8 sps:$4 sm:$0xff]  }
  0x4e   : > { %1306 = vmatpush1.bf16.msra.mxu0 %v1961_v59  ;;  %v2053_v59 = vld [vmem:[%s2190_s6 + $0x2c4] ss:$8 sps:$4 sm:$0xff]  }
  0x4f   : > { %1347 = vmatpush1.bf16.msra.mxu1 %v1962_v60  ;;  %1307 = vmatprep.subr.bf16.mxu0 %v1963_v61  ;;  %v2056_v60 = vld [vmem:[%s2190_s6 + $0x3c4] ss:$8 sps:$4 sm:$0xff]   ;;  %v2051_v61 = vld [vmem:[%s2190_s6 + $0x2c0] ss:$8 sps:$4 sm:$0xff]  }
  0x50   : > { %1348 = vmatprep.subr.bf16.mxu1 %v1965_v62  ;;  %v2054_v62 = vld [vmem:[%s2190_s6 + $0x3c0] ss:$8 sps:$4 sm:$0xff]  }
  0x52   : > { %1308 = vmatpush1.bf16.msra.mxu0 %v1967_v63  ;;  %v2059_v63 = vld [vmem:[%s2190_s6 + $0x2d4] ss:$8 sps:$4 sm:$0xff]  }
  0x53   : > { %1349 = vmatpush1.bf16.msra.mxu1 %v1968_v0  ;;  %1309 = vmatprep.subr.bf16.mxu0 %v1969_v1  ;;  %v2062_v0 = vld [vmem:[%s2190_s6 + $0x3d4] ss:$8 sps:$4 sm:$0xff]   ;;  %v2057_v1 = vld [vmem:[%s2190_s6 + $0x2d0] ss:$8 sps:$4 sm:$0xff]  }
  0x54   : > { %1350 = vmatprep.subr.bf16.mxu1 %v1971_v2  ;;  %v2060_v2 = vld [vmem:[%s2190_s6 + $0x3d0] ss:$8 sps:$4 sm:$0xff]  }
  0x56   : > { %1310 = vmatpush1.bf16.msra.mxu0 %v1973_v3  ;;  %v2065_v3 = vld [vmem:[%s2190_s6 + $0x2e4] ss:$8 sps:$4 sm:$0xff]  }
  0x57   : > { %1351 = vmatpush1.bf16.msra.mxu1 %v1974_v4  ;;  %1361 = vmatprep.subr.bf16.mxu0 %v1981_v5  ;;  %v2068_v4 = vld [vmem:[%s2190_s6 + $0x3e4] ss:$8 sps:$4 sm:$0xff]   ;;  %v2063_v5 = vld [vmem:[%s2190_s6 + $0x2e0] ss:$8 sps:$4 sm:$0xff]  }
  0x58   : > { %1402 = vmatprep.subr.bf16.mxu1 %v1984_v6  ;;  %v2066_v6 = vld [vmem:[%s2190_s6 + $0x3e0] ss:$8 sps:$4 sm:$0xff]  }
  0x59   : > { %1312 = vmatmul.mubr.bf16.vlgmr.msra.gmra.mrb[0].mxu0 %v1694_v7  ;;  %v2071_v7 = vld [vmem:[%s2190_s6 + $0x2f4] ss:$8 sps:$4 sm:$0xff]  }
  0x5a   : > { %1353 = vmatmul.mubr.bf16.vlgmr.msra.gmra.mrb[0].mxu1 %v1696_v8  ;;  %1362 = vmatpush1.bf16.msra.mxu0 %v1979_v9  ;;  %v2074_v8 = vld [vmem:[%s2190_s6 + $0x3f4] ss:$8 sps:$4 sm:$0xff]   ;;  %v2069_v9 = vld [vmem:[%s2190_s6 + $0x2f0] ss:$8 sps:$4 sm:$0xff]  }
  0x5b   : > { %1403 = vmatpush1.bf16.msra.mxu1 %v1982_v10  ;;  %1363 = vmatprep.subr.bf16.mxu0 %v1987_v11  ;;  %v2072_v10 = vld [vmem:[%s2190_s6 + $0x3f0] ss:$8 sps:$4 sm:$0xff]   ;;  %v2079_v11 = vld [vmem:[%s2190_s6 + $0x404] ss:$8 sps:$4 sm:$0xff]  }
  0x5c   : > { %1404 = vmatprep.subr.bf16.mxu1 %v1990_v12  ;;  %1393 = vmatprep.mubr.bf16.mxu0 %v1699_v36  ;;  %v1698_v12 = vcombine.low %v2286_v33, %v2286_v33 }
  0x5d   : > { %1434 = vmatprep.mubr.bf16.mxu1 %v1701_v39 }
  0x5e   : > { %1364 = vmatpush1.bf16.msra.mxu0 %v1985_v13  ;;  %v1700_v13 = vcombine.low %v2293_v37, %v2293_v37 }
  0x5f   : > { %1405 = vmatpush1.bf16.msra.mxu1 %v1988_v14  ;;  %1365 = vmatprep.subr.bf16.mxu0 %v1993_v15  ;;  %v2077_v14 = vld [vmem:[%s2190_s6 + $0x400] ss:$8 sps:$4 sm:$0xff]   ;;  %v2084_v15 = vld [vmem:[%s2190_s6 + $0x414] ss:$8 sps:$4 sm:$0xff]  }
  0x60   : > { %1406 = vmatprep.subr.bf16.mxu1 %v1996_v16  ;;  %v2082_v16 = vld [vmem:[%s2190_s6 + $0x410] ss:$8 sps:$4 sm:$0xff]  }
  0x62   : > { %1366 = vmatpush1.bf16.msra.mxu0 %v1991_v17  ;;  %v2129_v17 = vmov 0  }
  0x63   : > { %1407 = vmatpush1.bf16.msra.mxu1 %v1994_v18  ;;  %1367 = vmatprep.subr.bf16.mxu0 %v1999_v19  ;;  %v2087_v18 = vld [vmem:[%s2190_s6 + $0x424] ss:$8 sps:$4 sm:$0xff]   ;;  %v2085_v19 = vld [vmem:[%s2190_s6 + $0x420] ss:$8 sps:$4 sm:$0xff]  }
  0x64   : > { %1408 = vmatprep.subr.bf16.mxu1 %v2002_v20  ;;  %v2090_v20 = vld [vmem:[%s2190_s6 + $0x434] ss:$8 sps:$4 sm:$0xff]  }
  0x66   : > { %1368 = vmatpush1.bf16.msra.mxu0 %v1997_v21  ;;  %v2088_v21 = vld [vmem:[%s2190_s6 + $0x430] ss:$8 sps:$4 sm:$0xff]  }
  0x67   : > { %1409 = vmatpush1.bf16.msra.mxu1 %v2000_v22  ;;  %1369 = vmatprep.subr.bf16.mxu0 %v2005_v23  ;;  %v2093_v22 = vld [vmem:[%s2190_s6 + $0x444] ss:$8 sps:$4 sm:$0xff]   ;;  %v2091_v23 = vld [vmem:[%s2190_s6 + $0x440] ss:$8 sps:$4 sm:$0xff]  }
  0x68   : > { %1410 = vmatprep.subr.bf16.mxu1 %v2008_v24  ;;  %v2096_v24 = vld [vmem:[%s2190_s6 + $0x454] ss:$8 sps:$4 sm:$0xff]  }
  0x6a   : > { %1370 = vmatpush1.bf16.msra.mxu0 %v2003_v25  ;;  %v2094_v25 = vld [vmem:[%s2190_s6 + $0x450] ss:$8 sps:$4 sm:$0xff]  }
  0x6b   : > { %1411 = vmatpush1.bf16.msra.mxu1 %v2006_v26  ;;  %1371 = vmatprep.subr.bf16.mxu0 %v2011_v27  ;;  %v2099_v26 = vld [vmem:[%s2190_s6 + $0x464] ss:$8 sps:$4 sm:$0xff]   ;;  %v2097_v27 = vld [vmem:[%s2190_s6 + $0x460] ss:$8 sps:$4 sm:$0xff]  }
  0x6c   : > { %1412 = vmatprep.subr.bf16.mxu1 %v2014_v28  ;;  %v2102_v28 = vld [vmem:[%s2190_s6 + $0x474] ss:$8 sps:$4 sm:$0xff]  }
  0x6e   : > { %1372 = vmatpush1.bf16.msra.mxu0 %v2009_v29  ;;  %v2100_v29 = vld [vmem:[%s2190_s6 + $0x470] ss:$8 sps:$4 sm:$0xff]  }
  0x6f   : > { %1413 = vmatpush1.bf16.msra.mxu1 %v2012_v30  ;;  %1373 = vmatprep.subr.bf16.mxu0 %v2017_v31  ;;  %v2103_v30 = vld [vmem:[%s2185_s27 + $0x20] ss:$0 sps:$4 sm:$0xff]  }
  0x70   : > { %1414 = vmatprep.subr.bf16.mxu1 %v2020_v32 }
  0x72   : > { %1374 = vmatpush1.bf16.msra.mxu0 %v2015_v34 }
  0x73   : > { %1415 = vmatpush1.bf16.msra.mxu1 %v2018_v35  ;;  %1375 = vmatprep.subr.bf16.mxu0 %v2023_v38 }
  0x74   : > { %1416 = vmatprep.subr.bf16.mxu1 %v2026_v40 }
  0x76   : > { %1376 = vmatpush1.bf16.msra.mxu0 %v2021_v41 }
  0x77   : > { %1417 = vmatpush1.bf16.msra.mxu1 %v2024_v42  ;;  %1377 = vmatprep.subr.bf16.mxu0 %v2029_v43 }
  0x78   : > { %1418 = vmatprep.subr.bf16.mxu1 %v2032_v44 }
  0x7a   : > { %1378 = vmatpush1.bf16.msra.mxu0 %v2027_v45 }
  0x7b   : > { %1419 = vmatpush1.bf16.msra.mxu1 %v2030_v46  ;;  %1379 = vmatprep.subr.bf16.mxu0 %v2035_v47 }
  0x7c   : > { %1420 = vmatprep.subr.bf16.mxu1 %v2038_v48 }
  0x7e   : > { %1380 = vmatpush1.bf16.msra.mxu0 %v2033_v49 }
  0x7f   : > { %1421 = vmatpush1.bf16.msra.mxu1 %v2036_v50  ;;  %1381 = vmatprep.subr.bf16.mxu0 %v2041_v51 }
  0x80   : > { %1422 = vmatprep.subr.bf16.mxu1 %v2044_v52 }
  0x82   : > { %1382 = vmatpush1.bf16.msra.mxu0 %v2039_v53  ;;  %v376_v53 = vld [vmem:[#allocation2] sm:$0xff] }
  0x83   : > { %1423 = vmatpush1.bf16.msra.mxu1 %v2042_v54  ;;  %1383 = vmatprep.subr.bf16.mxu0 %v2047_v55 }
  0x84   : > { %1424 = vmatprep.subr.bf16.mxu1 %v2050_v56  ;;  %v377_v56 = vld [vmem:[#allocation2 + $0x8] sm:$0xff] }
  0x86   : > { %1384 = vmatpush1.bf16.msra.mxu0 %v2045_v57 }
  0x87   : > { %1425 = vmatpush1.bf16.msra.mxu1 %v2048_v58  ;;  %1385 = vmatprep.subr.bf16.mxu0 %v2053_v59 }
  0x88   : > { %1426 = vmatprep.subr.bf16.mxu1 %v2056_v60 }
  0x8a   : > { %1386 = vmatpush1.bf16.msra.mxu0 %v2051_v61 }
  0x8b   : > { %1427 = vmatpush1.bf16.msra.mxu1 %v2054_v62  ;;  %1387 = vmatprep.subr.bf16.mxu0 %v2059_v63  ;;  %v1496_v63 = vlaneseq (!%p1847_p7) }
  0x8c   : > { %1428 = vmatprep.subr.bf16.mxu1 %v2062_v0 }
  0x8d   : > { %v1497_v0 = vshrl.u32 (!%p1847_p7), %v1496_v63, 7 }
  0x8e   : > { %1388 = vmatpush1.bf16.msra.mxu0 %v2057_v1  ;;  %v1494_v1 = vld [vmem:[%s2381_s2] sm:$0x3] (!%p1847_p7) }
  0x8f   : > { %1429 = vmatpush1.bf16.msra.mxu1 %v2060_v2  ;;  %1389 = vmatprep.subr.bf16.mxu0 %v2065_v3  ;;  %v1508_v2 = vld [vmem:[%s2382_s3] sm:$0x3] (!%p1847_p7)  ;;  %v1498_v3 = vsub.s32 (!%p1847_p7), 0, %v1497_v0 }
  0x90   : > { %1430 = vmatprep.subr.bf16.mxu1 %v2068_v4  ;;  %v1502_v4 = vsub.s32 (!%p1847_p7), 1, %v1497_v0 }
  0x92   : > { %1390 = vmatpush1.bf16.msra.mxu0 %v2063_v5 }
  0x93   : > { %1431 = vmatpush1.bf16.msra.mxu1 %v2066_v6  ;;  %1391 = vmatprep.subr.bf16.mxu0 %v2071_v7  ;;  %v1522_v6 = vld [vmem:[%s2383_s4] sm:$0x3] (!%p1847_p7) }
  0x94   : > { %1432 = vmatprep.subr.bf16.mxu1 %v2074_v8  ;;  %v1499_v8 = vrot.slane (!%p1847_p7), %v1494_v1, %v1498_v3 }
  0x96   : > { %1392 = vmatpush1.bf16.msra.mxu0 %v2069_v9  ;;  %v1513_v9 = vrot.slane (!%p1847_p7), %v1508_v2, %v1498_v3 }
  0x97   : > { %1433 = vmatpush1.bf16.msra.mxu1 %v2072_v10  ;;  %1443 = vmatprep.subr.bf16.mxu0 %v2079_v11  ;;  %v1503_v10 = vrot.slane (!%p1847_p7), %v1494_v1, %v1502_v4  ;;  %v1517_v11 = vrot.slane (!%p1847_p7), %v1508_v2, %v1502_v4 }
  0x99   : > { %1394 = vmatmul.mubr.bf16.vlgmr.msra.gmra.mrb[4].mxu0 %v1698_v12 }
  0x9a   : > { %1435 = vmatmul.mubr.bf16.vlgmr.msra.gmra.mrb[4].mxu1 %v1700_v13  ;;  %1444 = vmatpush1.bf16.msra.mxu0 %v2077_v14  ;;  %v1529_v13 = vrot.slane (!%p1847_p7), %v1522_v6, %v1498_v3 }
  0x9b   : > { %1475 = vmatprep.mubr.bf16.mxu0 %v2129_v17  ;;  %1445 = vmatprep.subr.bf16.mxu0 %v2084_v15  ;;  %v1533_v15 = vrot.slane (!%p1847_p7), %v1522_v6, %v1502_v4 }
  0x9e   : > { %1446 = vmatpush1.bf16.msra.mxu0 %v2082_v16 }
  0x9f   : > { %1447 = vmatprep.subr.bf16.mxu0 %v2087_v18 }
  0xa2   : > { %1448 = vmatpush1.bf16.msra.mxu0 %v2085_v19 }
  0xa3   : > { %1449 = vmatprep.subr.bf16.mxu0 %v2090_v20 }
  0xa6   : > { %1450 = vmatpush1.bf16.msra.mxu0 %v2088_v21 }
  0xa7   : > { %1451 = vmatprep.subr.bf16.mxu0 %v2093_v22 }
  0xaa   : > { %1452 = vmatpush1.bf16.msra.mxu0 %v2091_v23 }
  0xab   : > { %1453 = vmatprep.subr.bf16.mxu0 %v2096_v24 }
  0xae   : > { %1454 = vmatpush1.bf16.msra.mxu0 %v2094_v25 }
  0xaf   : > { %1455 = vmatprep.subr.bf16.mxu0 %v2099_v26 }
  0xb2   : > { %1456 = vmatpush1.bf16.msra.mxu0 %v2097_v27 }
  0xb3   : > { %1457 = vmatprep.subr.bf16.mxu0 %v2102_v28 }
  0xb6   : > { %1458 = vmatpush1.bf16.msra.mxu0 %v2100_v29 }
  0xb9   : > { %1476 = vmatmul.mubr.bf16.vlgmr.msra.gmra.mrb[8].mxu0 %v2103_v30 }
 0x12c   : > { %v1313_v31 = vpop.f32.mrb[0].mxu0 }
 0x12d   : > { %v1354_v32 = vpop.f32.mrb[0].mxu1  ;;  %v1315_v34 = vpop.f32.mrb[1].mxu0 }
 0x12e   : > { %v1355_v33 = vadd.f32 %v1354_v32, %v1313_v31  ;;  %v1356_v35 = vpop.f32.mrb[1].mxu1  ;;  %v1317_v37 = vpop.f32.mrb[2].mxu0 }
 0x12f   : > { %v1357_v36 = vadd.f32 %v1356_v35, %v1315_v34  ;;  %v1358_v38 = vpop.f32.mrb[2].mxu1  ;;  %v1318_v39 = vpop.f32.mrb[3].mxu0 }
 0x130   : > { %v1359_v40 = vpop.f32.mrb[3].mxu1 }
 0x16c   : > { %v1395_v41 = vpop.f32.mrb[4].mxu0 }
 0x16d   : > { %v1436_v42 = vpop.f32.mrb[4].mxu1  ;;  %v1396_v43 = vadd.f32 %v1395_v41, %v1355_v33  ;;  %v1397_v44 = vpop.f32.mrb[5].mxu0 }
 0x16e   : > { %v1438_v45 = vpop.f32.mrb[5].mxu1  ;;  %v1398_v46 = vadd.f32 %v1397_v44, %v1357_v36  ;;  %v1399_v47 = vpop.f32.mrb[6].mxu0 }
 0x16f   : > { %v1440_v48 = vpop.f32.mrb[6].mxu1  ;;  %v1437_v49 = vadd.f32 %v1436_v42, %v1396_v43  ;;  %v1400_v50 = vpop.f32.mrb[7].mxu0 }
 0x170   : > { %v1441_v51 = vpop.f32.mrb[7].mxu1  ;;  %v1439_v52 = vadd.f32 %v1438_v45, %v1398_v46 }
 0x18c   : > { %v1477_v54 = vpop.f32.mrb[8].mxu0  ;;  %1491 = sbr.rel (%p1847_p7) target bundleno = 418 (0x1a2), region = 48 }
 0x18d   : > { %v1478_v55 = vadd.f32 %v1477_v54, %v1437_v49  ;;  %v1479_v57 = vpop.f32.mrb[9].mxu0 }
 0x18e   : > { %v1480_v58 = vadd.f32 %v1479_v57, %v1439_v52  ;;  %v1481_v59 = vpop.f32.mrb[10].mxu0 }
 0x18f   : > { %v1484_v60 = vadd.f32 %v1478_v55, %v376_v53  ;;  %v1482_v61 = vpop.f32.mrb[11].mxu0 }
 0x190   : > { %v1485_v62 = vadd.f32 %v1480_v58, %v377_v56 }
 0x191   : > { %1486 = vst [vmem:[#allocation2] sm:$0xff] %v1484_v60 }
 0x192   : > { %1487 = vst [vmem:[#allocation2 + $0x8] sm:$0xff] %v1485_v62 }
 0x198   : > { %v1492_v5 = vld [vmem:[#allocation2] sm:$0xff] }
 0x199   : > { %v1493_v7 = vld [vmem:[#allocation2 + $0x8] sm:$0xff]  ;;  %v1506_v12 = vmul.f32 %v1499_v8, %v1492_v5 }
 0x19a   : > { %v1507_v14 = vmul.f32 %v1503_v10, %v1493_v7 }
 0x19b   : > { %v1520_v16 = vadd.f32 %v1513_v9, %v1506_v12 }
 0x19c   : > { %v1521_v17 = vadd.f32 %v1517_v11, %v1507_v14 }
 0x19d   : > { %vm1523_vm0 = vcmp.ge.f32.partialorder %v1520_v16, 0.0  ;;  %v1536_v18 = vmul.f32 %v1529_v13, %v1520_v16 }
 0x19e   : > { %vm1524_vm1 = vcmp.ge.f32.partialorder %v1521_v17, 0.0  ;;  %v1537_v19 = vmul.f32 %v1533_v15, %v1521_v17 }
 0x19f   : > { %v1538_v20 = vsel %vm1523_vm0, %v1520_v16, %v1536_v18 }
 0x1a0   : > { %v1539_v21 = vsel %vm1524_vm1, %v1521_v17, %v1537_v19  ;;  %1540 = vst [vmem:[%s2384_s5] sm:$0xff] %v1538_v20 }
 0x1a1   : > { %1541 = vst [vmem:[%s2384_s5 + $0x8] sm:$0xff] %v1539_v21 }
 0x1a2 PF: > { %s15_s20 = sadd.s32 1, %s2126_s20   ;;  %s2385_s18 = smov %s2122_s19 }
 0x1a3   : > { %p12_p8 = scmp.ge.s32.totalorder %s15_s20, 4   ;;  %s2386_s19 = smov %s2388_s21 }
 0x1a5   :  { %14 = sbr.rel (!%p12_p8) target bundleno = 2 (0x2), region = 90 }

</bundles_post_ra>
